<compile_context>
chip_gen: v7x
topology: tpu7x:2x2x1
jax: 0.10.0
libtpu: 0.0.40
codegen_flags: <defaults>
</compile_context>

<pallas_src>
import functools
import numpy as np
import jax
import jax.numpy as jnp
from jax.experimental import pallas as pl
from jax.experimental.pallas import tpu as pltpu

EPS = 1e-5  # F.layer_norm default eps (CLN uses elementwise_affine=None)
NAMES = ['16', '32', '64', '128', '256', '512', '1024']
SKIP_START = NAMES.index('128')   # residual skip for blocks named >= '128'
RGB_PAD = 128                     # lane-dense ToRGB accumulator width


# ------------------------------- Pallas kernel -------------------------------

def _leaky_relu(x):
    # exact for slope 0.2: x>=0 -> x, x<0 -> 0.2*x (0.2*x > x when x < 0)
    return jnp.maximum(x, 0.2 * x)


def _layer_norm(x):
    # single-pass statistics; clamp guards tiny negative var from cancellation
    mu = jnp.mean(x, axis=-1, keepdims=True)
    var = jnp.maximum(jnp.mean(x * x, axis=-1, keepdims=True) - mu * mu, 0.0)
    return (x - mu) * jax.lax.rsqrt(var + EPS)


def fused_inr_kernel(x_ref, w1f_ref, w1r_ref, b1_ref, w2_ref, b2_ref,
                     wr_ref, br_ref, g1_ref, be1_ref, g2_ref, be2_ref,
                     rgb_ref, *, num_layers, skip_start, compute_dtype):
    """One grid step = ALL CLN blocks + ToRGB heads + tanh for one point tile.

    Grid = (batch, point-tile).  The layer loop is statically unrolled; the
    activation `x` and the lane-dense rgb accumulator `acc` are traced values
    carried in VMEM by the compiler.  The 3-wide output block is written once.
    """
    x = x_ref[0]                                      # (tn, cin_pad) f32
    acc = None

    for l in range(num_layers):
        # ---- linear1 + CLN1 + leaky relu -----------------------------------
        if l == 0:
            h = jnp.dot(x.astype(compute_dtype), w1f_ref[...],
                        preferred_element_type=jnp.float32)
        else:
            h = jnp.dot(x.astype(compute_dtype), w1r_ref[l - 1],
                        preferred_element_type=jnp.float32)
        h = h + b1_ref[l]                             # (tn, C) + (1, C)
        h = _layer_norm(h) * g1_ref[0, l] + be1_ref[0, l]
        h = _leaky_relu(h)

        # ---- linear2 + CLN2 + leaky relu -----------------------------------
        h = jnp.dot(h.astype(compute_dtype), w2_ref[l],
                    preferred_element_type=jnp.float32) + b2_ref[l]
        h = _layer_norm(h) * g2_ref[0, l] + be2_ref[0, l]
        out = _leaky_relu(h)

        # ---- static residual skip for blocks named >= '128' ----------------
        if l >= skip_start and l > 0:                 # in/out widths match here
            out = out + x
        x = out

        # ---- ToRGB, lane-dense (padded to 128 output lanes) ----------------
        rgb = jnp.dot(out.astype(compute_dtype), wr_ref[l],
                      preferred_element_type=jnp.float32) + br_ref[l]
        acc = rgb if acc is None else acc + rgb

    # final nn.Tanh fused in; single 3-wide store per point tile
    rgb_ref[0] = jnp.tanh(acc[:, :3])


# --------------------------------- wrapper ------------------------------------

def _round_up(v, m):
    return ((v + m - 1) // m) * m


def _pick_point_tile(n, batch, target):
    tn = min(_round_up(target, 8), _round_up(n, 8))
    tn = max(8, tn)
    # v7x shards the 'parallel' grid axes over 2 TensorCores: keep >= 2 tiles.
    while tn > 8 and batch * ((n + tn - 1) // tn) < 2:
        tn = max(8, ((tn // 2 + 7) // 8) * 8)
    return tn


def inr_forward(x, style_dict, params, img_size, name_prefix='inr',
                compute_dtype=jnp.float32, tn_target=1024):
    img_name = str(2 ** int(np.log2(img_size)))
    num_layers = NAMES.index(img_name) + 1
    names = NAMES[:num_layers]

    B, N, Cin = x.shape
    C = params[names[0]]['w1'].shape[1]
    assert Cin <= C, "first-layer input dim must not exceed channel width"
    # TODO(synk): support input_dim > channel (needs a wider first-layer path).

    cin_pad = min(C, 128)
    if Cin > cin_pad:
        cin_pad = C

    # ---- per-layer weight stacks (fully VMEM-resident, DMA'd once) ---------
    w1_first = params[names[0]]['w1']
    if w1_first.shape[0] < cin_pad:
        w1_first = jnp.pad(w1_first, ((0, cin_pad - w1_first.shape[0]), (0, 0)))
    W1F = w1_first.astype(compute_dtype)                                 # (cin_pad, C)
    if num_layers > 1:
        W1R = jnp.stack([params[nm]['w1'] for nm in names[1:]]).astype(compute_dtype)
    else:
        W1R = jnp.zeros((1, C, C), compute_dtype)                        # dummy, never read
    B1 = jnp.stack([params[nm]['b1'] for nm in names])                   # (L, 1, C) f32
    W2 = jnp.stack([params[nm]['w2'] for nm in names]).astype(compute_dtype)
    B2 = jnp.stack([params[nm]['b2'] for nm in names])
    WR = jnp.pad(jnp.stack([params[nm]['wrgb'] for nm in names]),
                 ((0, 0), (0, 0), (0, RGB_PAD - 3))).astype(compute_dtype)  # (L, C, 128)
    BR = jnp.pad(jnp.stack([params[nm]['brgb'] for nm in names]),
                 ((0, 0), (0, 0), (0, RGB_PAD - 3)))                         # (L, 1, 128)

    # ---- all layers' CLN style FCs in one batched einsum (hoisted glue) -----
    S0 = jnp.stack([style_dict[f'{name_prefix}_w{nm}_0'] for nm in names])   # (L, B, S)
    S1 = jnp.stack([style_dict[f'{name_prefix}_w{nm}_1'] for nm in names])
    WG1 = jnp.stack([params[nm]['wg1'] for nm in names])                     # (L, S, C)
    BG1 = jnp.stack([params[nm]['bg1'] for nm in names])                     # (L, 1, C)
    WB1 = jnp.stack([params[nm]['wb1'] for nm in names])
    BB1 = jnp.stack([params[nm]['bb1'] for nm in names])
    WG2 = jnp.stack([params[nm]['wg2'] for nm in names])
    BG2 = jnp.stack([params[nm]['bg2'] for nm in names])
    WB2 = jnp.stack([params[nm]['wb2'] for nm in names])
    BB2 = jnp.stack([params[nm]['bb2'] for nm in names])

    gain1 = jnp.einsum('lbs,lsc->blc', S0, WG1) + BG1[:, 0] + 1.0            # (B, L, C)
    bias1 = jnp.einsum('lbs,lsc->blc', S0, WB1) + BB1[:, 0]
    gain2 = jnp.einsum('lbs,lsc->blc', S1, WG2) + BG2[:, 0] + 1.0
    bias2 = jnp.einsum('lbs,lsc->blc', S1, WB2) + BB2[:, 0]

    # ---- point tiling: pad N to a tile multiple, pad channels to cin_pad ----
    tn = _pick_point_tile(N, B, tn_target)
    n_pad = _round_up(N, tn)

    x_pad = x.astype(jnp.float32)
    if cin_pad > Cin:
        x_pad = jnp.pad(x_pad, ((0, 0), (0, 0), (0, cin_pad - Cin)))
    if n_pad > N:
        x_pad = jnp.pad(x_pad, ((0, 0), (0, n_pad - N), (0, 0)))

    grid = (B, n_pad // tn)

    def _resident(arr):            # whole array stays in VMEM for the full call
        if arr.ndim == 2:
            return pl.BlockSpec(tuple(arr.shape), lambda b, n: (0, 0))
        return pl.BlockSpec(tuple(arr.shape), lambda b, n: (0, 0, 0))

    cln_spec = pl.BlockSpec((1, num_layers, C), lambda b, n: (b, 0, 0))

    kernel = functools.partial(fused_inr_kernel,
                               num_layers=num_layers,
                               skip_start=SKIP_START,
                               compute_dtype=compute_dtype)

    # ---- rough VMEM budget; bump the scoped limit only for big configs ------
    wsize = jnp.dtype(compute_dtype).itemsize
    resident_bytes = ((W1F.size + W1R.size + W2.size + WR.size) * wsize
                      + (B1.size + B2.size + BR.size) * 4)
    tile_bytes = 2 * (tn * cin_pad + tn * 3) * 4            # double-buffered in/out
    cln_bytes = 2 * 4 * num_layers * C * 4
    act_bytes = (4 * tn * C + tn * RGB_PAD) * 4             # in-kernel temporaries
    est = 2 * resident_bytes + tile_bytes + cln_bytes + act_bytes

    ckwargs = dict(dimension_semantics=("parallel", "parallel"))
    if est > 12 * (1 << 20):
        ckwargs["vmem_limit_bytes"] = int(min(64 * (1 << 20), 2 * est))
    # TODO(synk): for channel >= 512 consider pl.Buffered(1) on the resident
    # weight specs to drop their second pipeline buffer on v7x/v5e.

    rgb = pl.pallas_call(
        kernel,
        out_shape=jax.ShapeDtypeStruct((B, n_pad, 3), jnp.float32),
        grid_spec=pltpu.PrefetchScalarGridSpec(
            num_scalar_prefetch=0,
            grid=grid,
            in_specs=[
                pl.BlockSpec((1, tn, cin_pad), lambda b, n: (b, n, 0)),   # x
                _resident(W1F), _resident(W1R), _resident(B1),
                _resident(W2), _resident(B2),
                _resident(WR), _resident(BR),
                cln_spec, cln_spec, cln_spec, cln_spec,
            ],
            out_specs=pl.BlockSpec((1, tn, 3), lambda b, n: (b, n, 0)),
        ),
        compiler_params=pltpu.CompilerParams(**ckwargs),
    )(x_pad, W1F, W1R, B1, W2, B2, WR, BR, gain1, bias1, gain2, bias2)

    return rgb[:, :N] if n_pad > N else rgb


# --------------------------- parameters (synthetic) ---------------------------

def _linear_params(key, in_dim, out_dim, w_bound=None):
    # PyTorch nn.Linear default init; weight stored transposed as (in, out).
    k1, k2 = jax.random.split(key)
    bound = 1.0 / np.sqrt(in_dim)
    wb = bound if w_bound is None else w_bound
    w = jax.random.uniform(k1, (in_dim, out_dim), jnp.float32, -wb, wb)
    b = jax.random.uniform(k2, (1, out_dim), jnp.float32, -bound, bound)
    return w, b


def build_inr_params(key, input_dim, style_dim, dim_scale):
    channel = int(256 * dim_scale)
    params = {}
    in_dim = input_dim
    for name in NAMES:
        key, *ks = jax.random.split(key, 8)
        p = {}
        p['w1'], p['b1'] = _linear_params(ks[0], in_dim, channel)
        p['wg1'], p['bg1'] = _linear_params(ks[1], style_dim, channel)   # cln1 gain_fc
        p['wb1'], p['bb1'] = _linear_params(ks[2], style_dim, channel)   # cln1 bias_fc
        p['w2'], p['b2'] = _linear_params(ks[3], channel, channel)
        p['wg2'], p['bg2'] = _linear_params(ks[4], style_dim, channel)   # cln2 gain_fc
        p['wb2'], p['bb2'] = _linear_params(ks[5], style_dim, channel)   # cln2 bias_fc
        # ToRGB with frequency_init(100)
        p['wrgb'], p['brgb'] = _linear_params(
            ks[6], channel, 3, w_bound=np.sqrt(6.0 / channel) / 100.0)
        params[name] = p
        in_dim = channel
    return params


# --------------------------- pure-JAX reference ------------------------------

def _ref_block(x, p, s0, s1, skip):
    hp = jax.lax.Precision.HIGHEST

    def ln(h):
        mu = h.mean(-1, keepdims=True)
        var = ((h - mu) ** 2).mean(-1, keepdims=True)
        return (h - mu) / jnp.sqrt(var + EPS)

    g1 = s0 @ p['wg1'] + p['bg1'] + 1.0
    be1 = s0 @ p['wb1'] + p['bb1']
    g2 = s1 @ p['wg2'] + p['bg2'] + 1.0
    be2 = s1 @ p['wb2'] + p['bb2']
    h = jnp.einsum('bnc,cd->bnd', x, p['w1'], precision=hp) + p['b1']
    h = ln(h) * g1[:, None, :] + be1[:, None, :]
    h = jnp.where(h >= 0, h, 0.2 * h)
    h = jnp.einsum('bnc,cd->bnd', h, p['w2'], precision=hp) + p['b2']
    h = ln(h) * g2[:, None, :] + be2[:, None, :]
    out = jnp.where(h >= 0, h, 0.2 * h)
    if skip and out.shape[-1] == x.shape[-1]:
        out = out + x
    return out


def ref_forward(x, style_dict, params, img_size, name_prefix='inr'):
    hp = jax.lax.Precision.HIGHEST
    img_name = str(2 ** int(np.log2(img_size)))
    rgb = 0.0
    for name in NAMES:
        p = params[name]
        skip = int(name) >= 128
        s0 = style_dict[f'{name_prefix}_w{name}_0']
        s1 = style_dict[f'{name_prefix}_w{name}_1']
        x = _ref_block(x, p, s0, s1, skip)
        rgb = jnp.einsum('bnc,cd->bnd', x, p['wrgb'], precision=hp) + p['brgb'] + rgb
        if name == img_name:
            break
    return jnp.tanh(rgb)


# ----------------------------------- main -------------------------------------

if __name__ == "__main__":
    key = jax.random.PRNGKey(0)
    B, N = 2, 256
    input_dim, style_dim = 3, 16
    dim_scale = 0.125          # channels = int(256 * 0.125) = 32
    img_size = 128             # runs blocks '16','32','64','128' ('128' uses residual skip)

    k_par, k_x, k_s = jax.random.split(key, 3)
    params = build_inr_params(k_par, input_dim, style_dim, dim_scale)
    x = jax.random.normal(k_x, (B, N, input_dim), jnp.float32)

    style_dict = {}
    for i, name in enumerate(NAMES):
        ka, kb = jax.random.split(jax.random.fold_in(k_s, i))
        style_dict[f'inr_w{name}_0'] = jax.random.normal(ka, (B, style_dim), jnp.float32)
        style_dict[f'inr_w{name}_1'] = jax.random.normal(kb, (B, style_dim), jnp.float32)

    ref = ref_forward(x, style_dict, params, img_size)

    # f32 matmul path — validated tightly against the HIGHEST-precision reference.
    out = jax.block_until_ready(inr_forward(x, style_dict, params, img_size))
    assert out.shape == (B, N, 3)
    np.testing.assert_allclose(np.asarray(out), np.asarray(ref), atol=1e-2, rtol=1e-2)

    # bf16 matmul-input path (full-rate MXU on v5e/v6e/v7x); LN/activation math stays f32.
    out_bf16 = jax.block_until_ready(
        inr_forward(x, style_dict, params, img_size, compute_dtype=jnp.bfloat16))
    np.testing.assert_allclose(np.asarray(out_bf16), np.asarray(ref), atol=5e-2, rtol=5e-2)

    print("KERNEL_OK")
</pallas_src>

<mosaic_0001>
module attributes {stable_mosaic.version = 11 : i64} {
  func.func @fused_inr_kernel(%arg0: i32, %arg1: i32, %arg2: memref<1x256x32xf32, #tpu.memory_space<vmem>>, %arg3: memref<32x32xf32, #tpu.memory_space<vmem>>, %arg4: memref<3x32x32xf32, #tpu.memory_space<vmem>>, %arg5: memref<4x1x32xf32, #tpu.memory_space<vmem>>, %arg6: memref<4x32x32xf32, #tpu.memory_space<vmem>>, %arg7: memref<4x1x32xf32, #tpu.memory_space<vmem>>, %arg8: memref<4x32x128xf32, #tpu.memory_space<vmem>>, %arg9: memref<4x1x128xf32, #tpu.memory_space<vmem>>, %arg10: memref<1x4x32xf32, #tpu.memory_space<vmem>>, %arg11: memref<1x4x32xf32, #tpu.memory_space<vmem>>, %arg12: memref<1x4x32xf32, #tpu.memory_space<vmem>>, %arg13: memref<1x4x32xf32, #tpu.memory_space<vmem>>, %arg14: memref<1x256x3xf32, #tpu.memory_space<vmem>>) attributes {dimension_semantics = [#tpu.dimension_semantics<parallel>, #tpu.dimension_semantics<parallel>], iteration_bounds = array<i64: 2, 1>, scalar_prefetch = 0 : i64, scratch_operands = 0 : i64, tpu.core_type = #tpu.core_type<tc>, window_params = [{transform_indices = @transform_0, window_bounds = array<i64: 1, 256, 32>}, {pipeline_mode = #tpu.pipeline_mode<synchronous>, transform_indices = @transform_1, window_bounds = array<i64: 32, 32>}, {pipeline_mode = #tpu.pipeline_mode<synchronous>, transform_indices = @transform_2, window_bounds = array<i64: 3, 32, 32>}, {pipeline_mode = #tpu.pipeline_mode<synchronous>, transform_indices = @transform_3, window_bounds = array<i64: 4, 1, 32>}, {pipeline_mode = #tpu.pipeline_mode<synchronous>, transform_indices = @transform_4, window_bounds = array<i64: 4, 32, 32>}, {pipeline_mode = #tpu.pipeline_mode<synchronous>, transform_indices = @transform_5, window_bounds = array<i64: 4, 1, 32>}, {pipeline_mode = #tpu.pipeline_mode<synchronous>, transform_indices = @transform_6, window_bounds = array<i64: 4, 32, 128>}, {pipeline_mode = #tpu.pipeline_mode<synchronous>, transform_indices = @transform_7, window_bounds = array<i64: 4, 1, 128>}, {transform_indices = @transform_8, window_bounds = array<i64: 1, 4, 32>}, {transform_indices = @transform_9, window_bounds = array<i64: 1, 4, 32>}, {transform_indices = @transform_10, window_bounds = array<i64: 1, 4, 32>}, {transform_indices = @transform_11, window_bounds = array<i64: 1, 4, 32>}, {transform_indices = @transform_12, window_bounds = array<i64: 1, 256, 3>}]} {
    %c0 = arith.constant 0 : index
    %c0_0 = arith.constant 0 : index
    %c0_1 = arith.constant 0 : index
    %0 = vector.load %arg2[%c0, %c0_0, %c0_1] : memref<1x256x32xf32, #tpu.memory_space<vmem>>, vector<1x256x32xf32>
    %1 = vector.shape_cast %0 : vector<1x256x32xf32> to vector<256x32xf32>
    %c0_2 = arith.constant 0 : index
    %c0_3 = arith.constant 0 : index
    %2 = vector.load %arg3[%c0_2, %c0_3] : memref<32x32xf32, #tpu.memory_space<vmem>>, vector<32x32xf32>
    %cst = arith.constant dense<0.000000e+00> : vector<256x32xf32>
    %3 = tpu.matmul %1, %2, %cst {dimension_numbers = #tpu.dot_dimension_numbers<[1], [0], [0], [1], [0, 0, 1, 1], [], []>} : vector<256x32xf32>, vector<32x32xf32>, vector<256x32xf32> -> vector<256x32xf32>
    %c0_4 = arith.constant 0 : index
    %c0_5 = arith.constant 0 : index
    %c0_6 = arith.constant 0 : index
    %4 = vector.load %arg5[%c0_4, %c0_5, %c0_6] : memref<4x1x32xf32, #tpu.memory_space<vmem>>, vector<1x1x32xf32>
    %5 = vector.shape_cast %4 : vector<1x1x32xf32> to vector<1x32xf32>
    %6 = vector.broadcast %5 : vector<1x32xf32> to vector<256x32xf32>
    %7 = arith.addf %3, %6 : vector<256x32xf32>
    %cst_7 = arith.constant dense<0.000000e+00> : vector<256xf32>
    %8 = vector.multi_reduction <add>, %7, %cst_7 [1] : vector<256x32xf32> to vector<256xf32>
    %9 = vector.shape_cast %8 : vector<256xf32> to vector<256x1xf32>
    %cst_8 = arith.constant 3.200000e+01 : f32
    %10 = vector.broadcast %cst_8 : f32 to vector<256x1xf32>
    %11 = arith.divf %9, %10 : vector<256x1xf32>
    %12 = arith.mulf %7, %7 : vector<256x32xf32>
    %cst_9 = arith.constant dense<0.000000e+00> : vector<256xf32>
    %13 = vector.multi_reduction <add>, %12, %cst_9 [1] : vector<256x32xf32> to vector<256xf32>
    %14 = vector.shape_cast %13 : vector<256xf32> to vector<256x1xf32>
    %cst_10 = arith.constant 3.200000e+01 : f32
    %15 = vector.broadcast %cst_10 : f32 to vector<256x1xf32>
    %16 = arith.divf %14, %15 : vector<256x1xf32>
    %17 = arith.mulf %11, %11 : vector<256x1xf32>
    %18 = arith.subf %16, %17 : vector<256x1xf32>
    %cst_11 = arith.constant 0.000000e+00 : f32
    %19 = vector.broadcast %cst_11 : f32 to vector<256x1xf32>
    %20 = arith.maximumf %18, %19 : vector<256x1xf32>
    %21 = vector.broadcast %11 : vector<256x1xf32> to vector<256x32xf32>
    %22 = arith.subf %7, %21 : vector<256x32xf32>
    %cst_12 = arith.constant 9.99999974E-6 : f32
    %23 = vector.broadcast %cst_12 : f32 to vector<256x1xf32>
    %24 = arith.addf %20, %23 : vector<256x1xf32>
    %25 = math.rsqrt %24 : vector<256x1xf32>
    %26 = vector.broadcast %25 : vector<256x1xf32> to vector<256x32xf32>
    %27 = arith.mulf %22, %26 : vector<256x32xf32>
    %c0_13 = arith.constant 0 : index
    %c0_14 = arith.constant 0 : index
    %c0_15 = arith.constant 0 : index
    %28 = vector.load %arg10[%c0_13, %c0_14, %c0_15] : memref<1x4x32xf32, #tpu.memory_space<vmem>>, vector<1x1x32xf32>
    %29 = vector.shape_cast %28 : vector<1x1x32xf32> to vector<32xf32>
    %30 = vector.shape_cast %29 : vector<32xf32> to vector<1x32xf32>
    %31 = vector.broadcast %30 : vector<1x32xf32> to vector<256x32xf32>
    %32 = arith.mulf %27, %31 : vector<256x32xf32>
    %c0_16 = arith.constant 0 : index
    %c0_17 = arith.constant 0 : index
    %c0_18 = arith.constant 0 : index
    %33 = vector.load %arg11[%c0_16, %c0_17, %c0_18] : memref<1x4x32xf32, #tpu.memory_space<vmem>>, vector<1x1x32xf32>
    %34 = vector.shape_cast %33 : vector<1x1x32xf32> to vector<32xf32>
    %35 = vector.shape_cast %34 : vector<32xf32> to vector<1x32xf32>
    %36 = vector.broadcast %35 : vector<1x32xf32> to vector<256x32xf32>
    %37 = arith.addf %32, %36 : vector<256x32xf32>
    %cst_19 = arith.constant 2.000000e-01 : f32
    %38 = vector.broadcast %cst_19 : f32 to vector<256x32xf32>
    %39 = arith.mulf %38, %37 : vector<256x32xf32>
    %40 = arith.maximumf %37, %39 : vector<256x32xf32>
    %c0_20 = arith.constant 0 : index
    %c0_21 = arith.constant 0 : index
    %c0_22 = arith.constant 0 : index
    %41 = vector.load %arg6[%c0_20, %c0_21, %c0_22] : memref<4x32x32xf32, #tpu.memory_space<vmem>>, vector<1x32x32xf32>
    %42 = vector.shape_cast %41 : vector<1x32x32xf32> to vector<32x32xf32>
    %cst_23 = arith.constant dense<0.000000e+00> : vector<256x32xf32>
    %43 = tpu.matmul %40, %42, %cst_23 {dimension_numbers = #tpu.dot_dimension_numbers<[1], [0], [0], [1], [0, 0, 1, 1], [], []>} : vector<256x32xf32>, vector<32x32xf32>, vector<256x32xf32> -> vector<256x32xf32>
    %c0_24 = arith.constant 0 : index
    %c0_25 = arith.constant 0 : index
    %c0_26 = arith.constant 0 : index
    %44 = vector.load %arg7[%c0_24, %c0_25, %c0_26] : memref<4x1x32xf32, #tpu.memory_space<vmem>>, vector<1x1x32xf32>
    %45 = vector.shape_cast %44 : vector<1x1x32xf32> to vector<1x32xf32>
    %46 = vector.broadcast %45 : vector<1x32xf32> to vector<256x32xf32>
    %47 = arith.addf %43, %46 : vector<256x32xf32>
    %cst_27 = arith.constant dense<0.000000e+00> : vector<256xf32>
    %48 = vector.multi_reduction <add>, %47, %cst_27 [1] : vector<256x32xf32> to vector<256xf32>
    %49 = vector.shape_cast %48 : vector<256xf32> to vector<256x1xf32>
    %cst_28 = arith.constant 3.200000e+01 : f32
    %50 = vector.broadcast %cst_28 : f32 to vector<256x1xf32>
    %51 = arith.divf %49, %50 : vector<256x1xf32>
    %52 = arith.mulf %47, %47 : vector<256x32xf32>
    %cst_29 = arith.constant dense<0.000000e+00> : vector<256xf32>
    %53 = vector.multi_reduction <add>, %52, %cst_29 [1] : vector<256x32xf32> to vector<256xf32>
    %54 = vector.shape_cast %53 : vector<256xf32> to vector<256x1xf32>
    %cst_30 = arith.constant 3.200000e+01 : f32
    %55 = vector.broadcast %cst_30 : f32 to vector<256x1xf32>
    %56 = arith.divf %54, %55 : vector<256x1xf32>
    %57 = arith.mulf %51, %51 : vector<256x1xf32>
    %58 = arith.subf %56, %57 : vector<256x1xf32>
    %cst_31 = arith.constant 0.000000e+00 : f32
    %59 = vector.broadcast %cst_31 : f32 to vector<256x1xf32>
    %60 = arith.maximumf %58, %59 : vector<256x1xf32>
    %61 = vector.broadcast %51 : vector<256x1xf32> to vector<256x32xf32>
    %62 = arith.subf %47, %61 : vector<256x32xf32>
    %cst_32 = arith.constant 9.99999974E-6 : f32
    %63 = vector.broadcast %cst_32 : f32 to vector<256x1xf32>
    %64 = arith.addf %60, %63 : vector<256x1xf32>
    %65 = math.rsqrt %64 : vector<256x1xf32>
    %66 = vector.broadcast %65 : vector<256x1xf32> to vector<256x32xf32>
    %67 = arith.mulf %62, %66 : vector<256x32xf32>
    %c0_33 = arith.constant 0 : index
    %c0_34 = arith.constant 0 : index
    %c0_35 = arith.constant 0 : index
    %68 = vector.load %arg12[%c0_33, %c0_34, %c0_35] : memref<1x4x32xf32, #tpu.memory_space<vmem>>, vector<1x1x32xf32>
    %69 = vector.shape_cast %68 : vector<1x1x32xf32> to vector<32xf32>
    %70 = vector.shape_cast %69 : vector<32xf32> to vector<1x32xf32>
    %71 = vector.broadcast %70 : vector<1x32xf32> to vector<256x32xf32>
    %72 = arith.mulf %67, %71 : vector<256x32xf32>
    %c0_36 = arith.constant 0 : index
    %c0_37 = arith.constant 0 : index
    %c0_38 = arith.constant 0 : index
    %73 = vector.load %arg13[%c0_36, %c0_37, %c0_38] : memref<1x4x32xf32, #tpu.memory_space<vmem>>, vector<1x1x32xf32>
    %74 = vector.shape_cast %73 : vector<1x1x32xf32> to vector<32xf32>
    %75 = vector.shape_cast %74 : vector<32xf32> to vector<1x32xf32>
    %76 = vector.broadcast %75 : vector<1x32xf32> to vector<256x32xf32>
    %77 = arith.addf %72, %76 : vector<256x32xf32>
    %cst_39 = arith.constant 2.000000e-01 : f32
    %78 = vector.broadcast %cst_39 : f32 to vector<256x32xf32>
    %79 = arith.mulf %78, %77 : vector<256x32xf32>
    %80 = arith.maximumf %77, %79 : vector<256x32xf32>
    %c0_40 = arith.constant 0 : index
    %c0_41 = arith.constant 0 : index
    %c0_42 = arith.constant 0 : index
    %81 = vector.load %arg8[%c0_40, %c0_41, %c0_42] : memref<4x32x128xf32, #tpu.memory_space<vmem>>, vector<1x32x128xf32>
    %82 = vector.shape_cast %81 : vector<1x32x128xf32> to vector<32x128xf32>
    %cst_43 = arith.constant dense<0.000000e+00> : vector<256x128xf32>
    %83 = tpu.matmul %80, %82, %cst_43 {dimension_numbers = #tpu.dot_dimension_numbers<[1], [0], [0], [1], [0, 0, 1, 1], [], []>} : vector<256x32xf32>, vector<32x128xf32>, vector<256x128xf32> -> vector<256x128xf32>
    %c0_44 = arith.constant 0 : index
    %c0_45 = arith.constant 0 : index
    %c0_46 = arith.constant 0 : index
    %84 = vector.load %arg9[%c0_44, %c0_45, %c0_46] : memref<4x1x128xf32, #tpu.memory_space<vmem>>, vector<1x1x128xf32>
    %85 = vector.shape_cast %84 : vector<1x1x128xf32> to vector<1x128xf32>
    %86 = vector.broadcast %85 : vector<1x128xf32> to vector<256x128xf32>
    %87 = arith.addf %83, %86 : vector<256x128xf32>
    %c0_47 = arith.constant 0 : index
    %c0_48 = arith.constant 0 : index
    %c0_49 = arith.constant 0 : index
    %88 = vector.load %arg4[%c0_47, %c0_48, %c0_49] : memref<3x32x32xf32, #tpu.memory_space<vmem>>, vector<1x32x32xf32>
    %89 = vector.shape_cast %88 : vector<1x32x32xf32> to vector<32x32xf32>
    %cst_50 = arith.constant dense<0.000000e+00> : vector<256x32xf32>
    %90 = tpu.matmul %80, %89, %cst_50 {dimension_numbers = #tpu.dot_dimension_numbers<[1], [0], [0], [1], [0, 0, 1, 1], [], []>} : vector<256x32xf32>, vector<32x32xf32>, vector<256x32xf32> -> vector<256x32xf32>
    %c1 = arith.constant 1 : index
    %c0_51 = arith.constant 0 : index
    %c0_52 = arith.constant 0 : index
    %91 = vector.load %arg5[%c1, %c0_51, %c0_52] : memref<4x1x32xf32, #tpu.memory_space<vmem>>, vector<1x1x32xf32>
    %92 = vector.shape_cast %91 : vector<1x1x32xf32> to vector<1x32xf32>
    %93 = vector.broadcast %92 : vector<1x32xf32> to vector<256x32xf32>
    %94 = arith.addf %90, %93 : vector<256x32xf32>
    %cst_53 = arith.constant dense<0.000000e+00> : vector<256xf32>
    %95 = vector.multi_reduction <add>, %94, %cst_53 [1] : vector<256x32xf32> to vector<256xf32>
    %96 = vector.shape_cast %95 : vector<256xf32> to vector<256x1xf32>
    %cst_54 = arith.constant 3.200000e+01 : f32
    %97 = vector.broadcast %cst_54 : f32 to vector<256x1xf32>
    %98 = arith.divf %96, %97 : vector<256x1xf32>
    %99 = arith.mulf %94, %94 : vector<256x32xf32>
    %cst_55 = arith.constant dense<0.000000e+00> : vector<256xf32>
    %100 = vector.multi_reduction <add>, %99, %cst_55 [1] : vector<256x32xf32> to vector<256xf32>
    %101 = vector.shape_cast %100 : vector<256xf32> to vector<256x1xf32>
    %cst_56 = arith.constant 3.200000e+01 : f32
    %102 = vector.broadcast %cst_56 : f32 to vector<256x1xf32>
    %103 = arith.divf %101, %102 : vector<256x1xf32>
    %104 = arith.mulf %98, %98 : vector<256x1xf32>
    %105 = arith.subf %103, %104 : vector<256x1xf32>
    %cst_57 = arith.constant 0.000000e+00 : f32
    %106 = vector.broadcast %cst_57 : f32 to vector<256x1xf32>
    %107 = arith.maximumf %105, %106 : vector<256x1xf32>
    %108 = vector.broadcast %98 : vector<256x1xf32> to vector<256x32xf32>
    %109 = arith.subf %94, %108 : vector<256x32xf32>
    %cst_58 = arith.constant 9.99999974E-6 : f32
    %110 = vector.broadcast %cst_58 : f32 to vector<256x1xf32>
    %111 = arith.addf %107, %110 : vector<256x1xf32>
    %112 = math.rsqrt %111 : vector<256x1xf32>
    %113 = vector.broadcast %112 : vector<256x1xf32> to vector<256x32xf32>
    %114 = arith.mulf %109, %113 : vector<256x32xf32>
    %c0_59 = arith.constant 0 : index
    %c1_60 = arith.constant 1 : index
    %c0_61 = arith.constant 0 : index
    %115 = vector.load %arg10[%c0_59, %c1_60, %c0_61] : memref<1x4x32xf32, #tpu.memory_space<vmem>>, vector<1x1x32xf32>
    %116 = vector.shape_cast %115 : vector<1x1x32xf32> to vector<32xf32>
    %117 = vector.shape_cast %116 : vector<32xf32> to vector<1x32xf32>
    %118 = vector.broadcast %117 : vector<1x32xf32> to vector<256x32xf32>
    %119 = arith.mulf %114, %118 : vector<256x32xf32>
    %c0_62 = arith.constant 0 : index
    %c1_63 = arith.constant 1 : index
    %c0_64 = arith.constant 0 : index
    %120 = vector.load %arg11[%c0_62, %c1_63, %c0_64] : memref<1x4x32xf32, #tpu.memory_space<vmem>>, vector<1x1x32xf32>
    %121 = vector.shape_cast %120 : vector<1x1x32xf32> to vector<32xf32>
    %122 = vector.shape_cast %121 : vector<32xf32> to vector<1x32xf32>
    %123 = vector.broadcast %122 : vector<1x32xf32> to vector<256x32xf32>
    %124 = arith.addf %119, %123 : vector<256x32xf32>
    %cst_65 = arith.constant 2.000000e-01 : f32
    %125 = vector.broadcast %cst_65 : f32 to vector<256x32xf32>
    %126 = arith.mulf %125, %124 : vector<256x32xf32>
    %127 = arith.maximumf %124, %126 : vector<256x32xf32>
    %c1_66 = arith.constant 1 : index
    %c0_67 = arith.constant 0 : index
    %c0_68 = arith.constant 0 : index
    %128 = vector.load %arg6[%c1_66, %c0_67, %c0_68] : memref<4x32x32xf32, #tpu.memory_space<vmem>>, vector<1x32x32xf32>
    %129 = vector.shape_cast %128 : vector<1x32x32xf32> to vector<32x32xf32>
    %cst_69 = arith.constant dense<0.000000e+00> : vector<256x32xf32>
    %130 = tpu.matmul %127, %129, %cst_69 {dimension_numbers = #tpu.dot_dimension_numbers<[1], [0], [0], [1], [0, 0, 1, 1], [], []>} : vector<256x32xf32>, vector<32x32xf32>, vector<256x32xf32> -> vector<256x32xf32>
    %c1_70 = arith.constant 1 : index
    %c0_71 = arith.constant 0 : index
    %c0_72 = arith.constant 0 : index
    %131 = vector.load %arg7[%c1_70, %c0_71, %c0_72] : memref<4x1x32xf32, #tpu.memory_space<vmem>>, vector<1x1x32xf32>
    %132 = vector.shape_cast %131 : vector<1x1x32xf32> to vector<1x32xf32>
    %133 = vector.broadcast %132 : vector<1x32xf32> to vector<256x32xf32>
    %134 = arith.addf %130, %133 : vector<256x32xf32>
    %cst_73 = arith.constant dense<0.000000e+00> : vector<256xf32>
    %135 = vector.multi_reduction <add>, %134, %cst_73 [1] : vector<256x32xf32> to vector<256xf32>
    %136 = vector.shape_cast %135 : vector<256xf32> to vector<256x1xf32>
    %cst_74 = arith.constant 3.200000e+01 : f32
    %137 = vector.broadcast %cst_74 : f32 to vector<256x1xf32>
    %138 = arith.divf %136, %137 : vector<256x1xf32>
    %139 = arith.mulf %134, %134 : vector<256x32xf32>
    %cst_75 = arith.constant dense<0.000000e+00> : vector<256xf32>
    %140 = vector.multi_reduction <add>, %139, %cst_75 [1] : vector<256x32xf32> to vector<256xf32>
    %141 = vector.shape_cast %140 : vector<256xf32> to vector<256x1xf32>
    %cst_76 = arith.constant 3.200000e+01 : f32
    %142 = vector.broadcast %cst_76 : f32 to vector<256x1xf32>
    %143 = arith.divf %141, %142 : vector<256x1xf32>
    %144 = arith.mulf %138, %138 : vector<256x1xf32>
    %145 = arith.subf %143, %144 : vector<256x1xf32>
    %cst_77 = arith.constant 0.000000e+00 : f32
    %146 = vector.broadcast %cst_77 : f32 to vector<256x1xf32>
    %147 = arith.maximumf %145, %146 : vector<256x1xf32>
    %148 = vector.broadcast %138 : vector<256x1xf32> to vector<256x32xf32>
    %149 = arith.subf %134, %148 : vector<256x32xf32>
    %cst_78 = arith.constant 9.99999974E-6 : f32
    %150 = vector.broadcast %cst_78 : f32 to vector<256x1xf32>
    %151 = arith.addf %147, %150 : vector<256x1xf32>
    %152 = math.rsqrt %151 : vector<256x1xf32>
    %153 = vector.broadcast %152 : vector<256x1xf32> to vector<256x32xf32>
    %154 = arith.mulf %149, %153 : vector<256x32xf32>
    %c0_79 = arith.constant 0 : index
    %c1_80 = arith.constant 1 : index
    %c0_81 = arith.constant 0 : index
    %155 = vector.load %arg12[%c0_79, %c1_80, %c0_81] : memref<1x4x32xf32, #tpu.memory_space<vmem>>, vector<1x1x32xf32>
    %156 = vector.shape_cast %155 : vector<1x1x32xf32> to vector<32xf32>
    %157 = vector.shape_cast %156 : vector<32xf32> to vector<1x32xf32>
    %158 = vector.broadcast %157 : vector<1x32xf32> to vector<256x32xf32>
    %159 = arith.mulf %154, %158 : vector<256x32xf32>
    %c0_82 = arith.constant 0 : index
    %c1_83 = arith.constant 1 : index
    %c0_84 = arith.constant 0 : index
    %160 = vector.load %arg13[%c0_82, %c1_83, %c0_84] : memref<1x4x32xf32, #tpu.memory_space<vmem>>, vector<1x1x32xf32>
    %161 = vector.shape_cast %160 : vector<1x1x32xf32> to vector<32xf32>
    %162 = vector.shape_cast %161 : vector<32xf32> to vector<1x32xf32>
    %163 = vector.broadcast %162 : vector<1x32xf32> to vector<256x32xf32>
    %164 = arith.addf %159, %163 : vector<256x32xf32>
    %cst_85 = arith.constant 2.000000e-01 : f32
    %165 = vector.broadcast %cst_85 : f32 to vector<256x32xf32>
    %166 = arith.mulf %165, %164 : vector<256x32xf32>
    %167 = arith.maximumf %164, %166 : vector<256x32xf32>
    %c1_86 = arith.constant 1 : index
    %c0_87 = arith.constant 0 : index
    %c0_88 = arith.constant 0 : index
    %168 = vector.load %arg8[%c1_86, %c0_87, %c0_88] : memref<4x32x128xf32, #tpu.memory_space<vmem>>, vector<1x32x128xf32>
    %169 = vector.shape_cast %168 : vector<1x32x128xf32> to vector<32x128xf32>
    %cst_89 = arith.constant dense<0.000000e+00> : vector<256x128xf32>
    %170 = tpu.matmul %167, %169, %cst_89 {dimension_numbers = #tpu.dot_dimension_numbers<[1], [0], [0], [1], [0, 0, 1, 1], [], []>} : vector<256x32xf32>, vector<32x128xf32>, vector<256x128xf32> -> vector<256x128xf32>
    %c1_90 = arith.constant 1 : index
    %c0_91 = arith.constant 0 : index
    %c0_92 = arith.constant 0 : index
    %171 = vector.load %arg9[%c1_90, %c0_91, %c0_92] : memref<4x1x128xf32, #tpu.memory_space<vmem>>, vector<1x1x128xf32>
    %172 = vector.shape_cast %171 : vector<1x1x128xf32> to vector<1x128xf32>
    %173 = vector.broadcast %172 : vector<1x128xf32> to vector<256x128xf32>
    %174 = arith.addf %170, %173 : vector<256x128xf32>
    %175 = arith.addf %87, %174 : vector<256x128xf32>
    %c1_93 = arith.constant 1 : index
    %c0_94 = arith.constant 0 : index
    %c0_95 = arith.constant 0 : index
    %176 = vector.load %arg4[%c1_93, %c0_94, %c0_95] : memref<3x32x32xf32, #tpu.memory_space<vmem>>, vector<1x32x32xf32>
    %177 = vector.shape_cast %176 : vector<1x32x32xf32> to vector<32x32xf32>
    %cst_96 = arith.constant dense<0.000000e+00> : vector<256x32xf32>
    %178 = tpu.matmul %167, %177, %cst_96 {dimension_numbers = #tpu.dot_dimension_numbers<[1], [0], [0], [1], [0, 0, 1, 1], [], []>} : vector<256x32xf32>, vector<32x32xf32>, vector<256x32xf32> -> vector<256x32xf32>
    %c2 = arith.constant 2 : index
    %c0_97 = arith.constant 0 : index
    %c0_98 = arith.constant 0 : index
    %179 = vector.load %arg5[%c2, %c0_97, %c0_98] : memref<4x1x32xf32, #tpu.memory_space<vmem>>, vector<1x1x32xf32>
    %180 = vector.shape_cast %179 : vector<1x1x32xf32> to vector<1x32xf32>
    %181 = vector.broadcast %180 : vector<1x32xf32> to vector<256x32xf32>
    %182 = arith.addf %178, %181 : vector<256x32xf32>
    %cst_99 = arith.constant dense<0.000000e+00> : vector<256xf32>
    %183 = vector.multi_reduction <add>, %182, %cst_99 [1] : vector<256x32xf32> to vector<256xf32>
    %184 = vector.shape_cast %183 : vector<256xf32> to vector<256x1xf32>
    %cst_100 = arith.constant 3.200000e+01 : f32
    %185 = vector.broadcast %cst_100 : f32 to vector<256x1xf32>
    %186 = arith.divf %184, %185 : vector<256x1xf32>
    %187 = arith.mulf %182, %182 : vector<256x32xf32>
    %cst_101 = arith.constant dense<0.000000e+00> : vector<256xf32>
    %188 = vector.multi_reduction <add>, %187, %cst_101 [1] : vector<256x32xf32> to vector<256xf32>
    %189 = vector.shape_cast %188 : vector<256xf32> to vector<256x1xf32>
    %cst_102 = arith.constant 3.200000e+01 : f32
    %190 = vector.broadcast %cst_102 : f32 to vector<256x1xf32>
    %191 = arith.divf %189, %190 : vector<256x1xf32>
    %192 = arith.mulf %186, %186 : vector<256x1xf32>
    %193 = arith.subf %191, %192 : vector<256x1xf32>
    %cst_103 = arith.constant 0.000000e+00 : f32
    %194 = vector.broadcast %cst_103 : f32 to vector<256x1xf32>
    %195 = arith.maximumf %193, %194 : vector<256x1xf32>
    %196 = vector.broadcast %186 : vector<256x1xf32> to vector<256x32xf32>
    %197 = arith.subf %182, %196 : vector<256x32xf32>
    %cst_104 = arith.constant 9.99999974E-6 : f32
    %198 = vector.broadcast %cst_104 : f32 to vector<256x1xf32>
    %199 = arith.addf %195, %198 : vector<256x1xf32>
    %200 = math.rsqrt %199 : vector<256x1xf32>
    %201 = vector.broadcast %200 : vector<256x1xf32> to vector<256x32xf32>
    %202 = arith.mulf %197, %201 : vector<256x32xf32>
    %c0_105 = arith.constant 0 : index
    %c2_106 = arith.constant 2 : index
    %c0_107 = arith.constant 0 : index
    %203 = vector.load %arg10[%c0_105, %c2_106, %c0_107] : memref<1x4x32xf32, #tpu.memory_space<vmem>>, vector<1x1x32xf32>
    %204 = vector.shape_cast %203 : vector<1x1x32xf32> to vector<32xf32>
    %205 = vector.shape_cast %204 : vector<32xf32> to vector<1x32xf32>
    %206 = vector.broadcast %205 : vector<1x32xf32> to vector<256x32xf32>
    %207 = arith.mulf %202, %206 : vector<256x32xf32>
    %c0_108 = arith.constant 0 : index
    %c2_109 = arith.constant 2 : index
    %c0_110 = arith.constant 0 : index
    %208 = vector.load %arg11[%c0_108, %c2_109, %c0_110] : memref<1x4x32xf32, #tpu.memory_space<vmem>>, vector<1x1x32xf32>
    %209 = vector.shape_cast %208 : vector<1x1x32xf32> to vector<32xf32>
    %210 = vector.shape_cast %209 : vector<32xf32> to vector<1x32xf32>
    %211 = vector.broadcast %210 : vector<1x32xf32> to vector<256x32xf32>
    %212 = arith.addf %207, %211 : vector<256x32xf32>
    %cst_111 = arith.constant 2.000000e-01 : f32
    %213 = vector.broadcast %cst_111 : f32 to vector<256x32xf32>
    %214 = arith.mulf %213, %212 : vector<256x32xf32>
    %215 = arith.maximumf %212, %214 : vector<256x32xf32>
    %c2_112 = arith.constant 2 : index
    %c0_113 = arith.constant 0 : index
    %c0_114 = arith.constant 0 : index
    %216 = vector.load %arg6[%c2_112, %c0_113, %c0_114] : memref<4x32x32xf32, #tpu.memory_space<vmem>>, vector<1x32x32xf32>
    %217 = vector.shape_cast %216 : vector<1x32x32xf32> to vector<32x32xf32>
    %cst_115 = arith.constant dense<0.000000e+00> : vector<256x32xf32>
    %218 = tpu.matmul %215, %217, %cst_115 {dimension_numbers = #tpu.dot_dimension_numbers<[1], [0], [0], [1], [0, 0, 1, 1], [], []>} : vector<256x32xf32>, vector<32x32xf32>, vector<256x32xf32> -> vector<256x32xf32>
    %c2_116 = arith.constant 2 : index
    %c0_117 = arith.constant 0 : index
    %c0_118 = arith.constant 0 : index
    %219 = vector.load %arg7[%c2_116, %c0_117, %c0_118] : memref<4x1x32xf32, #tpu.memory_space<vmem>>, vector<1x1x32xf32>
    %220 = vector.shape_cast %219 : vector<1x1x32xf32> to vector<1x32xf32>
    %221 = vector.broadcast %220 : vector<1x32xf32> to vector<256x32xf32>
    %222 = arith.addf %218, %221 : vector<256x32xf32>
    %cst_119 = arith.constant dense<0.000000e+00> : vector<256xf32>
    %223 = vector.multi_reduction <add>, %222, %cst_119 [1] : vector<256x32xf32> to vector<256xf32>
    %224 = vector.shape_cast %223 : vector<256xf32> to vector<256x1xf32>
    %cst_120 = arith.constant 3.200000e+01 : f32
    %225 = vector.broadcast %cst_120 : f32 to vector<256x1xf32>
    %226 = arith.divf %224, %225 : vector<256x1xf32>
    %227 = arith.mulf %222, %222 : vector<256x32xf32>
    %cst_121 = arith.constant dense<0.000000e+00> : vector<256xf32>
    %228 = vector.multi_reduction <add>, %227, %cst_121 [1] : vector<256x32xf32> to vector<256xf32>
    %229 = vector.shape_cast %228 : vector<256xf32> to vector<256x1xf32>
    %cst_122 = arith.constant 3.200000e+01 : f32
    %230 = vector.broadcast %cst_122 : f32 to vector<256x1xf32>
    %231 = arith.divf %229, %230 : vector<256x1xf32>
    %232 = arith.mulf %226, %226 : vector<256x1xf32>
    %233 = arith.subf %231, %232 : vector<256x1xf32>
    %cst_123 = arith.constant 0.000000e+00 : f32
    %234 = vector.broadcast %cst_123 : f32 to vector<256x1xf32>
    %235 = arith.maximumf %233, %234 : vector<256x1xf32>
    %236 = vector.broadcast %226 : vector<256x1xf32> to vector<256x32xf32>
    %237 = arith.subf %222, %236 : vector<256x32xf32>
    %cst_124 = arith.constant 9.99999974E-6 : f32
    %238 = vector.broadcast %cst_124 : f32 to vector<256x1xf32>
    %239 = arith.addf %235, %238 : vector<256x1xf32>
    %240 = math.rsqrt %239 : vector<256x1xf32>
    %241 = vector.broadcast %240 : vector<256x1xf32> to vector<256x32xf32>
    %242 = arith.mulf %237, %241 : vector<256x32xf32>
    %c0_125 = arith.constant 0 : index
    %c2_126 = arith.constant 2 : index
    %c0_127 = arith.constant 0 : index
    %243 = vector.load %arg12[%c0_125, %c2_126, %c0_127] : memref<1x4x32xf32, #tpu.memory_space<vmem>>, vector<1x1x32xf32>
    %244 = vector.shape_cast %243 : vector<1x1x32xf32> to vector<32xf32>
    %245 = vector.shape_cast %244 : vector<32xf32> to vector<1x32xf32>
    %246 = vector.broadcast %245 : vector<1x32xf32> to vector<256x32xf32>
    %247 = arith.mulf %242, %246 : vector<256x32xf32>
    %c0_128 = arith.constant 0 : index
    %c2_129 = arith.constant 2 : index
    %c0_130 = arith.constant 0 : index
    %248 = vector.load %arg13[%c0_128, %c2_129, %c0_130] : memref<1x4x32xf32, #tpu.memory_space<vmem>>, vector<1x1x32xf32>
    %249 = vector.shape_cast %248 : vector<1x1x32xf32> to vector<32xf32>
    %250 = vector.shape_cast %249 : vector<32xf32> to vector<1x32xf32>
    %251 = vector.broadcast %250 : vector<1x32xf32> to vector<256x32xf32>
    %252 = arith.addf %247, %251 : vector<256x32xf32>
    %cst_131 = arith.constant 2.000000e-01 : f32
    %253 = vector.broadcast %cst_131 : f32 to vector<256x32xf32>
    %254 = arith.mulf %253, %252 : vector<256x32xf32>
    %255 = arith.maximumf %252, %254 : vector<256x32xf32>
    %c2_132 = arith.constant 2 : index
    %c0_133 = arith.constant 0 : index
    %c0_134 = arith.constant 0 : index
    %256 = vector.load %arg8[%c2_132, %c0_133, %c0_134] : memref<4x32x128xf32, #tpu.memory_space<vmem>>, vector<1x32x128xf32>
    %257 = vector.shape_cast %256 : vector<1x32x128xf32> to vector<32x128xf32>
    %cst_135 = arith.constant dense<0.000000e+00> : vector<256x128xf32>
    %258 = tpu.matmul %255, %257, %cst_135 {dimension_numbers = #tpu.dot_dimension_numbers<[1], [0], [0], [1], [0, 0, 1, 1], [], []>} : vector<256x32xf32>, vector<32x128xf32>, vector<256x128xf32> -> vector<256x128xf32>
    %c2_136 = arith.constant 2 : index
    %c0_137 = arith.constant 0 : index
    %c0_138 = arith.constant 0 : index
    %259 = vector.load %arg9[%c2_136, %c0_137, %c0_138] : memref<4x1x128xf32, #tpu.memory_space<vmem>>, vector<1x1x128xf32>
    %260 = vector.shape_cast %259 : vector<1x1x128xf32> to vector<1x128xf32>
    %261 = vector.broadcast %260 : vector<1x128xf32> to vector<256x128xf32>
    %262 = arith.addf %258, %261 : vector<256x128xf32>
    %263 = arith.addf %175, %262 : vector<256x128xf32>
    %c2_139 = arith.constant 2 : index
    %c0_140 = arith.constant 0 : index
    %c0_141 = arith.constant 0 : index
    %264 = vector.load %arg4[%c2_139, %c0_140, %c0_141] : memref<3x32x32xf32, #tpu.memory_space<vmem>>, vector<1x32x32xf32>
    %265 = vector.shape_cast %264 : vector<1x32x32xf32> to vector<32x32xf32>
    %cst_142 = arith.constant dense<0.000000e+00> : vector<256x32xf32>
    %266 = tpu.matmul %255, %265, %cst_142 {dimension_numbers = #tpu.dot_dimension_numbers<[1], [0], [0], [1], [0, 0, 1, 1], [], []>} : vector<256x32xf32>, vector<32x32xf32>, vector<256x32xf32> -> vector<256x32xf32>
    %c3 = arith.constant 3 : index
    %c0_143 = arith.constant 0 : index
    %c0_144 = arith.constant 0 : index
    %267 = vector.load %arg5[%c3, %c0_143, %c0_144] : memref<4x1x32xf32, #tpu.memory_space<vmem>>, vector<1x1x32xf32>
    %268 = vector.shape_cast %267 : vector<1x1x32xf32> to vector<1x32xf32>
    %269 = vector.broadcast %268 : vector<1x32xf32> to vector<256x32xf32>
    %270 = arith.addf %266, %269 : vector<256x32xf32>
    %cst_145 = arith.constant dense<0.000000e+00> : vector<256xf32>
    %271 = vector.multi_reduction <add>, %270, %cst_145 [1] : vector<256x32xf32> to vector<256xf32>
    %272 = vector.shape_cast %271 : vector<256xf32> to vector<256x1xf32>
    %cst_146 = arith.constant 3.200000e+01 : f32
    %273 = vector.broadcast %cst_146 : f32 to vector<256x1xf32>
    %274 = arith.divf %272, %273 : vector<256x1xf32>
    %275 = arith.mulf %270, %270 : vector<256x32xf32>
    %cst_147 = arith.constant dense<0.000000e+00> : vector<256xf32>
    %276 = vector.multi_reduction <add>, %275, %cst_147 [1] : vector<256x32xf32> to vector<256xf32>
    %277 = vector.shape_cast %276 : vector<256xf32> to vector<256x1xf32>
    %cst_148 = arith.constant 3.200000e+01 : f32
    %278 = vector.broadcast %cst_148 : f32 to vector<256x1xf32>
    %279 = arith.divf %277, %278 : vector<256x1xf32>
    %280 = arith.mulf %274, %274 : vector<256x1xf32>
    %281 = arith.subf %279, %280 : vector<256x1xf32>
    %cst_149 = arith.constant 0.000000e+00 : f32
    %282 = vector.broadcast %cst_149 : f32 to vector<256x1xf32>
    %283 = arith.maximumf %281, %282 : vector<256x1xf32>
    %284 = vector.broadcast %274 : vector<256x1xf32> to vector<256x32xf32>
    %285 = arith.subf %270, %284 : vector<256x32xf32>
    %cst_150 = arith.constant 9.99999974E-6 : f32
    %286 = vector.broadcast %cst_150 : f32 to vector<256x1xf32>
    %287 = arith.addf %283, %286 : vector<256x1xf32>
    %288 = math.rsqrt %287 : vector<256x1xf32>
    %289 = vector.broadcast %288 : vector<256x1xf32> to vector<256x32xf32>
    %290 = arith.mulf %285, %289 : vector<256x32xf32>
    %c0_151 = arith.constant 0 : index
    %c3_152 = arith.constant 3 : index
    %c0_153 = arith.constant 0 : index
    %291 = vector.load %arg10[%c0_151, %c3_152, %c0_153] : memref<1x4x32xf32, #tpu.memory_space<vmem>>, vector<1x1x32xf32>
    %292 = vector.shape_cast %291 : vector<1x1x32xf32> to vector<32xf32>
    %293 = vector.shape_cast %292 : vector<32xf32> to vector<1x32xf32>
    %294 = vector.broadcast %293 : vector<1x32xf32> to vector<256x32xf32>
    %295 = arith.mulf %290, %294 : vector<256x32xf32>
    %c0_154 = arith.constant 0 : index
    %c3_155 = arith.constant 3 : index
    %c0_156 = arith.constant 0 : index
    %296 = vector.load %arg11[%c0_154, %c3_155, %c0_156] : memref<1x4x32xf32, #tpu.memory_space<vmem>>, vector<1x1x32xf32>
    %297 = vector.shape_cast %296 : vector<1x1x32xf32> to vector<32xf32>
    %298 = vector.shape_cast %297 : vector<32xf32> to vector<1x32xf32>
    %299 = vector.broadcast %298 : vector<1x32xf32> to vector<256x32xf32>
    %300 = arith.addf %295, %299 : vector<256x32xf32>
    %cst_157 = arith.constant 2.000000e-01 : f32
    %301 = vector.broadcast %cst_157 : f32 to vector<256x32xf32>
    %302 = arith.mulf %301, %300 : vector<256x32xf32>
    %303 = arith.maximumf %300, %302 : vector<256x32xf32>
    %c3_158 = arith.constant 3 : index
    %c0_159 = arith.constant 0 : index
    %c0_160 = arith.constant 0 : index
    %304 = vector.load %arg6[%c3_158, %c0_159, %c0_160] : memref<4x32x32xf32, #tpu.memory_space<vmem>>, vector<1x32x32xf32>
    %305 = vector.shape_cast %304 : vector<1x32x32xf32> to vector<32x32xf32>
    %cst_161 = arith.constant dense<0.000000e+00> : vector<256x32xf32>
    %306 = tpu.matmul %303, %305, %cst_161 {dimension_numbers = #tpu.dot_dimension_numbers<[1], [0], [0], [1], [0, 0, 1, 1], [], []>} : vector<256x32xf32>, vector<32x32xf32>, vector<256x32xf32> -> vector<256x32xf32>
    %c3_162 = arith.constant 3 : index
    %c0_163 = arith.constant 0 : index
    %c0_164 = arith.constant 0 : index
    %307 = vector.load %arg7[%c3_162, %c0_163, %c0_164] : memref<4x1x32xf32, #tpu.memory_space<vmem>>, vector<1x1x32xf32>
    %308 = vector.shape_cast %307 : vector<1x1x32xf32> to vector<1x32xf32>
    %309 = vector.broadcast %308 : vector<1x32xf32> to vector<256x32xf32>
    %310 = arith.addf %306, %309 : vector<256x32xf32>
    %cst_165 = arith.constant dense<0.000000e+00> : vector<256xf32>
    %311 = vector.multi_reduction <add>, %310, %cst_165 [1] : vector<256x32xf32> to vector<256xf32>
    %312 = vector.shape_cast %311 : vector<256xf32> to vector<256x1xf32>
    %cst_166 = arith.constant 3.200000e+01 : f32
    %313 = vector.broadcast %cst_166 : f32 to vector<256x1xf32>
    %314 = arith.divf %312, %313 : vector<256x1xf32>
    %315 = arith.mulf %310, %310 : vector<256x32xf32>
    %cst_167 = arith.constant dense<0.000000e+00> : vector<256xf32>
    %316 = vector.multi_reduction <add>, %315, %cst_167 [1] : vector<256x32xf32> to vector<256xf32>
    %317 = vector.shape_cast %316 : vector<256xf32> to vector<256x1xf32>
    %cst_168 = arith.constant 3.200000e+01 : f32
    %318 = vector.broadcast %cst_168 : f32 to vector<256x1xf32>
    %319 = arith.divf %317, %318 : vector<256x1xf32>
    %320 = arith.mulf %314, %314 : vector<256x1xf32>
    %321 = arith.subf %319, %320 : vector<256x1xf32>
    %cst_169 = arith.constant 0.000000e+00 : f32
    %322 = vector.broadcast %cst_169 : f32 to vector<256x1xf32>
    %323 = arith.maximumf %321, %322 : vector<256x1xf32>
    %324 = vector.broadcast %314 : vector<256x1xf32> to vector<256x32xf32>
    %325 = arith.subf %310, %324 : vector<256x32xf32>
    %cst_170 = arith.constant 9.99999974E-6 : f32
    %326 = vector.broadcast %cst_170 : f32 to vector<256x1xf32>
    %327 = arith.addf %323, %326 : vector<256x1xf32>
    %328 = math.rsqrt %327 : vector<256x1xf32>
    %329 = vector.broadcast %328 : vector<256x1xf32> to vector<256x32xf32>
    %330 = arith.mulf %325, %329 : vector<256x32xf32>
    %c0_171 = arith.constant 0 : index
    %c3_172 = arith.constant 3 : index
    %c0_173 = arith.constant 0 : index
    %331 = vector.load %arg12[%c0_171, %c3_172, %c0_173] : memref<1x4x32xf32, #tpu.memory_space<vmem>>, vector<1x1x32xf32>
    %332 = vector.shape_cast %331 : vector<1x1x32xf32> to vector<32xf32>
    %333 = vector.shape_cast %332 : vector<32xf32> to vector<1x32xf32>
    %334 = vector.broadcast %333 : vector<1x32xf32> to vector<256x32xf32>
    %335 = arith.mulf %330, %334 : vector<256x32xf32>
    %c0_174 = arith.constant 0 : index
    %c3_175 = arith.constant 3 : index
    %c0_176 = arith.constant 0 : index
    %336 = vector.load %arg13[%c0_174, %c3_175, %c0_176] : memref<1x4x32xf32, #tpu.memory_space<vmem>>, vector<1x1x32xf32>
    %337 = vector.shape_cast %336 : vector<1x1x32xf32> to vector<32xf32>
    %338 = vector.shape_cast %337 : vector<32xf32> to vector<1x32xf32>
    %339 = vector.broadcast %338 : vector<1x32xf32> to vector<256x32xf32>
    %340 = arith.addf %335, %339 : vector<256x32xf32>
    %cst_177 = arith.constant 2.000000e-01 : f32
    %341 = vector.broadcast %cst_177 : f32 to vector<256x32xf32>
    %342 = arith.mulf %341, %340 : vector<256x32xf32>
    %343 = arith.maximumf %340, %342 : vector<256x32xf32>
    %344 = arith.addf %343, %255 : vector<256x32xf32>
    %c3_178 = arith.constant 3 : index
    %c0_179 = arith.constant 0 : index
    %c0_180 = arith.constant 0 : index
    %345 = vector.load %arg8[%c3_178, %c0_179, %c0_180] : memref<4x32x128xf32, #tpu.memory_space<vmem>>, vector<1x32x128xf32>
    %346 = vector.shape_cast %345 : vector<1x32x128xf32> to vector<32x128xf32>
    %cst_181 = arith.constant dense<0.000000e+00> : vector<256x128xf32>
    %347 = tpu.matmul %344, %346, %cst_181 {dimension_numbers = #tpu.dot_dimension_numbers<[1], [0], [0], [1], [0, 0, 1, 1], [], []>} : vector<256x32xf32>, vector<32x128xf32>, vector<256x128xf32> -> vector<256x128xf32>
    %c3_182 = arith.constant 3 : index
    %c0_183 = arith.constant 0 : index
    %c0_184 = arith.constant 0 : index
    %348 = vector.load %arg9[%c3_182, %c0_183, %c0_184] : memref<4x1x128xf32, #tpu.memory_space<vmem>>, vector<1x1x128xf32>
    %349 = vector.shape_cast %348 : vector<1x1x128xf32> to vector<1x128xf32>
    %350 = vector.broadcast %349 : vector<1x128xf32> to vector<256x128xf32>
    %351 = arith.addf %347, %350 : vector<256x128xf32>
    %352 = arith.addf %263, %351 : vector<256x128xf32>
    %353 = vector.extract_strided_slice %352 {offsets = [0, 0], sizes = [256, 3], strides = [1, 1]} : vector<256x128xf32> to vector<256x3xf32>
    %354 = math.tanh %353 : vector<256x3xf32>
    %c0_185 = arith.constant 0 : index
    %c0_186 = arith.constant 0 : index
    %c0_187 = arith.constant 0 : index
    %355 = vector.load %arg14[%c0_185, %c0_186, %c0_187] : memref<1x256x3xf32, #tpu.memory_space<vmem>>, vector<1x256x3xf32>
    %356 = vector.shape_cast %355 : vector<1x256x3xf32> to vector<256x3xf32>
    %357 = vector.shape_cast %354 : vector<256x3xf32> to vector<1x256x3xf32>
    tpu.vector_store %arg14[%c0_185, %c0_186, %c0_187], %357 {strides = array<i32>} : memref<1x256x3xf32, #tpu.memory_space<vmem>>, vector<1x256x3xf32>,
    return
  }
  func.func @transform_0(%arg0: i32, %arg1: i32) -> (i32, i32, i32) {
    %c0_i32 = arith.constant 0 : i32
    %c0_i32_0 = arith.constant 0 : i32
    return %arg0, %arg1, %c0_i32 : i32, i32, i32
  }
  func.func @transform_1(%arg0: i32, %arg1: i32) -> (i32, i32) {
    %c0_i32 = arith.constant 0 : i32
    %c0_i32_0 = arith.constant 0 : i32
    %c0_i32_1 = arith.constant 0 : i32
    return %c0_i32, %c0_i32_0 : i32, i32
  }
  func.func @transform_2(%arg0: i32, %arg1: i32) -> (i32, i32, i32) {
    %c0_i32 = arith.constant 0 : i32
    %c0_i32_0 = arith.constant 0 : i32
    %c0_i32_1 = arith.constant 0 : i32
    %c0_i32_2 = arith.constant 0 : i32
    return %c0_i32, %c0_i32_0, %c0_i32_1 : i32, i32, i32
  }
  func.func @transform_3(%arg0: i32, %arg1: i32) -> (i32, i32, i32) {
    %c0_i32 = arith.constant 0 : i32
    %c0_i32_0 = arith.constant 0 : i32
    %c0_i32_1 = arith.constant 0 : i32
    %c0_i32_2 = arith.constant 0 : i32
    return %c0_i32, %c0_i32_0, %c0_i32_1 : i32, i32, i32
  }
  func.func @transform_4(%arg0: i32, %arg1: i32) -> (i32, i32, i32) {
    %c0_i32 = arith.constant 0 : i32
    %c0_i32_0 = arith.constant 0 : i32
    %c0_i32_1 = arith.constant 0 : i32
    %c0_i32_2 = arith.constant 0 : i32
    return %c0_i32, %c0_i32_0, %c0_i32_1 : i32, i32, i32
  }
  func.func @transform_5(%arg0: i32, %arg1: i32) -> (i32, i32, i32) {
    %c0_i32 = arith.constant 0 : i32
    %c0_i32_0 = arith.constant 0 : i32
    %c0_i32_1 = arith.constant 0 : i32
    %c0_i32_2 = arith.constant 0 : i32
    return %c0_i32, %c0_i32_0, %c0_i32_1 : i32, i32, i32
  }
  func.func @transform_6(%arg0: i32, %arg1: i32) -> (i32, i32, i32) {
    %c0_i32 = arith.constant 0 : i32
    %c0_i32_0 = arith.constant 0 : i32
    %c0_i32_1 = arith.constant 0 : i32
    %c0_i32_2 = arith.constant 0 : i32
    return %c0_i32, %c0_i32_0, %c0_i32_1 : i32, i32, i32
  }
  func.func @transform_7(%arg0: i32, %arg1: i32) -> (i32, i32, i32) {
    %c0_i32 = arith.constant 0 : i32
    %c0_i32_0 = arith.constant 0 : i32
    %c0_i32_1 = arith.constant 0 : i32
    %c0_i32_2 = arith.constant 0 : i32
    return %c0_i32, %c0_i32_0, %c0_i32_1 : i32, i32, i32
  }
  func.func @transform_8(%arg0: i32, %arg1: i32) -> (i32, i32, i32) {
    %c0_i32 = arith.constant 0 : i32
    %c0_i32_0 = arith.constant 0 : i32
    %c0_i32_1 = arith.constant 0 : i32
    return %arg0, %c0_i32, %c0_i32_0 : i32, i32, i32
  }
  func.func @transform_9(%arg0: i32, %arg1: i32) -> (i32, i32, i32) {
    %c0_i32 = arith.constant 0 : i32
    %c0_i32_0 = arith.constant 0 : i32
    %c0_i32_1 = arith.constant 0 : i32
    return %arg0, %c0_i32, %c0_i32_0 : i32, i32, i32
  }
  func.func @transform_10(%arg0: i32, %arg1: i32) -> (i32, i32, i32) {
    %c0_i32 = arith.constant 0 : i32
    %c0_i32_0 = arith.constant 0 : i32
    %c0_i32_1 = arith.constant 0 : i32
    return %arg0, %c0_i32, %c0_i32_0 : i32, i32, i32
  }
  func.func @transform_11(%arg0: i32, %arg1: i32) -> (i32, i32, i32) {
    %c0_i32 = arith.constant 0 : i32
    %c0_i32_0 = arith.constant 0 : i32
    %c0_i32_1 = arith.constant 0 : i32
    return %arg0, %c0_i32, %c0_i32_0 : i32, i32, i32
  }
  func.func @transform_12(%arg0: i32, %arg1: i32) -> (i32, i32, i32) {
    %c0_i32 = arith.constant 0 : i32
    %c0_i32_0 = arith.constant 0 : i32
    return %arg0, %arg1, %c0_i32 : i32, i32, i32
  }
}

</mosaic_0001>

<bundles_post_ra>
// kernel: tpu_custom_call.1
= control target key start
LH: loop header
LB: loop body
LE: loop exit
PB: predicated region body
PF: predicated region fallthrough
CT: control target
= control target key end

     0   :  { %s12384_s21 = smov 0   ;;  %s12386_s22 = smov 0   ;;  %s17386_s0 = inlined_call_operand.vmem [shape: f32[2,256,32], index: 0, kind: input, shape index: {}]   ;;  %s17387_s1 = inlined_call_operand.vmem [shape: f32[32,32], index: 1, kind: input, shape index: {}]   ;;  %s17388_s2 = inlined_call_operand.vmem [shape: f32[3,32,32], index: 2, kind: input, shape index: {}]   ;;  %s17389_s3 = inlined_call_operand.vmem [shape: f32[4,1,32], index: 3, kind: input, shape index: {}]   ;;  %s17390_s4 = inlined_call_operand.vmem [shape: f32[4,32,32], index: 4, kind: input, shape index: {}]   ;;  %s17391_s5 = inlined_call_operand.vmem [shape: f32[4,1,32], index: 5, kind: input, shape index: {}]   ;;  %s17392_s6 = inlined_call_operand.vmem [shape: f32[4,32,128], index: 6, kind: input, shape index: {}]   ;;  %s17393_s7 = inlined_call_operand.vmem [shape: f32[4,1,128], index: 7, kind: input, shape index: {}]   ;;  %s17394_s8 = inlined_call_operand.vmem [shape: f32[2,4,32], index: 8, kind: input, shape index: {}]   ;;  %s17395_s9 = inlined_call_operand.vmem [shape: f32[2,4,32], index: 9, kind: input, shape index: {}]   ;;  %s17396_s10 = inlined_call_operand.vmem [shape: f32[2,4,32], index: 10, kind: input, shape index: {}]   ;;  %s17397_s11 = inlined_call_operand.vmem [shape: f32[2,4,32], index: 11, kind: input, shape index: {}]   ;;  %s17398_s12 = inlined_call_operand.vmem [shape: f32[2,256,3], index: 12, kind: output, shape index: {}]  }
   0x1   :  { %s12388_s23 = smov 0  }
   0x2 LB: > { %s34_s24 = sadd.s32 1, %s12313_s22  ;;  %p9800_p0 = scmp.ge.s32.totalorder %s12317_s23, 1  ;;  %s12317_s23 = sphi %s12388_s23, %s22_s23   ;;  %s12313_s22 = sphi %s12386_s22, %s17490_s22   ;;  %s12309_s21 = sphi %s12384_s21, %s17489_s21  }
   0x3   : > { %p36_p1 = scmp.ge.s32.totalorder %s34_s24, 2  ;;  %p419_p2 = scmp.lt.s32.totalorder %s12317_s23, 3 }
   0x5   : > { %s17492_s24 = smov (%p36_p1, %s34_s24), 0  ;;  %p420_p3 = pnand %p9800_p0, %p419_p2 }
   0x7   : > { %423 = sbr.rel (%p420_p3) target bundleno = 3511 (0xdb7), region = 68 }
   0xe   : > { %v553_v0 = vld [vmem:[%s17387_s1] sm:$0xff]  ;;  %v554_v1 = vld [vmem:[%s17387_s1 + $0x8] sm:$0xff]  ;;  %v555_v2 = vld [vmem:[%s17387_s1 + $0x10] sm:$0xff]  ;;  %p486_p4 = scmp.lt.s32.totalorder %s12309_s21, 1  ;;  %vm564_vm0 = vcmask 261120   ;;  %vm9628_vm1 = vcmask 23552  }
   0xf   : > { %v11370_v3 = vpack.c.bf16 %v554_v1, %v553_v0  ;;  %v556_v4 = vld [vmem:[%s17387_s1 + $0x18] sm:$0xff]  ;;  %v1537_v38 = vld [vmem:[%s17390_s4] sm:$0xff]  ;;  %v1538_v39 = vld [vmem:[%s17390_s4 + $0x8] sm:$0xff] }
  0x10   : > { %v11374_v5 = vpack.c.bf16 %v556_v4, %v555_v2  ;;  %s17494_s21 = smov (!%p486_p4, %s12309_s21), 1  ;;  %v11378_v40 = vpack.c.bf16 %v1538_v39, %v1537_v38  ;;  %v12497_v41 = vld [vmem:[%s17389_s3] ss:$0 sm:$0xff] }
  0x11   : > { %11371 = vmatprep.subr.bf16.mxu1 %v11370_v3  ;;  %s10264_s15 = sshll.u32 %s17494_s21, 8  ;;  %s12771_s16 = sshll.u32 %s17494_s21, 2 }
  0x12   : > { %11373 = vmatpush3.bf16.msra.mxu1 %v11370_v3  ;;  %s12422_s18 = scalar_lea.vmem %s17386_s0, %s10264_s15  ;;  %s12781_s19 = scalar_lea.vmem %s17394_s8, %s12771_s16 }
  0x13   : > { %11375 = vmatprep.subr.bf16.mxu1 %v11374_v5  ;;  %v521_v6 = vld [vmem:[%s12422_s18] sm:$0xff]  ;;  %v522_v7 = vld [vmem:[%s12422_s18 + $0x8] sm:$0xff]  ;;  %v523_v8 = vld [vmem:[%s12422_s18 + $0x10] sm:$0xff]  ;;  %s12789_s26 = scalar_lea.vmem %s17395_s9, %s12771_s16  ;;  %s13364_s27 = scalar_lea.vmem %s17396_s10, %s12771_s16 }
  0x14   : > { %10706 = vmatprep.mubr.msk.f32.mxu1 %vm564_vm0, %v521_v6  ;;  %v524_v9 = vld [vmem:[%s12422_s18 + $0x18] sm:$0xff]  ;;  %v525_v10 = vld [vmem:[%s12422_s18 + $0x20] sm:$0xff]  ;;  %v526_v11 = vld [vmem:[%s12422_s18 + $0x28] sm:$0xff]  ;;  %s13375_s30 = scalar_lea.vmem %s17397_s11, %s12771_s16  ;;  %s17283_s29 = scalar_lea.vmem %s17398_s12, %s10264_s15 }
  0x15   : > { %v527_v12 = vld [vmem:[%s12422_s18 + $0x30] sm:$0xff]  ;;  %v528_v13 = vld [vmem:[%s12422_s18 + $0x38] sm:$0xff]  ;;  %v529_v14 = vld [vmem:[%s12422_s18 + $0x40] sm:$0xff] }
  0x16   : > { %11377 = vmatpush3.bf16.msra.mxu1 %v11374_v5  ;;  %v530_v15 = vld [vmem:[%s12422_s18 + $0x48] sm:$0xff]  ;;  %v531_v16 = vld [vmem:[%s12422_s18 + $0x50] sm:$0xff]  ;;  %v532_v17 = vld [vmem:[%s12422_s18 + $0x58] sm:$0xff] }
  0x17   : > { %v533_v18 = vld [vmem:[%s12422_s18 + $0x60] sm:$0xff]  ;;  %v534_v19 = vld [vmem:[%s12422_s18 + $0x68] sm:$0xff]  ;;  %v535_v20 = vld [vmem:[%s12422_s18 + $0x70] sm:$0xff]  ;;  %11379 = vmatprep.subr.bf16.mxu1 %v11378_v40 }
  0x18   : > { %v536_v21 = vld [vmem:[%s12422_s18 + $0x78] sm:$0xff]  ;;  %v537_v22 = vld [vmem:[%s12422_s18 + $0x80] sm:$0xff]  ;;  %v538_v23 = vld [vmem:[%s12422_s18 + $0x88] sm:$0xff] }
  0x19   : > { %10707 = vmatmul.mubr.msk.f32.vlgmr.msra.gmra.mrb[0].mxu1 %vm564_vm0, %v522_v7  ;;  %v539_v24 = vld [vmem:[%s12422_s18 + $0x90] sm:$0xff]  ;;  %v540_v25 = vld [vmem:[%s12422_s18 + $0x98] sm:$0xff]  ;;  %v541_v26 = vld [vmem:[%s12422_s18 + $0xa0] sm:$0xff] }
  0x1a   : > { %10709 = vmatprep.mubr.msk.f32.mxu1 %vm564_vm0, %v523_v8  ;;  %v542_v27 = vld [vmem:[%s12422_s18 + $0xa8] sm:$0xff]  ;;  %v543_v28 = vld [vmem:[%s12422_s18 + $0xb0] sm:$0xff]  ;;  %v544_v29 = vld [vmem:[%s12422_s18 + $0xb8] sm:$0xff]  ;;  %11381 = vmatpush3.bf16.msra.mxu1 %v11378_v40 }
  0x1b   : > { %v545_v30 = vld [vmem:[%s12422_s18 + $0xc0] sm:$0xff]  ;;  %v546_v31 = vld [vmem:[%s12422_s18 + $0xc8] sm:$0xff]  ;;  %v547_v32 = vld [vmem:[%s12422_s18 + $0xd0] sm:$0xff] }
  0x1c   : > { %v548_v33 = vld [vmem:[%s12422_s18 + $0xd8] sm:$0xff]  ;;  %v549_v34 = vld [vmem:[%s12422_s18 + $0xe0] sm:$0xff]  ;;  %v550_v35 = vld [vmem:[%s12422_s18 + $0xe8] sm:$0xff] }
  0x1d   : > { %10710 = vmatmul.mubr.msk.f32.gmra.mrb[2].mxu1 %vm564_vm0, %v524_v9  ;;  %v551_v36 = vld [vmem:[%s12422_s18 + $0xf0] sm:$0xff]  ;;  %v552_v37 = vld [vmem:[%s12422_s18 + $0xf8] sm:$0xff] }
  0x1e   : > { %10712 = vmatprep.mubr.msk.f32.mxu1 %vm564_vm0, %v525_v10 }
  0x21   : > { %10713 = vmatmul.mubr.msk.f32.gmra.mrb[4].mxu1 %vm564_vm0, %v526_v11 }
  0x22   : > { %10715 = vmatprep.mubr.msk.f32.mxu1 %vm564_vm0, %v527_v12 }
  0x25   : > { %10716 = vmatmul.mubr.msk.f32.gmra.mrb[6].mxu1 %vm564_vm0, %v528_v13 }
  0x26   : > { %10718 = vmatprep.mubr.msk.f32.mxu1 %vm564_vm0, %v529_v14 }
  0x29   : > { %10719 = vmatmul.mubr.msk.f32.gmra.mrb[8].mxu1 %vm564_vm0, %v530_v15 }
  0x2a   : > { %10721 = vmatprep.mubr.msk.f32.mxu1 %vm564_vm0, %v531_v16 }
  0x2d   : > { %10722 = vmatmul.mubr.msk.f32.gmra.mrb[10].mxu1 %vm564_vm0, %v532_v17 }
  0x2e   : > { %10724 = vmatprep.mubr.msk.f32.mxu1 %vm564_vm0, %v533_v18 }
  0x31   : > { %10725 = vmatmul.mubr.msk.f32.gmra.mrb[12].mxu1 %vm564_vm0, %v534_v19 }
  0x32   : > { %10727 = vmatprep.mubr.msk.f32.mxu1 %vm564_vm0, %v535_v20 }
  0x35   : > { %10728 = vmatmul.mubr.msk.f32.gmra.mrb[14].mxu1 %vm564_vm0, %v536_v21 }
  0x36   : > { %10730 = vmatprep.mubr.msk.f32.mxu1 %vm564_vm0, %v537_v22 }
  0x39   : > { %10731 = vmatmul.mubr.msk.f32.gmra.mrb[16].mxu1 %vm564_vm0, %v538_v23 }
  0x3a   : > { %10733 = vmatprep.mubr.msk.f32.mxu1 %vm564_vm0, %v539_v24 }
  0x3d   : > { %10734 = vmatmul.mubr.msk.f32.gmra.mrb[18].mxu1 %vm564_vm0, %v540_v25 }
  0x3e   : > { %10736 = vmatprep.mubr.msk.f32.mxu1 %vm564_vm0, %v541_v26 }
  0x41   : > { %10737 = vmatmul.mubr.msk.f32.gmra.mrb[20].mxu1 %vm564_vm0, %v542_v27 }
  0x42   : > { %10739 = vmatprep.mubr.msk.f32.mxu1 %vm564_vm0, %v543_v28 }
  0x45   : > { %10740 = vmatmul.mubr.msk.f32.gmra.mrb[22].mxu1 %vm564_vm0, %v544_v29 }
  0x46   : > { %10742 = vmatprep.mubr.msk.f32.mxu1 %vm564_vm0, %v545_v30 }
  0x49   : > { %10743 = vmatmul.mubr.msk.f32.gmra.mrb[24].mxu1 %vm564_vm0, %v546_v31 }
  0x4a   : > { %10745 = vmatprep.mubr.msk.f32.mxu1 %vm564_vm0, %v547_v32 }
  0x4d   : > { %10746 = vmatmul.mubr.msk.f32.gmra.mrb[26].mxu1 %vm564_vm0, %v548_v33 }
  0x4e   : > { %10748 = vmatprep.mubr.msk.f32.mxu1 %vm564_vm0, %v549_v34 }
  0x51   : > { %10749 = vmatmul.mubr.msk.f32.gmra.mrb[28].mxu1 %vm564_vm0, %v550_v35 }
  0x52   : > { %10751 = vmatprep.mubr.msk.f32.mxu1 %vm564_vm0, %v551_v36 }
  0x55   : > { %10752 = vmatmul.mubr.msk.f32.gmra.mrb[30].mxu1 %vm564_vm0, %v552_v37 }
  0xec   : > { %v10708_v42 = vpop.f32.mrb[0].mxu1 }
  0xed   : > { %v12500_v43 = vadd.f32 %v10708_v42, %v12497_v41  ;;  %v727_v44 = vpop.f32.mrb[1].mxu1 }
  0xee   : > { %v12503_v45 = vadd.f32 %v12497_v41, %v727_v44 }
  0xef   : > { %v889_v46 = vsel %vm564_vm0, %v12500_v43, 0.0  ;;  %v1016_v47 = vmul.f32 %v12500_v43, %v12500_v43 }
  0xf0   : > { %890 = vadd.xlane.f32.xlu0 %v889_v46  ;;  %v10711_v48 = vpop.f32.mrb[2].mxu1  ;;  %v1015_v51 = vmul.f32 %v12503_v45, %v12503_v45  ;;  %v886_v54 = vsel %vm564_vm0, %v12503_v45, 0.0 }
  0xf1   : > { %v1050_v49 = vsel %vm564_vm0, %v1016_v47, 0.0  ;;  %v737_v50 = vpop.f32.mrb[3].mxu1  ;;  %v12516_v53 = vadd.f32 %v10711_v48, %v12497_v41 }
  0xf2   : > { %1051 = vadd.xlane.f32.xlu1 %v1050_v49  ;;  %v12513_v52 = vadd.f32 %v12497_v41, %v737_v50  ;;  %v1047_v56 = vsel %vm564_vm0, %v1015_v51, 0.0 }
  0xf3   : > { %v895_v60 = vsel %vm564_vm0, %v12516_v53, 0.0  ;;  %v1018_v0 = vmul.f32 %v12516_v53, %v12516_v53 }
  0xf4   : > { %887 = vadd.xlane.f32.xlu0 %v886_v54  ;;  %v10714_v55 = vpop.f32.mrb[4].mxu1  ;;  %v892_v57 = vsel %vm564_vm0, %v12513_v52, 0.0  ;;  %v1017_v59 = vmul.f32 %v12513_v52, %v12513_v52  ;;  %v1539_v54 = vld [vmem:[%s17390_s4 + $0x10] sm:$0xff] }
  0xf5   : > { %v747_v58 = vpop.f32.mrb[5].mxu1  ;;  %v12534_v2 = vadd.f32 %v10714_v55, %v12497_v41  ;;  %v1056_v4 = vsel %vm564_vm0, %v1018_v0, 0.0  ;;  %v1540_v55 = vld [vmem:[%s17390_s4 + $0x18] sm:$0xff] }
  0xf6   : > { %1048 = vadd.xlane.f32.xlu1 %v1047_v56  ;;  %v12528_v62 = vadd.f32 %v12497_v41, %v747_v58  ;;  %v1053_v63 = vsel %vm564_vm0, %v1017_v59, 0.0 }
  0xf7   : > { %v901_v8 = vsel %vm564_vm0, %v12534_v2, 0.0  ;;  %v1020_v12 = vmul.f32 %v12534_v2, %v12534_v2 }
  0xf8   : > { %893 = vadd.xlane.f32.xlu0 %v892_v57  ;;  %v10717_v61 = vpop.f32.mrb[6].mxu1  ;;  %v898_v5 = vsel %vm564_vm0, %v12528_v62, 0.0  ;;  %v1019_v6 = vmul.f32 %v12528_v62, %v12528_v62  ;;  %v11382_v57 = vpack.c.bf16 %v1540_v55, %v1539_v54 }
  0xf9   : > { %v757_v1 = vpop.f32.mrb[7].mxu1  ;;  %v12550_v14 = vadd.f32 %v10717_v61, %v12497_v41  ;;  %v1062_v16 = vsel %vm564_vm0, %v1020_v12, 0.0 }
  0xfa   : > { %896 = vadd.xlane.f32.xlu1 %v895_v60  ;;  %v12544_v10 = vadd.f32 %v12497_v41, %v757_v1  ;;  %v1059_v11 = vsel %vm564_vm0, %v1019_v6, 0.0  ;;  %11383 = vmatprep.subr.bf16.mxu1 %v11382_v57 }
  0xfb   : > { %v907_v20 = vsel %vm564_vm0, %v12550_v14, 0.0  ;;  %v1022_v24 = vmul.f32 %v12550_v14, %v12550_v14  ;;  %11385 = vmatpush3.bf16.msra.mxu1 %v11382_v57 }
  0xfc   : > { %1054 = vadd.xlane.f32.xlu0 %v1053_v63  ;;  %v10720_v3 = vpop.f32.mrb[8].mxu1  ;;  %v904_v17 = vsel %vm564_vm0, %v12544_v10, 0.0  ;;  %v1021_v18 = vmul.f32 %v12544_v10, %v12544_v10 }
  0xfd   : > { %v767_v7 = vpop.f32.mrb[9].mxu1  ;;  %v12568_v26 = vadd.f32 %v10720_v3, %v12497_v41  ;;  %v1068_v28 = vsel %vm564_vm0, %v1022_v24, 0.0 }
  0xfe   : > { %1057 = vadd.xlane.f32.xlu1 %v1056_v4  ;;  %v12562_v22 = vadd.f32 %v12497_v41, %v767_v7  ;;  %v1065_v23 = vsel %vm564_vm0, %v1021_v18, 0.0 }
  0xff   : > { %v913_v34 = vsel %vm564_vm0, %v12568_v26, 0.0  ;;  %v1024_v38 = vmul.f32 %v12568_v26, %v12568_v26 }
 0x100   : > { %899 = vadd.xlane.f32.xlu0 %v898_v5  ;;  %v10723_v9 = vpop.f32.mrb[10].mxu1  ;;  %v910_v29 = vsel %vm564_vm0, %v12562_v22, 0.0  ;;  %v1023_v30 = vmul.f32 %v12562_v22, %v12562_v22 }
 0x101   : > { %v777_v13 = vpop.f32.mrb[11].mxu1  ;;  %v12596_v44 = vadd.f32 %v10723_v9, %v12497_v41  ;;  %v1074_v47 = vsel %vm564_vm0, %v1024_v38, 0.0 }
 0x102   : > { %902 = vadd.xlane.f32.xlu1 %v901_v8  ;;  %v12584_v36 = vadd.f32 %v12497_v41, %v777_v13  ;;  %v1071_v37 = vsel %vm564_vm0, %v1023_v30, 0.0 }
 0x103   : > { %v919_v58 = vsel %vm564_vm0, %v12596_v44, 0.0  ;;  %v1026_v63 = vmul.f32 %v12596_v44, %v12596_v44 }
 0x104   : > { %1060 = vadd.xlane.f32.xlu0 %v1059_v11  ;;  %v10726_v15 = vpop.f32.mrb[12].mxu1  ;;  %v916_v48 = vsel %vm564_vm0, %v12584_v36, 0.0  ;;  %v1025_v49 = vmul.f32 %v12584_v36, %v12584_v36 }
 0x105   : > { %v787_v19 = vpop.f32.mrb[13].mxu1  ;;  %v12630_v4 = vadd.f32 %v10726_v15, %v12497_v41  ;;  %v1080_v6 = vsel %vm564_vm0, %v1026_v63, 0.0 }
 0x106   : > { %1063 = vadd.xlane.f32.xlu1 %v1062_v16  ;;  %v12618_v60 = vadd.f32 %v12497_v41, %v787_v19  ;;  %v1077_v61 = vsel %vm564_vm0, %v1025_v49, 0.0 }
 0x107   : > { %v925_v13 = vsel %vm564_vm0, %v12630_v4, 0.0  ;;  %v1028_v18 = vmul.f32 %v12630_v4, %v12630_v4 }
 0x108   : > { %905 = vadd.xlane.f32.xlu0 %v904_v17  ;;  %v12559_v21 = vpop.f32.mrb[14].mxu1  ;;  %v922_v7 = vsel %vm564_vm0, %v12618_v60, 0.0  ;;  %v1027_v8 = vmul.f32 %v12618_v60, %v12618_v60 }
 0x109   : > { %v797_v25 = vpop.f32.mrb[15].mxu1  ;;  %v12659_v24 = vadd.f32 %v12559_v21, %v12497_v41 }
 0x10a   : > { %908 = vadd.xlane.f32.xlu1 %v907_v20  ;;  %v12646_v16 = vadd.f32 %v12497_v41, %v797_v25  ;;  %v1083_v17 = vsel %vm564_vm0, %v1027_v8, 0.0 }
 0x10b   : > { %v931_v21 = vsel %vm564_vm0, %v12659_v24, 0.0  ;;  %v1030_v38 = vmul.f32 %v12659_v24, %v12659_v24 }
 0x10c   : > { %1066 = vadd.xlane.f32.xlu0 %v1065_v23  ;;  %v10732_v27 = vpop.f32.mrb[16].mxu1 }
 0x10d   : > { %v12576_v31 = vadd.f32 %v10732_v27, %v12497_v41  ;;  %v807_v32 = vpop.f32.mrb[17].mxu1  ;;  %v1086_v27 = vsel %vm564_vm0, %v1028_v18, 0.0 }
 0x10e   : > { %1069 = vadd.xlane.f32.xlu1 %v1068_v28  ;;  %v12579_v33 = vadd.f32 %v12497_v41, %v807_v32  ;;  %v928_v28 = vsel %vm564_vm0, %v12646_v16, 0.0 }
 0x10f   : > { %v937_v54 = vsel %vm564_vm0, %v12576_v31, 0.0 }
 0x110   : > { %911 = vadd.xlane.f32.xlu0 %v910_v29  ;;  %v10735_v35 = vpop.f32.mrb[18].mxu1  ;;  %v1029_v29 = vmul.f32 %v12646_v16, %v12646_v16  ;;  %v934_v49 = vsel %vm564_vm0, %v12579_v33, 0.0 }
 0x111   : > { %v12590_v39 = vadd.f32 %v10735_v35, %v12497_v41  ;;  %v817_v40 = vpop.f32.mrb[19].mxu1 }
 0x112   : > { %914 = vadd.xlane.f32.xlu1 %v913_v34  ;;  %v12593_v42 = vadd.f32 %v12497_v41, %v817_v40 }
 0x114   : > { %1072 = vadd.xlane.f32.xlu0 %v1071_v37  ;;  %v10738_v46 = vpop.f32.mrb[20].mxu1  ;;  %v1089_v37 = vsel %vm564_vm0, %v1029_v29, 0.0 }
 0x115   : > { %v12604_v50 = vadd.f32 %v10738_v46, %v12497_v41  ;;  %v827_v51 = vpop.f32.mrb[21].mxu1 }
 0x116   : > { %1075 = vadd.xlane.f32.xlu1 %v1074_v47  ;;  %v12613_v56 = vadd.f32 %v12497_v41, %v827_v51  ;;  %v1031_v51 = vmul.f32 %v12579_v33, %v12579_v33 }
 0x117   : > { %v949_v8 = vsel %vm564_vm0, %v12604_v50, 0.0 }
 0x118   : > { %917 = vadd.xlane.f32.xlu0 %v916_v48  ;;  %v10741_v59 = vpop.f32.mrb[22].mxu1  ;;  %v1092_v48 = vsel %vm564_vm0, %v1030_v38, 0.0  ;;  %v1095_v55 = vsel %vm564_vm0, %v1031_v51, 0.0 }
 0x119   : > { %v12624_v0 = vadd.f32 %v10741_v59, %v12497_v41  ;;  %v837_v1 = vpop.f32.mrb[23].mxu1  ;;  %v1033_v59 = vmul.f32 %v12593_v42, %v12593_v42 }
 0x11a   : > { %920 = vadd.xlane.f32.xlu1 %v919_v58  ;;  %v12627_v3 = vadd.f32 %v12497_v41, %v837_v1  ;;  %v940_v58 = vsel %vm564_vm0, %v12593_v42, 0.0  ;;  %v1034_v1 = vmul.f32 %v12590_v39, %v12590_v39 }
 0x11b   : > { %v1101_v63 = vsel %vm564_vm0, %v1033_v59, 0.0 }
 0x11c   : > { %1078 = vadd.xlane.f32.xlu0 %v1077_v61  ;;  %v10744_v5 = vpop.f32.mrb[24].mxu1  ;;  %v943_v61 = vsel %vm564_vm0, %v12590_v39, 0.0  ;;  %v1037_v18 = vmul.f32 %v12627_v3, %v12627_v3 }
 0x11d   : > { %v12638_v9 = vadd.f32 %v10744_v5, %v12497_v41  ;;  %v847_v11 = vpop.f32.mrb[25].mxu1  ;;  %v1104_v5 = vsel %vm564_vm0, %v1034_v1, 0.0 }
 0x11e   : > { %1081 = vadd.xlane.f32.xlu1 %v1080_v6  ;;  %v12641_v12 = vadd.f32 %v12497_v41, %v847_v11  ;;  %v946_v6 = vsel %vm564_vm0, %v12613_v56, 0.0 }
 0x120   : > { %923 = vadd.xlane.f32.xlu0 %v922_v7  ;;  %v10747_v15 = vpop.f32.mrb[26].mxu1  ;;  %v1035_v7 = vmul.f32 %v12613_v56, %v12613_v56  ;;  %v958_v29 = vsel %vm564_vm0, %v12641_v12, 0.0 }
 0x121   : > { %v12652_v19 = vadd.f32 %v10747_v15, %v12497_v41  ;;  %v857_v20 = vpop.f32.mrb[27].mxu1 }
 0x122   : > { %926 = vadd.xlane.f32.xlu1 %v925_v13  ;;  %v12655_v23 = vadd.f32 %v12497_v41, %v857_v20  ;;  %v1107_v11 = vsel %vm564_vm0, %v1035_v7, 0.0  ;;  %v1036_v13 = vmul.f32 %v12604_v50, %v12604_v50  ;;  %v955_v20 = vsel %vm564_vm0, %v12624_v0, 0.0 }
 0x124   : > { %1084 = vadd.xlane.f32.xlu0 %v1083_v17  ;;  %v10750_v25 = vpop.f32.mrb[28].mxu1  ;;  %v1110_v15 = vsel %vm564_vm0, %v1036_v13, 0.0  ;;  %v952_v17 = vsel %vm564_vm0, %v12627_v3, 0.0 }
 0x125   : > { %v12667_v30 = vadd.f32 %v10750_v25, %v12497_v41  ;;  %v867_v32 = vpop.f32.mrb[29].mxu1  ;;  %v1113_v25 = vsel %vm564_vm0, %v1037_v18, 0.0 }
 0x126   : > { %1087 = vadd.xlane.f32.xlu1 %v1086_v27  ;;  %v12670_v34 = vadd.f32 %v12497_v41, %v867_v32  ;;  %v1038_v27 = vmul.f32 %v12624_v0, %v12624_v0  ;;  %v1039_v32 = vmul.f32 %v12641_v12, %v12641_v12 }
 0x128   : > { %929 = vadd.xlane.f32.xlu0 %v928_v28  ;;  %v10753_v35 = vpop.f32.mrb[30].mxu1  ;;  %v1116_v28 = vsel %vm564_vm0, %v1038_v27, 0.0 }
 0x129   : > { %v12678_v40 = vadd.f32 %v10753_v35, %v12497_v41  ;;  %v877_v46 = vpop.f32.mrb[31].mxu1  ;;  %v1119_v35 = vsel %vm564_vm0, %v1039_v32, 0.0 }
 0x12a   : > { %932 = vadd.xlane.f32.xlu1 %v931_v21  ;;  %v12681_v47 = vadd.f32 %v12497_v41, %v877_v46  ;;  %v1032_v41 = vmul.f32 %v12576_v31, %v12576_v31  ;;  %v961_v21 = vsel %vm564_vm0, %v12638_v9, 0.0  ;;  %v964_v46 = vsel %vm564_vm0, %v12655_v23, 0.0 }
 0x12c   : > { %1090 = vadd.xlane.f32.xlu0 %v1089_v37  ;;  %v1098_v57 = vsel %vm564_vm0, %v1032_v41, 0.0  ;;  %v1040_v37 = vmul.f32 %v12638_v9, %v12638_v9  ;;  %v970_v41 = vsel %vm564_vm0, %v12670_v34, 0.0  ;;  %v976_v1 = vsel %vm564_vm0, %v12681_v47, 0.0 }
 0x12e   : > { %1093 = vadd.xlane.f32.xlu1 %v1092_v48  ;;  %v1122_v38 = vsel %vm564_vm0, %v1040_v37, 0.0  ;;  %v1041_v48 = vmul.f32 %v12655_v23, %v12655_v23 }
 0x130   : > { %935 = vadd.xlane.f32.xlu0 %v934_v49  ;;  %v967_v49 = vsel %vm564_vm0, %v12652_v19, 0.0  ;;  %v1125_v51 = vsel %vm564_vm0, %v1041_v48, 0.0 }
 0x132   : > { %938 = vadd.xlane.f32.xlu1 %v937_v54  ;;  %v1042_v54 = vmul.f32 %v12652_v19, %v12652_v19 }
 0x134   : > { %1096 = vadd.xlane.f32.xlu0 %v1095_v55  ;;  %v1128_v55 = vsel %vm564_vm0, %v1042_v54, 0.0 }
 0x136   : > { %1099 = vadd.xlane.f32.xlu1 %v1098_v57  ;;  %v1043_v57 = vmul.f32 %v12670_v34, %v12670_v34 }
 0x138   : > { %941 = vadd.xlane.f32.xlu0 %v940_v58  ;;  %v973_v58 = vsel %vm564_vm0, %v12667_v30, 0.0  ;;  %v1131_v59 = vsel %vm564_vm0, %v1043_v57, 0.0 }
 0x13a   : > { %944 = vadd.xlane.f32.xlu1 %v943_v61  ;;  %v1044_v61 = vmul.f32 %v12667_v30, %v12667_v30 }
 0x13c   : > { %1102 = vadd.xlane.f32.xlu0 %v1101_v63  ;;  %v1134_v63 = vsel %vm564_vm0, %v1044_v61, 0.0 }
 0x13e   : > { %1105 = vadd.xlane.f32.xlu1 %v1104_v5  ;;  %v1045_v5 = vmul.f32 %v12681_v47, %v12681_v47 }
 0x140   : > { %947 = vadd.xlane.f32.xlu0 %v946_v6  ;;  %v979_v6 = vsel %vm564_vm0, %v12678_v40, 0.0  ;;  %v1137_v7 = vsel %vm564_vm0, %v1045_v5, 0.0 }
 0x142   : > { %950 = vadd.xlane.f32.xlu1 %v949_v8  ;;  %v1046_v8 = vmul.f32 %v12678_v40, %v12678_v40 }
 0x144   : > { %1108 = vadd.xlane.f32.xlu0 %v1107_v11  ;;  %v1140_v11 = vsel %vm564_vm0, %v1046_v8, 0.0 }
 0x146   : > { %1111 = vadd.xlane.f32.xlu1 %v1110_v15 }
 0x148   : > { %953 = vadd.xlane.f32.xlu0 %v952_v17 }
 0x14a   : > { %956 = vadd.xlane.f32.xlu1 %v955_v20 }
 0x14c   : > { %1114 = vadd.xlane.f32.xlu0 %v1113_v25 }
 0x14e   : > { %1117 = vadd.xlane.f32.xlu1 %v1116_v28 }
 0x150   : > { %959 = vadd.xlane.f32.xlu0 %v958_v29 }
 0x152   : > { %962 = vadd.xlane.f32.xlu1 %v961_v21 }
 0x154   : > { %1120 = vadd.xlane.f32.xlu0 %v1119_v35 }
 0x156   : > { %1123 = vadd.xlane.f32.xlu1 %v1122_v38 }
 0x158   : > { %965 = vadd.xlane.f32.xlu0 %v964_v46 }
 0x15a   : > { %968 = vadd.xlane.f32.xlu1 %v967_v49 }
 0x15c   : > { %1126 = vadd.xlane.f32.xlu0 %v1125_v51 }
 0x15e   : > { %1129 = vadd.xlane.f32.xlu1 %v1128_v55 }
 0x160   : > { %971 = vadd.xlane.f32.xlu0 %v970_v41 }
 0x162   : > { %974 = vadd.xlane.f32.xlu1 %v973_v58 }
 0x164   : > { %1132 = vadd.xlane.f32.xlu0 %v1131_v59 }
 0x166   : > { %1135 = vadd.xlane.f32.xlu1 %v1134_v63 }
 0x168   : > { %977 = vadd.xlane.f32.xlu0 %v976_v1 }
 0x16a   : > { %980 = vadd.xlane.f32.xlu1 %v979_v6 }
 0x16c   : > { %1138 = vadd.xlane.f32.xlu0 %v1137_v7 }
 0x16e   : > { %1141 = vadd.xlane.f32.xlu1 %v1140_v11 }
 0x17d   : > { %v891_v13 = vpop.xlane.xlu0 %890 }
 0x17e   : > { %v984_v15 = vmul.f32 0.03125, %v891_v13 }
 0x17f   : > { %v1052_v17 = vpop.xlane.xlu1 %1051 }
 0x180   : > { %v1176_v18 = vmul.f32 %v984_v15, %v984_v15  ;;  %v1144_v20 = vmul.f32 0.03125, %v1052_v17 }
 0x181   : > { %v888_v25 = vpop.xlane.xlu0 %887 }
 0x182   : > { %v1208_v27 = vsub.f32 %v1144_v20, %v1176_v18  ;;  %v983_v28 = vmul.f32 0.03125, %v888_v25  ;;  %v1272_v20 = vsub.f32 %v12500_v43, %v984_v15 }
 0x183   : > { %v1049_v29 = vpop.xlane.xlu1 %1048 }
 0x184   : > { %v1240_v32 = vmax.f32 %v1208_v27, 0.0  ;;  %v1175_v21 = vmul.f32 %v983_v28, %v983_v28  ;;  %v1143_v35 = vmul.f32 0.03125, %v1049_v29  ;;  %v1271_v15 = vsub.f32 %v12503_v45, %v983_v28 }
 0x185   : > { %v894_v37 = vpop.xlane.xlu0 %893 }
 0x186   : > { %v1304_v38 = vadd.f32 1e-05, %v1240_v32  ;;  %v1207_v46 = vsub.f32 %v1143_v35, %v1175_v21  ;;  %v12764_v48 = vmul.f32 0.03125, %v894_v37  ;;  %v12795_v32 = vld [vmem:[%s12781_s19] ss:$0 sm:$0xff] }
 0x187   : > { %v897_v49 = vpop.xlane.xlu1 %896 }
 0x188   : > { %11714 = vrsqrt.f32 %v1304_v38  ;;  %v1239_v51 = vmax.f32 %v1207_v46, 0.0  ;;  %v1177_v54 = vmul.f32 %v12764_v48, %v12764_v48  ;;  %v12768_v55 = vmul.f32 0.03125, %v897_v49 }
 0x189   : > { %v1055_v41 = vpop.xlane.xlu0 %1054 }
 0x18a   : > { %v1303_v57 = vadd.f32 1e-05, %v1239_v51  ;;  %v1145_v58 = vmul.f32 0.03125, %v1055_v41  ;;  %v1178_v61 = vmul.f32 %v12768_v55, %v12768_v55 }
 0x18b   : > { %v1058_v59 = vpop.xlane.xlu1 %1057 }
 0x18c   : > { %11716 = vrsqrt.f32 %v1303_v57  ;;  %v1209_v63 = vsub.f32 %v1145_v58, %v1177_v54  ;;  %v1146_v1 = vmul.f32 0.03125, %v1058_v59  ;;  %v12800_v54 = vld [vmem:[%s12789_s26] ss:$0 sm:$0xff] }
 0x18d   : > { %v900_v5 = vpop.xlane.xlu0 %899 }
 0x18e   : > { %v1241_v6 = vmax.f32 %v1209_v63, 0.0  ;;  %v1210_v7 = vsub.f32 %v1146_v1, %v1178_v61  ;;  %v12775_v8 = vmul.f32 0.03125, %v900_v5 }
 0x18f   : > { %v903_v11 = vpop.xlane.xlu1 %902 }
 0x190   : > { %v1305_v13 = vadd.f32 1e-05, %v1241_v6  ;;  %v1242_v17 = vmax.f32 %v1210_v7, 0.0  ;;  %v1179_v18 = vmul.f32 %v12775_v8, %v12775_v8  ;;  %v12792_v25 = vmul.f32 0.03125, %v903_v11 }
 0x191   : > { %v1061_v27 = vpop.xlane.xlu0 %1060 }
 0x192   : > { %v11715_v29 = vpop.eup %11714  ;;  %11718 = vrsqrt.f32 %v1305_v13  ;;  %v1306_v21 = vadd.f32 1e-05, %v1242_v17  ;;  %v1147_v35 = vmul.f32 0.03125, %v1061_v27  ;;  %v1180_v46 = vmul.f32 %v12792_v25, %v12792_v25 }
 0x193   : > { %v1368_v37 = vmul.f32 %v11715_v29, %v1272_v20  ;;  %v1064_v38 = vpop.xlane.xlu1 %1063  ;;  %v1273_v20 = vsub.f32 %v12513_v52, %v12764_v48 }
 0x194   : > { %11720 = vrsqrt.f32 %v1306_v21  ;;  %v1211_v49 = vsub.f32 %v1147_v35, %v1179_v18  ;;  %v1148_v51 = vmul.f32 0.03125, %v1064_v38 }
 0x195   : > { %v1405_v43 = vmul.f32 %v12795_v32, %v1368_v37  ;;  %v906_v41 = vpop.xlane.xlu0 %905 }
 0x196   : > { %v11717_v57 = vpop.eup %11716  ;;  %v1243_v58 = vmax.f32 %v1211_v49, 0.0  ;;  %v1212_v59 = vsub.f32 %v1148_v51, %v1180_v46  ;;  %v12804_v61 = vmul.f32 0.03125, %v906_v41  ;;  %v1274_v49 = vsub.f32 %v12516_v53, %v12768_v55 }
 0x197   : > { %v909_v63 = vpop.xlane.xlu1 %908  ;;  %v1367_v1 = vmul.f32 %v11717_v57, %v1271_v15  ;;  %v1442_v5 = vadd.f32 %v12800_v54, %v1405_v43 }
 0x198   : > { %v1307_v6 = vadd.f32 1e-05, %v1243_v58  ;;  %v1244_v7 = vmax.f32 %v1212_v59, 0.0  ;;  %v1181_v11 = vmul.f32 %v12804_v61, %v12804_v61  ;;  %v12809_v13 = vmul.f32 0.03125, %v909_v63 }
 0x199   : > { %v1067_v17 = vpop.xlane.xlu0 %1066  ;;  %v1404_v45 = vmul.f32 %v12795_v32, %v1367_v1  ;;  %v1474_v21 = vmul.f32 0.2, %v1442_v5 }
 0x19a   : > { %11722 = vrsqrt.f32 %v1307_v6  ;;  %v1308_v28 = vadd.f32 1e-05, %v1244_v7  ;;  %v1149_v18 = vmul.f32 0.03125, %v1067_v17  ;;  %v1182_v37 = vmul.f32 %v12809_v13, %v12809_v13 }
 0x19b   : > { %v1070_v27 = vpop.xlane.xlu1 %1069  ;;  %v1441_v29 = vadd.f32 %v12800_v54, %v1404_v45  ;;  %v1506_v17 = vmax.f32 %v1442_v5, %v1474_v21 }
 0x19c   : > { %v11719_v35 = vpop.eup %11718  ;;  %11724 = vrsqrt.f32 %v1308_v28  ;;  %v1213_v38 = vsub.f32 %v1149_v18, %v1181_v11  ;;  %v1150_v46 = vmul.f32 0.03125, %v1070_v27  ;;  %v1275_v27 = vsub.f32 %v12528_v62, %v12775_v8 }
 0x19d   : > { %v912_v51 = vpop.xlane.xlu0 %911  ;;  %v1473_v43 = vmul.f32 0.2, %v1441_v29  ;;  %v1369_v15 = vmul.f32 %v11719_v35, %v1273_v20 }
 0x19e   : > { %v11721_v41 = vpop.eup %11720  ;;  %v1245_v57 = vmax.f32 %v1213_v38, 0.0  ;;  %v1214_v52 = vsub.f32 %v1150_v46, %v1182_v37  ;;  %v12819_v48 = vmul.f32 0.03125, %v912_v51 }
 0x19f   : > { %v915_v58 = vpop.xlane.xlu1 %914  ;;  %v1505_v59 = vmax.f32 %v1441_v29, %v1473_v43  ;;  %v1406_v63 = vmul.f32 %v12795_v32, %v1369_v15  ;;  %v1370_v1 = vmul.f32 %v11721_v41, %v1274_v49  ;;  %v1276_v49 = vsub.f32 %v12534_v2, %v12792_v25 }
 0x1a0   : > { %v1309_v6 = vadd.f32 1e-05, %v1245_v57  ;;  %v1246_v7 = vmax.f32 %v1214_v52, 0.0  ;;  %v1183_v11 = vmul.f32 %v12819_v48, %v12819_v48  ;;  %v12824_v53 = vmul.f32 0.03125, %v915_v58 }
 0x1a1   : > { %10762 = vmatprep.mubr.msk.f32.mxu1 %vm564_vm0, %v1505_v59  ;;  %v1073_v55 = vpop.xlane.xlu0 %1072  ;;  %v1443_v45 = vadd.f32 %v12800_v54, %v1406_v63  ;;  %v1407_v28 = vmul.f32 %v12795_v32, %v1370_v1 }
 0x1a2   : > { %11726 = vrsqrt.f32 %v1309_v6  ;;  %v1310_v18 = vadd.f32 1e-05, %v1246_v7  ;;  %v1151_v20 = vmul.f32 0.03125, %v1073_v55  ;;  %10763 = vmatmul.mubr.msk.f32.vlgmr.msra.gmra.mrb[32].mxu1 %vm564_vm0, %v1506_v17  ;;  %v1184_v37 = vmul.f32 %v12824_v53, %v12824_v53 }
 0x1a3   : > { %v1076_v29 = vpop.xlane.xlu1 %1075  ;;  %v1475_v35 = vmul.f32 0.2, %v1443_v45  ;;  %v1444_v5 = vadd.f32 %v12800_v54, %v1407_v28 }
 0x1a4   : > { %v11723_v21 = vpop.eup %11722  ;;  %11728 = vrsqrt.f32 %v1310_v18  ;;  %v1215_v38 = vsub.f32 %v1151_v20, %v1183_v11  ;;  %v1152_v46 = vmul.f32 0.03125, %v1076_v29  ;;  %v1277_v18 = vsub.f32 %v12544_v10, %v12804_v61 }
 0x1a5   : > { %v918_v51 = vpop.xlane.xlu0 %917  ;;  %v1507_v43 = vmax.f32 %v1443_v45, %v1475_v35  ;;  %v1476_v15 = vmul.f32 0.2, %v1444_v5  ;;  %v1371_v41 = vmul.f32 %v11723_v21, %v1275_v27 }
 0x1a6   : > { %v11725_v57 = vpop.eup %11724  ;;  %v1247_v62 = vmax.f32 %v1215_v38, 0.0  ;;  %v1216_v8 = vsub.f32 %v1152_v46, %v1184_v37  ;;  %v12837_v52 = vmul.f32 0.03125, %v918_v51  ;;  %v1278_v38 = vsub.f32 %v12550_v14, %v12809_v13 }
 0x1a7   : > { %v921_v58 = vpop.xlane.xlu1 %920  ;;  %10765 = vmatprep.mubr.msk.f32.mxu1 %vm564_vm0, %v1507_v43  ;;  %v1508_v59 = vmax.f32 %v1444_v5, %v1476_v15  ;;  %v1408_v63 = vmul.f32 %v12795_v32, %v1371_v41  ;;  %v1372_v1 = vmul.f32 %v11725_v57, %v1276_v49 }
 0x1a8   : > { %v1311_v6 = vadd.f32 1e-05, %v1247_v62  ;;  %v1248_v7 = vmax.f32 %v1216_v8, 0.0  ;;  %v1185_v2 = vmul.f32 %v12837_v52, %v12837_v52  ;;  %v12843_v25 = vmul.f32 0.03125, %v921_v58 }
 0x1a9   : > { %10766 = vmatmul.mubr.msk.f32.gmra.mrb[34].mxu1 %vm564_vm0, %v1508_v59  ;;  %v1079_v11 = vpop.xlane.xlu0 %1078  ;;  %v1445_v17 = vadd.f32 %v12800_v54, %v1408_v63  ;;  %v1409_v55 = vmul.f32 %v12795_v32, %v1372_v1 }
 0x1aa   : > { %11730 = vrsqrt.f32 %v1311_v6  ;;  %v1312_v45 = vadd.f32 1e-05, %v1248_v7  ;;  %v1153_v28 = vmul.f32 0.03125, %v1079_v11  ;;  %v1186_v5 = vmul.f32 %v12843_v25, %v12843_v25 }
 0x1ab   : > { %v1082_v20 = vpop.xlane.xlu1 %1081  ;;  %v1477_v27 = vmul.f32 0.2, %v1445_v17  ;;  %v1446_v29 = vadd.f32 %v12800_v54, %v1409_v55 }
 0x1ac   : > { %v11727_v35 = vpop.eup %11726  ;;  %11732 = vrsqrt.f32 %v1312_v45  ;;  %v1217_v21 = vsub.f32 %v1153_v28, %v1185_v2  ;;  %v1154_v37 = vmul.f32 0.03125, %v1082_v20 }
 0x1ad   : > { %v924_v46 = vpop.xlane.xlu0 %923  ;;  %v1509_v49 = vmax.f32 %v1445_v17, %v1477_v27  ;;  %v1478_v51 = vmul.f32 0.2, %v1446_v29  ;;  %v1373_v43 = vmul.f32 %v11727_v35, %v1277_v18  ;;  %v1279_v17 = vsub.f32 %v12562_v22, %v12819_v48 }
 0x1ae   : > { %v11729_v15 = vpop.eup %11728  ;;  %v1249_v10 = vmax.f32 %v1217_v21, 0.0  ;;  %v1218_v61 = vsub.f32 %v1154_v37, %v1186_v5  ;;  %v12855_v41 = vmul.f32 0.03125, %v924_v46  ;;  %v1280_v35 = vsub.f32 %v12568_v26, %v12824_v53 }
 0x1af   : > { %v927_v57 = vpop.xlane.xlu1 %926  ;;  %10768 = vmatprep.mubr.msk.f32.mxu1 %vm564_vm0, %v1509_v49  ;;  %v1510_v62 = vmax.f32 %v1446_v29, %v1478_v51  ;;  %v1410_v8 = vmul.f32 %v12795_v32, %v1373_v43  ;;  %v1374_v58 = vmul.f32 %v11729_v15, %v1278_v38 }
 0x1b0   : > { %v1313_v59 = vadd.f32 1e-05, %v1249_v10  ;;  %v1250_v63 = vmax.f32 %v1218_v61, 0.0  ;;  %v1187_v14 = vmul.f32 %v12855_v41, %v12855_v41  ;;  %v12861_v13 = vmul.f32 0.03125, %v927_v57 }
 0x1b1   : > { %10769 = vmatmul.mubr.msk.f32.gmra.mrb[36].mxu1 %vm564_vm0, %v1510_v62  ;;  %v1085_v1 = vpop.xlane.xlu0 %1084  ;;  %v1447_v6 = vadd.f32 %v12800_v54, %v1410_v8  ;;  %v1411_v7 = vmul.f32 %v12795_v32, %v1374_v58 }
 0x1b2   : > { %11734 = vrsqrt.f32 %v1313_v59  ;;  %v1314_v2 = vadd.f32 1e-05, %v1250_v63  ;;  %v1155_v11 = vmul.f32 0.03125, %v1085_v1  ;;  %v1188_v20 = vmul.f32 %v12861_v13, %v12861_v13 }
 0x1b3   : > { %v1088_v55 = vpop.xlane.xlu1 %1087  ;;  %v1479_v45 = vmul.f32 0.2, %v1447_v6  ;;  %v1448_v28 = vadd.f32 %v12800_v54, %v1411_v7 }
 0x1b4   : > { %v11731_v18 = vpop.eup %11730  ;;  %11736 = vrsqrt.f32 %v1314_v2  ;;  %v1219_v27 = vsub.f32 %v1155_v11, %v1187_v14  ;;  %v1156_v29 = vmul.f32 0.03125, %v1088_v55  ;;  %v1281_v14 = vsub.f32 %v12584_v36, %v12837_v52 }
 0x1b5   : > { %v930_v5 = vpop.xlane.xlu0 %929  ;;  %v1511_v21 = vmax.f32 %v1447_v6, %v1479_v45  ;;  %v1480_v37 = vmul.f32 0.2, %v1448_v28  ;;  %v1375_v38 = vmul.f32 %v11731_v18, %v1279_v17  ;;  %v1282_v45 = vsub.f32 %v12596_v44, %v12843_v25 }
 0x1b6   : > { %v11733_v46 = vpop.eup %11732  ;;  %v1251_v22 = vmax.f32 %v1219_v27, 0.0  ;;  %v1220_v48 = vsub.f32 %v1156_v29, %v1188_v20  ;;  %v12873_v49 = vmul.f32 0.03125, %v930_v5 }
 0x1b7   : > { %v933_v51 = vpop.xlane.xlu1 %932  ;;  %10771 = vmatprep.mubr.msk.f32.mxu1 %vm564_vm0, %v1511_v21  ;;  %v1512_v43 = vmax.f32 %v1448_v28, %v1480_v37  ;;  %v1412_v15 = vmul.f32 %v12795_v32, %v1375_v38  ;;  %v1376_v10 = vmul.f32 %v11733_v46, %v1280_v35 }
 0x1b8   : > { %v1315_v61 = vadd.f32 1e-05, %v1251_v22  ;;  %v1252_v57 = vmax.f32 %v1220_v48, 0.0  ;;  %v1189_v26 = vmul.f32 %v12873_v49, %v12873_v49  ;;  %v12879_v53 = vmul.f32 0.03125, %v933_v51 }
 0x1b9   : > { %10772 = vmatmul.mubr.msk.f32.gmra.mrb[38].mxu1 %vm564_vm0, %v1512_v43  ;;  %v1091_v62 = vpop.xlane.xlu0 %1090  ;;  %v1449_v8 = vadd.f32 %v12800_v54, %v1412_v15  ;;  %v1413_v58 = vmul.f32 %v12795_v32, %v1376_v10 }
 0x1ba   : > { %11738 = vrsqrt.f32 %v1315_v61  ;;  %v1316_v59 = vadd.f32 1e-05, %v1252_v57  ;;  %v1157_v63 = vmul.f32 0.03125, %v1091_v62  ;;  %v1190_v11 = vmul.f32 %v12879_v53, %v12879_v53 }
 0x1bb   : > { %v1094_v1 = vpop.xlane.xlu1 %1093  ;;  %v1481_v6 = vmul.f32 0.2, %v1449_v8  ;;  %v1450_v7 = vadd.f32 %v12800_v54, %v1413_v58  ;;  %v1283_v61 = vsub.f32 %v12618_v60, %v12855_v41 }
 0x1bc   : > { %v11735_v2 = vpop.eup %11734  ;;  %11740 = vrsqrt.f32 %v1316_v59  ;;  %v1221_v17 = vsub.f32 %v1157_v63, %v1189_v26  ;;  %v1158_v55 = vmul.f32 0.03125, %v1094_v1 }
 0x1bd   : > { %v936_v28 = vpop.xlane.xlu0 %935  ;;  %v1513_v18 = vmax.f32 %v1449_v8, %v1481_v6  ;;  %v1482_v20 = vmul.f32 0.2, %v1450_v7  ;;  %v1377_v27 = vmul.f32 %v11735_v2, %v1281_v14  ;;  %v1284_v14 = vsub.f32 %v12630_v4, %v12861_v13 }
 0x1be   : > { %v11737_v29 = vpop.eup %11736  ;;  %v1253_v36 = vmax.f32 %v1221_v17, 0.0  ;;  %v1222_v52 = vsub.f32 %v1158_v55, %v1190_v11  ;;  %v12891_v35 = vmul.f32 0.03125, %v936_v28 }
 0x1bf   : > { %v939_v5 = vpop.xlane.xlu1 %938  ;;  %10774 = vmatprep.mubr.msk.f32.mxu1 %vm564_vm0, %v1513_v18  ;;  %v1514_v21 = vmax.f32 %v1450_v7, %v1482_v20  ;;  %v1414_v37 = vmul.f32 %v12795_v32, %v1377_v27  ;;  %v1378_v38 = vmul.f32 %v11737_v29, %v1282_v45 }
 0x1c0   : > { %v1317_v46 = vadd.f32 1e-05, %v1253_v36  ;;  %v1254_v22 = vmax.f32 %v1222_v52, 0.0  ;;  %v1191_v44 = vmul.f32 %v12891_v35, %v12891_v35  ;;  %v12897_v25 = vmul.f32 0.03125, %v939_v5 }
 0x1c1   : > { %10775 = vmatmul.mubr.msk.f32.gmra.mrb[40].mxu1 %vm564_vm0, %v1514_v21  ;;  %v1097_v48 = vpop.xlane.xlu0 %1096  ;;  %v1451_v51 = vadd.f32 %v12800_v54, %v1414_v37  ;;  %v1415_v43 = vmul.f32 %v12795_v32, %v1378_v38  ;;  %v1285_v37 = vsub.f32 %v12646_v16, %v12873_v49 }
 0x1c2   : > { %11742 = vrsqrt.f32 %v1317_v46  ;;  %v1318_v15 = vadd.f32 1e-05, %v1254_v22  ;;  %v1159_v10 = vmul.f32 0.03125, %v1097_v48  ;;  %v1192_v58 = vmul.f32 %v12897_v25, %v12897_v25 }
 0x1c3   : > { %v1100_v57 = vpop.xlane.xlu1 %1099  ;;  %v1483_v26 = vmul.f32 0.2, %v1451_v51  ;;  %v1452_v62 = vadd.f32 %v12800_v54, %v1415_v43 }
 0x1c4   : > { %v11739_v8 = vpop.eup %11738  ;;  %11744 = vrsqrt.f32 %v1318_v15  ;;  %v1223_v59 = vsub.f32 %v1159_v10, %v1191_v44  ;;  %v1160_v63 = vmul.f32 0.03125, %v1100_v57  ;;  %v1286_v15 = vsub.f32 %v12659_v24, %v12879_v53 }
 0x1c5   : > { %v942_v1 = vpop.xlane.xlu0 %941  ;;  %v1515_v6 = vmax.f32 %v1451_v51, %v1483_v26  ;;  %v1484_v7 = vmul.f32 0.2, %v1452_v62  ;;  %v1379_v2 = vmul.f32 %v11739_v8, %v1283_v61 }
 0x1c6   : > { %v11741_v11 = vpop.eup %11740  ;;  %v1255_v60 = vmax.f32 %v1223_v59, 0.0  ;;  %v1224_v41 = vsub.f32 %v1160_v63, %v1192_v58  ;;  %v12909_v17 = vmul.f32 0.03125, %v942_v1 }
 0x1c7   : > { %v945_v55 = vpop.xlane.xlu1 %944  ;;  %10777 = vmatprep.mubr.msk.f32.mxu1 %vm564_vm0, %v1515_v6  ;;  %v1516_v45 = vmax.f32 %v1452_v62, %v1484_v7  ;;  %v1416_v28 = vmul.f32 %v12795_v32, %v1379_v2  ;;  %v1380_v18 = vmul.f32 %v11741_v11, %v1284_v14 }
 0x1c8   : > { %v1319_v20 = vadd.f32 1e-05, %v1255_v60  ;;  %v1256_v27 = vmax.f32 %v1224_v41, 0.0  ;;  %v1193_v4 = vmul.f32 %v12909_v17, %v12909_v17  ;;  %v12915_v13 = vmul.f32 0.03125, %v945_v55 }
 0x1c9   : > { %10778 = vmatmul.mubr.msk.f32.gmra.mrb[42].mxu1 %vm564_vm0, %v1516_v45  ;;  %v1103_v29 = vpop.xlane.xlu0 %1102  ;;  %v1453_v36 = vadd.f32 %v12800_v54, %v1416_v28  ;;  %v1417_v52 = vmul.f32 %v12795_v32, %v1380_v18  ;;  %v1287_v55 = vsub.f32 %v12579_v33, %v12891_v35 }
 0x1ca   : > { %11746 = vrsqrt.f32 %v1319_v20  ;;  %v1320_v5 = vadd.f32 1e-05, %v1256_v27  ;;  %v1161_v21 = vmul.f32 0.03125, %v1103_v29  ;;  %v1194_v48 = vmul.f32 %v12915_v13, %v12915_v13 }
 0x1cb   : > { %v1106_v38 = vpop.xlane.xlu1 %1105  ;;  %v1485_v46 = vmul.f32 0.2, %v1453_v36  ;;  %v1454_v22 = vadd.f32 %v12800_v54, %v1417_v52 }
 0x1cc   : > { %v11743_v44 = vpop.eup %11742  ;;  %11748 = vrsqrt.f32 %v1320_v5  ;;  %v1225_v51 = vsub.f32 %v1161_v21, %v1193_v4  ;;  %v1162_v43 = vmul.f32 0.03125, %v1106_v38 }
 0x1cd   : > { %v948_v10 = vpop.xlane.xlu0 %947  ;;  %v1517_v61 = vmax.f32 %v1453_v36, %v1485_v46  ;;  %v1486_v57 = vmul.f32 0.2, %v1454_v22  ;;  %v1381_v26 = vmul.f32 %v11743_v44, %v1285_v37  ;;  %v1288_v36 = vsub.f32 %v12576_v31, %v12897_v25 }
 0x1ce   : > { %v11745_v62 = vpop.eup %11744  ;;  %v1257_v16 = vmax.f32 %v1225_v51, 0.0  ;;  %v1226_v49 = vsub.f32 %v1162_v43, %v1194_v48  ;;  %v12927_v8 = vmul.f32 0.03125, %v948_v10 }
 0x1cf   : > { %v951_v58 = vpop.xlane.xlu1 %950  ;;  %10780 = vmatprep.mubr.msk.f32.mxu1 %vm564_vm0, %v1517_v61  ;;  %v1518_v59 = vmax.f32 %v1454_v22, %v1486_v57  ;;  %v1418_v63 = vmul.f32 %v12795_v32, %v1381_v26  ;;  %v1382_v14 = vmul.f32 %v11745_v62, %v1286_v15 }
 0x1d0   : > { %v1321_v1 = vadd.f32 1e-05, %v1257_v16  ;;  %v1258_v6 = vmax.f32 %v1226_v49, 0.0  ;;  %v1195_v24 = vmul.f32 %v12927_v8, %v12927_v8  ;;  %v12933_v53 = vmul.f32 0.03125, %v951_v58 }
 0x1d1   : > { %10781 = vmatmul.mubr.msk.f32.gmra.mrb[44].mxu1 %vm564_vm0, %v1518_v59  ;;  %v1109_v7 = vpop.xlane.xlu0 %1108  ;;  %v1455_v2 = vadd.f32 %v12800_v54, %v1418_v63  ;;  %v1419_v11 = vmul.f32 %v12795_v32, %v1382_v14  ;;  %v1289_v16 = vsub.f32 %v12593_v42, %v12909_v17 }
 0x1d2   : > { %11750 = vrsqrt.f32 %v1321_v1  ;;  %v1322_v60 = vadd.f32 1e-05, %v1258_v6  ;;  %v1163_v41 = vmul.f32 0.03125, %v1109_v7  ;;  %v1196_v27 = vmul.f32 %v12933_v53, %v12933_v53 }
 0x1d3   : > { %v1112_v45 = vpop.xlane.xlu1 %1111  ;;  %v1487_v28 = vmul.f32 0.2, %v1455_v2  ;;  %v1456_v18 = vadd.f32 %v12800_v54, %v1419_v11 }
 0x1d4   : > { %v11747_v20 = vpop.eup %11746  ;;  %11752 = vrsqrt.f32 %v1322_v60  ;;  %v1227_v4 = vsub.f32 %v1163_v41, %v1195_v24  ;;  %v1164_v29 = vmul.f32 0.03125, %v1112_v45  ;;  %v1290_v24 = vsub.f32 %v12590_v39, %v12915_v13 }
 0x1d5   : > { %v954_v52 = vpop.xlane.xlu0 %953  ;;  %v1519_v5 = vmax.f32 %v1455_v2, %v1487_v28  ;;  %v1488_v21 = vmul.f32 0.2, %v1456_v18  ;;  %v1383_v37 = vmul.f32 %v11747_v20, %v1287_v55 }
 0x1d6   : > { %v11749_v38 = vpop.eup %11748  ;;  %v1259_v33 = vmax.f32 %v1227_v4, 0.0  ;;  %v1228_v35 = vsub.f32 %v1164_v29, %v1196_v27  ;;  %v12945_v46 = vmul.f32 0.03125, %v954_v52 }
 0x1d7   : > { %v957_v22 = vpop.xlane.xlu1 %956  ;;  %10783 = vmatprep.mubr.msk.f32.mxu1 %vm564_vm0, %v1519_v5  ;;  %v1520_v44 = vmax.f32 %v1456_v18, %v1488_v21  ;;  %v1420_v48 = vmul.f32 %v12795_v32, %v1383_v37  ;;  %v1384_v51 = vmul.f32 %v11749_v38, %v1288_v36  ;;  %v1291_v37 = vsub.f32 %v12613_v56, %v12927_v8 }
 0x1d8   : > { %v1323_v43 = vadd.f32 1e-05, %v1259_v33  ;;  %v1260_v15 = vmax.f32 %v1228_v35, 0.0  ;;  %v1197_v31 = vmul.f32 %v12945_v46, %v12945_v46  ;;  %v12951_v25 = vmul.f32 0.03125, %v957_v22 }
 0x1d9   : > { %10784 = vmatmul.mubr.msk.f32.gmra.mrb[46].mxu1 %vm564_vm0, %v1520_v44  ;;  %v1115_v10 = vpop.xlane.xlu0 %1114  ;;  %v1457_v61 = vadd.f32 %v12800_v54, %v1420_v48  ;;  %v1421_v57 = vmul.f32 %v12795_v32, %v1384_v51 }
 0x1da   : > { %11754 = vrsqrt.f32 %v1323_v43  ;;  %v1324_v26 = vadd.f32 1e-05, %v1260_v15  ;;  %v1165_v62 = vmul.f32 0.03125, %v1115_v10  ;;  %v1198_v14 = vmul.f32 %v12951_v25, %v12951_v25 }
 0x1db   : > { %v1118_v49 = vpop.xlane.xlu1 %1117  ;;  %v1489_v58 = vmul.f32 0.2, %v1457_v61  ;;  %v1458_v59 = vadd.f32 %v12800_v54, %v1421_v57  ;;  %v1292_v43 = vsub.f32 %v12604_v50, %v12933_v53 }
 0x1dc   : > { %v11751_v63 = vpop.eup %11750  ;;  %11756 = vrsqrt.f32 %v1324_v26  ;;  %v1229_v1 = vsub.f32 %v1165_v62, %v1197_v31  ;;  %v1166_v6 = vmul.f32 0.03125, %v1118_v49 }
 0x1dd   : > { %v960_v7 = vpop.xlane.xlu0 %959  ;;  %v1521_v2 = vmax.f32 %v1457_v61, %v1489_v58  ;;  %v1490_v11 = vmul.f32 0.2, %v1458_v59  ;;  %v1385_v60 = vmul.f32 %v11751_v63, %v1289_v16 }
 0x1de   : > { %v11753_v41 = vpop.eup %11752  ;;  %v1261_v42 = vmax.f32 %v1229_v1, 0.0  ;;  %v1230_v17 = vsub.f32 %v1166_v6, %v1198_v14  ;;  %v12963_v55 = vmul.f32 0.03125, %v960_v7 }
 0x1df   : > { %v963_v45 = vpop.xlane.xlu1 %962  ;;  %10786 = vmatprep.mubr.msk.f32.mxu1 %vm564_vm0, %v1521_v2  ;;  %v1522_v28 = vmax.f32 %v1458_v59, %v1490_v11  ;;  %v1422_v18 = vmul.f32 %v12795_v32, %v1385_v60  ;;  %v1386_v20 = vmul.f32 %v11753_v41, %v1290_v24  ;;  %v1293_v2 = vsub.f32 %v12627_v3, %v12945_v46 }
 0x1e0   : > { %v1325_v27 = vadd.f32 1e-05, %v1261_v42  ;;  %v1262_v4 = vmax.f32 %v1230_v17, 0.0  ;;  %v1199_v39 = vmul.f32 %v12963_v55, %v12963_v55  ;;  %v12969_v13 = vmul.f32 0.03125, %v963_v45 }
 0x1e1   : > { %10787 = vmatmul.mubr.msk.f32.gmra.mrb[48].mxu1 %vm564_vm0, %v1522_v28  ;;  %v1121_v29 = vpop.xlane.xlu0 %1120  ;;  %v1459_v36 = vadd.f32 %v12800_v54, %v1422_v18  ;;  %v1423_v52 = vmul.f32 %v12795_v32, %v1386_v20  ;;  %v1294_v18 = vsub.f32 %v12624_v0, %v12951_v25 }
 0x1e2   : > { %11758 = vrsqrt.f32 %v1325_v27  ;;  %v1326_v5 = vadd.f32 1e-05, %v1262_v4  ;;  %v1167_v21 = vmul.f32 0.03125, %v1121_v29  ;;  %v1200_v44 = vmul.f32 %v12969_v13, %v12969_v13 }
 0x1e3   : > { %v1124_v38 = vpop.xlane.xlu1 %1123  ;;  %v1491_v33 = vmul.f32 0.2, %v1459_v36  ;;  %v1460_v35 = vadd.f32 %v12800_v54, %v1423_v52 }
 0x1e4   : > { %v11755_v22 = vpop.eup %11754  ;;  %11760 = vrsqrt.f32 %v1326_v5  ;;  %v1231_v48 = vsub.f32 %v1167_v21, %v1199_v39  ;;  %v1168_v51 = vmul.f32 0.03125, %v1124_v38 }
 0x1e5   : > { %v966_v15 = vpop.xlane.xlu0 %965  ;;  %v1523_v31 = vmax.f32 %v1459_v36, %v1491_v33  ;;  %v1492_v10 = vmul.f32 0.2, %v1460_v35  ;;  %v1387_v61 = vmul.f32 %v11755_v22, %v1291_v37 }
 0x1e6   : > { %v11757_v57 = vpop.eup %11756  ;;  %v1263_v56 = vmax.f32 %v1231_v48, 0.0  ;;  %v1232_v8 = vsub.f32 %v1168_v51, %v1200_v44  ;;  %v12981_v26 = vmul.f32 0.03125, %v966_v15 }
 0x1e7   : > { %v969_v62 = vpop.xlane.xlu1 %968  ;;  %10789 = vmatprep.mubr.msk.f32.mxu1 %vm564_vm0, %v1523_v31  ;;  %v1524_v16 = vmax.f32 %v1460_v35, %v1492_v10  ;;  %v1424_v49 = vmul.f32 %v12795_v32, %v1387_v61  ;;  %v1388_v58 = vmul.f32 %v11757_v57, %v1292_v43  ;;  %v1295_v43 = vsub.f32 %v12641_v12, %v12963_v55 }
 0x1e8   : > { %v1327_v59 = vadd.f32 1e-05, %v1263_v56  ;;  %v1264_v63 = vmax.f32 %v1232_v8, 0.0  ;;  %v1201_v50 = vmul.f32 %v12981_v26, %v12981_v26  ;;  %v12987_v53 = vmul.f32 0.03125, %v969_v62 }
 0x1e9   : > { %10790 = vmatmul.mubr.msk.f32.gmra.mrb[50].mxu1 %vm564_vm0, %v1524_v16  ;;  %v1127_v14 = vpop.xlane.xlu0 %1126  ;;  %v1461_v1 = vadd.f32 %v12800_v54, %v1424_v49  ;;  %v1425_v6 = vmul.f32 %v12795_v32, %v1388_v58  ;;  %v1296_v62 = vsub.f32 %v12638_v9, %v12969_v13 }
 0x1ea   : > { %11762 = vrsqrt.f32 %v1327_v59  ;;  %v1328_v24 = vadd.f32 1e-05, %v1264_v63  ;;  %v1169_v7 = vmul.f32 0.03125, %v1127_v14  ;;  %v1202_v17 = vmul.f32 %v12987_v53, %v12987_v53 }
 0x1eb   : > { %v1130_v11 = vpop.xlane.xlu1 %1129  ;;  %v1493_v60 = vmul.f32 0.2, %v1461_v1  ;;  %v1462_v41 = vadd.f32 %v12800_v54, %v1425_v6 }
 0x1ec   : > { %v11759_v42 = vpop.eup %11758  ;;  %11764 = vrsqrt.f32 %v1328_v24  ;;  %v1233_v45 = vsub.f32 %v1169_v7, %v1201_v50  ;;  %v1170_v28 = vmul.f32 0.03125, %v1130_v11 }
 0x1ed   : > { %v972_v20 = vpop.xlane.xlu0 %971  ;;  %v1525_v27 = vmax.f32 %v1461_v1, %v1493_v60  ;;  %v1494_v4 = vmul.f32 0.2, %v1462_v41  ;;  %v1389_v39 = vmul.f32 %v11759_v42, %v1293_v2 }
 0x1ee   : > { %v11761_v29 = vpop.eup %11760  ;;  %v1265_v3 = vmax.f32 %v1233_v45, 0.0  ;;  %v1234_v46 = vsub.f32 %v1170_v28, %v1202_v17  ;;  %v12999_v36 = vmul.f32 0.03125, %v972_v20  ;;  %v1297_v45 = vsub.f32 %v12655_v23, %v12981_v26 }
 0x1ef   : > { %v975_v52 = vpop.xlane.xlu1 %974  ;;  %10792 = vmatprep.mubr.msk.f32.mxu1 %vm564_vm0, %v1525_v27  ;;  %v1526_v5 = vmax.f32 %v1462_v41, %v1494_v4  ;;  %v1426_v21 = vmul.f32 %v12795_v32, %v1389_v39  ;;  %v1390_v37 = vmul.f32 %v11761_v29, %v1294_v18 }
 0x1f0   : > { %v1329_v38 = vadd.f32 1e-05, %v1265_v3  ;;  %v1266_v33 = vmax.f32 %v1234_v46, 0.0  ;;  %v1203_v0 = vmul.f32 %v12999_v36, %v12999_v36  ;;  %v13005_v25 = vmul.f32 0.03125, %v975_v52 }
 0x1f1   : > { %10793 = vmatmul.mubr.msk.f32.gmra.mrb[52].mxu1 %vm564_vm0, %v1526_v5  ;;  %v1133_v35 = vpop.xlane.xlu0 %1132  ;;  %v1463_v22 = vadd.f32 %v12800_v54, %v1426_v21  ;;  %v1427_v44 = vmul.f32 %v12795_v32, %v1390_v37  ;;  %v1298_v3 = vsub.f32 %v12652_v19, %v12987_v53 }
 0x1f2   : > { %11766 = vrsqrt.f32 %v1329_v38  ;;  %v1330_v48 = vadd.f32 1e-05, %v1266_v33  ;;  %v1171_v51 = vmul.f32 0.03125, %v1133_v35  ;;  %v1204_v57 = vmul.f32 %v13005_v25, %v13005_v25 }
 0x1f3   : > { %v1136_v15 = vpop.xlane.xlu1 %1135  ;;  %v1495_v31 = vmul.f32 0.2, %v1463_v22  ;;  %v1464_v10 = vadd.f32 %v12800_v54, %v1427_v44  ;;  %v1299_v44 = vsub.f32 %v12670_v34, %v12999_v36 }
 0x1f4   : > { %v11763_v61 = vpop.eup %11762  ;;  %11768 = vrsqrt.f32 %v1330_v48  ;;  %v1235_v56 = vsub.f32 %v1171_v51, %v1203_v0  ;;  %v1172_v8 = vmul.f32 0.03125, %v1136_v15  ;;  %v1300_v15 = vsub.f32 %v12667_v30, %v13005_v25 }
 0x1f5   : > { %v978_v16 = vpop.xlane.xlu0 %977  ;;  %v1527_v49 = vmax.f32 %v1463_v22, %v1495_v31  ;;  %v1496_v58 = vmul.f32 0.2, %v1464_v10  ;;  %v1391_v59 = vmul.f32 %v11763_v61, %v1295_v43 }
 0x1f6   : > { %v11765_v63 = vpop.eup %11764  ;;  %v1267_v12 = vmax.f32 %v1235_v56, 0.0  ;;  %v1236_v55 = vsub.f32 %v1172_v8, %v1204_v57  ;;  %v13017_v50 = vmul.f32 0.03125, %v978_v16 }
 0x1f7   : > { %v981_v14 = vpop.xlane.xlu1 %980  ;;  %10795 = vmatprep.mubr.msk.f32.mxu1 %vm564_vm0, %v1527_v49  ;;  %v1528_v1 = vmax.f32 %v1464_v10, %v1496_v58  ;;  %v1428_v6 = vmul.f32 %v12795_v32, %v1391_v59  ;;  %v1392_v24 = vmul.f32 %v11765_v63, %v1296_v62 }
 0x1f8   : > { %v1331_v7 = vadd.f32 1e-05, %v1267_v12  ;;  %v1268_v2 = vmax.f32 %v1236_v55, 0.0  ;;  %v1205_v9 = vmul.f32 %v13017_v50, %v13017_v50  ;;  %v13023_v13 = vmul.f32 0.03125, %v981_v14 }
 0x1f9   : > { %10796 = vmatmul.mubr.msk.f32.gmra.mrb[54].mxu1 %vm564_vm0, %v1528_v1  ;;  %v1139_v11 = vpop.xlane.xlu0 %1138  ;;  %v1465_v60 = vadd.f32 %v12800_v54, %v1428_v6  ;;  %v1429_v41 = vmul.f32 %v12795_v32, %v1392_v24  ;;  %v1301_v16 = vsub.f32 %v12681_v47, %v13017_v50 }
 0x1fa   : > { %11770 = vrsqrt.f32 %v1331_v7  ;;  %v1332_v42 = vadd.f32 1e-05, %v1268_v2  ;;  %v1173_v17 = vmul.f32 0.03125, %v1139_v11  ;;  %v1206_v4 = vmul.f32 %v13023_v13, %v13023_v13  ;;  %v2852_v11 = vld [vmem:[%s17388_s2 + $0x8] sm:$0xff] }
 0x1fb   : > { %v1142_v28 = vpop.xlane.xlu1 %1141  ;;  %v1497_v18 = vmul.f32 0.2, %v1465_v60  ;;  %v1466_v20 = vadd.f32 %v12800_v54, %v1429_v41  ;;  %v1302_v58 = vsub.f32 %v12678_v40, %v13023_v13  ;;  %v2851_v13 = vld [vmem:[%s17388_s2] sm:$0xff] }
 0x1fc   : > { %v11767_v27 = vpop.eup %11766  ;;  %11772 = vrsqrt.f32 %v1332_v42  ;;  %v1237_v39 = vsub.f32 %v1173_v17, %v1205_v9  ;;  %v1174_v29 = vmul.f32 0.03125, %v1142_v28 }
 0x1fd   : > { %v1529_v46 = vmax.f32 %v1465_v60, %v1497_v18  ;;  %v1498_v52 = vmul.f32 0.2, %v1466_v20  ;;  %v1393_v5 = vmul.f32 %v11767_v27, %v1297_v45  ;;  %v11394_v60 = vpack.c.bf16 %v2852_v11, %v2851_v13  ;;  %v2519_v13 = vld [vmem:[%s17392_s6] sm:$0xff]  ;;  %v2520_v11 = vld [vmem:[%s17392_s6 + $0x8] sm:$0xff] }
 0x1fe   : > { %v11769_v21 = vpop.eup %11768  ;;  %v1269_v37 = vmax.f32 %v1237_v39, 0.0  ;;  %v1238_v23 = vsub.f32 %v1174_v29, %v1206_v4 }
 0x1ff   : > { %10798 = vmatprep.mubr.msk.f32.mxu1 %vm564_vm0, %v1529_v46  ;;  %v1530_v26 = vmax.f32 %v1466_v20, %v1498_v52  ;;  %v1430_v38 = vmul.f32 %v12795_v32, %v1393_v5  ;;  %v1394_v33 = vmul.f32 %v11769_v21, %v1298_v3  ;;  %11395 = vmatprep.subr.bf16.mxu1 %v11394_v60 }
 0x200   : > { %v1333_v0 = vadd.f32 1e-05, %v1269_v37  ;;  %v1270_v35 = vmax.f32 %v1238_v23, 0.0  ;;  %11397 = vmatpush3.bf16.msra.mxu1 %v11394_v60 }
 0x201   : > { %10799 = vmatmul.mubr.msk.f32.gmra.mrb[56].mxu1 %vm564_vm0, %v1530_v26  ;;  %v1467_v22 = vadd.f32 %v12800_v54, %v1430_v38  ;;  %v1431_v19 = vmul.f32 %v12795_v32, %v1394_v33 }
 0x202   : > { %11774 = vrsqrt.f32 %v1333_v0  ;;  %v1334_v53 = vadd.f32 1e-05, %v1270_v35 }
 0x203   : > { %v1499_v48 = vmul.f32 0.2, %v1467_v22  ;;  %v1468_v51 = vadd.f32 %v12800_v54, %v1431_v19 }
 0x204   : > { %v11771_v43 = vpop.eup %11770  ;;  %11776 = vrsqrt.f32 %v1334_v53 }
 0x205   : > { %v1531_v31 = vmax.f32 %v1467_v22, %v1499_v48  ;;  %v1500_v10 = vmul.f32 0.2, %v1468_v51  ;;  %v1395_v61 = vmul.f32 %v11771_v43, %v1299_v44  ;;  %v2853_v48 = vld [vmem:[%s17388_s2 + $0x10] sm:$0xff] }
 0x206   : > { %v11773_v57 = vpop.eup %11772 }
 0x207   : > { %10801 = vmatprep.mubr.msk.f32.mxu1 %vm564_vm0, %v1531_v31  ;;  %v1532_v56 = vmax.f32 %v1468_v51, %v1500_v10  ;;  %v1432_v8 = vmul.f32 %v12795_v32, %v1395_v61  ;;  %v1396_v62 = vmul.f32 %v11773_v57, %v1300_v15  ;;  %v2854_v51 = vld [vmem:[%s17388_s2 + $0x18] sm:$0xff] }
 0x208   : > { %v11398_v43 = vpack.c.bf16 %v2854_v51, %v2853_v48 }
 0x209   : > { %10802 = vmatmul.mubr.msk.f32.gmra.mrb[58].mxu1 %vm564_vm0, %v1532_v56  ;;  %v1469_v34 = vadd.f32 %v12800_v54, %v1432_v8  ;;  %v1433_v36 = vmul.f32 %v12795_v32, %v1396_v62 }
 0x20a   : > { %11399 = vmatprep.subr.bf16.mxu1 %v11398_v43 }
 0x20b   : > { %v1501_v30 = vmul.f32 0.2, %v1469_v34  ;;  %v1470_v25 = vadd.f32 %v12800_v54, %v1433_v36  ;;  %11401 = vmatpush3.bf16.msra.mxu1 %v11398_v43 }
 0x20c   : > { %v11775_v49 = vpop.eup %11774 }
 0x20d   : > { %v1533_v59 = vmax.f32 %v1469_v34, %v1501_v30  ;;  %v1502_v63 = vmul.f32 0.2, %v1470_v25  ;;  %v1397_v12 = vmul.f32 %v11775_v49, %v1301_v16 }
 0x20e   : > { %v11777_v55 = vpop.eup %11776 }
 0x20f   : > { %10804 = vmatprep.mubr.msk.f32.mxu1 %vm564_vm0, %v1533_v59  ;;  %v1534_v14 = vmax.f32 %v1470_v25, %v1502_v63  ;;  %v1434_v1 = vmul.f32 %v12795_v32, %v1397_v12  ;;  %v1398_v6 = vmul.f32 %v11777_v55, %v1302_v58 }
 0x211   : > { %10805 = vmatmul.mubr.msk.f32.gmra.mrb[60].mxu1 %vm564_vm0, %v1534_v14  ;;  %v1471_v47 = vadd.f32 %v12800_v54, %v1434_v1  ;;  %v1435_v50 = vmul.f32 %v12795_v32, %v1398_v6  ;;  %v13072_v32 = vld [vmem:[%s17391_s5] ss:$0 sm:$0xff] }
 0x213   : > { %v1503_v24 = vmul.f32 0.2, %v1471_v47  ;;  %v1472_v7 = vadd.f32 %v12800_v54, %v1435_v50 }
 0x215   : > { %v1535_v40 = vmax.f32 %v1471_v47, %v1503_v24  ;;  %v1504_v2 = vmul.f32 0.2, %v1472_v7 }
 0x217   : > { %10807 = vmatprep.mubr.msk.f32.mxu1 %vm564_vm0, %v1535_v40  ;;  %v1536_v9 = vmax.f32 %v1472_v7, %v1504_v2 }
 0x219   : > { %10808 = vmatmul.mubr.msk.f32.gmra.mrb[62].mxu1 %vm564_vm0, %v1536_v9 }
 0x275   : > { %v10764_v54 = vpop.f32.mrb[32].mxu1 }
 0x276   : > { %v13075_v41 = vadd.f32 %v10764_v54, %v13072_v32  ;;  %v1710_v42 = vpop.f32.mrb[33].mxu1  ;;  %v11386_v54 = vpack.c.bf16 %v2520_v11, %v2519_v13 }
 0x277   : > { %v13078_v17 = vadd.f32 %v13072_v32, %v1710_v42 }
 0x278   : > { %v1872_v45 = vsel %vm564_vm0, %v13075_v41, 0.0  ;;  %v1998_v28 = vmul.f32 %v13075_v41, %v13075_v41  ;;  %11387 = vmatprep.subr.bf16.mxu0 %v11386_v54 }
 0x279   : > { %1873 = vadd.xlane.f32.xlu1 %v1872_v45  ;;  %v1869_v18 = vsel %vm564_vm0, %v13078_v17, 0.0  ;;  %v1997_v20 = vmul.f32 %v13078_v17, %v13078_v17  ;;  %11389 = vmatpush3.bf16.msra.mxu0 %v11386_v54 }
 0x27a   : > { %1870 = vadd.xlane.f32.xlu0 %v1869_v18  ;;  %v2032_v4 = vsel %vm564_vm0, %v1998_v28, 0.0  ;;  %v2521_v28 = vld [vmem:[%s17392_s6 + $0x10] sm:$0xff]  ;;  %v2522_v18 = vld [vmem:[%s17392_s6 + $0x18] sm:$0xff] }
 0x27b   : > { %v2029_v3 = vsel %vm564_vm0, %v1997_v20, 0.0 }
 0x27c   : > { %v10767_v27 = vpop.f32.mrb[34].mxu1 }
 0x27d   : > { %v13090_v39 = vadd.f32 %v10767_v27, %v13072_v32  ;;  %2033 = vadd.xlane.f32.xlu1 %v2032_v4  ;;  %v1720_v29 = vpop.f32.mrb[35].mxu1 }
 0x27e   : > { %v13094_v46 = vadd.f32 %v13072_v32, %v1720_v29  ;;  %2030 = vadd.xlane.f32.xlu0 %v2029_v3  ;;  %v11390_v29 = vpack.c.bf16 %v2522_v18, %v2521_v28 }
 0x27f   : > { %v1878_v52 = vsel %vm564_vm0, %v13090_v39, 0.0  ;;  %v2000_v21 = vmul.f32 %v13090_v39, %v13090_v39 }
 0x280   : > { %v1875_v5 = vsel %vm564_vm0, %v13094_v46, 0.0  ;;  %v1999_v37 = vmul.f32 %v13094_v46, %v13094_v46  ;;  %11391 = vmatprep.subr.bf16.mxu0 %v11390_v29 }
 0x281   : > { %1879 = vadd.xlane.f32.xlu1 %v1878_v52  ;;  %v2038_v26 = vsel %vm564_vm0, %v2000_v21, 0.0  ;;  %11393 = vmatpush3.bf16.msra.mxu0 %v11390_v29 }
 0x282   : > { %1876 = vadd.xlane.f32.xlu0 %v1875_v5  ;;  %v2035_v0 = vsel %vm564_vm0, %v1999_v37, 0.0 }
 0x284   : > { %v10770_v23 = vpop.f32.mrb[36].mxu1 }
 0x285   : > { %v13106_v38 = vadd.f32 %v10770_v23, %v13072_v32  ;;  %2039 = vadd.xlane.f32.xlu1 %v2038_v26  ;;  %v1730_v33 = vpop.f32.mrb[37].mxu1 }
 0x286   : > { %v13110_v35 = vadd.f32 %v13072_v32, %v1730_v33  ;;  %2036 = vadd.xlane.f32.xlu0 %v2035_v0 }
 0x287   : > { %v1884_v22 = vsel %vm564_vm0, %v13106_v38, 0.0  ;;  %v2002_v53 = vmul.f32 %v13106_v38, %v13106_v38 }
 0x288   : > { %v1881_v19 = vsel %vm564_vm0, %v13110_v35, 0.0  ;;  %v2001_v44 = vmul.f32 %v13110_v35, %v13110_v35 }
 0x289   : > { %1885 = vadd.xlane.f32.xlu1 %v1884_v22  ;;  %v2044_v31 = vsel %vm564_vm0, %v2002_v53, 0.0 }
 0x28a   : > { %1882 = vadd.xlane.f32.xlu0 %v1881_v19  ;;  %v2041_v57 = vsel %vm564_vm0, %v2001_v44, 0.0 }
 0x28c   : > { %v10773_v15 = vpop.f32.mrb[38].mxu1 }
 0x28d   : > { %v13128_v10 = vadd.f32 %v10773_v15, %v13072_v32  ;;  %2045 = vadd.xlane.f32.xlu1 %v2044_v31  ;;  %v1740_v61 = vpop.f32.mrb[39].mxu1 }
 0x28e   : > { %v13132_v56 = vadd.f32 %v13072_v32, %v1740_v61  ;;  %2042 = vadd.xlane.f32.xlu0 %v2041_v57 }
 0x28f   : > { %v1890_v8 = vsel %vm564_vm0, %v13128_v10, 0.0  ;;  %v2004_v34 = vmul.f32 %v13128_v10, %v13128_v10 }
 0x290   : > { %v1887_v62 = vsel %vm564_vm0, %v13132_v56, 0.0  ;;  %v2003_v36 = vmul.f32 %v13132_v56, %v13132_v56 }
 0x291   : > { %1891 = vadd.xlane.f32.xlu1 %v1890_v8  ;;  %v2050_v30 = vsel %vm564_vm0, %v2004_v34, 0.0 }
 0x292   : > { %1888 = vadd.xlane.f32.xlu0 %v1887_v62  ;;  %v2047_v58 = vsel %vm564_vm0, %v2003_v36, 0.0 }
 0x294   : > { %v10776_v16 = vpop.f32.mrb[40].mxu1 }
 0x295   : > { %v13144_v25 = vadd.f32 %v10776_v16, %v13072_v32  ;;  %2051 = vadd.xlane.f32.xlu1 %v2050_v30  ;;  %v1750_v49 = vpop.f32.mrb[41].mxu1 }
 0x296   : > { %v13148_v59 = vadd.f32 %v13072_v32, %v1750_v49  ;;  %2048 = vadd.xlane.f32.xlu0 %v2047_v58 }
 0x297   : > { %v1896_v63 = vsel %vm564_vm0, %v13144_v25, 0.0  ;;  %v2006_v55 = vmul.f32 %v13144_v25, %v13144_v25 }
 0x298   : > { %v1893_v12 = vsel %vm564_vm0, %v13148_v59, 0.0  ;;  %v2005_v14 = vmul.f32 %v13148_v59, %v13148_v59 }
 0x299   : > { %1897 = vadd.xlane.f32.xlu1 %v1896_v63  ;;  %v2056_v6 = vsel %vm564_vm0, %v2006_v55, 0.0 }
 0x29a   : > { %1894 = vadd.xlane.f32.xlu0 %v1893_v12  ;;  %v2053_v24 = vsel %vm564_vm0, %v2005_v14, 0.0 }
 0x29c   : > { %v10779_v1 = vpop.f32.mrb[42].mxu1 }
 0x29d   : > { %v13160_v47 = vadd.f32 %v10779_v1, %v13072_v32  ;;  %2057 = vadd.xlane.f32.xlu1 %v2056_v6  ;;  %v1760_v50 = vpop.f32.mrb[43].mxu1 }
 0x29e   : > { %v13164_v7 = vadd.f32 %v13072_v32, %v1760_v50  ;;  %2054 = vadd.xlane.f32.xlu0 %v2053_v24 }
 0x29f   : > { %v1902_v40 = vsel %vm564_vm0, %v13160_v47, 0.0  ;;  %v2008_v9 = vmul.f32 %v13160_v47, %v13160_v47 }
 0x2a0   : > { %v1899_v2 = vsel %vm564_vm0, %v13164_v7, 0.0  ;;  %v2007_v60 = vmul.f32 %v13164_v7, %v13164_v7 }
 0x2a1   : > { %1903 = vadd.xlane.f32.xlu1 %v1902_v40  ;;  %v2062_v45 = vsel %vm564_vm0, %v2008_v9, 0.0 }
 0x2a2   : > { %1900 = vadd.xlane.f32.xlu0 %v1899_v2  ;;  %v2059_v4 = vsel %vm564_vm0, %v2007_v60, 0.0 }
 0x2a4   : > { %v10782_v42 = vpop.f32.mrb[44].mxu1 }
 0x2a5   : > { %v13188_v20 = vadd.f32 %v10782_v42, %v13072_v32  ;;  %2063 = vadd.xlane.f32.xlu1 %v2062_v45  ;;  %v1770_v27 = vpop.f32.mrb[45].mxu1 }
 0x2a6   : > { %v13192_v3 = vadd.f32 %v13072_v32, %v1770_v27  ;;  %2060 = vadd.xlane.f32.xlu0 %v2059_v4 }
 0x2a7   : > { %v1908_v52 = vsel %vm564_vm0, %v13188_v20, 0.0  ;;  %v2010_v21 = vmul.f32 %v13188_v20, %v13188_v20 }
 0x2a8   : > { %v1905_v5 = vsel %vm564_vm0, %v13192_v3, 0.0  ;;  %v2009_v37 = vmul.f32 %v13192_v3, %v13192_v3 }
 0x2a9   : > { %1909 = vadd.xlane.f32.xlu1 %v1908_v52  ;;  %v2068_v26 = vsel %vm564_vm0, %v2010_v21, 0.0 }
 0x2aa   : > { %1906 = vadd.xlane.f32.xlu0 %v1905_v5  ;;  %v2065_v22 = vsel %vm564_vm0, %v2009_v37, 0.0 }
 0x2ac   : > { %v10785_v23 = vpop.f32.mrb[46].mxu1 }
 0x2ad   : > { %v13204_v33 = vadd.f32 %v10785_v23, %v13072_v32  ;;  %2069 = vadd.xlane.f32.xlu1 %v2068_v26  ;;  %v1780_v0 = vpop.f32.mrb[47].mxu1 }
 0x2ae   : > { %v13208_v19 = vadd.f32 %v13072_v32, %v1780_v0  ;;  %2066 = vadd.xlane.f32.xlu0 %v2065_v22 }
 0x2af   : > { %v1914_v53 = vsel %vm564_vm0, %v13204_v33, 0.0  ;;  %v2012_v48 = vmul.f32 %v13204_v33, %v13204_v33 }
 0x2b0   : > { %v1911_v44 = vsel %vm564_vm0, %v13208_v19, 0.0  ;;  %v2011_v51 = vmul.f32 %v13208_v19, %v13208_v19 }
 0x2b1   : > { %1915 = vadd.xlane.f32.xlu1 %v1914_v53  ;;  %v2074_v15 = vsel %vm564_vm0, %v2012_v48, 0.0 }
 0x2b2   : > { %1912 = vadd.xlane.f32.xlu0 %v1911_v44  ;;  %v2071_v57 = vsel %vm564_vm0, %v2011_v51, 0.0 }
 0x2b4   : > { %v10788_v43 = vpop.f32.mrb[48].mxu1 }
 0x2b5   : > { %v13220_v31 = vadd.f32 %v10788_v43, %v13072_v32  ;;  %2075 = vadd.xlane.f32.xlu1 %v2074_v15  ;;  %v1790_v61 = vpop.f32.mrb[49].mxu1 }
 0x2b6   : > { %v13224_v8 = vadd.f32 %v13072_v32, %v1790_v61  ;;  %2072 = vadd.xlane.f32.xlu0 %v2071_v57 }
 0x2b7   : > { %v1920_v62 = vsel %vm564_vm0, %v13220_v31, 0.0  ;;  %v2014_v36 = vmul.f32 %v13220_v31, %v13220_v31 }
 0x2b8   : > { %v1917_v34 = vsel %vm564_vm0, %v13224_v8, 0.0  ;;  %v2013_v16 = vmul.f32 %v13224_v8, %v13224_v8 }
 0x2b9   : > { %1921 = vadd.xlane.f32.xlu1 %v1920_v62  ;;  %v2080_v49 = vsel %vm564_vm0, %v2014_v36, 0.0 }
 0x2ba   : > { %1918 = vadd.xlane.f32.xlu0 %v1917_v34  ;;  %v2077_v12 = vsel %vm564_vm0, %v2013_v16, 0.0 }
 0x2bc   : > { %v10791_v30 = vpop.f32.mrb[50].mxu1 }
 0x2bd   : > { %v13236_v58 = vadd.f32 %v10791_v30, %v13072_v32  ;;  %2081 = vadd.xlane.f32.xlu1 %v2080_v49  ;;  %v1800_v63 = vpop.f32.mrb[51].mxu1 }
 0x2be   : > { %v13240_v55 = vadd.f32 %v13072_v32, %v1800_v63  ;;  %2078 = vadd.xlane.f32.xlu0 %v2077_v12 }
 0x2bf   : > { %v1926_v14 = vsel %vm564_vm0, %v13236_v58, 0.0  ;;  %v2016_v6 = vmul.f32 %v13236_v58, %v13236_v58 }
 0x2c0   : > { %v1923_v1 = vsel %vm564_vm0, %v13240_v55, 0.0  ;;  %v2015_v50 = vmul.f32 %v13240_v55, %v13240_v55 }
 0x2c1   : > { %1927 = vadd.xlane.f32.xlu1 %v1926_v14  ;;  %v2086_v40 = vsel %vm564_vm0, %v2016_v6, 0.0 }
 0x2c2   : > { %1924 = vadd.xlane.f32.xlu0 %v1923_v1  ;;  %v2083_v13 = vsel %vm564_vm0, %v2015_v50, 0.0 }
 0x2c4   : > { %v10794_v24 = vpop.f32.mrb[52].mxu1 }
 0x2c5   : > { %v13252_v2 = vadd.f32 %v10794_v24, %v13072_v32  ;;  %2087 = vadd.xlane.f32.xlu1 %v2086_v40  ;;  %v1810_v9 = vpop.f32.mrb[53].mxu1 }
 0x2c6   : > { %v13256_v11 = vadd.f32 %v13072_v32, %v1810_v9  ;;  %2084 = vadd.xlane.f32.xlu0 %v2083_v13 }
 0x2c7   : > { %v1932_v60 = vsel %vm564_vm0, %v13252_v2, 0.0  ;;  %v2018_v42 = vmul.f32 %v13252_v2, %v13252_v2 }
 0x2c8   : > { %v1929_v54 = vsel %vm564_vm0, %v13256_v11, 0.0  ;;  %v2017_v45 = vmul.f32 %v13256_v11, %v13256_v11 }
 0x2c9   : > { %1933 = vadd.xlane.f32.xlu1 %v1932_v60  ;;  %v2092_v18 = vsel %vm564_vm0, %v2018_v42, 0.0 }
 0x2ca   : > { %1930 = vadd.xlane.f32.xlu0 %v1929_v54  ;;  %v2089_v29 = vsel %vm564_vm0, %v2017_v45, 0.0 }
 0x2cc   : > { %v10797_v28 = vpop.f32.mrb[54].mxu1 }
 0x2cd   : > { %v13268_v27 = vadd.f32 %v10797_v28, %v13072_v32  ;;  %2093 = vadd.xlane.f32.xlu1 %v2092_v18  ;;  %v1820_v4 = vpop.f32.mrb[55].mxu1 }
 0x2ce   : > { %v13272_v52 = vadd.f32 %v13072_v32, %v1820_v4  ;;  %2090 = vadd.xlane.f32.xlu0 %v2089_v29 }
 0x2cf   : > { %v1938_v5 = vsel %vm564_vm0, %v13268_v27, 0.0  ;;  %v2020_v37 = vmul.f32 %v13268_v27, %v13268_v27 }
 0x2d0   : > { %v1935_v21 = vsel %vm564_vm0, %v13272_v52, 0.0  ;;  %v2019_v23 = vmul.f32 %v13272_v52, %v13272_v52 }
 0x2d1   : > { %1939 = vadd.xlane.f32.xlu1 %v1938_v5  ;;  %v2098_v0 = vsel %vm564_vm0, %v2020_v37, 0.0 }
 0x2d2   : > { %1936 = vadd.xlane.f32.xlu0 %v1935_v21  ;;  %v2095_v44 = vsel %vm564_vm0, %v2019_v23, 0.0 }
 0x2d4   : > { %v10800_v26 = vpop.f32.mrb[56].mxu1 }
 0x2d5   : > { %v13284_v22 = vadd.f32 %v10800_v26, %v13072_v32  ;;  %2099 = vadd.xlane.f32.xlu1 %v2098_v0  ;;  %v1830_v53 = vpop.f32.mrb[57].mxu1 }
 0x2d6   : > { %v13288_v48 = vadd.f32 %v13072_v32, %v1830_v53  ;;  %2096 = vadd.xlane.f32.xlu0 %v2095_v44 }
 0x2d7   : > { %v1944_v51 = vsel %vm564_vm0, %v13284_v22, 0.0  ;;  %v2022_v15 = vmul.f32 %v13284_v22, %v13284_v22 }
 0x2d8   : > { %v1941_v43 = vsel %vm564_vm0, %v13288_v48, 0.0  ;;  %v2021_v61 = vmul.f32 %v13288_v48, %v13288_v48 }
 0x2d9   : > { %1945 = vadd.xlane.f32.xlu1 %v1944_v51  ;;  %v2104_v62 = vsel %vm564_vm0, %v2022_v15, 0.0 }
 0x2da   : > { %1942 = vadd.xlane.f32.xlu0 %v1941_v43  ;;  %v2101_v16 = vsel %vm564_vm0, %v2021_v61, 0.0 }
 0x2dc   : > { %v10803_v57 = vpop.f32.mrb[58].mxu1 }
 0x2dd   : > { %v13300_v34 = vadd.f32 %v10803_v57, %v13072_v32  ;;  %2105 = vadd.xlane.f32.xlu1 %v2104_v62  ;;  %v1840_v36 = vpop.f32.mrb[59].mxu1 }
 0x2de   : > { %v13304_v30 = vadd.f32 %v13072_v32, %v1840_v36  ;;  %2102 = vadd.xlane.f32.xlu0 %v2101_v16 }
 0x2df   : > { %v1950_v49 = vsel %vm564_vm0, %v13300_v34, 0.0  ;;  %v2024_v12 = vmul.f32 %v13300_v34, %v13300_v34 }
 0x2e0   : > { %v1947_v63 = vsel %vm564_vm0, %v13304_v30, 0.0  ;;  %v2023_v14 = vmul.f32 %v13304_v30, %v13304_v30 }
 0x2e1   : > { %1951 = vadd.xlane.f32.xlu1 %v1950_v49  ;;  %v2110_v6 = vsel %vm564_vm0, %v2024_v12, 0.0 }
 0x2e2   : > { %1948 = vadd.xlane.f32.xlu0 %v1947_v63  ;;  %v2107_v40 = vsel %vm564_vm0, %v2023_v14, 0.0 }
 0x2e4   : > { %v10806_v1 = vpop.f32.mrb[60].mxu1 }
 0x2e5   : > { %v13316_v50 = vadd.f32 %v10806_v1, %v13072_v32  ;;  %2111 = vadd.xlane.f32.xlu1 %v2110_v6  ;;  %v1850_v24 = vpop.f32.mrb[61].mxu1 }
 0x2e6   : > { %v13320_v9 = vadd.f32 %v13072_v32, %v1850_v24  ;;  %2108 = vadd.xlane.f32.xlu0 %v2107_v40 }
 0x2e7   : > { %v1956_v13 = vsel %vm564_vm0, %v13316_v50, 0.0  ;;  %v2026_v54 = vmul.f32 %v13316_v50, %v13316_v50 }
 0x2e8   : > { %v1953_v60 = vsel %vm564_vm0, %v13320_v9, 0.0  ;;  %v2025_v42 = vmul.f32 %v13320_v9, %v13320_v9 }
 0x2e9   : > { %1957 = vadd.xlane.f32.xlu1 %v1956_v13  ;;  %v2116_v28 = vsel %vm564_vm0, %v2026_v54, 0.0 }
 0x2ea   : > { %1954 = vadd.xlane.f32.xlu0 %v1953_v60  ;;  %v2113_v29 = vsel %vm564_vm0, %v2025_v42, 0.0 }
 0x2ec   : > { %v10809_v45 = vpop.f32.mrb[62].mxu1 }
 0x2ed   : > { %v13332_v18 = vadd.f32 %v10809_v45, %v13072_v32  ;;  %2117 = vadd.xlane.f32.xlu1 %v2116_v28  ;;  %v1860_v4 = vpop.f32.mrb[63].mxu1 }
 0x2ee   : > { %v13336_v5 = vadd.f32 %v13072_v32, %v1860_v4  ;;  %2114 = vadd.xlane.f32.xlu0 %v2113_v29 }
 0x2ef   : > { %v1962_v21 = vsel %vm564_vm0, %v13332_v18, 0.0  ;;  %v2028_v23 = vmul.f32 %v13332_v18, %v13332_v18 }
 0x2f0   : > { %v1959_v37 = vsel %vm564_vm0, %v13336_v5, 0.0  ;;  %v2027_v26 = vmul.f32 %v13336_v5, %v13336_v5 }
 0x2f1   : > { %1963 = vadd.xlane.f32.xlu1 %v1962_v21  ;;  %v2122_v0 = vsel %vm564_vm0, %v2028_v23, 0.0 }
 0x2f2   : > { %1960 = vadd.xlane.f32.xlu0 %v1959_v37  ;;  %v2119_v32 = vsel %vm564_vm0, %v2027_v26, 0.0 }
 0x2f5   : > { %2123 = vadd.xlane.f32.xlu1 %v2122_v0 }
 0x2f6   : > { %2120 = vadd.xlane.f32.xlu0 %v2119_v32 }
 0x306   : > { %v1874_v53 = vpop.xlane.xlu1 %1873 }
 0x307   : > { %v1966_v44 = vmul.f32 0.03125, %v1874_v53  ;;  %v1871_v51 = vpop.xlane.xlu0 %1870 }
 0x308   : > { %v1965_v43 = vmul.f32 0.03125, %v1871_v51 }
 0x309   : > { %v2158_v61 = vmul.f32 %v1966_v44, %v1966_v44 }
 0x30a   : > { %v2034_v15 = vpop.xlane.xlu1 %2033  ;;  %v2157_v36 = vmul.f32 %v1965_v43, %v1965_v43 }
 0x30b   : > { %v2126_v57 = vmul.f32 0.03125, %v2034_v15  ;;  %v2031_v62 = vpop.xlane.xlu0 %2030 }
 0x30c   : > { %v2125_v16 = vmul.f32 0.03125, %v2031_v62 }
 0x30d   : > { %v2190_v49 = vsub.f32 %v2126_v57, %v2158_v61 }
 0x30e   : > { %v2189_v63 = vsub.f32 %v2125_v16, %v2157_v36  ;;  %v1880_v12 = vpop.xlane.xlu1 %1879 }
 0x30f   : > { %v2222_v14 = vmax.f32 %v2190_v49, 0.0  ;;  %v13348_v1 = vmul.f32 0.03125, %v1880_v12  ;;  %v1877_v6 = vpop.xlane.xlu0 %1876  ;;  %v2254_v49 = vsub.f32 %v13075_v41, %v1966_v44 }
 0x310   : > { %v2221_v24 = vmax.f32 %v2189_v63, 0.0  ;;  %v13350_v40 = vmul.f32 0.03125, %v1877_v6  ;;  %v2253_v6 = vsub.f32 %v13078_v17, %v1965_v43 }
 0x311   : > { %v2286_v13 = vadd.f32 1e-05, %v2222_v14  ;;  %v2160_v42 = vmul.f32 %v13348_v1, %v13348_v1 }
 0x312   : > { %v2285_v60 = vadd.f32 1e-05, %v2221_v24  ;;  %v2040_v54 = vpop.xlane.xlu1 %2039  ;;  %v2159_v4 = vmul.f32 %v13350_v40, %v13350_v40 }
 0x313   : > { %11778 = vrsqrt.f32 %v2286_v13  ;;  %v2128_v45 = vmul.f32 0.03125, %v2040_v54  ;;  %v2037_v28 = vpop.xlane.xlu0 %2036  ;;  %v13379_v13 = vld [vmem:[%s13364_s27] ss:$0 sm:$0xff] }
 0x314   : > { %11780 = vrsqrt.f32 %v2285_v60  ;;  %v2127_v29 = vmul.f32 0.03125, %v2037_v28 }
 0x315   : > { %v2192_v21 = vsub.f32 %v2128_v45, %v2160_v42 }
 0x316   : > { %v2191_v37 = vsub.f32 %v2127_v29, %v2159_v4  ;;  %v1886_v23 = vpop.xlane.xlu1 %1885  ;;  %v13384_v29 = vld [vmem:[%s13375_s30] ss:$0 sm:$0xff] }
 0x317   : > { %v2224_v26 = vmax.f32 %v2192_v21, 0.0  ;;  %v13356_v0 = vmul.f32 0.03125, %v1886_v23  ;;  %v1883_v32 = vpop.xlane.xlu0 %1882 }
 0x318   : > { %v2223_v53 = vmax.f32 %v2191_v37, 0.0  ;;  %v13358_v51 = vmul.f32 0.03125, %v1883_v32 }
 0x319   : > { %v2288_v15 = vadd.f32 1e-05, %v2224_v26  ;;  %v2162_v62 = vmul.f32 %v13356_v0, %v13356_v0  ;;  %v2256_v26 = vsub.f32 %v13090_v39, %v13348_v1  ;;  %v2255_v39 = vsub.f32 %v13094_v46, %v13350_v40 }
 0x31a   : > { %v2287_v61 = vadd.f32 1e-05, %v2223_v53  ;;  %v2046_v57 = vpop.xlane.xlu1 %2045  ;;  %v2161_v63 = vmul.f32 %v13358_v51, %v13358_v51  ;;  %v2258_v40 = vsub.f32 %v13106_v38, %v13356_v0 }
 0x31b   : > { %11782 = vrsqrt.f32 %v2288_v15  ;;  %v2130_v36 = vmul.f32 0.03125, %v2046_v57  ;;  %v2043_v16 = vpop.xlane.xlu0 %2042 }
 0x31c   : > { %11784 = vrsqrt.f32 %v2287_v61  ;;  %v2129_v12 = vmul.f32 0.03125, %v2043_v16 }
 0x31d   : > { %v11779_v14 = vpop.eup %11778  ;;  %v2194_v24 = vsub.f32 %v2130_v36, %v2162_v62 }
 0x31e   : > { %v11781_v60 = vpop.eup %11780  ;;  %v2193_v54 = vsub.f32 %v2129_v12, %v2161_v63  ;;  %v1892_v41 = vpop.xlane.xlu1 %1891  ;;  %v2350_v44 = vmul.f32 %v11779_v14, %v2254_v49 }
 0x31f   : > { %v2226_v42 = vmax.f32 %v2194_v24, 0.0  ;;  %v13381_v45 = vmul.f32 0.03125, %v1892_v41  ;;  %v1889_v28 = vpop.xlane.xlu0 %1888  ;;  %v2349_v4 = vmul.f32 %v11781_v60, %v2253_v6 }
 0x320   : > { %v2225_v21 = vmax.f32 %v2193_v54, 0.0  ;;  %v13386_v37 = vmul.f32 0.03125, %v1889_v28  ;;  %v2387_v23 = vmul.f32 %v13379_v13, %v2350_v44 }
 0x321   : > { %v2290_v17 = vadd.f32 1e-05, %v2226_v42  ;;  %v2386_v43 = vmul.f32 %v13379_v13, %v2349_v4  ;;  %v2164_v61 = vmul.f32 %v13381_v45, %v13381_v45 }
 0x322   : > { %v2289_v32 = vadd.f32 1e-05, %v2225_v21  ;;  %v2052_v53 = vpop.xlane.xlu1 %2051  ;;  %v2424_v15 = vadd.f32 %v13384_v29, %v2387_v23  ;;  %v2163_v16 = vmul.f32 %v13386_v37, %v13386_v37 }
 0x323   : > { %11786 = vrsqrt.f32 %v2290_v17  ;;  %v2132_v57 = vmul.f32 0.03125, %v2052_v53  ;;  %v2049_v62 = vpop.xlane.xlu0 %2048  ;;  %v2423_v36 = vadd.f32 %v13384_v29, %v2386_v43 }
 0x324   : > { %11788 = vrsqrt.f32 %v2289_v32  ;;  %v2131_v49 = vmul.f32 0.03125, %v2049_v62  ;;  %v2456_v63 = vmul.f32 0.2, %v2424_v15 }
 0x325   : > { %v11783_v12 = vpop.eup %11782  ;;  %v2196_v1 = vsub.f32 %v2132_v57, %v2164_v61  ;;  %v2455_v14 = vmul.f32 0.2, %v2423_v36 }
 0x326   : > { %v11785_v6 = vpop.eup %11784  ;;  %v2195_v24 = vsub.f32 %v2131_v49, %v2163_v16  ;;  %v1898_v60 = vpop.xlane.xlu1 %1897  ;;  %v2352_v54 = vmul.f32 %v11783_v12, %v2256_v26  ;;  %v2488_v17 = vmax.f32 %v2424_v15, %v2456_v63  ;;  %v2257_v63 = vsub.f32 %v13110_v35, %v13358_v51 }
 0x327   : > { %v2228_v41 = vmax.f32 %v2196_v1, 0.0  ;;  %v13400_v44 = vmul.f32 0.03125, %v1898_v60  ;;  %v1895_v42 = vpop.xlane.xlu0 %1894  ;;  %v2487_v28 = vmax.f32 %v2423_v36, %v2455_v14  ;;  %v2351_v4 = vmul.f32 %v11785_v6, %v2255_v39 }
 0x328   : > { %v2227_v21 = vmax.f32 %v2195_v24, 0.0  ;;  %v13402_v23 = vmul.f32 0.03125, %v1895_v42  ;;  %v2389_v43 = vmul.f32 %v13379_v13, %v2352_v54  ;;  %v2260_v51 = vsub.f32 %v13128_v10, %v13381_v45 }
 0x329   : > { %v2292_v32 = vadd.f32 1e-05, %v2228_v41  ;;  %10818 = vmatprep.mubr.msk.f32.mxu0 %vm564_vm0, %v2487_v28  ;;  %10874 = vmatprep.mubr.msk.f32.mxu1 %vm564_vm0, %v2487_v28  ;;  %v2388_v46 = vmul.f32 %v13379_v13, %v2351_v4  ;;  %v2166_v61 = vmul.f32 %v13400_v44, %v13400_v44 }
 0x32a   : > { %v2291_v26 = vadd.f32 1e-05, %v2227_v21  ;;  %v2058_v53 = vpop.xlane.xlu1 %2057  ;;  %10819 = vmatmul.mubr.msk.f32.vlgmr.msra.gmra.mrb[0].mxu0 %vm564_vm0, %v2488_v17  ;;  %10875 = vmatmul.mubr.msk.f32.vlgmr.msra.gmra.mrb[64].mxu1 %vm564_vm0, %v2488_v17  ;;  %v2426_v15 = vadd.f32 %v13384_v29, %v2389_v43  ;;  %v2165_v38 = vmul.f32 %v13402_v23, %v13402_v23 }
 0x32b   : > { %11790 = vrsqrt.f32 %v2292_v32  ;;  %v2134_v57 = vmul.f32 0.03125, %v2058_v53  ;;  %v2055_v62 = vpop.xlane.xlu0 %2054  ;;  %v2425_v36 = vadd.f32 %v13384_v29, %v2388_v46 }
 0x32c   : > { %11792 = vrsqrt.f32 %v2291_v26  ;;  %v2133_v0 = vmul.f32 0.03125, %v2055_v62  ;;  %v2458_v16 = vmul.f32 0.2, %v2426_v15 }
 0x32d   : > { %v11787_v49 = vpop.eup %11786  ;;  %v2198_v12 = vsub.f32 %v2134_v57, %v2166_v61  ;;  %v2457_v39 = vmul.f32 0.2, %v2425_v36 }
 0x32e   : > { %v11789_v1 = vpop.eup %11788  ;;  %v2197_v14 = vsub.f32 %v2133_v0, %v2165_v38  ;;  %v1904_v6 = vpop.xlane.xlu1 %1903  ;;  %v2354_v24 = vmul.f32 %v11787_v49, %v2258_v40  ;;  %v2490_v17 = vmax.f32 %v2426_v15, %v2458_v16  ;;  %v2259_v38 = vsub.f32 %v13132_v56, %v13386_v37 }
 0x32f   : > { %v2230_v60 = vmax.f32 %v2198_v12, 0.0  ;;  %v13420_v54 = vmul.f32 0.03125, %v1904_v6  ;;  %v1901_v41 = vpop.xlane.xlu0 %1900  ;;  %v2489_v42 = vmax.f32 %v2425_v36, %v2457_v39  ;;  %v2353_v28 = vmul.f32 %v11789_v1, %v2257_v63 }
 0x330   : > { %v2229_v4 = vmax.f32 %v2197_v14, 0.0  ;;  %v13422_v21 = vmul.f32 0.03125, %v1901_v41  ;;  %v2391_v43 = vmul.f32 %v13379_v13, %v2354_v24  ;;  %v2262_v37 = vsub.f32 %v13144_v25, %v13400_v44 }
 0x331   : > { %v2294_v32 = vadd.f32 1e-05, %v2230_v60  ;;  %10821 = vmatprep.mubr.msk.f32.mxu0 %vm564_vm0, %v2489_v42  ;;  %10877 = vmatprep.mubr.msk.f32.mxu1 %vm564_vm0, %v2489_v42  ;;  %v2390_v35 = vmul.f32 %v13379_v13, %v2353_v28  ;;  %v2168_v53 = vmul.f32 %v13420_v54, %v13420_v54 }
 0x332   : > { %v2293_v46 = vadd.f32 1e-05, %v2229_v4  ;;  %v2064_v40 = vpop.xlane.xlu1 %2063  ;;  %10822 = vmatmul.mubr.msk.f32.gmra.mrb[2].mxu0 %vm564_vm0, %v2490_v17  ;;  %10878 = vmatmul.mubr.msk.f32.gmra.mrb[66].mxu1 %vm564_vm0, %v2490_v17  ;;  %v2428_v26 = vadd.f32 %v13384_v29, %v2391_v43  ;;  %v2167_v10 = vmul.f32 %v13422_v21, %v13422_v21 }
 0x333   : > { %11794 = vrsqrt.f32 %v2294_v32  ;;  %v2136_v15 = vmul.f32 0.03125, %v2064_v40  ;;  %v2061_v61 = vpop.xlane.xlu0 %2060  ;;  %v2427_v57 = vadd.f32 %v13384_v29, %v2390_v35 }
 0x334   : > { %11796 = vrsqrt.f32 %v2293_v46  ;;  %v2135_v45 = vmul.f32 0.03125, %v2061_v61  ;;  %v2460_v62 = vmul.f32 0.2, %v2428_v26  ;;  %v2261_v61 = vsub.f32 %v13148_v59, %v13402_v23 }
 0x335   : > { %v11791_v36 = vpop.eup %11790  ;;  %v2200_v0 = vsub.f32 %v2136_v15, %v2168_v53  ;;  %v2459_v16 = vmul.f32 0.2, %v2427_v57  ;;  %v2264_v23 = vsub.f32 %v13160_v47, %v13420_v54 }
 0x336   : > { %v11793_v49 = vpop.eup %11792  ;;  %v2199_v63 = vsub.f32 %v2135_v45, %v2167_v10  ;;  %v1910_v12 = vpop.xlane.xlu1 %1909  ;;  %v2356_v39 = vmul.f32 %v11791_v36, %v2260_v51  ;;  %v2492_v28 = vmax.f32 %v2428_v26, %v2460_v62 }
 0x337   : > { %v2232_v1 = vmax.f32 %v2200_v0, 0.0  ;;  %v13440_v14 = vmul.f32 0.03125, %v1910_v12  ;;  %v1907_v6 = vpop.xlane.xlu0 %1906  ;;  %v2491_v24 = vmax.f32 %v2427_v57, %v2459_v16  ;;  %v2355_v60 = vmul.f32 %v11793_v49, %v2259_v38 }
 0x338   : > { %v2231_v41 = vmax.f32 %v2199_v63, 0.0  ;;  %v13442_v42 = vmul.f32 0.03125, %v1907_v6  ;;  %v2393_v4 = vmul.f32 %v13379_v13, %v2356_v39 }
 0x339   : > { %v2296_v17 = vadd.f32 1e-05, %v2232_v1  ;;  %10824 = vmatprep.mubr.msk.f32.mxu0 %vm564_vm0, %v2491_v24  ;;  %10880 = vmatprep.mubr.msk.f32.mxu1 %vm564_vm0, %v2491_v24  ;;  %v2392_v56 = vmul.f32 %v13379_v13, %v2355_v60  ;;  %v2170_v51 = vmul.f32 %v13440_v14, %v13440_v14 }
 0x33a   : > { %v2295_v43 = vadd.f32 1e-05, %v2231_v41  ;;  %v2070_v32 = vpop.xlane.xlu1 %2069  ;;  %10825 = vmatmul.mubr.msk.f32.gmra.mrb[4].mxu0 %vm564_vm0, %v2492_v28  ;;  %10881 = vmatmul.mubr.msk.f32.gmra.mrb[68].mxu1 %vm564_vm0, %v2492_v28  ;;  %v2430_v35 = vadd.f32 %v13384_v29, %v2393_v4  ;;  %v2169_v25 = vmul.f32 %v13442_v42, %v13442_v42 }
 0x33b   : > { %11798 = vrsqrt.f32 %v2296_v17  ;;  %v2138_v46 = vmul.f32 0.03125, %v2070_v32  ;;  %v2067_v40 = vpop.xlane.xlu0 %2066  ;;  %v2429_v26 = vadd.f32 %v13384_v29, %v2392_v56 }
 0x33c   : > { %11800 = vrsqrt.f32 %v2295_v43  ;;  %v2137_v44 = vmul.f32 0.03125, %v2067_v40  ;;  %v2462_v53 = vmul.f32 0.2, %v2430_v35 }
 0x33d   : > { %v11795_v15 = vpop.eup %11794  ;;  %v2202_v57 = vsub.f32 %v2138_v46, %v2170_v51  ;;  %v2461_v10 = vmul.f32 0.2, %v2429_v26  ;;  %v2263_v51 = vsub.f32 %v13164_v7, %v13422_v21  ;;  %v2266_v21 = vsub.f32 %v13188_v20, %v13440_v14 }
 0x33e   : > { %v11797_v45 = vpop.eup %11796  ;;  %v2201_v62 = vsub.f32 %v2137_v44, %v2169_v25  ;;  %v1916_v36 = vpop.xlane.xlu1 %1915  ;;  %v2358_v38 = vmul.f32 %v11795_v15, %v2262_v37  ;;  %v2494_v6 = vmax.f32 %v2430_v35, %v2462_v53 }
 0x33f   : > { %v2234_v0 = vmax.f32 %v2202_v57, 0.0  ;;  %v13460_v16 = vmul.f32 0.03125, %v1916_v36  ;;  %v1913_v49 = vpop.xlane.xlu0 %1912  ;;  %v2493_v63 = vmax.f32 %v2429_v26, %v2461_v10  ;;  %v2357_v12 = vmul.f32 %v11797_v45, %v2261_v61 }
 0x340   : > { %v2233_v39 = vmax.f32 %v2201_v62, 0.0  ;;  %v13462_v1 = vmul.f32 0.03125, %v1913_v49  ;;  %v2395_v24 = vmul.f32 %v13379_v13, %v2358_v38 }
 0x341   : > { %v2298_v60 = vadd.f32 1e-05, %v2234_v0  ;;  %10827 = vmatprep.mubr.msk.f32.mxu0 %vm564_vm0, %v2493_v63  ;;  %10883 = vmatprep.mubr.msk.f32.mxu1 %vm564_vm0, %v2493_v63  ;;  %v2394_v59 = vmul.f32 %v13379_v13, %v2357_v12  ;;  %v2172_v17 = vmul.f32 %v13460_v16, %v13460_v16 }
 0x342   : > { %v2297_v41 = vadd.f32 1e-05, %v2233_v39  ;;  %v2076_v28 = vpop.xlane.xlu1 %2075  ;;  %10828 = vmatmul.mubr.msk.f32.gmra.mrb[6].mxu0 %vm564_vm0, %v2494_v6  ;;  %10884 = vmatmul.mubr.msk.f32.gmra.mrb[70].mxu1 %vm564_vm0, %v2494_v6  ;;  %v2432_v4 = vadd.f32 %v13384_v29, %v2395_v24  ;;  %v2171_v47 = vmul.f32 %v13462_v1, %v13462_v1 }
 0x343   : > { %11802 = vrsqrt.f32 %v2298_v60  ;;  %v2140_v56 = vmul.f32 0.03125, %v2076_v28  ;;  %v2073_v37 = vpop.xlane.xlu0 %2072  ;;  %v2431_v43 = vadd.f32 %v13384_v29, %v2394_v59  ;;  %v2265_v28 = vsub.f32 %v13192_v3, %v13442_v42 }
 0x344   : > { %11804 = vrsqrt.f32 %v2297_v41  ;;  %v2139_v54 = vmul.f32 0.03125, %v2073_v37  ;;  %v2464_v32 = vmul.f32 0.2, %v2432_v4  ;;  %v2268_v42 = vsub.f32 %v13204_v33, %v13460_v16 }
 0x345   : > { %v11799_v35 = vpop.eup %11798  ;;  %v2204_v46 = vsub.f32 %v2140_v56, %v2172_v17  ;;  %v2463_v40 = vmul.f32 0.2, %v2431_v43 }
 0x346   : > { %v11801_v26 = vpop.eup %11800  ;;  %v2203_v25 = vsub.f32 %v2139_v54, %v2171_v47  ;;  %v1922_v44 = vpop.xlane.xlu1 %1921  ;;  %v2360_v53 = vmul.f32 %v11799_v35, %v2264_v23  ;;  %v2496_v38 = vmax.f32 %v2432_v4, %v2464_v32 }
 0x347   : > { %v2236_v15 = vmax.f32 %v2204_v46, 0.0  ;;  %v13480_v61 = vmul.f32 0.03125, %v1922_v44  ;;  %v1919_v57 = vpop.xlane.xlu0 %1918  ;;  %v2495_v10 = vmax.f32 %v2431_v43, %v2463_v40  ;;  %v2359_v45 = vmul.f32 %v11801_v26, %v2263_v51 }
 0x348   : > { %v2235_v62 = vmax.f32 %v2203_v25, 0.0  ;;  %v13482_v36 = vmul.f32 0.03125, %v1919_v57  ;;  %v2397_v0 = vmul.f32 %v13379_v13, %v2360_v53 }
 0x349   : > { %v2300_v49 = vadd.f32 1e-05, %v2236_v15  ;;  %10830 = vmatprep.mubr.msk.f32.mxu0 %vm564_vm0, %v2495_v10  ;;  %10886 = vmatprep.mubr.msk.f32.mxu1 %vm564_vm0, %v2495_v10  ;;  %v2396_v7 = vmul.f32 %v13379_v13, %v2359_v45  ;;  %v2174_v6 = vmul.f32 %v13480_v61, %v13480_v61 }
 0x34a   : > { %v2299_v63 = vadd.f32 1e-05, %v2235_v62  ;;  %v2082_v12 = vpop.xlane.xlu1 %2081  ;;  %10831 = vmatmul.mubr.msk.f32.gmra.mrb[8].mxu0 %vm564_vm0, %v2496_v38  ;;  %10887 = vmatmul.mubr.msk.f32.gmra.mrb[72].mxu1 %vm564_vm0, %v2496_v38  ;;  %v2434_v39 = vadd.f32 %v13384_v29, %v2397_v0  ;;  %v2173_v20 = vmul.f32 %v13482_v36, %v13482_v36 }
 0x34b   : > { %11806 = vrsqrt.f32 %v2300_v49  ;;  %v2142_v24 = vmul.f32 0.03125, %v2082_v12  ;;  %v2079_v60 = vpop.xlane.xlu0 %2078  ;;  %v2433_v59 = vadd.f32 %v13384_v29, %v2396_v7 }
 0x34c   : > { %11808 = vrsqrt.f32 %v2299_v63  ;;  %v2141_v14 = vmul.f32 0.03125, %v2079_v60  ;;  %v2466_v23 = vmul.f32 0.2, %v2434_v39 }
 0x34d   : > { %v11803_v41 = vpop.eup %11802  ;;  %v2206_v4 = vsub.f32 %v2142_v24, %v2174_v6  ;;  %v2465_v17 = vmul.f32 0.2, %v2433_v59 }
 0x34e   : > { %v11805_v56 = vpop.eup %11804  ;;  %v2205_v37 = vsub.f32 %v2141_v14, %v2173_v20  ;;  %v1928_v43 = vpop.xlane.xlu1 %1927  ;;  %v2362_v47 = vmul.f32 %v11803_v41, %v2266_v21  ;;  %v2498_v25 = vmax.f32 %v2434_v39, %v2466_v23  ;;  %v2267_v21 = vsub.f32 %v13208_v19, %v13462_v1 }
 0x34f   : > { %v2238_v54 = vmax.f32 %v2206_v4, 0.0  ;;  %v13500_v32 = vmul.f32 0.03125, %v1928_v43  ;;  %v1925_v35 = vpop.xlane.xlu0 %1924  ;;  %v2497_v51 = vmax.f32 %v2433_v59, %v2465_v17  ;;  %v2361_v46 = vmul.f32 %v11805_v56, %v2265_v28 }
 0x350   : > { %v2237_v40 = vmax.f32 %v2205_v37, 0.0  ;;  %v13502_v26 = vmul.f32 0.03125, %v1925_v35  ;;  %v2399_v44 = vmul.f32 %v13379_v13, %v2362_v47  ;;  %v2270_v1 = vsub.f32 %v13220_v31, %v13480_v61 }
 0x351   : > { %v2302_v53 = vadd.f32 1e-05, %v2238_v54  ;;  %10833 = vmatprep.mubr.msk.f32.mxu0 %vm564_vm0, %v2497_v51  ;;  %10889 = vmatprep.mubr.msk.f32.mxu1 %vm564_vm0, %v2497_v51  ;;  %v2398_v3 = vmul.f32 %v13379_v13, %v2361_v46  ;;  %v2176_v45 = vmul.f32 %v13500_v32, %v13500_v32 }
 0x352   : > { %v2301_v15 = vadd.f32 1e-05, %v2237_v40  ;;  %v2088_v57 = vpop.xlane.xlu1 %2087  ;;  %10834 = vmatmul.mubr.msk.f32.gmra.mrb[10].mxu0 %vm564_vm0, %v2498_v25  ;;  %10890 = vmatmul.mubr.msk.f32.gmra.mrb[74].mxu1 %vm564_vm0, %v2498_v25  ;;  %v2436_v10 = vadd.f32 %v13384_v29, %v2399_v44  ;;  %v2175_v33 = vmul.f32 %v13502_v26, %v13502_v26 }
 0x353   : > { %11810 = vrsqrt.f32 %v2302_v53  ;;  %v2144_v62 = vmul.f32 0.03125, %v2088_v57  ;;  %v2085_v38 = vpop.xlane.xlu0 %2084  ;;  %v2435_v0 = vadd.f32 %v13384_v29, %v2398_v3  ;;  %v2269_v53 = vsub.f32 %v13224_v8, %v13482_v36 }
 0x354   : > { %11812 = vrsqrt.f32 %v2301_v15  ;;  %v2143_v16 = vmul.f32 0.03125, %v2085_v38  ;;  %v2468_v49 = vmul.f32 0.2, %v2436_v10  ;;  %v2272_v36 = vsub.f32 %v13236_v58, %v13500_v32 }
 0x355   : > { %v11807_v7 = vpop.eup %11806  ;;  %v2208_v63 = vsub.f32 %v2144_v62, %v2176_v45  ;;  %v2467_v12 = vmul.f32 0.2, %v2435_v0 }
 0x356   : > { %v11809_v39 = vpop.eup %11808  ;;  %v2207_v6 = vsub.f32 %v2143_v16, %v2175_v33  ;;  %v1934_v24 = vpop.xlane.xlu1 %1933  ;;  %v2364_v60 = vmul.f32 %v11807_v7, %v2268_v42  ;;  %v2500_v17 = vmax.f32 %v2436_v10, %v2468_v49 }
 0x357   : > { %v2240_v59 = vmax.f32 %v2208_v63, 0.0  ;;  %v13520_v20 = vmul.f32 0.03125, %v1934_v24  ;;  %v1931_v14 = vpop.xlane.xlu0 %1930  ;;  %v2499_v23 = vmax.f32 %v2435_v0, %v2467_v12  ;;  %v2363_v41 = vmul.f32 %v11809_v39, %v2267_v21 }
 0x358   : > { %v2239_v28 = vmax.f32 %v2207_v6, 0.0  ;;  %v13522_v4 = vmul.f32 0.03125, %v1931_v14  ;;  %v2401_v56 = vmul.f32 %v13379_v13, %v2364_v60 }
 0x359   : > { %v2304_v37 = vadd.f32 1e-05, %v2240_v59  ;;  %10836 = vmatprep.mubr.msk.f32.mxu0 %vm564_vm0, %v2499_v23  ;;  %10892 = vmatprep.mubr.msk.f32.mxu1 %vm564_vm0, %v2499_v23  ;;  %v2400_v19 = vmul.f32 %v13379_v13, %v2363_v41  ;;  %v2178_v35 = vmul.f32 %v13520_v20, %v13520_v20 }
 0x35a   : > { %v2303_v43 = vadd.f32 1e-05, %v2239_v28  ;;  %v2094_v47 = vpop.xlane.xlu1 %2093  ;;  %10837 = vmatmul.mubr.msk.f32.gmra.mrb[12].mxu0 %vm564_vm0, %v2500_v17  ;;  %10893 = vmatmul.mubr.msk.f32.gmra.mrb[76].mxu1 %vm564_vm0, %v2500_v17  ;;  %v2438_v54 = vadd.f32 %v13384_v29, %v2401_v56  ;;  %v2177_v31 = vmul.f32 %v13522_v4, %v13522_v4  ;;  %v2271_v17 = vsub.f32 %v13240_v55, %v13502_v26 }
 0x35b   : > { %11814 = vrsqrt.f32 %v2304_v37  ;;  %v2146_v51 = vmul.f32 0.03125, %v2094_v47  ;;  %v2091_v46 = vpop.xlane.xlu0 %2090  ;;  %v2437_v40 = vadd.f32 %v13384_v29, %v2400_v19  ;;  %v2274_v26 = vsub.f32 %v13252_v2, %v13520_v20 }
 0x35c   : > { %11816 = vrsqrt.f32 %v2303_v43  ;;  %v2145_v61 = vmul.f32 0.03125, %v2091_v46  ;;  %v2470_v25 = vmul.f32 0.2, %v2438_v54 }
 0x35d   : > { %v11811_v44 = vpop.eup %11810  ;;  %v2210_v3 = vsub.f32 %v2146_v51, %v2178_v35  ;;  %v2469_v42 = vmul.f32 0.2, %v2437_v40 }
 0x35e   : > { %v11813_v15 = vpop.eup %11812  ;;  %v2209_v57 = vsub.f32 %v2145_v61, %v2177_v31  ;;  %v1940_v10 = vpop.xlane.xlu1 %1939  ;;  %v2366_v45 = vmul.f32 %v11811_v44, %v2270_v1  ;;  %v2502_v21 = vmax.f32 %v2438_v54, %v2470_v25 }
 0x35f   : > { %v2242_v62 = vmax.f32 %v2210_v3, 0.0  ;;  %v13540_v38 = vmul.f32 0.03125, %v1940_v10  ;;  %v1937_v0 = vpop.xlane.xlu0 %1936  ;;  %v2501_v33 = vmax.f32 %v2437_v40, %v2469_v42  ;;  %v2365_v16 = vmul.f32 %v11813_v15, %v2269_v53 }
 0x360   : > { %v2241_v49 = vmax.f32 %v2209_v57, 0.0  ;;  %v13542_v7 = vmul.f32 0.03125, %v1937_v0  ;;  %v2403_v63 = vmul.f32 %v13379_v13, %v2366_v45 }
 0x361   : > { %v2306_v12 = vadd.f32 1e-05, %v2242_v62  ;;  %10839 = vmatprep.mubr.msk.f32.mxu0 %vm564_vm0, %v2501_v33  ;;  %10895 = vmatprep.mubr.msk.f32.mxu1 %vm564_vm0, %v2501_v33  ;;  %v2402_v8 = vmul.f32 %v13379_v13, %v2365_v16  ;;  %v2180_v60 = vmul.f32 %v13540_v38, %v13540_v38  ;;  %v2273_v16 = vsub.f32 %v13256_v11, %v13522_v4 }
 0x362   : > { %v2305_v39 = vadd.f32 1e-05, %v2241_v49  ;;  %v2100_v6 = vpop.xlane.xlu1 %2099  ;;  %10840 = vmatmul.mubr.msk.f32.gmra.mrb[14].mxu0 %vm564_vm0, %v2502_v21  ;;  %10896 = vmatmul.mubr.msk.f32.gmra.mrb[78].mxu1 %vm564_vm0, %v2502_v21  ;;  %v2440_v24 = vadd.f32 %v13384_v29, %v2403_v63  ;;  %v2179_v58 = vmul.f32 %v13542_v7, %v13542_v7  ;;  %v2276_v4 = vsub.f32 %v13268_v27, %v13540_v38 }
 0x363   : > { %11818 = vrsqrt.f32 %v2306_v12  ;;  %v2148_v59 = vmul.f32 0.03125, %v2100_v6  ;;  %v2097_v14 = vpop.xlane.xlu0 %2096  ;;  %v2439_v23 = vadd.f32 %v13384_v29, %v2402_v8 }
 0x364   : > { %11820 = vrsqrt.f32 %v2305_v39  ;;  %v2147_v32 = vmul.f32 0.03125, %v2097_v14  ;;  %v2472_v41 = vmul.f32 0.2, %v2440_v24 }
 0x365   : > { %v11815_v28 = vpop.eup %11814  ;;  %v2212_v56 = vsub.f32 %v2148_v59, %v2180_v60  ;;  %v2471_v37 = vmul.f32 0.2, %v2439_v23 }
 0x366   : > { %v11817_v19 = vpop.eup %11816  ;;  %v2211_v1 = vsub.f32 %v2147_v32, %v2179_v58  ;;  %v1946_v43 = vpop.xlane.xlu1 %1945  ;;  %v2368_v47 = vmul.f32 %v11815_v28, %v2272_v36  ;;  %v2504_v25 = vmax.f32 %v2440_v24, %v2472_v41 }
 0x367   : > { %v2244_v54 = vmax.f32 %v2212_v56, 0.0  ;;  %v13560_v35 = vmul.f32 0.03125, %v1946_v43  ;;  %v1943_v51 = vpop.xlane.xlu0 %1942  ;;  %v2503_v46 = vmax.f32 %v2439_v23, %v2471_v37  ;;  %v2367_v40 = vmul.f32 %v11817_v19, %v2271_v17 }
 0x368   : > { %v2243_v31 = vmax.f32 %v2211_v1, 0.0  ;;  %v13562_v61 = vmul.f32 0.03125, %v1943_v51  ;;  %v2405_v44 = vmul.f32 %v13379_v13, %v2368_v47  ;;  %v2275_v51 = vsub.f32 %v13272_v52, %v13542_v7 }
 0x369   : > { %v2308_v53 = vadd.f32 1e-05, %v2244_v54  ;;  %10842 = vmatprep.mubr.msk.f32.mxu0 %vm564_vm0, %v2503_v46  ;;  %10898 = vmatprep.mubr.msk.f32.mxu1 %vm564_vm0, %v2503_v46  ;;  %v2404_v55 = vmul.f32 %v13379_v13, %v2367_v40  ;;  %v2182_v57 = vmul.f32 %v13560_v35, %v13560_v35  ;;  %v2278_v7 = vsub.f32 %v13284_v22, %v13560_v35 }
 0x36a   : > { %v2307_v3 = vadd.f32 1e-05, %v2243_v31  ;;  %v2106_v42 = vpop.xlane.xlu1 %2105  ;;  %10843 = vmatmul.mubr.msk.f32.gmra.mrb[16].mxu0 %vm564_vm0, %v2504_v25  ;;  %10899 = vmatmul.mubr.msk.f32.gmra.mrb[80].mxu1 %vm564_vm0, %v2504_v25  ;;  %v2442_v15 = vadd.f32 %v13384_v29, %v2405_v44  ;;  %v2181_v2 = vmul.f32 %v13562_v61, %v13562_v61 }
 0x36b   : > { %11822 = vrsqrt.f32 %v2308_v53  ;;  %v2150_v10 = vmul.f32 0.03125, %v2106_v42  ;;  %v2103_v45 = vpop.xlane.xlu0 %2102  ;;  %v2441_v62 = vadd.f32 %v13384_v29, %v2404_v55 }
 0x36c   : > { %11824 = vrsqrt.f32 %v2307_v3  ;;  %v2149_v20 = vmul.f32 0.03125, %v2103_v45  ;;  %v2474_v0 = vmul.f32 0.2, %v2442_v15 }
 0x36d   : > { %v11819_v33 = vpop.eup %11818  ;;  %v2214_v49 = vsub.f32 %v2150_v10, %v2182_v57  ;;  %v2473_v21 = vmul.f32 0.2, %v2441_v62 }
 0x36e   : > { %v11821_v63 = vpop.eup %11820  ;;  %v2213_v12 = vsub.f32 %v2149_v20, %v2181_v2  ;;  %v1952_v8 = vpop.xlane.xlu1 %1951  ;;  %v2370_v36 = vmul.f32 %v11819_v33, %v2274_v26  ;;  %v2506_v58 = vmax.f32 %v2442_v15, %v2474_v0 }
 0x36f   : > { %v2246_v39 = vmax.f32 %v2214_v49, 0.0  ;;  %v13580_v6 = vmul.f32 0.03125, %v1952_v8  ;;  %v1949_v24 = vpop.xlane.xlu0 %1948  ;;  %v2505_v60 = vmax.f32 %v2441_v62, %v2473_v21  ;;  %v2369_v59 = vmul.f32 %v11821_v63, %v2273_v16 }
 0x370   : > { %v2245_v14 = vmax.f32 %v2213_v12, 0.0  ;;  %v13582_v23 = vmul.f32 0.03125, %v1949_v24  ;;  %v2407_v32 = vmul.f32 %v13379_v13, %v2370_v36  ;;  %v2277_v36 = vsub.f32 %v13288_v48, %v13562_v61 }
 0x371   : > { %v2310_v41 = vadd.f32 1e-05, %v2246_v39  ;;  %10845 = vmatprep.mubr.msk.f32.mxu0 %vm564_vm0, %v2505_v60  ;;  %10901 = vmatprep.mubr.msk.f32.mxu1 %vm564_vm0, %v2505_v60  ;;  %v2406_v11 = vmul.f32 %v13379_v13, %v2369_v59  ;;  %v2184_v37 = vmul.f32 %v13580_v6, %v13580_v6  ;;  %v2280_v61 = vsub.f32 %v13300_v34, %v13580_v6 }
 0x372   : > { %v2309_v28 = vadd.f32 1e-05, %v2245_v14  ;;  %v2112_v17 = vpop.xlane.xlu1 %2111  ;;  %10846 = vmatmul.mubr.msk.f32.gmra.mrb[18].mxu0 %vm564_vm0, %v2506_v58  ;;  %10902 = vmatmul.mubr.msk.f32.gmra.mrb[82].mxu1 %vm564_vm0, %v2506_v58  ;;  %v2444_v56 = vadd.f32 %v13384_v29, %v2407_v32  ;;  %v2183_v27 = vmul.f32 %v13582_v23, %v13582_v23 }
 0x373   : > { %11826 = vrsqrt.f32 %v2310_v41  ;;  %v2152_v19 = vmul.f32 0.03125, %v2112_v17  ;;  %v2109_v1 = vpop.xlane.xlu0 %2108  ;;  %v2443_v43 = vadd.f32 %v13384_v29, %v2406_v11 }
 0x374   : > { %11828 = vrsqrt.f32 %v2309_v28  ;;  %v2151_v38 = vmul.f32 0.03125, %v2109_v1  ;;  %v2476_v47 = vmul.f32 0.2, %v2444_v56 }
 0x375   : > { %v11823_v54 = vpop.eup %11822  ;;  %v2216_v46 = vsub.f32 %v2152_v19, %v2184_v37  ;;  %v2475_v40 = vmul.f32 0.2, %v2443_v43 }
 0x376   : > { %v11825_v31 = vpop.eup %11824  ;;  %v2215_v25 = vsub.f32 %v2151_v38, %v2183_v27  ;;  %v1958_v44 = vpop.xlane.xlu1 %1957  ;;  %v2372_v53 = vmul.f32 %v11823_v54, %v2276_v4  ;;  %v2508_v45 = vmax.f32 %v2444_v56, %v2476_v47 }
 0x377   : > { %v2248_v55 = vmax.f32 %v2216_v46, 0.0  ;;  %v13600_v26 = vmul.f32 0.03125, %v1958_v44  ;;  %v1955_v3 = vpop.xlane.xlu0 %1954  ;;  %v2507_v42 = vmax.f32 %v2443_v43, %v2475_v40  ;;  %v2371_v15 = vmul.f32 %v11825_v31, %v2275_v51 }
 0x378   : > { %v2247_v57 = vmax.f32 %v2215_v25, 0.0  ;;  %v13602_v10 = vmul.f32 0.03125, %v1955_v3  ;;  %v2409_v62 = vmul.f32 %v13379_v13, %v2372_v53  ;;  %v2279_v25 = vsub.f32 %v13304_v30, %v13582_v23 }
 0x379   : > { %v2312_v2 = vadd.f32 1e-05, %v2248_v55  ;;  %10848 = vmatprep.mubr.msk.f32.mxu0 %vm564_vm0, %v2507_v42  ;;  %10904 = vmatprep.mubr.msk.f32.mxu1 %vm564_vm0, %v2507_v42  ;;  %v2408_v52 = vmul.f32 %v13379_v13, %v2371_v15  ;;  %v2186_v16 = vmul.f32 %v13600_v26, %v13600_v26 }
 0x37a   : > { %v2311_v20 = vadd.f32 1e-05, %v2247_v57  ;;  %v2118_v0 = vpop.xlane.xlu1 %2117  ;;  %10849 = vmatmul.mubr.msk.f32.gmra.mrb[20].mxu0 %vm564_vm0, %v2508_v45  ;;  %10905 = vmatmul.mubr.msk.f32.gmra.mrb[84].mxu1 %vm564_vm0, %v2508_v45  ;;  %v2446_v33 = vadd.f32 %v13384_v29, %v2409_v62  ;;  %v2185_v22 = vmul.f32 %v13602_v10, %v13602_v10 }
 0x37b   : > { %11830 = vrsqrt.f32 %v2312_v2  ;;  %v2154_v49 = vmul.f32 0.03125, %v2118_v0  ;;  %v2115_v21 = vpop.xlane.xlu0 %2114  ;;  %v2445_v63 = vadd.f32 %v13384_v29, %v2408_v52 }
 0x37c   : > { %11832 = vrsqrt.f32 %v2311_v20  ;;  %v2153_v35 = vmul.f32 0.03125, %v2115_v21  ;;  %v2478_v12 = vmul.f32 0.2, %v2446_v33  ;;  %v2281_v21 = vsub.f32 %v13320_v9, %v13602_v10 }
 0x37d   : > { %v11827_v8 = vpop.eup %11826  ;;  %v2218_v39 = vsub.f32 %v2154_v49, %v2186_v16  ;;  %v2477_v24 = vmul.f32 0.2, %v2445_v63 }
 0x37e   : > { %v11829_v60 = vpop.eup %11828  ;;  %v2217_v59 = vsub.f32 %v2153_v35, %v2185_v22  ;;  %v1964_v14 = vpop.xlane.xlu1 %1963  ;;  %v2374_v58 = vmul.f32 %v11827_v8, %v2278_v7  ;;  %v2510_v37 = vmax.f32 %v2446_v33, %v2478_v12  ;;  %v2282_v33 = vsub.f32 %v13316_v50, %v13600_v26 }
 0x37f   : > { %v2250_v32 = vmax.f32 %v2218_v39, 0.0  ;;  %v13620_v41 = vmul.f32 0.03125, %v1964_v14  ;;  %v1961_v11 = vpop.xlane.xlu0 %1960  ;;  %v2509_v4 = vmax.f32 %v2445_v63, %v2477_v24  ;;  %v2373_v28 = vmul.f32 %v11829_v60, %v2277_v36 }
 0x380   : > { %v2249_v17 = vmax.f32 %v2217_v59, 0.0  ;;  %v13622_v56 = vmul.f32 0.03125, %v1961_v11  ;;  %v2411_v19 = vmul.f32 %v13379_v13, %v2374_v58 }
 0x381   : > { %v2314_v1 = vadd.f32 1e-05, %v2250_v32  ;;  %10851 = vmatprep.mubr.msk.f32.mxu0 %vm564_vm0, %v2509_v4  ;;  %10907 = vmatprep.mubr.msk.f32.mxu1 %vm564_vm0, %v2509_v4  ;;  %v2410_v48 = vmul.f32 %v13379_v13, %v2373_v28  ;;  %v2188_v47 = vmul.f32 %v13620_v41, %v13620_v41  ;;  %v2284_v10 = vsub.f32 %v13332_v18, %v13620_v41  ;;  %v12290_v28 = vld [vmem:[%s13364_s27] ss:$0 sm:$0xff] }
 0x382   : > { %v2313_v43 = vadd.f32 1e-05, %v2249_v17  ;;  %v2124_v27 = vpop.xlane.xlu1 %2123  ;;  %10852 = vmatmul.mubr.msk.f32.gmra.mrb[22].mxu0 %vm564_vm0, %v2510_v37  ;;  %10908 = vmatmul.mubr.msk.f32.gmra.mrb[86].mxu1 %vm564_vm0, %v2510_v37  ;;  %v2448_v38 = vadd.f32 %v13384_v29, %v2411_v19  ;;  %v2187_v34 = vmul.f32 %v13622_v56, %v13622_v56  ;;  %v2283_v59 = vsub.f32 %v13336_v5, %v13622_v56 }
 0x383   : > { %11834 = vrsqrt.f32 %v2314_v1  ;;  %v2156_v54 = vmul.f32 0.03125, %v2124_v27  ;;  %v2121_v51 = vpop.xlane.xlu0 %2120  ;;  %v2447_v46 = vadd.f32 %v13384_v29, %v2410_v48  ;;  %v9948_v48 = vld [vmem:[%s17390_s4 + $0x20] sm:$0xff] }
 0x384   : > { %11836 = vrsqrt.f32 %v2313_v43  ;;  %v2155_v6 = vmul.f32 0.03125, %v2121_v51  ;;  %v2480_v40 = vmul.f32 0.2, %v2448_v38  ;;  %v13684_v43 = vld [vmem:[%s17389_s3 + $0x1] ss:$0 sm:$0xff] }
 0x385   : > { %v11831_v31 = vpop.eup %11830  ;;  %v2220_v44 = vsub.f32 %v2156_v54, %v2188_v47  ;;  %v2479_v53 = vmul.f32 0.2, %v2447_v46 }
 0x386   : > { %v11833_v55 = vpop.eup %11832  ;;  %v2219_v3 = vsub.f32 %v2155_v6, %v2187_v34  ;;  %v2376_v42 = vmul.f32 %v11831_v31, %v2280_v61  ;;  %v2512_v2 = vmax.f32 %v2448_v38, %v2480_v40 }
 0x387   : > { %v2252_v15 = vmax.f32 %v2220_v44, 0.0  ;;  %v2511_v57 = vmax.f32 %v2447_v46, %v2479_v53  ;;  %v2375_v45 = vmul.f32 %v11833_v55, %v2279_v25 }
 0x388   : > { %v2251_v62 = vmax.f32 %v2219_v3, 0.0  ;;  %v2413_v52 = vmul.f32 %v13379_v13, %v2376_v42 }
 0x389   : > { %v2316_v7 = vadd.f32 1e-05, %v2252_v15  ;;  %10854 = vmatprep.mubr.msk.f32.mxu0 %vm564_vm0, %v2511_v57  ;;  %10910 = vmatprep.mubr.msk.f32.mxu1 %vm564_vm0, %v2511_v57  ;;  %v2412_v20 = vmul.f32 %v13379_v13, %v2375_v45 }
 0x38a   : > { %v2315_v30 = vadd.f32 1e-05, %v2251_v62  ;;  %10855 = vmatmul.mubr.msk.f32.gmra.mrb[24].mxu0 %vm564_vm0, %v2512_v2  ;;  %10911 = vmatmul.mubr.msk.f32.gmra.mrb[88].mxu1 %vm564_vm0, %v2512_v2  ;;  %v2450_v23 = vadd.f32 %v13384_v29, %v2413_v52 }
 0x38b   : > { %11838 = vrsqrt.f32 %v2316_v7  ;;  %v2449_v0 = vadd.f32 %v13384_v29, %v2412_v20 }
 0x38c   : > { %11840 = vrsqrt.f32 %v2315_v30  ;;  %v2482_v16 = vmul.f32 0.2, %v2450_v23 }
 0x38d   : > { %v11835_v49 = vpop.eup %11834  ;;  %v2481_v63 = vmul.f32 0.2, %v2449_v0 }
 0x38e   : > { %v11837_v22 = vpop.eup %11836  ;;  %v2378_v35 = vmul.f32 %v11835_v49, %v2282_v33  ;;  %v2514_v36 = vmax.f32 %v2450_v23, %v2482_v16  ;;  %v9950_v16 = vld [vmem:[%s17390_s4 + $0x30] sm:$0xff]  ;;  %v9951_v49 = vld [vmem:[%s17390_s4 + $0x38] sm:$0xff] }
 0x38f   : > { %v2513_v12 = vmax.f32 %v2449_v0, %v2481_v63  ;;  %v2377_v8 = vmul.f32 %v11837_v22, %v2281_v21  ;;  %v11406_v21 = vpack.c.bf16 %v9951_v49, %v9950_v16 }
 0x390   : > { %v2415_v39 = vmul.f32 %v13379_v13, %v2378_v35 }
 0x391   : > { %10857 = vmatprep.mubr.msk.f32.mxu0 %vm564_vm0, %v2513_v12  ;;  %10913 = vmatprep.mubr.msk.f32.mxu1 %vm564_vm0, %v2513_v12  ;;  %v2414_v50 = vmul.f32 %v13379_v13, %v2377_v8 }
 0x392   : > { %10858 = vmatmul.mubr.msk.f32.gmra.mrb[26].mxu0 %vm564_vm0, %v2514_v36  ;;  %10914 = vmatmul.mubr.msk.f32.gmra.mrb[90].mxu1 %vm564_vm0, %v2514_v36  ;;  %v2452_v9 = vadd.f32 %v13384_v29, %v2415_v39 }
 0x393   : > { %v2451_v26 = vadd.f32 %v13384_v29, %v2414_v50 }
 0x394   : > { %v2484_v24 = vmul.f32 0.2, %v2452_v9 }
 0x395   : > { %v11839_v60 = vpop.eup %11838  ;;  %v2483_v14 = vmul.f32 0.2, %v2451_v26 }
 0x396   : > { %v11841_v58 = vpop.eup %11840  ;;  %v2380_v32 = vmul.f32 %v11839_v60, %v2284_v10  ;;  %v2516_v4 = vmax.f32 %v2452_v9, %v2484_v24 }
 0x397   : > { %v2515_v13 = vmax.f32 %v2451_v26, %v2483_v14  ;;  %v2379_v11 = vmul.f32 %v11841_v58, %v2283_v59 }
 0x398   : > { %v2417_v17 = vmul.f32 %v12290_v28, %v2380_v32 }
 0x399   : > { %10860 = vmatprep.mubr.msk.f32.mxu0 %vm564_vm0, %v2515_v13  ;;  %10916 = vmatprep.mubr.msk.f32.mxu1 %vm564_vm0, %v2515_v13  ;;  %v2416_v37 = vmul.f32 %v12290_v28, %v2379_v11 }
 0x39a   : > { %10861 = vmatmul.mubr.msk.f32.gmra.mrb[28].mxu0 %vm564_vm0, %v2516_v4  ;;  %10917 = vmatmul.mubr.msk.f32.gmra.mrb[92].mxu1 %vm564_vm0, %v2516_v4  ;;  %v2454_v18 = vadd.f32 %v13384_v29, %v2417_v17 }
 0x39b   : > { %v2453_v5 = vadd.f32 %v13384_v29, %v2416_v37  ;;  %v9949_v29 = vld [vmem:[%s17390_s4 + $0x28] sm:$0xff] }
 0x39c   : > { %v2486_v41 = vmul.f32 0.2, %v2454_v18  ;;  %v11402_v61 = vpack.c.bf16 %v9949_v29, %v9948_v48 }
 0x39d   : > { %v2485_v56 = vmul.f32 0.2, %v2453_v5 }
 0x39e   : > { %v2518_v1 = vmax.f32 %v2454_v18, %v2486_v41  ;;  %11403 = vmatprep.subr.bf16.mxu0 %v11402_v61 }
 0x39f   : > { %v2517_v19 = vmax.f32 %v2453_v5, %v2485_v56  ;;  %11405 = vmatpush3.bf16.msra.mxu0 %v11402_v61 }
 0x3a0   : > { %11407 = vmatprep.subr.bf16.mxu0 %v11406_v21 }
 0x3a1   : > { %10863 = vmatprep.mubr.msk.f32.mxu0 %vm564_vm0, %v2517_v19  ;;  %10919 = vmatprep.mubr.msk.f32.mxu1 %vm564_vm0, %v2517_v19 }
 0x3a2   : > { %10864 = vmatmul.mubr.msk.f32.gmra.mrb[30].mxu0 %vm564_vm0, %v2518_v1  ;;  %10920 = vmatmul.mubr.msk.f32.gmra.mrb[94].mxu1 %vm564_vm0, %v2518_v1 }
 0x3a3   : > { %11409 = vmatpush3.bf16.msra.mxu0 %v11406_v21 }
 0x3fd   : > { %v10876_v27 = vpop.f32.mrb[64].mxu1 }
 0x3fe   : > { %v13687_v38 = vadd.f32 %v10876_v27, %v13684_v43  ;;  %v2929_v47 = vpop.f32.mrb[65].mxu1 }
 0x3ff   : > { %v13690_v54 = vadd.f32 %v13684_v43, %v2929_v47 }
 0x400   : > { %v3091_v51 = vsel %vm564_vm0, %v13687_v38, 0.0  ;;  %v3217_v46 = vmul.f32 %v13687_v38, %v13687_v38 }
 0x401   : > { %3092 = vadd.xlane.f32.xlu1 %v3091_v51  ;;  %v3088_v34 = vsel %vm564_vm0, %v13690_v54, 0.0  ;;  %v3216_v6 = vmul.f32 %v13690_v54, %v13690_v54 }
 0x402   : > { %3089 = vadd.xlane.f32.xlu0 %v3088_v34  ;;  %v3251_v40 = vsel %vm564_vm0, %v3217_v46, 0.0 }
 0x403   : > { %v3248_v25 = vsel %vm564_vm0, %v3216_v6, 0.0 }
 0x405   : > { %3252 = vadd.xlane.f32.xlu1 %v3251_v40  ;;  %v10879_v31 = vpop.f32.mrb[66].mxu1 }
 0x406   : > { %v13703_v44 = vadd.f32 %v10879_v31, %v13684_v43  ;;  %3249 = vadd.xlane.f32.xlu0 %v3248_v25  ;;  %v2939_v53 = vpop.f32.mrb[67].mxu1 }
 0x407   : > { %v13706_v55 = vadd.f32 %v13684_v43, %v2939_v53 }
 0x408   : > { %v3097_v3 = vsel %vm564_vm0, %v13703_v44, 0.0  ;;  %v3219_v42 = vmul.f32 %v13703_v44, %v13703_v44 }
 0x409   : > { %3098 = vadd.xlane.f32.xlu1 %v3097_v3  ;;  %v3094_v15 = vsel %vm564_vm0, %v13706_v55, 0.0  ;;  %v3218_v57 = vmul.f32 %v13706_v55, %v13706_v55 }
 0x40a   : > { %3095 = vadd.xlane.f32.xlu0 %v3094_v15  ;;  %v3257_v45 = vsel %vm564_vm0, %v3219_v42, 0.0 }
 0x40b   : > { %v3254_v2 = vsel %vm564_vm0, %v3218_v57, 0.0 }
 0x40d   : > { %3258 = vadd.xlane.f32.xlu1 %v3257_v45  ;;  %v10882_v62 = vpop.f32.mrb[68].mxu1 }
 0x40e   : > { %v13719_v52 = vadd.f32 %v10882_v62, %v13684_v43  ;;  %3255 = vadd.xlane.f32.xlu0 %v3254_v2  ;;  %v2949_v7 = vpop.f32.mrb[69].mxu1 }
 0x40f   : > { %v13722_v20 = vadd.f32 %v13684_v43, %v2949_v7 }
 0x410   : > { %v3103_v30 = vsel %vm564_vm0, %v13719_v52, 0.0  ;;  %v3221_v23 = vmul.f32 %v13719_v52, %v13719_v52 }
 0x411   : > { %3104 = vadd.xlane.f32.xlu1 %v3103_v30  ;;  %v3100_v0 = vsel %vm564_vm0, %v13722_v20, 0.0  ;;  %v3220_v33 = vmul.f32 %v13722_v20, %v13722_v20 }
 0x412   : > { %3101 = vadd.xlane.f32.xlu0 %v3100_v0  ;;  %v3263_v63 = vsel %vm564_vm0, %v3221_v23, 0.0 }
 0x413   : > { %v3260_v35 = vsel %vm564_vm0, %v3220_v33, 0.0 }
 0x415   : > { %3264 = vadd.xlane.f32.xlu1 %v3263_v63  ;;  %v10885_v22 = vpop.f32.mrb[70].mxu1 }
 0x416   : > { %v13741_v12 = vadd.f32 %v10885_v22, %v13684_v43  ;;  %3261 = vadd.xlane.f32.xlu0 %v3260_v35  ;;  %v2959_v8 = vpop.f32.mrb[71].mxu1 }
 0x417   : > { %v13744_v36 = vadd.f32 %v13684_v43, %v2959_v8 }
 0x418   : > { %v3109_v39 = vsel %vm564_vm0, %v13741_v12, 0.0  ;;  %v3223_v50 = vmul.f32 %v13741_v12, %v13741_v12 }
 0x419   : > { %3110 = vadd.xlane.f32.xlu1 %v3109_v39  ;;  %v3106_v9 = vsel %vm564_vm0, %v13744_v36, 0.0  ;;  %v3222_v26 = vmul.f32 %v13744_v36, %v13744_v36 }
 0x41a   : > { %3107 = vadd.xlane.f32.xlu0 %v3106_v9  ;;  %v3269_v10 = vsel %vm564_vm0, %v3223_v50, 0.0 }
 0x41b   : > { %v3266_v60 = vsel %vm564_vm0, %v3222_v26, 0.0 }
 0x41d   : > { %3270 = vadd.xlane.f32.xlu1 %v3269_v10  ;;  %v10888_v24 = vpop.f32.mrb[72].mxu1 }
 0x41e   : > { %v13757_v59 = vadd.f32 %v10888_v24, %v13684_v43  ;;  %3267 = vadd.xlane.f32.xlu0 %v3266_v60  ;;  %v2969_v14 = vpop.f32.mrb[73].mxu1 }
 0x41f   : > { %v13760_v58 = vadd.f32 %v13684_v43, %v2969_v14 }
 0x420   : > { %v3115_v32 = vsel %vm564_vm0, %v13757_v59, 0.0  ;;  %v3225_v13 = vmul.f32 %v13757_v59, %v13757_v59 }
 0x421   : > { %3116 = vadd.xlane.f32.xlu1 %v3115_v32  ;;  %v3112_v11 = vsel %vm564_vm0, %v13760_v58, 0.0  ;;  %v3224_v4 = vmul.f32 %v13760_v58, %v13760_v58 }
 0x422   : > { %3113 = vadd.xlane.f32.xlu0 %v3112_v11  ;;  %v3275_v28 = vsel %vm564_vm0, %v3225_v13, 0.0 }
 0x423   : > { %v3272_v37 = vsel %vm564_vm0, %v3224_v4, 0.0 }
 0x425   : > { %3276 = vadd.xlane.f32.xlu1 %v3275_v28  ;;  %v10891_v17 = vpop.f32.mrb[74].mxu1 }
 0x426   : > { %v13773_v18 = vadd.f32 %v10891_v17, %v13684_v43  ;;  %3273 = vadd.xlane.f32.xlu0 %v3272_v37  ;;  %v2979_v5 = vpop.f32.mrb[75].mxu1 }
 0x427   : > { %v13776_v41 = vadd.f32 %v13684_v43, %v2979_v5 }
 0x428   : > { %v3121_v56 = vsel %vm564_vm0, %v13773_v18, 0.0  ;;  %v3227_v19 = vmul.f32 %v13773_v18, %v13773_v18 }
 0x429   : > { %3122 = vadd.xlane.f32.xlu1 %v3121_v56  ;;  %v3118_v1 = vsel %vm564_vm0, %v13776_v41, 0.0  ;;  %v3226_v48 = vmul.f32 %v13776_v41, %v13776_v41 }
 0x42a   : > { %3119 = vadd.xlane.f32.xlu0 %v3118_v1  ;;  %v3281_v29 = vsel %vm564_vm0, %v3227_v19, 0.0 }
 0x42b   : > { %v3278_v27 = vsel %vm564_vm0, %v3226_v48, 0.0 }
 0x42d   : > { %3282 = vadd.xlane.f32.xlu1 %v3281_v29  ;;  %v10894_v61 = vpop.f32.mrb[76].mxu1 }
 0x42e   : > { %v13789_v47 = vadd.f32 %v10894_v61, %v13684_v43  ;;  %3279 = vadd.xlane.f32.xlu0 %v3278_v27  ;;  %v2989_v51 = vpop.f32.mrb[77].mxu1 }
 0x42f   : > { %v13792_v46 = vadd.f32 %v13684_v43, %v2989_v51 }
 0x430   : > { %v3127_v34 = vsel %vm564_vm0, %v13789_v47, 0.0  ;;  %v3229_v6 = vmul.f32 %v13789_v47, %v13789_v47 }
 0x431   : > { %3128 = vadd.xlane.f32.xlu1 %v3127_v34  ;;  %v3124_v40 = vsel %vm564_vm0, %v13792_v46, 0.0  ;;  %v3228_v31 = vmul.f32 %v13792_v46, %v13792_v46 }
 0x432   : > { %3125 = vadd.xlane.f32.xlu0 %v3124_v40  ;;  %v3287_v25 = vsel %vm564_vm0, %v3229_v6, 0.0 }
 0x433   : > { %v3284_v3 = vsel %vm564_vm0, %v3228_v31, 0.0 }
 0x435   : > { %3288 = vadd.xlane.f32.xlu1 %v3287_v25  ;;  %v10897_v53 = vpop.f32.mrb[78].mxu1 }
 0x436   : > { %v13805_v42 = vadd.f32 %v10897_v53, %v13684_v43  ;;  %3285 = vadd.xlane.f32.xlu0 %v3284_v3  ;;  %v2999_v15 = vpop.f32.mrb[79].mxu1 }
 0x437   : > { %v13808_v57 = vadd.f32 %v13684_v43, %v2999_v15 }
 0x438   : > { %v3133_v45 = vsel %vm564_vm0, %v13805_v42, 0.0  ;;  %v3231_v62 = vmul.f32 %v13805_v42, %v13805_v42 }
 0x439   : > { %3134 = vadd.xlane.f32.xlu1 %v3133_v45  ;;  %v3130_v2 = vsel %vm564_vm0, %v13808_v57, 0.0  ;;  %v3230_v7 = vmul.f32 %v13808_v57, %v13808_v57 }
 0x43a   : > { %3131 = vadd.xlane.f32.xlu0 %v3130_v2  ;;  %v3293_v30 = vsel %vm564_vm0, %v3231_v62, 0.0 }
 0x43b   : > { %v3290_v0 = vsel %vm564_vm0, %v3230_v7, 0.0 }
 0x43d   : > { %3294 = vadd.xlane.f32.xlu1 %v3293_v30  ;;  %v10900_v23 = vpop.f32.mrb[80].mxu1 }
 0x43e   : > { %v13821_v33 = vadd.f32 %v10900_v23, %v13684_v43  ;;  %3291 = vadd.xlane.f32.xlu0 %v3290_v0  ;;  %v3009_v16 = vpop.f32.mrb[81].mxu1 }
 0x43f   : > { %v13824_v49 = vadd.f32 %v13684_v43, %v3009_v16 }
 0x440   : > { %v3139_v21 = vsel %vm564_vm0, %v13821_v33, 0.0  ;;  %v3233_v63 = vmul.f32 %v13821_v33, %v13821_v33 }
 0x441   : > { %3140 = vadd.xlane.f32.xlu1 %v3139_v21  ;;  %v3136_v22 = vsel %vm564_vm0, %v13824_v49, 0.0  ;;  %v3232_v35 = vmul.f32 %v13824_v49, %v13824_v49 }
 0x442   : > { %3137 = vadd.xlane.f32.xlu0 %v3136_v22  ;;  %v3299_v8 = vsel %vm564_vm0, %v3233_v63, 0.0 }
 0x443   : > { %v3296_v50 = vsel %vm564_vm0, %v3232_v35, 0.0 }
 0x445   : > { %3300 = vadd.xlane.f32.xlu1 %v3299_v8  ;;  %v10903_v39 = vpop.f32.mrb[82].mxu1 }
 0x446   : > { %v13837_v9 = vadd.f32 %v10903_v39, %v13684_v43  ;;  %3297 = vadd.xlane.f32.xlu0 %v3296_v50  ;;  %v3019_v26 = vpop.f32.mrb[83].mxu1 }
 0x447   : > { %v13840_v10 = vadd.f32 %v13684_v43, %v3019_v26 }
 0x448   : > { %v3145_v24 = vsel %vm564_vm0, %v13837_v9, 0.0  ;;  %v3235_v60 = vmul.f32 %v13837_v9, %v13837_v9 }
 0x449   : > { %3146 = vadd.xlane.f32.xlu1 %v3145_v24  ;;  %v3142_v14 = vsel %vm564_vm0, %v13840_v10, 0.0  ;;  %v3234_v32 = vmul.f32 %v13840_v10, %v13840_v10 }
 0x44a   : > { %3143 = vadd.xlane.f32.xlu0 %v3142_v14  ;;  %v3305_v13 = vsel %vm564_vm0, %v3235_v60, 0.0 }
 0x44b   : > { %v3302_v4 = vsel %vm564_vm0, %v3234_v32, 0.0 }
 0x44d   : > { %3306 = vadd.xlane.f32.xlu1 %v3305_v13  ;;  %v10906_v11 = vpop.f32.mrb[84].mxu1 }
 0x44e   : > { %v13853_v28 = vadd.f32 %v10906_v11, %v13684_v43  ;;  %3303 = vadd.xlane.f32.xlu0 %v3302_v4  ;;  %v3029_v17 = vpop.f32.mrb[85].mxu1 }
 0x44f   : > { %v13856_v37 = vadd.f32 %v13684_v43, %v3029_v17 }
 0x450   : > { %v3151_v5 = vsel %vm564_vm0, %v13853_v28, 0.0  ;;  %v3237_v56 = vmul.f32 %v13853_v28, %v13853_v28 }
 0x451   : > { %3152 = vadd.xlane.f32.xlu1 %v3151_v5  ;;  %v3148_v19 = vsel %vm564_vm0, %v13856_v37, 0.0  ;;  %v3236_v1 = vmul.f32 %v13856_v37, %v13856_v37 }
 0x452   : > { %3149 = vadd.xlane.f32.xlu0 %v3148_v19  ;;  %v3311_v48 = vsel %vm564_vm0, %v3237_v56, 0.0 }
 0x453   : > { %v3308_v61 = vsel %vm564_vm0, %v3236_v1, 0.0 }
 0x455   : > { %3312 = vadd.xlane.f32.xlu1 %v3311_v48  ;;  %v10909_v29 = vpop.f32.mrb[86].mxu1 }
 0x456   : > { %v13869_v27 = vadd.f32 %v10909_v29, %v13684_v43  ;;  %3309 = vadd.xlane.f32.xlu0 %v3308_v61  ;;  %v3039_v51 = vpop.f32.mrb[87].mxu1 }
 0x457   : > { %v13872_v34 = vadd.f32 %v13684_v43, %v3039_v51 }
 0x458   : > { %v3157_v6 = vsel %vm564_vm0, %v13869_v27, 0.0  ;;  %v3239_v40 = vmul.f32 %v13869_v27, %v13869_v27 }
 0x459   : > { %3158 = vadd.xlane.f32.xlu1 %v3157_v6  ;;  %v3154_v31 = vsel %vm564_vm0, %v13872_v34, 0.0  ;;  %v3238_v25 = vmul.f32 %v13872_v34, %v13872_v34 }
 0x45a   : > { %3155 = vadd.xlane.f32.xlu0 %v3154_v31  ;;  %v3317_v53 = vsel %vm564_vm0, %v3239_v40, 0.0 }
 0x45b   : > { %v3314_v15 = vsel %vm564_vm0, %v3238_v25, 0.0 }
 0x45d   : > { %3318 = vadd.xlane.f32.xlu1 %v3317_v53  ;;  %v10912_v3 = vpop.f32.mrb[88].mxu1 }
 0x45e   : > { %v13885_v45 = vadd.f32 %v10912_v3, %v13684_v43  ;;  %3315 = vadd.xlane.f32.xlu0 %v3314_v15  ;;  %v3049_v62 = vpop.f32.mrb[89].mxu1 }
 0x45f   : > { %v13888_v2 = vadd.f32 %v13684_v43, %v3049_v62 }
 0x460   : > { %v3163_v7 = vsel %vm564_vm0, %v13885_v45, 0.0  ;;  %v3241_v30 = vmul.f32 %v13885_v45, %v13885_v45 }
 0x461   : > { %3164 = vadd.xlane.f32.xlu1 %v3163_v7  ;;  %v3160_v23 = vsel %vm564_vm0, %v13888_v2, 0.0  ;;  %v3240_v0 = vmul.f32 %v13888_v2, %v13888_v2 }
 0x462   : > { %3161 = vadd.xlane.f32.xlu0 %v3160_v23  ;;  %v3323_v16 = vsel %vm564_vm0, %v3241_v30, 0.0 }
 0x463   : > { %v3320_v63 = vsel %vm564_vm0, %v3240_v0, 0.0 }
 0x465   : > { %3324 = vadd.xlane.f32.xlu1 %v3323_v16  ;;  %v10915_v21 = vpop.f32.mrb[90].mxu1 }
 0x466   : > { %v13901_v22 = vadd.f32 %v10915_v21, %v13684_v43  ;;  %3321 = vadd.xlane.f32.xlu0 %v3320_v63  ;;  %v3059_v35 = vpop.f32.mrb[91].mxu1 }
 0x467   : > { %v13904_v8 = vadd.f32 %v13684_v43, %v3059_v35 }
 0x468   : > { %v3169_v39 = vsel %vm564_vm0, %v13901_v22, 0.0  ;;  %v3243_v50 = vmul.f32 %v13901_v22, %v13901_v22 }
 0x469   : > { %3170 = vadd.xlane.f32.xlu1 %v3169_v39  ;;  %v3166_v26 = vsel %vm564_vm0, %v13904_v8, 0.0  ;;  %v3242_v24 = vmul.f32 %v13904_v8, %v13904_v8 }
 0x46a   : > { %3167 = vadd.xlane.f32.xlu0 %v3166_v26  ;;  %v3329_v60 = vsel %vm564_vm0, %v3243_v50, 0.0 }
 0x46b   : > { %v3326_v32 = vsel %vm564_vm0, %v3242_v24, 0.0 }
 0x46d   : > { %3330 = vadd.xlane.f32.xlu1 %v3329_v60  ;;  %v10918_v14 = vpop.f32.mrb[92].mxu1 }
 0x46e   : > { %v13917_v13 = vadd.f32 %v10918_v14, %v13684_v43  ;;  %3327 = vadd.xlane.f32.xlu0 %v3326_v32  ;;  %v3069_v11 = vpop.f32.mrb[93].mxu1 }
 0x46f   : > { %v13920_v4 = vadd.f32 %v13684_v43, %v3069_v11 }
 0x470   : > { %v3175_v17 = vsel %vm564_vm0, %v13917_v13, 0.0  ;;  %v3245_v5 = vmul.f32 %v13917_v13, %v13917_v13 }
 0x471   : > { %3176 = vadd.xlane.f32.xlu1 %v3175_v17  ;;  %v3172_v56 = vsel %vm564_vm0, %v13920_v4, 0.0  ;;  %v3244_v19 = vmul.f32 %v13920_v4, %v13920_v4 }
 0x472   : > { %3173 = vadd.xlane.f32.xlu0 %v3172_v56  ;;  %v3335_v1 = vsel %vm564_vm0, %v3245_v5, 0.0 }
 0x473   : > { %v3332_v29 = vsel %vm564_vm0, %v3244_v19, 0.0 }
 0x475   : > { %3336 = vadd.xlane.f32.xlu1 %v3335_v1  ;;  %v10921_v48 = vpop.f32.mrb[94].mxu1 }
 0x476   : > { %v13933_v61 = vadd.f32 %v10921_v48, %v13684_v43  ;;  %3333 = vadd.xlane.f32.xlu0 %v3332_v29  ;;  %v3079_v51 = vpop.f32.mrb[95].mxu1 }
 0x477   : > { %v13936_v6 = vadd.f32 %v13684_v43, %v3079_v51 }
 0x478   : > { %v3181_v40 = vsel %vm564_vm0, %v13933_v61, 0.0  ;;  %v3247_v31 = vmul.f32 %v13933_v61, %v13933_v61 }
 0x479   : > { %3182 = vadd.xlane.f32.xlu1 %v3181_v40  ;;  %v3178_v25 = vsel %vm564_vm0, %v13936_v6, 0.0  ;;  %v3246_v53 = vmul.f32 %v13936_v6, %v13936_v6 }
 0x47a   : > { %3179 = vadd.xlane.f32.xlu0 %v3178_v25  ;;  %v3341_v3 = vsel %vm564_vm0, %v3247_v31, 0.0 }
 0x47b   : > { %v3338_v43 = vsel %vm564_vm0, %v3246_v53, 0.0 }
 0x47d   : > { %3342 = vadd.xlane.f32.xlu1 %v3341_v3 }
 0x47e   : > { %3339 = vadd.xlane.f32.xlu0 %v3338_v43 }
 0x48e   : > { %v3093_v15 = vpop.xlane.xlu1 %3092 }
 0x48f   : > { %v3185_v62 = vmul.f32 0.03125, %v3093_v15  ;;  %v3090_v7 = vpop.xlane.xlu0 %3089 }
 0x490   : > { %v3184_v30 = vmul.f32 0.03125, %v3090_v7 }
 0x491   : > { %v3377_v0 = vmul.f32 %v3185_v62, %v3185_v62 }
 0x492   : > { %v3253_v23 = vpop.xlane.xlu1 %3252  ;;  %v3376_v63 = vmul.f32 %v3184_v30, %v3184_v30 }
 0x493   : > { %v3345_v16 = vmul.f32 0.03125, %v3253_v23  ;;  %v3250_v21 = vpop.xlane.xlu0 %3249 }
 0x494   : > { %v3344_v35 = vmul.f32 0.03125, %v3250_v21 }
 0x495   : > { %v3409_v39 = vsub.f32 %v3345_v16, %v3377_v0 }
 0x496   : > { %v3408_v50 = vsub.f32 %v3344_v35, %v3376_v63  ;;  %v3099_v26 = vpop.xlane.xlu1 %3098 }
 0x497   : > { %v3441_v24 = vmax.f32 %v3409_v39, 0.0  ;;  %v13948_v60 = vmul.f32 0.03125, %v3099_v26  ;;  %v3096_v14 = vpop.xlane.xlu0 %3095  ;;  %v3473_v39 = vsub.f32 %v13687_v38, %v3185_v62 }
 0x498   : > { %v3440_v32 = vmax.f32 %v3408_v50, 0.0  ;;  %v13950_v11 = vmul.f32 0.03125, %v3096_v14  ;;  %v13966_v14 = vld [vmem:[%s12781_s19 + $0x1] ss:$0 sm:$0xff] }
 0x499   : > { %v3505_v17 = vadd.f32 1e-05, %v3441_v24  ;;  %v3379_v19 = vmul.f32 %v13948_v60, %v13948_v60 }
 0x49a   : > { %v3504_v5 = vadd.f32 1e-05, %v3440_v32  ;;  %v3259_v56 = vpop.xlane.xlu1 %3258  ;;  %v3378_v29 = vmul.f32 %v13950_v11, %v13950_v11  ;;  %v3472_v32 = vsub.f32 %v13690_v54, %v3184_v30  ;;  %v3475_v30 = vsub.f32 %v13703_v44, %v13948_v60 }
 0x49b   : > { %11842 = vrsqrt.f32 %v3505_v17  ;;  %v3347_v1 = vmul.f32 0.03125, %v3259_v56  ;;  %v3256_v48 = vpop.xlane.xlu0 %3255  ;;  %v3474_v44 = vsub.f32 %v13706_v55, %v13950_v11 }
 0x49c   : > { %11844 = vrsqrt.f32 %v3504_v5  ;;  %v3346_v51 = vmul.f32 0.03125, %v3256_v48 }
 0x49d   : > { %v3411_v40 = vsub.f32 %v3347_v1, %v3379_v19 }
 0x49e   : > { %v3410_v31 = vsub.f32 %v3346_v51, %v3378_v29  ;;  %v3105_v25 = vpop.xlane.xlu1 %3104  ;;  %v13972_v51 = vld [vmem:[%s12789_s26 + $0x1] ss:$0 sm:$0xff] }
 0x49f   : > { %v3443_v53 = vmax.f32 %v3411_v40, 0.0  ;;  %v13956_v3 = vmul.f32 0.03125, %v3105_v25  ;;  %v3102_v43 = vpop.xlane.xlu0 %3101 }
 0x4a0   : > { %v3442_v15 = vmax.f32 %v3410_v31, 0.0  ;;  %v13958_v7 = vmul.f32 0.03125, %v3102_v43 }
 0x4a1   : > { %v3507_v23 = vadd.f32 1e-05, %v3443_v53  ;;  %v3381_v21 = vmul.f32 %v13956_v3, %v13956_v3  ;;  %v3477_v11 = vsub.f32 %v13719_v52, %v13956_v3 }
 0x4a2   : > { %v3506_v0 = vadd.f32 1e-05, %v3442_v15  ;;  %v3265_v16 = vpop.xlane.xlu1 %3264  ;;  %v3380_v50 = vmul.f32 %v13958_v7, %v13958_v7 }
 0x4a3   : > { %11846 = vrsqrt.f32 %v3507_v23  ;;  %v3349_v63 = vmul.f32 0.03125, %v3265_v16  ;;  %v3262_v35 = vpop.xlane.xlu0 %3261 }
 0x4a4   : > { %11848 = vrsqrt.f32 %v3506_v0  ;;  %v3348_v26 = vmul.f32 0.03125, %v3262_v35 }
 0x4a5   : > { %v11843_v24 = vpop.eup %11842  ;;  %v3413_v17 = vsub.f32 %v3349_v63, %v3381_v21 }
 0x4a6   : > { %v11845_v5 = vpop.eup %11844  ;;  %v3569_v56 = vmul.f32 %v11843_v24, %v3473_v39  ;;  %v3412_v19 = vsub.f32 %v3348_v26, %v3380_v50  ;;  %v3111_v1 = vpop.xlane.xlu1 %3110 }
 0x4a7   : > { %v3445_v48 = vmax.f32 %v3413_v17, 0.0  ;;  %v13969_v29 = vmul.f32 0.03125, %v3111_v1  ;;  %v3108_v38 = vpop.xlane.xlu0 %3107  ;;  %v3568_v62 = vmul.f32 %v11845_v5, %v3472_v32 }
 0x4a8   : > { %v3606_v40 = vmul.f32 %v13966_v14, %v3569_v56  ;;  %v3444_v31 = vmax.f32 %v3412_v19, 0.0  ;;  %v13975_v25 = vmul.f32 0.03125, %v3108_v38 }
 0x4a9   : > { %v3509_v53 = vadd.f32 1e-05, %v3445_v48  ;;  %v3605_v54 = vmul.f32 %v13966_v14, %v3568_v62  ;;  %v3383_v0 = vmul.f32 %v13969_v29, %v13969_v29 }
 0x4aa   : > { %v3508_v43 = vadd.f32 1e-05, %v3444_v31  ;;  %v3271_v15 = vpop.xlane.xlu1 %3270  ;;  %v3643_v23 = vadd.f32 %v13972_v51, %v3606_v40  ;;  %v3382_v35 = vmul.f32 %v13975_v25, %v13975_v25 }
 0x4ab   : > { %11850 = vrsqrt.f32 %v3509_v53  ;;  %v3351_v16 = vmul.f32 0.03125, %v3271_v15  ;;  %v3268_v21 = vpop.xlane.xlu0 %3267  ;;  %v3642_v63 = vadd.f32 %v13972_v51, %v3605_v54 }
 0x4ac   : > { %11852 = vrsqrt.f32 %v3508_v43  ;;  %v3350_v39 = vmul.f32 0.03125, %v3268_v21  ;;  %v3675_v50 = vmul.f32 0.2, %v3643_v23 }
 0x4ad   : > { %v11847_v26 = vpop.eup %11846  ;;  %v3415_v60 = vsub.f32 %v3351_v16, %v3383_v0  ;;  %v3674_v24 = vmul.f32 0.2, %v3642_v63 }
 0x4ae   : > { %v11849_v32 = vpop.eup %11848  ;;  %v3414_v17 = vsub.f32 %v3350_v39, %v3382_v35  ;;  %v3117_v5 = vpop.xlane.xlu1 %3116  ;;  %v3571_v56 = vmul.f32 %v11847_v26, %v3475_v30  ;;  %v3707_v53 = vmax.f32 %v3643_v23, %v3675_v50  ;;  %v3476_v50 = vsub.f32 %v13722_v20, %v13958_v7 }
 0x4af   : > { %v3447_v19 = vmax.f32 %v3415_v60, 0.0  ;;  %v13988_v1 = vmul.f32 0.03125, %v3117_v5  ;;  %v3114_v48 = vpop.xlane.xlu0 %3113  ;;  %v3706_v38 = vmax.f32 %v3642_v63, %v3674_v24  ;;  %v3570_v62 = vmul.f32 %v11849_v32, %v3474_v44 }
 0x4b0   : > { %v3446_v40 = vmax.f32 %v3414_v17, 0.0  ;;  %v13990_v31 = vmul.f32 0.03125, %v3114_v48  ;;  %v3608_v54 = vmul.f32 %v13966_v14, %v3571_v56  ;;  %v3479_v7 = vsub.f32 %v13741_v12, %v13969_v29 }
 0x4b1   : > { %v3511_v43 = vadd.f32 1e-05, %v3447_v19  ;;  %10930 = vmatprep.mubr.msk.f32.mxu0 %vm564_vm0, %v3706_v38  ;;  %v3607_v55 = vmul.f32 %v13966_v14, %v3570_v62  ;;  %v3385_v23 = vmul.f32 %v13988_v1, %v13988_v1 }
 0x4b2   : > { %v3510_v30 = vadd.f32 1e-05, %v3446_v40  ;;  %v3277_v15 = vpop.xlane.xlu1 %3276  ;;  %10931 = vmatmul.mubr.msk.f32.vlgmr.msra.gmra.mrb[32].mxu0 %vm564_vm0, %v3707_v53  ;;  %v3645_v0 = vadd.f32 %v13972_v51, %v3608_v54  ;;  %v3384_v35 = vmul.f32 %v13990_v31, %v13990_v31 }
 0x4b3   : > { %11854 = vrsqrt.f32 %v3511_v43  ;;  %v3353_v16 = vmul.f32 0.03125, %v3277_v15  ;;  %v3274_v21 = vpop.xlane.xlu0 %3273  ;;  %v3644_v63 = vadd.f32 %v13972_v51, %v3607_v55 }
 0x4b4   : > { %11856 = vrsqrt.f32 %v3510_v30  ;;  %v3352_v39 = vmul.f32 0.03125, %v3274_v21  ;;  %v3677_v52 = vmul.f32 0.2, %v3645_v0 }
 0x4b5   : > { %v11851_v3 = vpop.eup %11850  ;;  %v3417_v26 = vsub.f32 %v3353_v16, %v3385_v23  ;;  %v3676_v44 = vmul.f32 0.2, %v3644_v63 }
 0x4b6   : > { %v11853_v60 = vpop.eup %11852  ;;  %v3416_v24 = vsub.f32 %v3352_v39, %v3384_v35  ;;  %v3123_v32 = vpop.xlane.xlu1 %3122  ;;  %v3573_v17 = vmul.f32 %v11851_v3, %v3477_v11  ;;  %v3709_v53 = vmax.f32 %v3645_v0, %v3677_v52  ;;  %v3478_v35 = vsub.f32 %v13744_v36, %v13975_v25 }
 0x4b7   : > { %v3449_v5 = vmax.f32 %v3417_v26, 0.0  ;;  %v14006_v56 = vmul.f32 0.03125, %v3123_v32  ;;  %v3120_v19 = vpop.xlane.xlu0 %3119  ;;  %v3708_v48 = vmax.f32 %v3644_v63, %v3676_v44  ;;  %v3572_v38 = vmul.f32 %v11853_v60, %v3476_v50 }
 0x4b8   : > { %v3448_v62 = vmax.f32 %v3416_v24, 0.0  ;;  %v14008_v40 = vmul.f32 0.03125, %v3120_v19  ;;  %v3610_v54 = vmul.f32 %v13966_v14, %v3573_v17  ;;  %v3481_v25 = vsub.f32 %v13757_v59, %v13988_v1 }
 0x4b9   : > { %v3513_v43 = vadd.f32 1e-05, %v3449_v5  ;;  %10933 = vmatprep.mubr.msk.f32.mxu0 %vm564_vm0, %v3708_v48  ;;  %v3609_v20 = vmul.f32 %v13966_v14, %v3572_v38  ;;  %v3387_v15 = vmul.f32 %v14006_v56, %v14006_v56 }
 0x4ba   : > { %v3512_v55 = vadd.f32 1e-05, %v3448_v62  ;;  %v3283_v11 = vpop.xlane.xlu1 %3282  ;;  %10934 = vmatmul.mubr.msk.f32.gmra.mrb[34].mxu0 %vm564_vm0, %v3709_v53  ;;  %v3647_v30 = vadd.f32 %v13972_v51, %v3610_v54  ;;  %v3386_v21 = vmul.f32 %v14008_v40, %v14008_v40 }
 0x4bb   : > { %11858 = vrsqrt.f32 %v3513_v43  ;;  %v3355_v0 = vmul.f32 0.03125, %v3283_v11  ;;  %v3280_v23 = vpop.xlane.xlu0 %3279  ;;  %v3646_v16 = vadd.f32 %v13972_v51, %v3609_v20 }
 0x4bc   : > { %11860 = vrsqrt.f32 %v3512_v55  ;;  %v3354_v63 = vmul.f32 0.03125, %v3280_v23  ;;  %v3679_v12 = vmul.f32 0.2, %v3647_v30  ;;  %v3480_v23 = vsub.f32 %v13760_v58, %v13990_v31 }
 0x4bd   : > { %v11855_v29 = vpop.eup %11854  ;;  %v3419_v39 = vsub.f32 %v3355_v0, %v3387_v15  ;;  %v3678_v52 = vmul.f32 0.2, %v3646_v16  ;;  %v3483_v31 = vsub.f32 %v13773_v18, %v14006_v56 }
 0x4be   : > { %v11857_v3 = vpop.eup %11856  ;;  %v3418_v50 = vsub.f32 %v3354_v63, %v3386_v21  ;;  %v3129_v26 = vpop.xlane.xlu1 %3128  ;;  %v3575_v44 = vmul.f32 %v11855_v29, %v3479_v7  ;;  %v3711_v38 = vmax.f32 %v3647_v30, %v3679_v12 }
 0x4bf   : > { %v3451_v60 = vmax.f32 %v3419_v39, 0.0  ;;  %v14024_v24 = vmul.f32 0.03125, %v3129_v26  ;;  %v3126_v32 = vpop.xlane.xlu0 %3125  ;;  %v3710_v17 = vmax.f32 %v3646_v16, %v3678_v52  ;;  %v3574_v5 = vmul.f32 %v11857_v3, %v3478_v35 }
 0x4c0   : > { %v3450_v19 = vmax.f32 %v3418_v50, 0.0  ;;  %v14026_v48 = vmul.f32 0.03125, %v3126_v32  ;;  %v3612_v62 = vmul.f32 %v13966_v14, %v3575_v44 }
 0x4c1   : > { %v3515_v53 = vadd.f32 1e-05, %v3451_v60  ;;  %10936 = vmatprep.mubr.msk.f32.mxu0 %vm564_vm0, %v3710_v17  ;;  %v3611_v36 = vmul.f32 %v13966_v14, %v3574_v5  ;;  %v3389_v7 = vmul.f32 %v14024_v24, %v14024_v24 }
 0x4c2   : > { %v3514_v54 = vadd.f32 1e-05, %v3450_v19  ;;  %v3289_v43 = vpop.xlane.xlu1 %3288  ;;  %10937 = vmatmul.mubr.msk.f32.gmra.mrb[36].mxu0 %vm564_vm0, %v3711_v38  ;;  %v3649_v20 = vadd.f32 %v13972_v51, %v3612_v62  ;;  %v3388_v15 = vmul.f32 %v14026_v48, %v14026_v48 }
 0x4c3   : > { %11862 = vrsqrt.f32 %v3515_v53  ;;  %v3357_v55 = vmul.f32 0.03125, %v3289_v43  ;;  %v3286_v11 = vpop.xlane.xlu0 %3285  ;;  %v3648_v30 = vadd.f32 %v13972_v51, %v3611_v36 }
 0x4c4   : > { %11864 = vrsqrt.f32 %v3514_v54  ;;  %v3356_v0 = vmul.f32 0.03125, %v3286_v11  ;;  %v3681_v59 = vmul.f32 0.2, %v3649_v20 }
 0x4c5   : > { %v11859_v1 = vpop.eup %11858  ;;  %v3421_v16 = vsub.f32 %v3357_v55, %v3389_v7  ;;  %v3680_v21 = vmul.f32 0.2, %v3648_v30  ;;  %v3482_v7 = vsub.f32 %v13776_v41, %v14008_v40  ;;  %v3485_v40 = vsub.f32 %v13789_v47, %v14024_v24 }
 0x4c6   : > { %v11861_v63 = vpop.eup %11860  ;;  %v3420_v12 = vsub.f32 %v3356_v0, %v3388_v15  ;;  %v3135_v29 = vpop.xlane.xlu1 %3134  ;;  %v3577_v35 = vmul.f32 %v11859_v1, %v3481_v25  ;;  %v3713_v32 = vmax.f32 %v3649_v20, %v3681_v59 }
 0x4c7   : > { %v3453_v39 = vmax.f32 %v3421_v16, 0.0  ;;  %v14042_v52 = vmul.f32 0.03125, %v3135_v29  ;;  %v3132_v3 = vpop.xlane.xlu0 %3131  ;;  %v3712_v50 = vmax.f32 %v3648_v30, %v3680_v21  ;;  %v3576_v26 = vmul.f32 %v11861_v63, %v3480_v23 }
 0x4c8   : > { %v3452_v44 = vmax.f32 %v3420_v12, 0.0  ;;  %v14044_v60 = vmul.f32 0.03125, %v3132_v3  ;;  %v3614_v17 = vmul.f32 %v13966_v14, %v3577_v35 }
 0x4c9   : > { %v3517_v5 = vadd.f32 1e-05, %v3453_v39  ;;  %10939 = vmatprep.mubr.msk.f32.mxu0 %vm564_vm0, %v3712_v50  ;;  %v3613_v58 = vmul.f32 %v13966_v14, %v3576_v26  ;;  %v3391_v53 = vmul.f32 %v14042_v52, %v14042_v52 }
 0x4ca   : > { %v3516_v19 = vadd.f32 1e-05, %v3452_v44  ;;  %v3295_v38 = vpop.xlane.xlu1 %3294  ;;  %10940 = vmatmul.mubr.msk.f32.gmra.mrb[38].mxu0 %vm564_vm0, %v3713_v32  ;;  %v3651_v62 = vadd.f32 %v13972_v51, %v3614_v17  ;;  %v3390_v43 = vmul.f32 %v14044_v60, %v14044_v60 }
 0x4cb   : > { %11866 = vrsqrt.f32 %v3517_v5  ;;  %v3359_v36 = vmul.f32 0.03125, %v3295_v38  ;;  %v3292_v25 = vpop.xlane.xlu0 %3291  ;;  %v3650_v54 = vadd.f32 %v13972_v51, %v3613_v58  ;;  %v3484_v38 = vsub.f32 %v13792_v46, %v14026_v48 }
 0x4cc   : > { %11868 = vrsqrt.f32 %v3516_v19  ;;  %v3358_v20 = vmul.f32 0.03125, %v3292_v25  ;;  %v3683_v18 = vmul.f32 0.2, %v3651_v62  ;;  %v3487_v48 = vsub.f32 %v13805_v42, %v14042_v52 }
 0x4cd   : > { %v11863_v56 = vpop.eup %11862  ;;  %v3423_v55 = vsub.f32 %v3359_v36, %v3391_v53  ;;  %v3682_v11 = vmul.f32 0.2, %v3650_v54 }
 0x4ce   : > { %v11865_v30 = vpop.eup %11864  ;;  %v3422_v15 = vsub.f32 %v3358_v20, %v3390_v43  ;;  %v3141_v0 = vpop.xlane.xlu1 %3140  ;;  %v3579_v59 = vmul.f32 %v11863_v56, %v3483_v31  ;;  %v3715_v35 = vmax.f32 %v3651_v62, %v3683_v18 }
 0x4cf   : > { %v3455_v1 = vmax.f32 %v3423_v55, 0.0  ;;  %v14060_v23 = vmul.f32 0.03125, %v3141_v0  ;;  %v3138_v16 = vpop.xlane.xlu0 %3137  ;;  %v3714_v21 = vmax.f32 %v3650_v54, %v3682_v11  ;;  %v3578_v63 = vmul.f32 %v11865_v30, %v3482_v7 }
 0x4d0   : > { %v3454_v12 = vmax.f32 %v3422_v15, 0.0  ;;  %v14062_v29 = vmul.f32 0.03125, %v3138_v16  ;;  %v3616_v39 = vmul.f32 %v13966_v14, %v3579_v59 }
 0x4d1   : > { %v3519_v3 = vadd.f32 1e-05, %v3455_v1  ;;  %10942 = vmatprep.mubr.msk.f32.mxu0 %vm564_vm0, %v3714_v21  ;;  %v3615_v41 = vmul.f32 %v13966_v14, %v3578_v63  ;;  %v3393_v32 = vmul.f32 %v14060_v23, %v14060_v23 }
 0x4d2   : > { %v3518_v50 = vadd.f32 1e-05, %v3454_v12  ;;  %v3301_v26 = vpop.xlane.xlu1 %3300  ;;  %10943 = vmatmul.mubr.msk.f32.gmra.mrb[40].mxu0 %vm564_vm0, %v3715_v35  ;;  %v3653_v44 = vadd.f32 %v13972_v51, %v3616_v39  ;;  %v3392_v31 = vmul.f32 %v14062_v29, %v14062_v29 }
 0x4d3   : > { %11870 = vrsqrt.f32 %v3519_v3  ;;  %v3361_v17 = vmul.f32 0.03125, %v3301_v26  ;;  %v3298_v5 = vpop.xlane.xlu0 %3297  ;;  %v3652_v58 = vadd.f32 %v13972_v51, %v3615_v41 }
 0x4d4   : > { %11872 = vrsqrt.f32 %v3518_v50  ;;  %v3360_v19 = vmul.f32 0.03125, %v3298_v5  ;;  %v3685_v47 = vmul.f32 0.2, %v3653_v44 }
 0x4d5   : > { %v11867_v24 = vpop.eup %11866  ;;  %v3425_v62 = vsub.f32 %v3361_v17, %v3393_v32  ;;  %v3684_v53 = vmul.f32 0.2, %v3652_v58 }
 0x4d6   : > { %v11869_v36 = vpop.eup %11868  ;;  %v3424_v25 = vsub.f32 %v3360_v19, %v3392_v31  ;;  %v3147_v54 = vpop.xlane.xlu1 %3146  ;;  %v3581_v43 = vmul.f32 %v11867_v24, %v3485_v40  ;;  %v3717_v15 = vmax.f32 %v3653_v44, %v3685_v47  ;;  %v3486_v40 = vsub.f32 %v13808_v57, %v14044_v60 }
 0x4d7   : > { %v3457_v20 = vmax.f32 %v3425_v62, 0.0  ;;  %v14078_v18 = vmul.f32 0.03125, %v3147_v54  ;;  %v3144_v56 = vpop.xlane.xlu0 %3143  ;;  %v3716_v7 = vmax.f32 %v3652_v58, %v3684_v53  ;;  %v3580_v55 = vmul.f32 %v11869_v36, %v3484_v38 }
 0x4d8   : > { %v3456_v11 = vmax.f32 %v3424_v25, 0.0  ;;  %v14080_v30 = vmul.f32 0.03125, %v3144_v56  ;;  %v3618_v0 = vmul.f32 %v13966_v14, %v3581_v43  ;;  %v3489_v60 = vsub.f32 %v13821_v33, %v14060_v23 }
 0x4d9   : > { %v3521_v59 = vadd.f32 1e-05, %v3457_v20  ;;  %10945 = vmatprep.mubr.msk.f32.mxu0 %vm564_vm0, %v3716_v7  ;;  %v3617_v46 = vmul.f32 %v13966_v14, %v3580_v55  ;;  %v3395_v63 = vmul.f32 %v14078_v18, %v14078_v18 }
 0x4da   : > { %v3520_v1 = vadd.f32 1e-05, %v3456_v11  ;;  %v3307_v16 = vpop.xlane.xlu1 %3306  ;;  %10946 = vmatmul.mubr.msk.f32.gmra.mrb[42].mxu0 %vm564_vm0, %v3717_v15  ;;  %v3655_v21 = vadd.f32 %v13972_v51, %v3618_v0  ;;  %v3394_v3 = vmul.f32 %v14080_v30, %v14080_v30 }
 0x4db   : > { %11874 = vrsqrt.f32 %v3521_v59  ;;  %v3363_v12 = vmul.f32 0.03125, %v3307_v16  ;;  %v3304_v35 = vpop.xlane.xlu0 %3303  ;;  %v3654_v39 = vadd.f32 %v13972_v51, %v3617_v46  ;;  %v3488_v59 = vsub.f32 %v13824_v49, %v14062_v29 }
 0x4dc   : > { %11876 = vrsqrt.f32 %v3520_v1  ;;  %v3362_v41 = vmul.f32 0.03125, %v3304_v35  ;;  %v3687_v42 = vmul.f32 0.2, %v3655_v21  ;;  %v3491_v29 = vsub.f32 %v13837_v9, %v14078_v18 }
 0x4dd   : > { %v11871_v52 = vpop.eup %11870  ;;  %v3427_v50 = vsub.f32 %v3363_v12, %v3395_v63  ;;  %v3686_v26 = vmul.f32 0.2, %v3654_v39 }
 0x4de   : > { %v11873_v44 = vpop.eup %11872  ;;  %v3426_v32 = vsub.f32 %v3362_v41, %v3394_v3  ;;  %v3153_v17 = vpop.xlane.xlu1 %3152  ;;  %v3583_v5 = vmul.f32 %v11871_v52, %v3487_v48  ;;  %v3719_v53 = vmax.f32 %v3655_v21, %v3687_v42 }
 0x4df   : > { %v3459_v58 = vmax.f32 %v3427_v50, 0.0  ;;  %v14096_v31 = vmul.f32 0.03125, %v3153_v17  ;;  %v3150_v19 = vpop.xlane.xlu0 %3149  ;;  %v3718_v47 = vmax.f32 %v3654_v39, %v3686_v26  ;;  %v3582_v24 = vmul.f32 %v11873_v44, %v3486_v40 }
 0x4e0   : > { %v3458_v38 = vmax.f32 %v3426_v32, 0.0  ;;  %v14098_v62 = vmul.f32 0.03125, %v3150_v19  ;;  %v3620_v36 = vmul.f32 %v13966_v14, %v3583_v5 }
 0x4e1   : > { %v3523_v25 = vadd.f32 1e-05, %v3459_v58  ;;  %10948 = vmatprep.mubr.msk.f32.mxu0 %vm564_vm0, %v3718_v47  ;;  %v3619_v57 = vmul.f32 %v13966_v14, %v3582_v24  ;;  %v3397_v56 = vmul.f32 %v14096_v31, %v14096_v31 }
 0x4e2   : > { %v3522_v54 = vadd.f32 1e-05, %v3458_v38  ;;  %v3313_v43 = vpop.xlane.xlu1 %3312  ;;  %10949 = vmatmul.mubr.msk.f32.gmra.mrb[44].mxu0 %vm564_vm0, %v3719_v53  ;;  %v3657_v20 = vadd.f32 %v13972_v51, %v3620_v36  ;;  %v3396_v15 = vmul.f32 %v14098_v62, %v14098_v62  ;;  %v3490_v53 = vsub.f32 %v13840_v10, %v14080_v30 }
 0x4e3   : > { %11878 = vrsqrt.f32 %v3523_v25  ;;  %v3365_v7 = vmul.f32 0.03125, %v3313_v43  ;;  %v3310_v55 = vpop.xlane.xlu0 %3309  ;;  %v3656_v11 = vadd.f32 %v13972_v51, %v3619_v57  ;;  %v3493_v30 = vsub.f32 %v13853_v28, %v14096_v31 }
 0x4e4   : > { %11880 = vrsqrt.f32 %v3522_v54  ;;  %v3364_v0 = vmul.f32 0.03125, %v3310_v55  ;;  %v3689_v33 = vmul.f32 0.2, %v3657_v20 }
 0x4e5   : > { %v11875_v23 = vpop.eup %11874  ;;  %v3429_v46 = vsub.f32 %v3365_v7, %v3397_v56  ;;  %v3688_v48 = vmul.f32 0.2, %v3656_v11 }
 0x4e6   : > { %v11877_v1 = vpop.eup %11876  ;;  %v3428_v16 = vsub.f32 %v3364_v0, %v3396_v15  ;;  %v3159_v21 = vpop.xlane.xlu1 %3158  ;;  %v3585_v63 = vmul.f32 %v11875_v23, %v3489_v60  ;;  %v3721_v40 = vmax.f32 %v3657_v20, %v3689_v33 }
 0x4e7   : > { %v3461_v12 = vmax.f32 %v3429_v46, 0.0  ;;  %v14114_v35 = vmul.f32 0.03125, %v3159_v21  ;;  %v3156_v39 = vpop.xlane.xlu0 %3155  ;;  %v3720_v3 = vmax.f32 %v3656_v11, %v3688_v48  ;;  %v3584_v41 = vmul.f32 %v11877_v1, %v3488_v59 }
 0x4e8   : > { %v3460_v42 = vmax.f32 %v3428_v16, 0.0  ;;  %v14116_v52 = vmul.f32 0.03125, %v3156_v39  ;;  %v3622_v50 = vmul.f32 %v13966_v14, %v3585_v63 }
 0x4e9   : > { %v3525_v26 = vadd.f32 1e-05, %v3461_v12  ;;  %10951 = vmatprep.mubr.msk.f32.mxu0 %vm564_vm0, %v3720_v3  ;;  %v3621_v49 = vmul.f32 %v13966_v14, %v3584_v41  ;;  %v3399_v5 = vmul.f32 %v14114_v35, %v14114_v35  ;;  %v3492_v41 = vsub.f32 %v13856_v37, %v14098_v62 }
 0x4ea   : > { %v3524_v44 = vadd.f32 1e-05, %v3460_v42  ;;  %v3319_v32 = vpop.xlane.xlu1 %3318  ;;  %10952 = vmatmul.mubr.msk.f32.gmra.mrb[46].mxu0 %vm564_vm0, %v3721_v40  ;;  %v3659_v17 = vadd.f32 %v13972_v51, %v3622_v50  ;;  %v3398_v24 = vmul.f32 %v14116_v52, %v14116_v52  ;;  %v3495_v62 = vsub.f32 %v13869_v27, %v14114_v35 }
 0x4eb   : > { %11882 = vrsqrt.f32 %v3525_v26  ;;  %v3367_v58 = vmul.f32 0.03125, %v3319_v32  ;;  %v3316_v19 = vpop.xlane.xlu0 %3315  ;;  %v3658_v47 = vadd.f32 %v13972_v51, %v3621_v49 }
 0x4ec   : > { %11884 = vrsqrt.f32 %v3524_v44  ;;  %v3366_v38 = vmul.f32 0.03125, %v3316_v19  ;;  %v3691_v9 = vmul.f32 0.2, %v3659_v17 }
 0x4ed   : > { %v11879_v18 = vpop.eup %11878  ;;  %v3431_v36 = vsub.f32 %v3367_v58, %v3399_v5  ;;  %v3690_v25 = vmul.f32 0.2, %v3658_v47 }
 0x4ee   : > { %v11881_v57 = vpop.eup %11880  ;;  %v3430_v60 = vsub.f32 %v3366_v38, %v3398_v24  ;;  %v3165_v54 = vpop.xlane.xlu1 %3164  ;;  %v3587_v43 = vmul.f32 %v11879_v18, %v3491_v29  ;;  %v3723_v33 = vmax.f32 %v3659_v17, %v3691_v9 }
 0x4ef   : > { %v3463_v20 = vmax.f32 %v3431_v36, 0.0  ;;  %v14132_v56 = vmul.f32 0.03125, %v3165_v54  ;;  %v3162_v7 = vpop.xlane.xlu0 %3161  ;;  %v3722_v55 = vmax.f32 %v3658_v47, %v3690_v25  ;;  %v3586_v11 = vmul.f32 %v11881_v57, %v3490_v53 }
 0x4f0   : > { %v3462_v15 = vmax.f32 %v3430_v60, 0.0  ;;  %v14134_v0 = vmul.f32 0.03125, %v3162_v7  ;;  %v3624_v23 = vmul.f32 %v13966_v14, %v3587_v43  ;;  %v3494_v7 = vsub.f32 %v13872_v34, %v14116_v52 }
 0x4f1   : > { %v3527_v59 = vadd.f32 1e-05, %v3463_v20  ;;  %10954 = vmatprep.mubr.msk.f32.mxu0 %vm564_vm0, %v3722_v55  ;;  %v3623_v10 = vmul.f32 %v13966_v14, %v3586_v11  ;;  %v3401_v16 = vmul.f32 %v14132_v56, %v14132_v56  ;;  %v3497_v52 = vsub.f32 %v13885_v45, %v14132_v56 }
 0x4f2   : > { %v3526_v46 = vadd.f32 1e-05, %v3462_v15  ;;  %v3325_v48 = vpop.xlane.xlu1 %3324  ;;  %10955 = vmatmul.mubr.msk.f32.gmra.mrb[48].mxu0 %vm564_vm0, %v3723_v33  ;;  %v3661_v1 = vadd.f32 %v13972_v51, %v3624_v23  ;;  %v3400_v39 = vmul.f32 %v14134_v0, %v14134_v0 }
 0x4f3   : > { %11886 = vrsqrt.f32 %v3527_v59  ;;  %v3369_v21 = vmul.f32 0.03125, %v3325_v48  ;;  %v3322_v63 = vpop.xlane.xlu0 %3321  ;;  %v3660_v12 = vadd.f32 %v13972_v51, %v3623_v10 }
 0x4f4   : > { %11888 = vrsqrt.f32 %v3526_v46  ;;  %v3368_v3 = vmul.f32 0.03125, %v3322_v63  ;;  %v3693_v28 = vmul.f32 0.2, %v3661_v1 }
 0x4f5   : > { %v11883_v31 = vpop.eup %11882  ;;  %v3433_v42 = vsub.f32 %v3369_v21, %v3401_v16  ;;  %v3692_v40 = vmul.f32 0.2, %v3660_v12 }
 0x4f6   : > { %v11885_v50 = vpop.eup %11884  ;;  %v3432_v26 = vsub.f32 %v3368_v3, %v3400_v39  ;;  %v3171_v49 = vpop.xlane.xlu1 %3170  ;;  %v3589_v29 = vmul.f32 %v11883_v31, %v3493_v30  ;;  %v3725_v24 = vmax.f32 %v3661_v1, %v3693_v28 }
 0x4f7   : > { %v3465_v44 = vmax.f32 %v3433_v42, 0.0  ;;  %v14150_v32 = vmul.f32 0.03125, %v3171_v49  ;;  %v3168_v17 = vpop.xlane.xlu0 %3167  ;;  %v3724_v5 = vmax.f32 %v3660_v12, %v3692_v40  ;;  %v3588_v58 = vmul.f32 %v11885_v50, %v3492_v41 }
 0x4f8   : > { %v3464_v19 = vmax.f32 %v3432_v26, 0.0  ;;  %v14152_v47 = vmul.f32 0.03125, %v3168_v17  ;;  %v3626_v38 = vmul.f32 %v13966_v14, %v3589_v29  ;;  %v3496_v29 = vsub.f32 %v13888_v2, %v14134_v0 }
 0x4f9   : > { %v3529_v9 = vadd.f32 1e-05, %v3465_v44  ;;  %10957 = vmatprep.mubr.msk.f32.mxu0 %vm564_vm0, %v3724_v5  ;;  %v3625_v37 = vmul.f32 %v13966_v14, %v3588_v58  ;;  %v3403_v25 = vmul.f32 %v14150_v32, %v14150_v32  ;;  %v3499_v0 = vsub.f32 %v13901_v22, %v14150_v32 }
 0x4fa   : > { %v3528_v18 = vadd.f32 1e-05, %v3464_v19  ;;  %v3331_v53 = vpop.xlane.xlu1 %3330  ;;  %10958 = vmatmul.mubr.msk.f32.gmra.mrb[50].mxu0 %vm564_vm0, %v3725_v24  ;;  %v3663_v36 = vadd.f32 %v13972_v51, %v3626_v38  ;;  %v3402_v43 = vmul.f32 %v14152_v47, %v14152_v47 }
 0x4fb   : > { %11890 = vrsqrt.f32 %v3529_v9  ;;  %v3371_v57 = vmul.f32 0.03125, %v3331_v53  ;;  %v3328_v60 = vpop.xlane.xlu0 %3327  ;;  %v3662_v54 = vadd.f32 %v13972_v51, %v3625_v37 }
 0x4fc   : > { %11892 = vrsqrt.f32 %v3528_v18  ;;  %v3370_v20 = vmul.f32 0.03125, %v3328_v60  ;;  %v3695_v27 = vmul.f32 0.2, %v3663_v36 }
 0x4fd   : > { %v11887_v35 = vpop.eup %11886  ;;  %v3435_v55 = vsub.f32 %v3371_v57, %v3403_v25  ;;  %v3694_v11 = vmul.f32 0.2, %v3662_v54 }
 0x4fe   : > { %v11889_v15 = vpop.eup %11888  ;;  %v3434_v33 = vsub.f32 %v3370_v20, %v3402_v43  ;;  %v3177_v23 = vpop.xlane.xlu1 %3176  ;;  %v3591_v59 = vmul.f32 %v11887_v35, %v3495_v62  ;;  %v3727_v63 = vmax.f32 %v3663_v36, %v3695_v27 }
 0x4ff   : > { %v3467_v10 = vmax.f32 %v3435_v55, 0.0  ;;  %v14168_v30 = vmul.f32 0.03125, %v3177_v23  ;;  %v3174_v46 = vpop.xlane.xlu0 %3173  ;;  %v3726_v48 = vmax.f32 %v3662_v54, %v3694_v11  ;;  %v3590_v1 = vmul.f32 %v11889_v15, %v3494_v7 }
 0x500   : > { %v3466_v16 = vmax.f32 %v3434_v33, 0.0  ;;  %v14170_v21 = vmul.f32 0.03125, %v3174_v46  ;;  %v3628_v12 = vmul.f32 %v13966_v14, %v3591_v59  ;;  %v3498_v33 = vsub.f32 %v13904_v8, %v14152_v47 }
 0x501   : > { %v3531_v39 = vadd.f32 1e-05, %v3467_v10  ;;  %10960 = vmatprep.mubr.msk.f32.mxu0 %vm564_vm0, %v3726_v48  ;;  %v3627_v34 = vmul.f32 %v13966_v14, %v3590_v1  ;;  %v3405_v41 = vmul.f32 %v14168_v30, %v14168_v30 }
 0x502   : > { %v3530_v3 = vadd.f32 1e-05, %v3466_v16  ;;  %v3337_v28 = vpop.xlane.xlu1 %3336  ;;  %10961 = vmatmul.mubr.msk.f32.gmra.mrb[52].mxu0 %vm564_vm0, %v3727_v63  ;;  %v3665_v31 = vadd.f32 %v13972_v51, %v3628_v12  ;;  %v3404_v26 = vmul.f32 %v14170_v21, %v14170_v21 }
 0x503   : > { %11894 = vrsqrt.f32 %v3531_v39  ;;  %v3373_v42 = vmul.f32 0.03125, %v3337_v28  ;;  %v3334_v40 = vpop.xlane.xlu0 %3333  ;;  %v3664_v50 = vadd.f32 %v13972_v51, %v3627_v34 }
 0x504   : > { %11896 = vrsqrt.f32 %v3530_v3  ;;  %v3372_v49 = vmul.f32 0.03125, %v3334_v40  ;;  %v3697_v45 = vmul.f32 0.2, %v3665_v31  ;;  %v3500_v40 = vsub.f32 %v13920_v4, %v14170_v21 }
 0x505   : > { %v11891_v56 = vpop.eup %11890  ;;  %v3437_v44 = vsub.f32 %v3373_v42, %v3405_v41  ;;  %v3696_v17 = vmul.f32 0.2, %v3664_v50 }
 0x506   : > { %v11893_v5 = vpop.eup %11892  ;;  %v3436_v58 = vsub.f32 %v3372_v49, %v3404_v26  ;;  %v3183_v19 = vpop.xlane.xlu1 %3182  ;;  %v3593_v24 = vmul.f32 %v11891_v56, %v3497_v52  ;;  %v3729_v25 = vmax.f32 %v3665_v31, %v3697_v45  ;;  %v3501_v31 = vsub.f32 %v13917_v13, %v14168_v30 }
 0x507   : > { %v3469_v38 = vmax.f32 %v3437_v44, 0.0  ;;  %v14186_v9 = vmul.f32 0.03125, %v3183_v19  ;;  %v3180_v37 = vpop.xlane.xlu0 %3179  ;;  %v3728_v62 = vmax.f32 %v3664_v50, %v3696_v17  ;;  %v3592_v18 = vmul.f32 %v11893_v5, %v3496_v29 }
 0x508   : > { %v3468_v53 = vmax.f32 %v3436_v58, 0.0  ;;  %v14188_v36 = vmul.f32 0.03125, %v3180_v37  ;;  %v3630_v57 = vmul.f32 %v13966_v14, %v3593_v24 }
 0x509   : > { %v3533_v60 = vadd.f32 1e-05, %v3469_v38  ;;  %10963 = vmatprep.mubr.msk.f32.mxu0 %vm564_vm0, %v3728_v62  ;;  %v3629_v2 = vmul.f32 %v13966_v14, %v3592_v18  ;;  %v3407_v27 = vmul.f32 %v14186_v9, %v14186_v9  ;;  %v3503_v4 = vsub.f32 %v13933_v61, %v14186_v9 }
 0x50a   : > { %v3532_v54 = vadd.f32 1e-05, %v3468_v53  ;;  %v3343_v43 = vpop.xlane.xlu1 %3342  ;;  %10964 = vmatmul.mubr.msk.f32.gmra.mrb[54].mxu0 %vm564_vm0, %v3729_v25  ;;  %v3667_v20 = vadd.f32 %v13972_v51, %v3630_v57  ;;  %v3406_v11 = vmul.f32 %v14188_v36, %v14188_v36  ;;  %v3502_v58 = vsub.f32 %v13936_v6, %v14188_v36 }
 0x50b   : > { %11898 = vrsqrt.f32 %v3533_v60  ;;  %v3375_v35 = vmul.f32 0.03125, %v3343_v43  ;;  %v3340_v7 = vpop.xlane.xlu0 %3339  ;;  %v3666_v55 = vadd.f32 %v13972_v51, %v3629_v2  ;;  %v10026_v2 = vld [vmem:[%s17388_s2 + $0x20] sm:$0xff] }
 0x50c   : > { %11900 = vrsqrt.f32 %v3532_v54  ;;  %v3374_v15 = vmul.f32 0.03125, %v3340_v7  ;;  %v3699_v22 = vmul.f32 0.2, %v3667_v20 }
 0x50d   : > { %v11895_v32 = vpop.eup %11894  ;;  %v3439_v23 = vsub.f32 %v3375_v35, %v3407_v27  ;;  %v3698_v59 = vmul.f32 0.2, %v3666_v55 }
 0x50e   : > { %v11897_v10 = vpop.eup %11896  ;;  %v3438_v46 = vsub.f32 %v3374_v15, %v3406_v11  ;;  %v3595_v48 = vmul.f32 %v11895_v32, %v3499_v0  ;;  %v3731_v39 = vmax.f32 %v3667_v20, %v3699_v22 }
 0x50f   : > { %v3471_v1 = vmax.f32 %v3439_v23, 0.0  ;;  %v3730_v16 = vmax.f32 %v3666_v55, %v3698_v59  ;;  %v3594_v63 = vmul.f32 %v11897_v10, %v3498_v33 }
 0x510   : > { %v3470_v12 = vmax.f32 %v3438_v46, 0.0  ;;  %v3632_v34 = vmul.f32 %v13966_v14, %v3595_v48 }
 0x511   : > { %v3535_v52 = vadd.f32 1e-05, %v3471_v1  ;;  %10966 = vmatprep.mubr.msk.f32.mxu0 %vm564_vm0, %v3730_v16  ;;  %v3631_v3 = vmul.f32 %v13966_v14, %v3594_v63 }
 0x512   : > { %v3534_v28 = vadd.f32 1e-05, %v3470_v12  ;;  %10967 = vmatmul.mubr.msk.f32.gmra.mrb[56].mxu0 %vm564_vm0, %v3731_v39  ;;  %v3669_v8 = vadd.f32 %v13972_v51, %v3632_v34 }
 0x513   : > { %11902 = vrsqrt.f32 %v3535_v52  ;;  %v3668_v47 = vadd.f32 %v13972_v51, %v3631_v3 }
 0x514   : > { %11904 = vrsqrt.f32 %v3534_v28  ;;  %v3701_v41 = vmul.f32 0.2, %v3669_v8 }
 0x515   : > { %v11899_v42 = vpop.eup %11898  ;;  %v3700_v50 = vmul.f32 0.2, %v3668_v47 }
 0x516   : > { %v11901_v26 = vpop.eup %11900  ;;  %v3597_v49 = vmul.f32 %v11899_v42, %v3501_v31  ;;  %v3733_v29 = vmax.f32 %v3669_v8, %v3701_v41  ;;  %v10028_v31 = vld [vmem:[%s17388_s2 + $0x30] sm:$0xff]  ;;  %v10029_v41 = vld [vmem:[%s17388_s2 + $0x38] sm:$0xff] }
 0x517   : > { %v3732_v45 = vmax.f32 %v3668_v47, %v3700_v50  ;;  %v3596_v56 = vmul.f32 %v11901_v26, %v3500_v40  ;;  %v11422_v42 = vpack.c.bf16 %v10029_v41, %v10028_v31 }
 0x518   : > { %v3634_v44 = vmul.f32 %v13966_v14, %v3597_v49 }
 0x519   : > { %10969 = vmatprep.mubr.msk.f32.mxu0 %vm564_vm0, %v3732_v45  ;;  %v3633_v17 = vmul.f32 %v13966_v14, %v3596_v56 }
 0x51a   : > { %10970 = vmatmul.mubr.msk.f32.gmra.mrb[58].mxu0 %vm564_vm0, %v3733_v29  ;;  %v3671_v13 = vadd.f32 %v13972_v51, %v3634_v44 }
 0x51b   : > { %v3670_v30 = vadd.f32 %v13972_v51, %v3633_v17 }
 0x51c   : > { %v3703_v21 = vmul.f32 0.2, %v3671_v13 }
 0x51d   : > { %v11903_v5 = vpop.eup %11902  ;;  %v3702_v19 = vmul.f32 0.2, %v3670_v30 }
 0x51e   : > { %v11905_v24 = vpop.eup %11904  ;;  %v3599_v38 = vmul.f32 %v11903_v5, %v3503_v4  ;;  %v3735_v18 = vmax.f32 %v3671_v13, %v3703_v21 }
 0x51f   : > { %v3734_v37 = vmax.f32 %v3670_v30, %v3702_v19  ;;  %v3598_v62 = vmul.f32 %v11905_v24, %v3502_v58 }
 0x520   : > { %v3636_v53 = vmul.f32 %v13966_v14, %v3599_v38 }
 0x521   : > { %10972 = vmatprep.mubr.msk.f32.mxu0 %vm564_vm0, %v3734_v37  ;;  %v3635_v25 = vmul.f32 %v13966_v14, %v3598_v62  ;;  %v10027_v14 = vld [vmem:[%s17388_s2 + $0x28] sm:$0xff] }
 0x522   : > { %10973 = vmatmul.mubr.msk.f32.gmra.mrb[60].mxu0 %vm564_vm0, %v3735_v18  ;;  %v3673_v61 = vadd.f32 %v13972_v51, %v3636_v53  ;;  %v11418_v0 = vpack.c.bf16 %v10027_v14, %v10026_v2  ;;  %v9989_v2 = vld [vmem:[%s17392_s6 + $0x28] sm:$0xff] }
 0x523   : > { %v3672_v9 = vadd.f32 %v13972_v51, %v3635_v25  ;;  %v14241_v51 = vld [vmem:[%s17391_s5 + $0x1] ss:$0 sm:$0xff] }
 0x524   : > { %v3705_v57 = vmul.f32 0.2, %v3673_v61  ;;  %11419 = vmatprep.subr.bf16.mxu1 %v11418_v0 }
 0x525   : > { %v3704_v6 = vmul.f32 0.2, %v3672_v9  ;;  %11421 = vmatpush3.bf16.msra.mxu1 %v11418_v0 }
 0x526   : > { %v3737_v60 = vmax.f32 %v3673_v61, %v3705_v57  ;;  %11423 = vmatprep.subr.bf16.mxu1 %v11422_v42 }
 0x527   : > { %v3736_v36 = vmax.f32 %v3672_v9, %v3704_v6 }
 0x529   : > { %10975 = vmatprep.mubr.msk.f32.mxu0 %vm564_vm0, %v3736_v36  ;;  %11425 = vmatpush3.bf16.msra.mxu1 %v11422_v42 }
 0x52a   : > { %10976 = vmatmul.mubr.msk.f32.gmra.mrb[62].mxu0 %vm564_vm0, %v3737_v60  ;;  %v9988_v60 = vld [vmem:[%s17392_s6 + $0x20] sm:$0xff] }
 0x585   : > { %v10932_v54 = vpop.f32.mrb[32].mxu0 }
 0x586   : > { %v14244_v43 = vadd.f32 %v10932_v54, %v14241_v51  ;;  %v3913_v20 = vpop.f32.mrb[33].mxu0  ;;  %v11410_v54 = vpack.c.bf16 %v9989_v2, %v9988_v60 }
 0x587   : > { %v14247_v27 = vadd.f32 %v14241_v51, %v3913_v20 }
 0x588   : > { %v4075_v35 = vsel %vm564_vm0, %v14244_v43, 0.0  ;;  %v4201_v7 = vmul.f32 %v14244_v43, %v14244_v43  ;;  %11411 = vmatprep.subr.bf16.mxu0 %v11410_v54 }
 0x589   : > { %4076 = vadd.xlane.f32.xlu1 %v4075_v35  ;;  %v4072_v55 = vsel %vm564_vm0, %v14247_v27, 0.0  ;;  %v4200_v11 = vmul.f32 %v14247_v27, %v14247_v27  ;;  %11413 = vmatpush3.bf16.msra.mxu0 %v11410_v54  ;;  %v9990_v35 = vld [vmem:[%s17392_s6 + $0x30] sm:$0xff] }
 0x58a   : > { %4073 = vadd.xlane.f32.xlu0 %v4072_v55  ;;  %v4235_v15 = vsel %vm564_vm0, %v4201_v7, 0.0  ;;  %v9991_v7 = vld [vmem:[%s17392_s6 + $0x38] sm:$0xff] }
 0x58b   : > { %v4232_v32 = vsel %vm564_vm0, %v4200_v11, 0.0 }
 0x58d   : > { %4236 = vadd.xlane.f32.xlu1 %v4235_v15  ;;  %v10935_v22 = vpop.f32.mrb[34].mxu0  ;;  %v11414_v15 = vpack.c.bf16 %v9991_v7, %v9990_v35 }
 0x58e   : > { %v14260_v33 = vadd.f32 %v10935_v22, %v14241_v51  ;;  %4233 = vadd.xlane.f32.xlu0 %v4232_v32  ;;  %v3923_v23 = vpop.f32.mrb[35].mxu0 }
 0x58f   : > { %v14263_v59 = vadd.f32 %v14241_v51, %v3923_v23  ;;  %11415 = vmatprep.subr.bf16.mxu0 %v11414_v15 }
 0x590   : > { %v4081_v10 = vsel %vm564_vm0, %v14260_v33, 0.0  ;;  %v4203_v46 = vmul.f32 %v14260_v33, %v14260_v33  ;;  %11417 = vmatpush3.bf16.msra.mxu0 %v11414_v15 }
 0x591   : > { %4082 = vadd.xlane.f32.xlu1 %v4081_v10  ;;  %v4078_v48 = vsel %vm564_vm0, %v14263_v59, 0.0  ;;  %v4202_v1 = vmul.f32 %v14263_v59, %v14263_v59 }
 0x592   : > { %4079 = vadd.xlane.f32.xlu0 %v4078_v48  ;;  %v4241_v16 = vsel %vm564_vm0, %v4203_v46, 0.0 }
 0x593   : > { %v4238_v12 = vsel %vm564_vm0, %v4202_v1, 0.0 }
 0x595   : > { %4242 = vadd.xlane.f32.xlu1 %v4241_v16  ;;  %v10938_v63 = vpop.f32.mrb[36].mxu0 }
 0x596   : > { %v14276_v39 = vadd.f32 %v10938_v63, %v14241_v51  ;;  %4239 = vadd.xlane.f32.xlu0 %v4238_v12  ;;  %v3933_v34 = vpop.f32.mrb[37].mxu0 }
 0x597   : > { %v14279_v52 = vadd.f32 %v14241_v51, %v3933_v34 }
 0x598   : > { %v4087_v3 = vsel %vm564_vm0, %v14276_v39, 0.0  ;;  %v4205_v28 = vmul.f32 %v14276_v39, %v14276_v39 }
 0x599   : > { %4088 = vadd.xlane.f32.xlu1 %v4087_v3  ;;  %v4084_v8 = vsel %vm564_vm0, %v14279_v52, 0.0  ;;  %v4204_v47 = vmul.f32 %v14279_v52, %v14279_v52 }
 0x59a   : > { %4085 = vadd.xlane.f32.xlu0 %v4084_v8  ;;  %v4247_v40 = vsel %vm564_vm0, %v4205_v28, 0.0 }
 0x59b   : > { %v4244_v26 = vsel %vm564_vm0, %v4204_v47, 0.0 }
 0x59d   : > { %4248 = vadd.xlane.f32.xlu1 %v4247_v40  ;;  %v10941_v50 = vpop.f32.mrb[38].mxu0 }
 0x59e   : > { %v14298_v49 = vadd.f32 %v10941_v50, %v14241_v51  ;;  %4245 = vadd.xlane.f32.xlu0 %v4244_v26  ;;  %v3943_v45 = vpop.f32.mrb[39].mxu0 }
 0x59f   : > { %v14301_v56 = vadd.f32 %v14241_v51, %v3943_v45 }
 0x5a0   : > { %v4093_v29 = vsel %vm564_vm0, %v14298_v49, 0.0  ;;  %v4207_v44 = vmul.f32 %v14298_v49, %v14298_v49 }
 0x5a1   : > { %4094 = vadd.xlane.f32.xlu1 %v4093_v29  ;;  %v4090_v17 = vsel %vm564_vm0, %v14301_v56, 0.0  ;;  %v4206_v13 = vmul.f32 %v14301_v56, %v14301_v56 }
 0x5a2   : > { %4091 = vadd.xlane.f32.xlu0 %v4090_v17  ;;  %v4253_v30 = vsel %vm564_vm0, %v4207_v44, 0.0 }
 0x5a3   : > { %v4250_v21 = vsel %vm564_vm0, %v4206_v13, 0.0 }
 0x5a5   : > { %4254 = vadd.xlane.f32.xlu1 %v4253_v30  ;;  %v10944_v4 = vpop.f32.mrb[40].mxu0 }
 0x5a6   : > { %v14314_v5 = vadd.f32 %v10944_v4, %v14241_v51  ;;  %4251 = vadd.xlane.f32.xlu0 %v4250_v21  ;;  %v3953_v58 = vpop.f32.mrb[41].mxu0 }
 0x5a7   : > { %v14317_v19 = vadd.f32 %v14241_v51, %v3953_v58 }
 0x5a8   : > { %v4099_v24 = vsel %vm564_vm0, %v14314_v5, 0.0  ;;  %v4209_v38 = vmul.f32 %v14314_v5, %v14314_v5 }
 0x5a9   : > { %4100 = vadd.xlane.f32.xlu1 %v4099_v24  ;;  %v4096_v37 = vsel %vm564_vm0, %v14317_v19, 0.0  ;;  %v4208_v62 = vmul.f32 %v14317_v19, %v14317_v19 }
 0x5aa   : > { %4097 = vadd.xlane.f32.xlu0 %v4096_v37  ;;  %v4259_v18 = vsel %vm564_vm0, %v4209_v38, 0.0 }
 0x5ab   : > { %v4256_v25 = vsel %vm564_vm0, %v4208_v62, 0.0 }
 0x5ad   : > { %4260 = vadd.xlane.f32.xlu1 %v4259_v18  ;;  %v10947_v53 = vpop.f32.mrb[42].mxu0 }
 0x5ae   : > { %v14330_v61 = vadd.f32 %v10947_v53, %v14241_v51  ;;  %4257 = vadd.xlane.f32.xlu0 %v4256_v25  ;;  %v3963_v9 = vpop.f32.mrb[43].mxu0 }
 0x5af   : > { %v14333_v57 = vadd.f32 %v14241_v51, %v3963_v9 }
 0x5b0   : > { %v4105_v6 = vsel %vm564_vm0, %v14330_v61, 0.0  ;;  %v4211_v36 = vmul.f32 %v14330_v61, %v14330_v61 }
 0x5b1   : > { %4106 = vadd.xlane.f32.xlu1 %v4105_v6  ;;  %v4102_v14 = vsel %vm564_vm0, %v14333_v57, 0.0  ;;  %v4210_v0 = vmul.f32 %v14333_v57, %v14333_v57 }
 0x5b2   : > { %4103 = vadd.xlane.f32.xlu0 %v4102_v14  ;;  %v4265_v20 = vsel %vm564_vm0, %v4211_v36, 0.0 }
 0x5b3   : > { %v4262_v11 = vsel %vm564_vm0, %v4210_v0, 0.0 }
 0x5b5   : > { %4266 = vadd.xlane.f32.xlu1 %v4265_v20  ;;  %v10950_v55 = vpop.f32.mrb[44].mxu0 }
 0x5b6   : > { %v14358_v22 = vadd.f32 %v10950_v55, %v14241_v51  ;;  %4263 = vadd.xlane.f32.xlu0 %v4262_v11  ;;  %v3973_v32 = vpop.f32.mrb[45].mxu0 }
 0x5b7   : > { %v14361_v23 = vadd.f32 %v14241_v51, %v3973_v32 }
 0x5b8   : > { %v4111_v10 = vsel %vm564_vm0, %v14358_v22, 0.0  ;;  %v4213_v46 = vmul.f32 %v14358_v22, %v14358_v22 }
 0x5b9   : > { %4112 = vadd.xlane.f32.xlu1 %v4111_v10  ;;  %v4108_v48 = vsel %vm564_vm0, %v14361_v23, 0.0  ;;  %v4212_v1 = vmul.f32 %v14361_v23, %v14361_v23 }
 0x5ba   : > { %4109 = vadd.xlane.f32.xlu0 %v4108_v48  ;;  %v4271_v16 = vsel %vm564_vm0, %v4213_v46, 0.0 }
 0x5bb   : > { %v4268_v12 = vsel %vm564_vm0, %v4212_v1, 0.0 }
 0x5bd   : > { %4272 = vadd.xlane.f32.xlu1 %v4271_v16  ;;  %v10953_v63 = vpop.f32.mrb[46].mxu0 }
 0x5be   : > { %v14374_v34 = vadd.f32 %v10953_v63, %v14241_v51  ;;  %4269 = vadd.xlane.f32.xlu0 %v4268_v12  ;;  %v3983_v3 = vpop.f32.mrb[47].mxu0 }
 0x5bf   : > { %v14377_v28 = vadd.f32 %v14241_v51, %v3983_v3 }
 0x5c0   : > { %v4117_v8 = vsel %vm564_vm0, %v14374_v34, 0.0  ;;  %v4215_v47 = vmul.f32 %v14374_v34, %v14374_v34 }
 0x5c1   : > { %4118 = vadd.xlane.f32.xlu1 %v4117_v8  ;;  %v4114_v31 = vsel %vm564_vm0, %v14377_v28, 0.0  ;;  %v4214_v41 = vmul.f32 %v14377_v28, %v14377_v28 }
 0x5c2   : > { %4115 = vadd.xlane.f32.xlu0 %v4114_v31  ;;  %v4277_v42 = vsel %vm564_vm0, %v4215_v47, 0.0 }
 0x5c3   : > { %v4274_v50 = vsel %vm564_vm0, %v4214_v41, 0.0 }
 0x5c5   : > { %4278 = vadd.xlane.f32.xlu1 %v4277_v42  ;;  %v10956_v40 = vpop.f32.mrb[48].mxu0 }
 0x5c6   : > { %v14390_v26 = vadd.f32 %v10956_v40, %v14241_v51  ;;  %4275 = vadd.xlane.f32.xlu0 %v4274_v50  ;;  %v3993_v45 = vpop.f32.mrb[49].mxu0 }
 0x5c7   : > { %v14393_v29 = vadd.f32 %v14241_v51, %v3993_v45 }
 0x5c8   : > { %v4123_v44 = vsel %vm564_vm0, %v14390_v26, 0.0  ;;  %v4217_v17 = vmul.f32 %v14390_v26, %v14390_v26 }
 0x5c9   : > { %4124 = vadd.xlane.f32.xlu1 %v4123_v44  ;;  %v4120_v13 = vsel %vm564_vm0, %v14393_v29, 0.0  ;;  %v4216_v30 = vmul.f32 %v14393_v29, %v14393_v29 }
 0x5ca   : > { %4121 = vadd.xlane.f32.xlu0 %v4120_v13  ;;  %v4283_v4 = vsel %vm564_vm0, %v4217_v17, 0.0 }
 0x5cb   : > { %v4280_v58 = vsel %vm564_vm0, %v4216_v30, 0.0 }
 0x5cd   : > { %4284 = vadd.xlane.f32.xlu1 %v4283_v4  ;;  %v10959_v21 = vpop.f32.mrb[50].mxu0 }
 0x5ce   : > { %v14406_v24 = vadd.f32 %v10959_v21, %v14241_v51  ;;  %4281 = vadd.xlane.f32.xlu0 %v4280_v58  ;;  %v4003_v38 = vpop.f32.mrb[51].mxu0 }
 0x5cf   : > { %v14409_v37 = vadd.f32 %v14241_v51, %v4003_v38 }
 0x5d0   : > { %v4129_v62 = vsel %vm564_vm0, %v14406_v24, 0.0  ;;  %v4219_v18 = vmul.f32 %v14406_v24, %v14406_v24 }
 0x5d1   : > { %4130 = vadd.xlane.f32.xlu1 %v4129_v62  ;;  %v4126_v53 = vsel %vm564_vm0, %v14409_v37, 0.0  ;;  %v4218_v25 = vmul.f32 %v14409_v37, %v14409_v37 }
 0x5d2   : > { %4127 = vadd.xlane.f32.xlu0 %v4126_v53  ;;  %v4289_v9 = vsel %vm564_vm0, %v4219_v18, 0.0 }
 0x5d3   : > { %v4286_v36 = vsel %vm564_vm0, %v4218_v25, 0.0 }
 0x5d5   : > { %4290 = vadd.xlane.f32.xlu1 %v4289_v9  ;;  %v10962_v6 = vpop.f32.mrb[52].mxu0 }
 0x5d6   : > { %v14422_v60 = vadd.f32 %v10962_v6, %v14241_v51  ;;  %4287 = vadd.xlane.f32.xlu0 %v4286_v36  ;;  %v4013_v2 = vpop.f32.mrb[53].mxu0 }
 0x5d7   : > { %v14425_v14 = vadd.f32 %v14241_v51, %v4013_v2 }
 0x5d8   : > { %v4135_v0 = vsel %vm564_vm0, %v14422_v60, 0.0  ;;  %v4221_v54 = vmul.f32 %v14422_v60, %v14422_v60 }
 0x5d9   : > { %4136 = vadd.xlane.f32.xlu1 %v4135_v0  ;;  %v4132_v20 = vsel %vm564_vm0, %v14425_v14, 0.0  ;;  %v4220_v35 = vmul.f32 %v14425_v14, %v14425_v14 }
 0x5da   : > { %4133 = vadd.xlane.f32.xlu0 %v4132_v20  ;;  %v4295_v7 = vsel %vm564_vm0, %v4221_v54, 0.0 }
 0x5db   : > { %v4292_v11 = vsel %vm564_vm0, %v4220_v35, 0.0 }
 0x5dd   : > { %4296 = vadd.xlane.f32.xlu1 %v4295_v7  ;;  %v10965_v55 = vpop.f32.mrb[54].mxu0 }
 0x5de   : > { %v14438_v15 = vadd.f32 %v10965_v55, %v14241_v51  ;;  %4293 = vadd.xlane.f32.xlu0 %v4292_v11  ;;  %v4023_v32 = vpop.f32.mrb[55].mxu0 }
 0x5df   : > { %v14441_v10 = vadd.f32 %v14241_v51, %v4023_v32 }
 0x5e0   : > { %v4141_v46 = vsel %vm564_vm0, %v14438_v15, 0.0  ;;  %v4223_v48 = vmul.f32 %v14438_v15, %v14438_v15 }
 0x5e1   : > { %4142 = vadd.xlane.f32.xlu1 %v4141_v46  ;;  %v4138_v1 = vsel %vm564_vm0, %v14441_v10, 0.0  ;;  %v4222_v16 = vmul.f32 %v14441_v10, %v14441_v10 }
 0x5e2   : > { %4139 = vadd.xlane.f32.xlu0 %v4138_v1  ;;  %v4301_v63 = vsel %vm564_vm0, %v4223_v48, 0.0 }
 0x5e3   : > { %v4298_v3 = vsel %vm564_vm0, %v4222_v16, 0.0 }
 0x5e5   : > { %4302 = vadd.xlane.f32.xlu1 %v4301_v63  ;;  %v10968_v12 = vpop.f32.mrb[56].mxu0 }
 0x5e6   : > { %v14454_v8 = vadd.f32 %v10968_v12, %v14241_v51  ;;  %4299 = vadd.xlane.f32.xlu0 %v4298_v3  ;;  %v4033_v47 = vpop.f32.mrb[57].mxu0 }
 0x5e7   : > { %v14457_v31 = vadd.f32 %v14241_v51, %v4033_v47 }
 0x5e8   : > { %v4147_v41 = vsel %vm564_vm0, %v14454_v8, 0.0  ;;  %v4225_v42 = vmul.f32 %v14454_v8, %v14454_v8 }
 0x5e9   : > { %4148 = vadd.xlane.f32.xlu1 %v4147_v41  ;;  %v4144_v40 = vsel %vm564_vm0, %v14457_v31, 0.0  ;;  %v4224_v50 = vmul.f32 %v14457_v31, %v14457_v31 }
 0x5ea   : > { %4145 = vadd.xlane.f32.xlu0 %v4144_v40  ;;  %v4307_v45 = vsel %vm564_vm0, %v4225_v42, 0.0 }
 0x5eb   : > { %v4304_v17 = vsel %vm564_vm0, %v4224_v50, 0.0 }
 0x5ed   : > { %4308 = vadd.xlane.f32.xlu1 %v4307_v45  ;;  %v10971_v44 = vpop.f32.mrb[58].mxu0 }
 0x5ee   : > { %v14470_v13 = vadd.f32 %v10971_v44, %v14241_v51  ;;  %4305 = vadd.xlane.f32.xlu0 %v4304_v17  ;;  %v4043_v30 = vpop.f32.mrb[59].mxu0 }
 0x5ef   : > { %v14473_v4 = vadd.f32 %v14241_v51, %v4043_v30 }
 0x5f0   : > { %v4153_v21 = vsel %vm564_vm0, %v14470_v13, 0.0  ;;  %v4227_v58 = vmul.f32 %v14470_v13, %v14470_v13 }
 0x5f1   : > { %4154 = vadd.xlane.f32.xlu1 %v4153_v21  ;;  %v4150_v38 = vsel %vm564_vm0, %v14473_v4, 0.0  ;;  %v4226_v62 = vmul.f32 %v14473_v4, %v14473_v4 }
 0x5f2   : > { %4151 = vadd.xlane.f32.xlu0 %v4150_v38  ;;  %v4313_v18 = vsel %vm564_vm0, %v4227_v58, 0.0 }
 0x5f3   : > { %v4310_v25 = vsel %vm564_vm0, %v4226_v62, 0.0 }
 0x5f5   : > { %4314 = vadd.xlane.f32.xlu1 %v4313_v18  ;;  %v10974_v53 = vpop.f32.mrb[60].mxu0 }
 0x5f6   : > { %v14486_v9 = vadd.f32 %v10974_v53, %v14241_v51  ;;  %4311 = vadd.xlane.f32.xlu0 %v4310_v25  ;;  %v4053_v6 = vpop.f32.mrb[61].mxu0 }
 0x5f7   : > { %v14489_v36 = vadd.f32 %v14241_v51, %v4053_v6 }
 0x5f8   : > { %v4159_v2 = vsel %vm564_vm0, %v14486_v9, 0.0  ;;  %v4229_v0 = vmul.f32 %v14486_v9, %v14486_v9 }
 0x5f9   : > { %4160 = vadd.xlane.f32.xlu1 %v4159_v2  ;;  %v4156_v54 = vsel %vm564_vm0, %v14489_v36, 0.0  ;;  %v4228_v20 = vmul.f32 %v14489_v36, %v14489_v36 }
 0x5fa   : > { %4157 = vadd.xlane.f32.xlu0 %v4156_v54  ;;  %v4319_v35 = vsel %vm564_vm0, %v4229_v0, 0.0 }
 0x5fb   : > { %v4316_v55 = vsel %vm564_vm0, %v4228_v20, 0.0 }
 0x5fd   : > { %4320 = vadd.xlane.f32.xlu1 %v4319_v35  ;;  %v10977_v7 = vpop.f32.mrb[62].mxu0 }
 0x5fe   : > { %v14502_v11 = vadd.f32 %v10977_v7, %v14241_v51  ;;  %4317 = vadd.xlane.f32.xlu0 %v4316_v55  ;;  %v4063_v32 = vpop.f32.mrb[63].mxu0 }
 0x5ff   : > { %v14505_v46 = vadd.f32 %v14241_v51, %v4063_v32 }
 0x600   : > { %v4165_v48 = vsel %vm564_vm0, %v14502_v11, 0.0  ;;  %v4231_v1 = vmul.f32 %v14502_v11, %v14502_v11 }
 0x601   : > { %4166 = vadd.xlane.f32.xlu1 %v4165_v48  ;;  %v4162_v16 = vsel %vm564_vm0, %v14505_v46, 0.0  ;;  %v4230_v63 = vmul.f32 %v14505_v46, %v14505_v46 }
 0x602   : > { %4163 = vadd.xlane.f32.xlu0 %v4162_v16  ;;  %v4325_v12 = vsel %vm564_vm0, %v4231_v1, 0.0 }
 0x603   : > { %v4322_v51 = vsel %vm564_vm0, %v4230_v63, 0.0 }
 0x605   : > { %4326 = vadd.xlane.f32.xlu1 %v4325_v12 }
 0x606   : > { %4323 = vadd.xlane.f32.xlu0 %v4322_v51 }
 0x616   : > { %v4077_v3 = vpop.xlane.xlu1 %4076 }
 0x617   : > { %v4169_v47 = vmul.f32 0.03125, %v4077_v3  ;;  %v4074_v41 = vpop.xlane.xlu0 %4073 }
 0x618   : > { %v4168_v42 = vmul.f32 0.03125, %v4074_v41 }
 0x619   : > { %v4361_v50 = vmul.f32 %v4169_v47, %v4169_v47 }
 0x61a   : > { %v4237_v40 = vpop.xlane.xlu1 %4236  ;;  %v4360_v17 = vmul.f32 %v4168_v42, %v4168_v42 }
 0x61b   : > { %v4329_v45 = vmul.f32 0.03125, %v4237_v40  ;;  %v4234_v44 = vpop.xlane.xlu0 %4233 }
 0x61c   : > { %v4328_v30 = vmul.f32 0.03125, %v4234_v44 }
 0x61d   : > { %v4393_v21 = vsub.f32 %v4329_v45, %v4361_v50 }
 0x61e   : > { %v4392_v58 = vsub.f32 %v4328_v30, %v4360_v17  ;;  %v4083_v38 = vpop.xlane.xlu1 %4082 }
 0x61f   : > { %v4425_v62 = vmax.f32 %v4393_v21, 0.0  ;;  %v14517_v18 = vmul.f32 0.03125, %v4083_v38  ;;  %v4080_v53 = vpop.xlane.xlu0 %4079  ;;  %v4457_v21 = vsub.f32 %v14244_v43, %v4169_v47 }
 0x620   : > { %v4424_v25 = vmax.f32 %v4392_v58, 0.0  ;;  %v14519_v6 = vmul.f32 0.03125, %v4080_v53  ;;  %v14535_v53 = vld [vmem:[%s13364_s27 + $0x1] ss:$0 sm:$0xff] }
 0x621   : > { %v4489_v2 = vadd.f32 1e-05, %v4425_v62  ;;  %v4363_v20 = vmul.f32 %v14517_v18, %v14517_v18 }
 0x622   : > { %v4488_v0 = vadd.f32 1e-05, %v4424_v25  ;;  %v4243_v54 = vpop.xlane.xlu1 %4242  ;;  %v4362_v55 = vmul.f32 %v14519_v6, %v14519_v6  ;;  %v4456_v25 = vsub.f32 %v14247_v27, %v4168_v42  ;;  %v4459_v42 = vsub.f32 %v14260_v33, %v14517_v18 }
 0x623   : > { %11906 = vrsqrt.f32 %v4489_v2  ;;  %v4331_v35 = vmul.f32 0.03125, %v4243_v54  ;;  %v4240_v7 = vpop.xlane.xlu0 %4239  ;;  %v4458_v33 = vsub.f32 %v14263_v59, %v14519_v6 }
 0x624   : > { %11908 = vrsqrt.f32 %v4488_v0  ;;  %v4330_v32 = vmul.f32 0.03125, %v4240_v7 }
 0x625   : > { %v4395_v48 = vsub.f32 %v4331_v35, %v4363_v20 }
 0x626   : > { %v4394_v1 = vsub.f32 %v4330_v32, %v4362_v55  ;;  %v4089_v16 = vpop.xlane.xlu1 %4088  ;;  %v14541_v32 = vld [vmem:[%s13375_s30 + $0x1] ss:$0 sm:$0xff] }
 0x627   : > { %v4427_v63 = vmax.f32 %v4395_v48, 0.0  ;;  %v14525_v12 = vmul.f32 0.03125, %v4089_v16  ;;  %v4086_v51 = vpop.xlane.xlu0 %4085 }
 0x628   : > { %v4426_v3 = vmax.f32 %v4394_v1, 0.0  ;;  %v14527_v41 = vmul.f32 0.03125, %v4086_v51 }
 0x629   : > { %v4491_v40 = vadd.f32 1e-05, %v4427_v63  ;;  %v4365_v44 = vmul.f32 %v14525_v12, %v14525_v12  ;;  %v4461_v6 = vsub.f32 %v14276_v39, %v14525_v12 }
 0x62a   : > { %v4490_v50 = vadd.f32 1e-05, %v4426_v3  ;;  %v4249_v45 = vpop.xlane.xlu1 %4248  ;;  %v4364_v58 = vmul.f32 %v14527_v41, %v14527_v41 }
 0x62b   : > { %11910 = vrsqrt.f32 %v4491_v40  ;;  %v4333_v17 = vmul.f32 0.03125, %v4249_v45  ;;  %v4246_v30 = vpop.xlane.xlu0 %4245 }
 0x62c   : > { %11912 = vrsqrt.f32 %v4490_v50  ;;  %v4332_v38 = vmul.f32 0.03125, %v4246_v30 }
 0x62d   : > { %v11907_v62 = vpop.eup %11906  ;;  %v4397_v2 = vsub.f32 %v4333_v17, %v4365_v44 }
 0x62e   : > { %v11909_v0 = vpop.eup %11908  ;;  %v4553_v54 = vmul.f32 %v11907_v62, %v4457_v21  ;;  %v4396_v20 = vsub.f32 %v4332_v38, %v4364_v58  ;;  %v4095_v35 = vpop.xlane.xlu1 %4094 }
 0x62f   : > { %v4429_v7 = vmax.f32 %v4397_v2, 0.0  ;;  %v14538_v55 = vmul.f32 0.03125, %v4095_v35  ;;  %v4092_v43 = vpop.xlane.xlu0 %4091  ;;  %v4552_v47 = vmul.f32 %v11909_v0, %v4456_v25 }
 0x630   : > { %v4590_v48 = vmul.f32 %v14535_v53, %v4553_v54  ;;  %v4428_v1 = vmax.f32 %v4396_v20, 0.0  ;;  %v14544_v16 = vmul.f32 0.03125, %v4092_v43 }
 0x631   : > { %v4493_v63 = vadd.f32 1e-05, %v4429_v7  ;;  %v4589_v27 = vmul.f32 %v14535_v53, %v4552_v47  ;;  %v4367_v50 = vmul.f32 %v14538_v55, %v14538_v55 }
 0x632   : > { %v4492_v51 = vadd.f32 1e-05, %v4428_v1  ;;  %v4255_v3 = vpop.xlane.xlu1 %4254  ;;  %v4627_v40 = vadd.f32 %v14541_v32, %v4590_v48  ;;  %v4366_v30 = vmul.f32 %v14544_v16, %v14544_v16 }
 0x633   : > { %11914 = vrsqrt.f32 %v4493_v63  ;;  %v4335_v45 = vmul.f32 0.03125, %v4255_v3  ;;  %v4252_v44 = vpop.xlane.xlu0 %4251  ;;  %v4626_v17 = vadd.f32 %v14541_v32, %v4589_v27 }
 0x634   : > { %11916 = vrsqrt.f32 %v4492_v51  ;;  %v4334_v21 = vmul.f32 0.03125, %v4252_v44  ;;  %v4659_v58 = vmul.f32 0.2, %v4627_v40 }
 0x635   : > { %v11911_v38 = vpop.eup %11910  ;;  %v4399_v18 = vsub.f32 %v4335_v45, %v4367_v50  ;;  %v4658_v62 = vmul.f32 0.2, %v4626_v17 }
 0x636   : > { %v11913_v25 = vpop.eup %11912  ;;  %v4398_v2 = vsub.f32 %v4334_v21, %v4366_v30  ;;  %v4101_v0 = vpop.xlane.xlu1 %4100  ;;  %v4555_v54 = vmul.f32 %v11911_v38, %v4459_v42  ;;  %v4691_v63 = vmax.f32 %v4627_v40, %v4659_v58  ;;  %v4460_v58 = vsub.f32 %v14279_v52, %v14527_v41 }
 0x637   : > { %v4431_v20 = vmax.f32 %v4399_v18, 0.0  ;;  %v14557_v35 = vmul.f32 0.03125, %v4101_v0  ;;  %v4098_v7 = vpop.xlane.xlu0 %4097  ;;  %v4690_v43 = vmax.f32 %v4626_v17, %v4658_v62  ;;  %v4554_v47 = vmul.f32 %v11913_v25, %v4458_v33 }
 0x638   : > { %v4430_v48 = vmax.f32 %v4398_v2, 0.0  ;;  %v14559_v1 = vmul.f32 0.03125, %v4098_v7  ;;  %v4592_v27 = vmul.f32 %v14535_v53, %v4555_v54  ;;  %v4463_v41 = vsub.f32 %v14298_v49, %v14538_v55 }
 0x639   : > { %v4495_v51 = vadd.f32 1e-05, %v4431_v20  ;;  %10986 = vmatprep.mubr.msk.f32.mxu0 %vm564_vm0, %v4690_v43  ;;  %11042 = vmatprep.mubr.msk.f32.mxu1 %vm564_vm0, %v4690_v43  ;;  %v4591_v59 = vmul.f32 %v14535_v53, %v4554_v47  ;;  %v4369_v50 = vmul.f32 %v14557_v35, %v14557_v35 }
 0x63a   : > { %v4494_v42 = vadd.f32 1e-05, %v4430_v48  ;;  %v4261_v3 = vpop.xlane.xlu1 %4260  ;;  %10987 = vmatmul.mubr.msk.f32.vlgmr.msra.gmra.mrb[0].mxu0 %vm564_vm0, %v4691_v63  ;;  %11043 = vmatmul.mubr.msk.f32.vlgmr.msra.gmra.mrb[96].mxu1 %vm564_vm0, %v4691_v63  ;;  %v4629_v40 = vadd.f32 %v14541_v32, %v4592_v27  ;;  %v4368_v39 = vmul.f32 %v14559_v1, %v14559_v1 }
 0x63b   : > { %11918 = vrsqrt.f32 %v4495_v51  ;;  %v4337_v45 = vmul.f32 0.03125, %v4261_v3  ;;  %v4258_v44 = vpop.xlane.xlu0 %4257  ;;  %v4628_v17 = vadd.f32 %v14541_v32, %v4591_v59 }
 0x63c   : > { %11920 = vrsqrt.f32 %v4494_v42  ;;  %v4336_v12 = vmul.f32 0.03125, %v4258_v44  ;;  %v4661_v30 = vmul.f32 0.2, %v4629_v40 }
 0x63d   : > { %v11915_v21 = vpop.eup %11914  ;;  %v4401_v38 = vsub.f32 %v4337_v45, %v4369_v50  ;;  %v4660_v33 = vmul.f32 0.2, %v4628_v17 }
 0x63e   : > { %v11917_v18 = vpop.eup %11916  ;;  %v4400_v62 = vsub.f32 %v4336_v12, %v4368_v39  ;;  %v4107_v25 = vpop.xlane.xlu1 %4106  ;;  %v4557_v2 = vmul.f32 %v11915_v21, %v4461_v6  ;;  %v4693_v63 = vmax.f32 %v4629_v40, %v4661_v30  ;;  %v4462_v39 = vsub.f32 %v14301_v56, %v14544_v16 }
 0x63f   : > { %v4433_v0 = vmax.f32 %v4401_v38, 0.0  ;;  %v14577_v54 = vmul.f32 0.03125, %v4107_v25  ;;  %v4104_v20 = vpop.xlane.xlu0 %4103  ;;  %v4692_v7 = vmax.f32 %v4628_v17, %v4660_v33  ;;  %v4556_v43 = vmul.f32 %v11917_v18, %v4460_v58 }
 0x640   : > { %v4432_v47 = vmax.f32 %v4400_v62, 0.0  ;;  %v14579_v48 = vmul.f32 0.03125, %v4104_v20  ;;  %v4594_v27 = vmul.f32 %v14535_v53, %v4557_v2  ;;  %v4465_v16 = vsub.f32 %v14314_v5, %v14557_v35 }
 0x641   : > { %v4497_v51 = vadd.f32 1e-05, %v4433_v0  ;;  %10989 = vmatprep.mubr.msk.f32.mxu0 %vm564_vm0, %v4692_v7  ;;  %11045 = vmatprep.mubr.msk.f32.mxu1 %vm564_vm0, %v4692_v7  ;;  %v4593_v52 = vmul.f32 %v14535_v53, %v4556_v43  ;;  %v4371_v3 = vmul.f32 %v14577_v54, %v14577_v54 }
 0x642   : > { %v4496_v59 = vadd.f32 1e-05, %v4432_v47  ;;  %v4267_v6 = vpop.xlane.xlu1 %4266  ;;  %10990 = vmatmul.mubr.msk.f32.gmra.mrb[2].mxu0 %vm564_vm0, %v4693_v63  ;;  %11046 = vmatmul.mubr.msk.f32.gmra.mrb[98].mxu1 %vm564_vm0, %v4693_v63  ;;  %v4631_v42 = vadd.f32 %v14541_v32, %v4594_v27  ;;  %v4370_v49 = vmul.f32 %v14579_v48, %v14579_v48 }
 0x643   : > { %11922 = vrsqrt.f32 %v4497_v51  ;;  %v4339_v40 = vmul.f32 0.03125, %v4267_v6  ;;  %v4264_v50 = vpop.xlane.xlu0 %4263  ;;  %v4630_v45 = vadd.f32 %v14541_v32, %v4593_v52 }
 0x644   : > { %11924 = vrsqrt.f32 %v4496_v59  ;;  %v4338_v55 = vmul.f32 0.03125, %v4264_v50  ;;  %v4663_v44 = vmul.f32 0.2, %v4631_v42  ;;  %v4464_v50 = vsub.f32 %v14317_v19, %v14559_v1 }
 0x645   : > { %v11919_v17 = vpop.eup %11918  ;;  %v4403_v12 = vsub.f32 %v4339_v40, %v4371_v3  ;;  %v4662_v30 = vmul.f32 0.2, %v4630_v45  ;;  %v4467_v1 = vsub.f32 %v14330_v61, %v14577_v54 }
 0x646   : > { %v11921_v21 = vpop.eup %11920  ;;  %v4402_v58 = vsub.f32 %v4338_v55, %v4370_v49  ;;  %v4113_v38 = vpop.xlane.xlu1 %4112  ;;  %v4559_v33 = vmul.f32 %v11919_v17, %v4463_v41  ;;  %v4695_v43 = vmax.f32 %v4631_v42, %v4663_v44 }
 0x647   : > { %v4435_v18 = vmax.f32 %v4403_v12, 0.0  ;;  %v14597_v62 = vmul.f32 0.03125, %v4113_v38  ;;  %v4110_v25 = vpop.xlane.xlu0 %4109  ;;  %v4694_v2 = vmax.f32 %v4630_v45, %v4662_v30  ;;  %v4558_v0 = vmul.f32 %v11921_v21, %v4462_v39 }
 0x648   : > { %v4434_v20 = vmax.f32 %v4402_v58, 0.0  ;;  %v14599_v7 = vmul.f32 0.03125, %v4110_v25  ;;  %v4596_v47 = vmul.f32 %v14535_v53, %v4559_v33 }
 0x649   : > { %v4499_v63 = vadd.f32 1e-05, %v4435_v18  ;;  %10992 = vmatprep.mubr.msk.f32.mxu0 %vm564_vm0, %v4694_v2  ;;  %11048 = vmatprep.mubr.msk.f32.mxu1 %vm564_vm0, %v4694_v2  ;;  %v4595_v56 = vmul.f32 %v14535_v53, %v4558_v0  ;;  %v4373_v41 = vmul.f32 %v14597_v62, %v14597_v62 }
 0x64a   : > { %v4498_v27 = vadd.f32 1e-05, %v4434_v20  ;;  %v4273_v51 = vpop.xlane.xlu1 %4272  ;;  %10993 = vmatmul.mubr.msk.f32.gmra.mrb[4].mxu0 %vm564_vm0, %v4695_v43  ;;  %11049 = vmatmul.mubr.msk.f32.gmra.mrb[100].mxu1 %vm564_vm0, %v4695_v43  ;;  %v4633_v52 = vadd.f32 %v14541_v32, %v4596_v47  ;;  %v4372_v5 = vmul.f32 %v14599_v7, %v14599_v7 }
 0x64b   : > { %11926 = vrsqrt.f32 %v4499_v63  ;;  %v4341_v59 = vmul.f32 0.03125, %v4273_v51  ;;  %v4270_v6 = vpop.xlane.xlu0 %4269  ;;  %v4632_v42 = vadd.f32 %v14541_v32, %v4595_v56 }
 0x64c   : > { %11928 = vrsqrt.f32 %v4498_v27  ;;  %v4340_v35 = vmul.f32 0.03125, %v4270_v6  ;;  %v4665_v3 = vmul.f32 0.2, %v4633_v52 }
 0x64d   : > { %v11923_v40 = vpop.eup %11922  ;;  %v4405_v45 = vsub.f32 %v4341_v59, %v4373_v41  ;;  %v4664_v49 = vmul.f32 0.2, %v4632_v42  ;;  %v4466_v41 = vsub.f32 %v14333_v57, %v14579_v48  ;;  %v4469_v48 = vsub.f32 %v14358_v22, %v14597_v62 }
 0x64e   : > { %v11925_v55 = vpop.eup %11924  ;;  %v4404_v44 = vsub.f32 %v4340_v35, %v4372_v5  ;;  %v4119_v17 = vpop.xlane.xlu1 %4118  ;;  %v4561_v39 = vmul.f32 %v11923_v40, %v4465_v16  ;;  %v4697_v25 = vmax.f32 %v4633_v52, %v4665_v3 }
 0x64f   : > { %v4437_v12 = vmax.f32 %v4405_v45, 0.0  ;;  %v14617_v30 = vmul.f32 0.03125, %v4119_v17  ;;  %v4116_v21 = vpop.xlane.xlu0 %4115  ;;  %v4696_v58 = vmax.f32 %v4632_v42, %v4664_v49  ;;  %v4560_v38 = vmul.f32 %v11925_v55, %v4464_v50 }
 0x650   : > { %v4436_v33 = vmax.f32 %v4404_v44, 0.0  ;;  %v14619_v18 = vmul.f32 0.03125, %v4116_v21  ;;  %v4598_v2 = vmul.f32 %v14535_v53, %v4561_v39 }
 0x651   : > { %v4501_v0 = vadd.f32 1e-05, %v4437_v12  ;;  %10995 = vmatprep.mubr.msk.f32.mxu0 %vm564_vm0, %v4696_v58  ;;  %11051 = vmatprep.mubr.msk.f32.mxu1 %vm564_vm0, %v4696_v58  ;;  %v4597_v19 = vmul.f32 %v14535_v53, %v4560_v38  ;;  %v4375_v63 = vmul.f32 %v14617_v30, %v14617_v30 }
 0x652   : > { %v4500_v20 = vadd.f32 1e-05, %v4436_v33  ;;  %v4279_v43 = vpop.xlane.xlu1 %4278  ;;  %10996 = vmatmul.mubr.msk.f32.gmra.mrb[6].mxu0 %vm564_vm0, %v4697_v25  ;;  %11052 = vmatmul.mubr.msk.f32.gmra.mrb[102].mxu1 %vm564_vm0, %v4697_v25  ;;  %v4635_v47 = vadd.f32 %v14541_v32, %v4598_v2  ;;  %v4374_v61 = vmul.f32 %v14619_v18, %v14619_v18 }
 0x653   : > { %11930 = vrsqrt.f32 %v4501_v0  ;;  %v4343_v56 = vmul.f32 0.03125, %v4279_v43  ;;  %v4276_v16 = vpop.xlane.xlu0 %4275  ;;  %v4634_v27 = vadd.f32 %v14541_v32, %v4597_v19  ;;  %v4468_v43 = vsub.f32 %v14361_v23, %v14599_v7 }
 0x654   : > { %11932 = vrsqrt.f32 %v4500_v20  ;;  %v4342_v54 = vmul.f32 0.03125, %v4276_v16  ;;  %v4667_v51 = vmul.f32 0.2, %v4635_v47  ;;  %v4471_v7 = vsub.f32 %v14374_v34, %v14617_v30 }
 0x655   : > { %v11927_v52 = vpop.eup %11926  ;;  %v4407_v59 = vsub.f32 %v4343_v56, %v4375_v63  ;;  %v4666_v6 = vmul.f32 0.2, %v4634_v27 }
 0x656   : > { %v11929_v42 = vpop.eup %11928  ;;  %v4406_v5 = vsub.f32 %v4342_v54, %v4374_v61  ;;  %v4125_v35 = vpop.xlane.xlu1 %4124  ;;  %v4563_v3 = vmul.f32 %v11927_v52, %v4467_v1  ;;  %v4699_v39 = vmax.f32 %v4635_v47, %v4667_v51 }
 0x657   : > { %v4439_v40 = vmax.f32 %v4407_v59, 0.0  ;;  %v14637_v50 = vmul.f32 0.03125, %v4125_v35  ;;  %v4122_v45 = vpop.xlane.xlu0 %4121  ;;  %v4698_v49 = vmax.f32 %v4634_v27, %v4666_v6  ;;  %v4562_v55 = vmul.f32 %v11929_v42, %v4466_v41 }
 0x658   : > { %v4438_v44 = vmax.f32 %v4406_v5, 0.0  ;;  %v14639_v17 = vmul.f32 0.03125, %v4122_v45  ;;  %v4600_v12 = vmul.f32 %v14535_v53, %v4563_v3 }
 0x659   : > { %v4503_v21 = vadd.f32 1e-05, %v4439_v40  ;;  %10998 = vmatprep.mubr.msk.f32.mxu0 %vm564_vm0, %v4698_v49  ;;  %11054 = vmatprep.mubr.msk.f32.mxu1 %vm564_vm0, %v4698_v49  ;;  %v4599_v57 = vmul.f32 %v14535_v53, %v4562_v55  ;;  %v4377_v25 = vmul.f32 %v14637_v50, %v14637_v50 }
 0x65a   : > { %v4502_v58 = vadd.f32 1e-05, %v4438_v44  ;;  %v4285_v38 = vpop.xlane.xlu1 %4284  ;;  %10999 = vmatmul.mubr.msk.f32.gmra.mrb[8].mxu0 %vm564_vm0, %v4699_v39  ;;  %11055 = vmatmul.mubr.msk.f32.gmra.mrb[104].mxu1 %vm564_vm0, %v4699_v39  ;;  %v4637_v33 = vadd.f32 %v14541_v32, %v4600_v12  ;;  %v4376_v22 = vmul.f32 %v14639_v17, %v14639_v17 }
 0x65b   : > { %11934 = vrsqrt.f32 %v4503_v21  ;;  %v4345_v2 = vmul.f32 0.03125, %v4285_v38  ;;  %v4282_v0 = vpop.xlane.xlu0 %4281  ;;  %v4636_v19 = vadd.f32 %v14541_v32, %v4599_v57 }
 0x65c   : > { %11936 = vrsqrt.f32 %v4502_v58  ;;  %v4344_v62 = vmul.f32 0.03125, %v4282_v0  ;;  %v4669_v1 = vmul.f32 0.2, %v4637_v33 }
 0x65d   : > { %v11931_v20 = vpop.eup %11930  ;;  %v4409_v47 = vsub.f32 %v4345_v2, %v4377_v25  ;;  %v4668_v63 = vmul.f32 0.2, %v4636_v19 }
 0x65e   : > { %v11933_v56 = vpop.eup %11932  ;;  %v4408_v16 = vsub.f32 %v4344_v62, %v4376_v22  ;;  %v4131_v27 = vpop.xlane.xlu1 %4130  ;;  %v4565_v61 = vmul.f32 %v11931_v20, %v4469_v48  ;;  %v4701_v5 = vmax.f32 %v4637_v33, %v4669_v1  ;;  %v4470_v48 = vsub.f32 %v14377_v28, %v14619_v18 }
 0x65f   : > { %v4441_v54 = vmax.f32 %v4409_v47, 0.0  ;;  %v14657_v51 = vmul.f32 0.03125, %v4131_v27  ;;  %v4128_v52 = vpop.xlane.xlu0 %4127  ;;  %v4700_v41 = vmax.f32 %v4636_v19, %v4668_v63  ;;  %v4564_v59 = vmul.f32 %v11933_v56, %v4468_v43 }
 0x660   : > { %v4440_v6 = vmax.f32 %v4408_v16, 0.0  ;;  %v14659_v42 = vmul.f32 0.03125, %v4128_v52  ;;  %v4602_v35 = vmul.f32 %v14535_v53, %v4565_v61  ;;  %v4473_v18 = vsub.f32 %v14390_v26, %v14637_v50 }
 0x661   : > { %v4505_v3 = vadd.f32 1e-05, %v4441_v54  ;;  %11001 = vmatprep.mubr.msk.f32.mxu0 %vm564_vm0, %v4700_v41  ;;  %11057 = vmatprep.mubr.msk.f32.mxu1 %vm564_vm0, %v4700_v41  ;;  %v4601_v23 = vmul.f32 %v14535_v53, %v4564_v59  ;;  %v4379_v55 = vmul.f32 %v14657_v51, %v14657_v51 }
 0x662   : > { %v4504_v40 = vadd.f32 1e-05, %v4440_v6  ;;  %v4291_v45 = vpop.xlane.xlu1 %4290  ;;  %11002 = vmatmul.mubr.msk.f32.gmra.mrb[10].mxu0 %vm564_vm0, %v4701_v5  ;;  %11058 = vmatmul.mubr.msk.f32.gmra.mrb[106].mxu1 %vm564_vm0, %v4701_v5  ;;  %v4639_v49 = vadd.f32 %v14541_v32, %v4602_v35  ;;  %v4378_v34 = vmul.f32 %v14659_v42, %v14659_v42 }
 0x663   : > { %11938 = vrsqrt.f32 %v4505_v3  ;;  %v4347_v44 = vmul.f32 0.03125, %v4291_v45  ;;  %v4288_v39 = vpop.xlane.xlu0 %4287  ;;  %v4638_v12 = vadd.f32 %v14541_v32, %v4601_v23  ;;  %v4472_v3 = vsub.f32 %v14393_v29, %v14639_v17 }
 0x664   : > { %11940 = vrsqrt.f32 %v4504_v40  ;;  %v4346_v30 = vmul.f32 0.03125, %v4288_v39  ;;  %v4671_v21 = vmul.f32 0.2, %v4639_v49  ;;  %v4475_v17 = vsub.f32 %v14406_v24, %v14657_v51 }
 0x665   : > { %v11935_v57 = vpop.eup %11934  ;;  %v4411_v58 = vsub.f32 %v4347_v44, %v4379_v55  ;;  %v4670_v38 = vmul.f32 0.2, %v4638_v12 }
 0x666   : > { %v11937_v33 = vpop.eup %11936  ;;  %v4410_v25 = vsub.f32 %v4346_v30, %v4378_v34  ;;  %v4137_v2 = vpop.xlane.xlu1 %4136  ;;  %v4567_v0 = vmul.f32 %v11935_v57, %v4471_v7  ;;  %v4703_v63 = vmax.f32 %v4639_v49, %v4671_v21 }
 0x667   : > { %v4443_v19 = vmax.f32 %v4411_v58, 0.0  ;;  %v14677_v22 = vmul.f32 0.03125, %v4137_v2  ;;  %v4134_v62 = vpop.xlane.xlu0 %4133  ;;  %v4702_v1 = vmax.f32 %v4638_v12, %v4670_v38  ;;  %v4566_v20 = vmul.f32 %v11937_v33, %v4470_v48 }
 0x668   : > { %v4442_v43 = vmax.f32 %v4410_v25, 0.0  ;;  %v14679_v47 = vmul.f32 0.03125, %v4134_v62  ;;  %v4604_v56 = vmul.f32 %v14535_v53, %v4567_v0 }
 0x669   : > { %v4507_v16 = vadd.f32 1e-05, %v4443_v19  ;;  %11004 = vmatprep.mubr.msk.f32.mxu0 %vm564_vm0, %v4702_v1  ;;  %11060 = vmatprep.mubr.msk.f32.mxu1 %vm564_vm0, %v4702_v1  ;;  %v4603_v28 = vmul.f32 %v14535_v53, %v4566_v20  ;;  %v4381_v52 = vmul.f32 %v14677_v22, %v14677_v22 }
 0x66a   : > { %v4506_v27 = vadd.f32 1e-05, %v4442_v43  ;;  %v4297_v61 = vpop.xlane.xlu1 %4296  ;;  %11005 = vmatmul.mubr.msk.f32.gmra.mrb[12].mxu0 %vm564_vm0, %v4703_v63  ;;  %11061 = vmatmul.mubr.msk.f32.gmra.mrb[108].mxu1 %vm564_vm0, %v4703_v63  ;;  %v4641_v54 = vadd.f32 %v14541_v32, %v4604_v56  ;;  %v4380_v26 = vmul.f32 %v14679_v47, %v14679_v47  ;;  %v4474_v63 = vsub.f32 %v14409_v37, %v14659_v42 }
 0x66b   : > { %11942 = vrsqrt.f32 %v4507_v16  ;;  %v4349_v41 = vmul.f32 0.03125, %v4297_v61  ;;  %v4294_v59 = vpop.xlane.xlu0 %4293  ;;  %v4640_v6 = vadd.f32 %v14541_v32, %v4603_v28  ;;  %v4477_v42 = vsub.f32 %v14422_v60, %v14677_v22 }
 0x66c   : > { %11944 = vrsqrt.f32 %v4506_v27  ;;  %v4348_v50 = vmul.f32 0.03125, %v4294_v59  ;;  %v4673_v5 = vmul.f32 0.2, %v4641_v54 }
 0x66d   : > { %v11939_v35 = vpop.eup %11938  ;;  %v4413_v23 = vsub.f32 %v4349_v41, %v4381_v52  ;;  %v4672_v7 = vmul.f32 0.2, %v4640_v6 }
 0x66e   : > { %v11941_v40 = vpop.eup %11940  ;;  %v4412_v45 = vsub.f32 %v4348_v50, %v4380_v26  ;;  %v4143_v49 = vpop.xlane.xlu1 %4142  ;;  %v4569_v55 = vmul.f32 %v11939_v35, %v4473_v18  ;;  %v4705_v48 = vmax.f32 %v4641_v54, %v4673_v5 }
 0x66f   : > { %v4445_v44 = vmax.f32 %v4413_v23, 0.0  ;;  %v14697_v39 = vmul.f32 0.03125, %v4143_v49  ;;  %v4140_v12 = vpop.xlane.xlu0 %4139  ;;  %v4704_v34 = vmax.f32 %v4640_v6, %v4672_v7  ;;  %v4568_v30 = vmul.f32 %v11941_v40, %v4472_v3 }
 0x670   : > { %v4444_v21 = vmax.f32 %v4412_v45, 0.0  ;;  %v14699_v57 = vmul.f32 0.03125, %v4140_v12  ;;  %v4606_v58 = vmul.f32 %v14535_v53, %v4569_v55 }
 0x671   : > { %v4509_v38 = vadd.f32 1e-05, %v4445_v44  ;;  %11007 = vmatprep.mubr.msk.f32.mxu0 %vm564_vm0, %v4704_v34  ;;  %11063 = vmatprep.mubr.msk.f32.mxu1 %vm564_vm0, %v4704_v34  ;;  %v4605_v29 = vmul.f32 %v14535_v53, %v4568_v30  ;;  %v4383_v0 = vmul.f32 %v14697_v39, %v14697_v39  ;;  %v4476_v30 = vsub.f32 %v14425_v14, %v14679_v47 }
 0x672   : > { %v4508_v33 = vadd.f32 1e-05, %v4444_v21  ;;  %v4303_v25 = vpop.xlane.xlu1 %4302  ;;  %11008 = vmatmul.mubr.msk.f32.gmra.mrb[14].mxu0 %vm564_vm0, %v4705_v48  ;;  %11064 = vmatmul.mubr.msk.f32.gmra.mrb[110].mxu1 %vm564_vm0, %v4705_v48  ;;  %v4643_v2 = vadd.f32 %v14541_v32, %v4606_v58  ;;  %v4382_v24 = vmul.f32 %v14699_v57, %v14699_v57  ;;  %v4479_v47 = vsub.f32 %v14438_v15, %v14697_v39 }
 0x673   : > { %11946 = vrsqrt.f32 %v4509_v38  ;;  %v4351_v19 = vmul.f32 0.03125, %v4303_v25  ;;  %v4300_v62 = vpop.xlane.xlu0 %4299  ;;  %v4642_v1 = vadd.f32 %v14541_v32, %v4605_v29 }
 0x674   : > { %11948 = vrsqrt.f32 %v4508_v33  ;;  %v4350_v51 = vmul.f32 0.03125, %v4300_v62  ;;  %v4675_v20 = vmul.f32 0.2, %v4643_v2 }
 0x675   : > { %v11943_v43 = vpop.eup %11942  ;;  %v4415_v56 = vsub.f32 %v4351_v19, %v4383_v0  ;;  %v4674_v16 = vmul.f32 0.2, %v4642_v1 }
 0x676   : > { %v11945_v28 = vpop.eup %11944  ;;  %v4414_v18 = vsub.f32 %v4350_v51, %v4382_v24  ;;  %v4149_v27 = vpop.xlane.xlu1 %4148  ;;  %v4571_v61 = vmul.f32 %v11943_v43, %v4475_v17  ;;  %v4707_v5 = vmax.f32 %v4643_v2, %v4675_v20 }
 0x677   : > { %v4447_v54 = vmax.f32 %v4415_v56, 0.0  ;;  %v14717_v52 = vmul.f32 0.03125, %v4149_v27  ;;  %v4146_v41 = vpop.xlane.xlu0 %4145  ;;  %v4706_v59 = vmax.f32 %v4642_v1, %v4674_v16  ;;  %v4570_v6 = vmul.f32 %v11945_v28, %v4474_v63 }
 0x678   : > { %v4446_v26 = vmax.f32 %v4414_v18, 0.0  ;;  %v14719_v50 = vmul.f32 0.03125, %v4146_v41  ;;  %v4608_v35 = vmul.f32 %v14535_v53, %v4571_v61  ;;  %v4478_v41 = vsub.f32 %v14441_v10, %v14699_v57 }
 0x679   : > { %v4511_v3 = vadd.f32 1e-05, %v4447_v54  ;;  %11010 = vmatprep.mubr.msk.f32.mxu0 %vm564_vm0, %v4706_v59  ;;  %11066 = vmatprep.mubr.msk.f32.mxu1 %vm564_vm0, %v4706_v59  ;;  %v4607_v37 = vmul.f32 %v14535_v53, %v4570_v6  ;;  %v4385_v45 = vmul.f32 %v14717_v52, %v14717_v52  ;;  %v4481_v57 = vsub.f32 %v14454_v8, %v14717_v52 }
 0x67a   : > { %v4510_v23 = vadd.f32 1e-05, %v4446_v26  ;;  %v4309_v7 = vpop.xlane.xlu1 %4308  ;;  %11011 = vmatmul.mubr.msk.f32.gmra.mrb[16].mxu0 %vm564_vm0, %v4707_v5  ;;  %11067 = vmatmul.mubr.msk.f32.gmra.mrb[112].mxu1 %vm564_vm0, %v4707_v5  ;;  %v4645_v40 = vadd.f32 %v14541_v32, %v4608_v35  ;;  %v4384_v60 = vmul.f32 %v14719_v50, %v14719_v50 }
 0x67b   : > { %11950 = vrsqrt.f32 %v4511_v3  ;;  %v4353_v49 = vmul.f32 0.03125, %v4309_v7  ;;  %v4306_v55 = vpop.xlane.xlu0 %4305  ;;  %v4644_v44 = vadd.f32 %v14541_v32, %v4607_v37 }
 0x67c   : > { %11952 = vrsqrt.f32 %v4510_v23  ;;  %v4352_v22 = vmul.f32 0.03125, %v4306_v55  ;;  %v4677_v12 = vmul.f32 0.2, %v4645_v40 }
 0x67d   : > { %v11947_v34 = vpop.eup %11946  ;;  %v4417_v21 = vsub.f32 %v4353_v49, %v4385_v45  ;;  %v4676_v48 = vmul.f32 0.2, %v4644_v44 }
 0x67e   : > { %v11949_v58 = vpop.eup %11948  ;;  %v4416_v38 = vsub.f32 %v4352_v22, %v4384_v60  ;;  %v4155_v29 = vpop.xlane.xlu1 %4154  ;;  %v4573_v17 = vmul.f32 %v11947_v34, %v4477_v42  ;;  %v4709_v24 = vmax.f32 %v4645_v40, %v4677_v12 }
 0x67f   : > { %v4449_v33 = vmax.f32 %v4417_v21, 0.0  ;;  %v14737_v25 = vmul.f32 0.03125, %v4155_v29  ;;  %v4152_v2 = vpop.xlane.xlu0 %4151  ;;  %v4708_v0 = vmax.f32 %v4644_v44, %v4676_v48  ;;  %v4572_v19 = vmul.f32 %v11949_v58, %v4476_v30 }
 0x680   : > { %v4448_v62 = vmax.f32 %v4416_v38, 0.0  ;;  %v14739_v1 = vmul.f32 0.03125, %v4152_v2  ;;  %v4610_v51 = vmul.f32 %v14535_v53, %v4573_v17  ;;  %v4480_v17 = vsub.f32 %v14457_v31, %v14719_v50 }
 0x681   : > { %v4513_v20 = vadd.f32 1e-05, %v4449_v33  ;;  %11013 = vmatprep.mubr.msk.f32.mxu0 %vm564_vm0, %v4708_v0  ;;  %11069 = vmatprep.mubr.msk.f32.mxu1 %vm564_vm0, %v4708_v0  ;;  %v4609_v14 = vmul.f32 %v14535_v53, %v4572_v19  ;;  %v4387_v16 = vmul.f32 %v14737_v25, %v14737_v25  ;;  %v4483_v50 = vsub.f32 %v14470_v13, %v14737_v25 }
 0x682   : > { %v4512_v43 = vadd.f32 1e-05, %v4448_v62  ;;  %v4315_v63 = vpop.xlane.xlu1 %4314  ;;  %11014 = vmatmul.mubr.msk.f32.gmra.mrb[18].mxu0 %vm564_vm0, %v4709_v24  ;;  %11070 = vmatmul.mubr.msk.f32.gmra.mrb[114].mxu1 %vm564_vm0, %v4709_v24  ;;  %v4647_v56 = vadd.f32 %v14541_v32, %v4610_v51  ;;  %v4386_v15 = vmul.f32 %v14739_v1, %v14739_v1 }
 0x683   : > { %11954 = vrsqrt.f32 %v4513_v20  ;;  %v4355_v28 = vmul.f32 0.03125, %v4315_v63  ;;  %v4312_v18 = vpop.xlane.xlu0 %4311  ;;  %v4646_v27 = vadd.f32 %v14541_v32, %v4609_v14 }
 0x684   : > { %11956 = vrsqrt.f32 %v4512_v43  ;;  %v4354_v39 = vmul.f32 0.03125, %v4312_v18  ;;  %v4679_v61 = vmul.f32 0.2, %v4647_v56 }
 0x685   : > { %v11951_v54 = vpop.eup %11950  ;;  %v4419_v59 = vsub.f32 %v4355_v28, %v4387_v16  ;;  %v4678_v6 = vmul.f32 0.2, %v4646_v27 }
 0x686   : > { %v11953_v26 = vpop.eup %11952  ;;  %v4418_v5 = vsub.f32 %v4354_v39, %v4386_v15  ;;  %v4161_v35 = vpop.xlane.xlu1 %4160  ;;  %v4575_v3 = vmul.f32 %v11951_v54, %v4479_v47  ;;  %v4711_v55 = vmax.f32 %v4647_v56, %v4679_v61 }
 0x687   : > { %v4451_v37 = vmax.f32 %v4419_v59, 0.0  ;;  %v14757_v42 = vmul.f32 0.03125, %v4161_v35  ;;  %v4158_v23 = vpop.xlane.xlu0 %4157  ;;  %v4710_v7 = vmax.f32 %v4646_v27, %v4678_v6  ;;  %v4574_v40 = vmul.f32 %v11953_v26, %v4478_v41 }
 0x688   : > { %v4450_v45 = vmax.f32 %v4418_v5, 0.0  ;;  %v14759_v49 = vmul.f32 0.03125, %v4158_v23  ;;  %v4612_v44 = vmul.f32 %v14535_v53, %v4575_v3  ;;  %v4482_v5 = vsub.f32 %v14473_v4, %v14739_v1 }
 0x689   : > { %v4515_v60 = vadd.f32 1e-05, %v4451_v37  ;;  %11016 = vmatprep.mubr.msk.f32.mxu0 %vm564_vm0, %v4710_v7  ;;  %11072 = vmatprep.mubr.msk.f32.mxu1 %vm564_vm0, %v4710_v7  ;;  %v4611_v10 = vmul.f32 %v14535_v53, %v4574_v40  ;;  %v4389_v30 = vmul.f32 %v14757_v42, %v14757_v42 }
 0x68a   : > { %v4514_v22 = vadd.f32 1e-05, %v4450_v45  ;;  %v4321_v12 = vpop.xlane.xlu1 %4320  ;;  %11017 = vmatmul.mubr.msk.f32.gmra.mrb[20].mxu0 %vm564_vm0, %v4711_v55  ;;  %11073 = vmatmul.mubr.msk.f32.gmra.mrb[116].mxu1 %vm564_vm0, %v4711_v55  ;;  %v4649_v34 = vadd.f32 %v14541_v32, %v4612_v44  ;;  %v4388_v8 = vmul.f32 %v14759_v49, %v14759_v49 }
 0x68b   : > { %11958 = vrsqrt.f32 %v4515_v60  ;;  %v4357_v21 = vmul.f32 0.03125, %v4321_v12  ;;  %v4318_v48 = vpop.xlane.xlu0 %4317  ;;  %v4648_v58 = vadd.f32 %v14541_v32, %v4611_v10 }
 0x68c   : > { %11960 = vrsqrt.f32 %v4514_v22  ;;  %v4356_v52 = vmul.f32 0.03125, %v4318_v48  ;;  %v4681_v38 = vmul.f32 0.2, %v4649_v34  ;;  %v4484_v48 = vsub.f32 %v14489_v36, %v14759_v49 }
 0x68d   : > { %v11955_v29 = vpop.eup %11954  ;;  %v4421_v33 = vsub.f32 %v4357_v21, %v4389_v30  ;;  %v4680_v2 = vmul.f32 0.2, %v4648_v58 }
 0x68e   : > { %v11957_v0 = vpop.eup %11956  ;;  %v4420_v19 = vsub.f32 %v4356_v52, %v4388_v8  ;;  %v4167_v62 = vpop.xlane.xlu1 %4166  ;;  %v4577_v24 = vmul.f32 %v11955_v29, %v4481_v57  ;;  %v4713_v16 = vmax.f32 %v4649_v34, %v4681_v38  ;;  %v4485_v34 = vsub.f32 %v14486_v9, %v14757_v42 }
 0x68f   : > { %v4453_v51 = vmax.f32 %v4421_v33, 0.0  ;;  %v14777_v20 = vmul.f32 0.03125, %v4167_v62  ;;  %v4164_v14 = vpop.xlane.xlu0 %4163  ;;  %v4712_v47 = vmax.f32 %v4648_v58, %v4680_v2  ;;  %v4576_v43 = vmul.f32 %v11957_v0, %v4480_v17 }
 0x690   : > { %v4452_v63 = vmax.f32 %v4420_v19, 0.0  ;;  %v14779_v56 = vmul.f32 0.03125, %v4164_v14  ;;  %v4614_v28 = vmul.f32 %v14535_v53, %v4577_v24 }
 0x691   : > { %v4517_v18 = vadd.f32 1e-05, %v4453_v51  ;;  %11019 = vmatprep.mubr.msk.f32.mxu0 %vm564_vm0, %v4712_v47  ;;  %11075 = vmatprep.mubr.msk.f32.mxu1 %vm564_vm0, %v4712_v47  ;;  %v4613_v31 = vmul.f32 %v14535_v53, %v4576_v43  ;;  %v4391_v61 = vmul.f32 %v14777_v20, %v14777_v20  ;;  %v4487_v49 = vsub.f32 %v14502_v11, %v14777_v20  ;;  %v12291_v43 = vld [vmem:[%s13364_s27 + $0x1] ss:$0 sm:$0xff] }
 0x692   : > { %v4516_v27 = vadd.f32 1e-05, %v4452_v63  ;;  %v4327_v15 = vpop.xlane.xlu1 %4326  ;;  %11020 = vmatmul.mubr.msk.f32.gmra.mrb[22].mxu0 %vm564_vm0, %v4713_v16  ;;  %11076 = vmatmul.mubr.msk.f32.gmra.mrb[118].mxu1 %vm564_vm0, %v4713_v16  ;;  %v4651_v39 = vadd.f32 %v14541_v32, %v4614_v28  ;;  %v4390_v13 = vmul.f32 %v14779_v56, %v14779_v56  ;;  %v4486_v19 = vsub.f32 %v14505_v46, %v14779_v56 }
 0x693   : > { %11962 = vrsqrt.f32 %v4517_v18  ;;  %v4359_v54 = vmul.f32 0.03125, %v4327_v15  ;;  %v4324_v41 = vpop.xlane.xlu0 %4323  ;;  %v4650_v59 = vadd.f32 %v14541_v32, %v4613_v31  ;;  %v10066_v31 = vld [vmem:[%s17390_s4 + $0x40] sm:$0xff] }
 0x694   : > { %11964 = vrsqrt.f32 %v4516_v27  ;;  %v4358_v25 = vmul.f32 0.03125, %v4324_v41  ;;  %v4683_v6 = vmul.f32 0.2, %v4651_v39  ;;  %v14841_v27 = vld [vmem:[%s17389_s3 + $0x2] ss:$0 sm:$0xff] }
 0x695   : > { %v11959_v26 = vpop.eup %11958  ;;  %v4423_v35 = vsub.f32 %v4359_v54, %v4391_v61  ;;  %v4682_v3 = vmul.f32 0.2, %v4650_v59 }
 0x696   : > { %v11961_v37 = vpop.eup %11960  ;;  %v4422_v23 = vsub.f32 %v4358_v25, %v4390_v13  ;;  %v4579_v7 = vmul.f32 %v11959_v26, %v4483_v50  ;;  %v4715_v60 = vmax.f32 %v4651_v39, %v4683_v6 }
 0x697   : > { %v4455_v40 = vmax.f32 %v4423_v35, 0.0  ;;  %v4714_v45 = vmax.f32 %v4650_v59, %v4682_v3  ;;  %v4578_v55 = vmul.f32 %v11961_v37, %v4482_v5 }
 0x698   : > { %v4454_v44 = vmax.f32 %v4422_v23, 0.0  ;;  %v4616_v10 = vmul.f32 %v14535_v53, %v4579_v7 }
 0x699   : > { %v4519_v57 = vadd.f32 1e-05, %v4455_v40  ;;  %11022 = vmatprep.mubr.msk.f32.mxu0 %vm564_vm0, %v4714_v45  ;;  %11078 = vmatprep.mubr.msk.f32.mxu1 %vm564_vm0, %v4714_v45  ;;  %v4615_v22 = vmul.f32 %v14535_v53, %v4578_v55 }
 0x69a   : > { %v4518_v4 = vadd.f32 1e-05, %v4454_v44  ;;  %11023 = vmatmul.mubr.msk.f32.gmra.mrb[24].mxu0 %vm564_vm0, %v4715_v60  ;;  %11079 = vmatmul.mubr.msk.f32.gmra.mrb[120].mxu1 %vm564_vm0, %v4715_v60  ;;  %v4653_v1 = vadd.f32 %v14541_v32, %v4616_v10 }
 0x69b   : > { %11966 = vrsqrt.f32 %v4519_v57  ;;  %v4652_v12 = vadd.f32 %v14541_v32, %v4615_v22 }
 0x69c   : > { %11968 = vrsqrt.f32 %v4518_v4  ;;  %v4685_v30 = vmul.f32 0.2, %v4653_v1 }
 0x69d   : > { %v11963_v21 = vpop.eup %11962  ;;  %v4684_v58 = vmul.f32 0.2, %v4652_v12 }
 0x69e   : > { %v11965_v8 = vpop.eup %11964  ;;  %v4581_v52 = vmul.f32 %v11963_v21, %v4485_v34  ;;  %v4717_v17 = vmax.f32 %v4653_v1, %v4685_v30  ;;  %v10068_v30 = vld [vmem:[%s17390_s4 + $0x50] sm:$0xff]  ;;  %v10069_v21 = vld [vmem:[%s17390_s4 + $0x58] sm:$0xff] }
 0x69f   : > { %v4716_v38 = vmax.f32 %v4652_v12, %v4684_v58  ;;  %v4580_v29 = vmul.f32 %v11965_v8, %v4484_v48  ;;  %v11430_v48 = vpack.c.bf16 %v10069_v21, %v10068_v30 }
 0x6a0   : > { %v4618_v33 = vmul.f32 %v14535_v53, %v4581_v52 }
 0x6a1   : > { %11025 = vmatprep.mubr.msk.f32.mxu0 %vm564_vm0, %v4716_v38  ;;  %11081 = vmatprep.mubr.msk.f32.mxu1 %vm564_vm0, %v4716_v38  ;;  %v4617_v9 = vmul.f32 %v14535_v53, %v4580_v29 }
 0x6a2   : > { %11026 = vmatmul.mubr.msk.f32.gmra.mrb[26].mxu0 %vm564_vm0, %v4717_v17  ;;  %11082 = vmatmul.mubr.msk.f32.gmra.mrb[122].mxu1 %vm564_vm0, %v4717_v17  ;;  %v4655_v36 = vadd.f32 %v14541_v32, %v4618_v33 }
 0x6a3   : > { %v4654_v42 = vadd.f32 %v14541_v32, %v4617_v9 }
 0x6a4   : > { %v4687_v2 = vmul.f32 0.2, %v4655_v36 }
 0x6a5   : > { %v11967_v0 = vpop.eup %11966  ;;  %v4686_v62 = vmul.f32 0.2, %v4654_v42 }
 0x6a6   : > { %v11969_v24 = vpop.eup %11968  ;;  %v4583_v51 = vmul.f32 %v11967_v0, %v4487_v49  ;;  %v4719_v47 = vmax.f32 %v4655_v36, %v4687_v2 }
 0x6a7   : > { %v4718_v53 = vmax.f32 %v4654_v42, %v4686_v62  ;;  %v4582_v14 = vmul.f32 %v11969_v24, %v4486_v19 }
 0x6a8   : > { %v4620_v63 = vmul.f32 %v12291_v43, %v4583_v51 }
 0x6a9   : > { %11028 = vmatprep.mubr.msk.f32.mxu0 %vm564_vm0, %v4718_v53  ;;  %11084 = vmatprep.mubr.msk.f32.mxu1 %vm564_vm0, %v4718_v53  ;;  %v4619_v16 = vmul.f32 %v12291_v43, %v4582_v14 }
 0x6aa   : > { %11029 = vmatmul.mubr.msk.f32.gmra.mrb[28].mxu0 %vm564_vm0, %v4719_v47  ;;  %11085 = vmatmul.mubr.msk.f32.gmra.mrb[124].mxu1 %vm564_vm0, %v4719_v47  ;;  %v4657_v11 = vadd.f32 %v14541_v32, %v4620_v63 }
 0x6ab   : > { %v4656_v46 = vadd.f32 %v14541_v32, %v4619_v16  ;;  %v10067_v32 = vld [vmem:[%s17390_s4 + $0x48] sm:$0xff] }
 0x6ac   : > { %v4689_v20 = vmul.f32 0.2, %v4657_v11  ;;  %v11426_v50 = vpack.c.bf16 %v10067_v32, %v10066_v31 }
 0x6ad   : > { %v4688_v56 = vmul.f32 0.2, %v4656_v46 }
 0x6ae   : > { %v4721_v18 = vmax.f32 %v4657_v11, %v4689_v20  ;;  %11427 = vmatprep.subr.bf16.mxu1 %v11426_v50 }
 0x6af   : > { %v4720_v28 = vmax.f32 %v4656_v46, %v4688_v56  ;;  %11429 = vmatpush3.bf16.msra.mxu1 %v11426_v50 }
 0x6b0   : > { %11431 = vmatprep.subr.bf16.mxu1 %v11430_v48 }
 0x6b1   : > { %11031 = vmatprep.mubr.msk.f32.mxu0 %vm564_vm0, %v4720_v28  ;;  %11087 = vmatprep.mubr.msk.f32.mxu1 %vm564_vm0, %v4720_v28 }
 0x6b2   : > { %11032 = vmatmul.mubr.msk.f32.gmra.mrb[30].mxu0 %vm564_vm0, %v4721_v18  ;;  %11088 = vmatmul.mubr.msk.f32.gmra.mrb[126].mxu1 %vm564_vm0, %v4721_v18 }
 0x6b3   : > { %11433 = vmatpush3.bf16.msra.mxu1 %v11430_v48 }
 0x70d   : > { %v11044_v15 = vpop.f32.mrb[96].mxu1 }
 0x70e   : > { %v14844_v39 = vadd.f32 %v11044_v15, %v14841_v27  ;;  %v5167_v61 = vpop.f32.mrb[97].mxu1 }
 0x70f   : > { %v14847_v54 = vadd.f32 %v14841_v27, %v5167_v61 }
 0x710   : > { %v5329_v41 = vsel %vm564_vm0, %v14844_v39, 0.0  ;;  %v5455_v59 = vmul.f32 %v14844_v39, %v14844_v39 }
 0x711   : > { %5330 = vadd.xlane.f32.xlu1 %v5329_v41  ;;  %v5326_v13 = vsel %vm564_vm0, %v14847_v54, 0.0  ;;  %v5454_v25 = vmul.f32 %v14847_v54, %v14847_v54 }
 0x712   : > { %5327 = vadd.xlane.f32.xlu0 %v5326_v13  ;;  %v5489_v6 = vsel %vm564_vm0, %v5455_v59, 0.0 }
 0x713   : > { %v5486_v5 = vsel %vm564_vm0, %v5454_v25, 0.0 }
 0x715   : > { %5490 = vadd.xlane.f32.xlu1 %v5489_v6  ;;  %v11047_v26 = vpop.f32.mrb[98].mxu1 }
 0x716   : > { %v14860_v35 = vadd.f32 %v11047_v26, %v14841_v27  ;;  %5487 = vadd.xlane.f32.xlu0 %v5486_v5  ;;  %v5177_v3 = vpop.f32.mrb[99].mxu1 }
 0x717   : > { %v14863_v37 = vadd.f32 %v14841_v27, %v5177_v3 }
 0x718   : > { %v5335_v23 = vsel %vm564_vm0, %v14860_v35, 0.0  ;;  %v5457_v7 = vmul.f32 %v14860_v35, %v14860_v35 }
 0x719   : > { %5336 = vadd.xlane.f32.xlu1 %v5335_v23  ;;  %v5332_v40 = vsel %vm564_vm0, %v14863_v37, 0.0  ;;  %v5456_v45 = vmul.f32 %v14863_v37, %v14863_v37 }
 0x71a   : > { %5333 = vadd.xlane.f32.xlu0 %v5332_v40  ;;  %v5495_v55 = vsel %vm564_vm0, %v5457_v7, 0.0 }
 0x71b   : > { %v5492_v60 = vsel %vm564_vm0, %v5456_v45, 0.0 }
 0x71d   : > { %5496 = vadd.xlane.f32.xlu1 %v5495_v55  ;;  %v11050_v44 = vpop.f32.mrb[100].mxu1 }
 0x71e   : > { %v14876_v10 = vadd.f32 %v11050_v44, %v14841_v27  ;;  %5493 = vadd.xlane.f32.xlu0 %v5492_v60  ;;  %v5187_v57 = vpop.f32.mrb[101].mxu1 }
 0x71f   : > { %v14879_v22 = vadd.f32 %v14841_v27, %v5187_v57 }
 0x720   : > { %v5341_v4 = vsel %vm564_vm0, %v14876_v10, 0.0  ;;  %v5459_v1 = vmul.f32 %v14876_v10, %v14876_v10 }
 0x721   : > { %5342 = vadd.xlane.f32.xlu1 %v5341_v4  ;;  %v5338_v12 = vsel %vm564_vm0, %v14879_v22, 0.0  ;;  %v5458_v34 = vmul.f32 %v14879_v22, %v14879_v22 }
 0x722   : > { %5339 = vadd.xlane.f32.xlu0 %v5338_v12  ;;  %v5501_v58 = vsel %vm564_vm0, %v5459_v1, 0.0 }
 0x723   : > { %v5498_v52 = vsel %vm564_vm0, %v5458_v34, 0.0 }
 0x725   : > { %5502 = vadd.xlane.f32.xlu1 %v5501_v58  ;;  %v11053_v8 = vpop.f32.mrb[102].mxu1 }
 0x726   : > { %v14898_v38 = vadd.f32 %v11053_v8, %v14841_v27  ;;  %5499 = vadd.xlane.f32.xlu0 %v5498_v52  ;;  %v5197_v29 = vpop.f32.mrb[103].mxu1 }
 0x727   : > { %v14901_v17 = vadd.f32 %v14841_v27, %v5197_v29 }
 0x728   : > { %v5347_v33 = vsel %vm564_vm0, %v14898_v38, 0.0  ;;  %v5461_v9 = vmul.f32 %v14898_v38, %v14898_v38 }
 0x729   : > { %5348 = vadd.xlane.f32.xlu1 %v5347_v33  ;;  %v5344_v36 = vsel %vm564_vm0, %v14901_v17, 0.0  ;;  %v5460_v42 = vmul.f32 %v14901_v17, %v14901_v17 }
 0x72a   : > { %5345 = vadd.xlane.f32.xlu0 %v5344_v36  ;;  %v5507_v49 = vsel %vm564_vm0, %v5461_v9, 0.0 }
 0x72b   : > { %v5504_v0 = vsel %vm564_vm0, %v5460_v42, 0.0 }
 0x72d   : > { %5508 = vadd.xlane.f32.xlu1 %v5507_v49  ;;  %v11056_v2 = vpop.f32.mrb[104].mxu1 }
 0x72e   : > { %v14914_v19 = vadd.f32 %v11056_v2, %v14841_v27  ;;  %5505 = vadd.xlane.f32.xlu0 %v5504_v0  ;;  %v5207_v62 = vpop.f32.mrb[105].mxu1 }
 0x72f   : > { %v14917_v24 = vadd.f32 %v14841_v27, %v5207_v62 }
 0x730   : > { %v5353_v51 = vsel %vm564_vm0, %v14914_v19, 0.0  ;;  %v5463_v53 = vmul.f32 %v14914_v19, %v14914_v19 }
 0x731   : > { %5354 = vadd.xlane.f32.xlu1 %v5353_v51  ;;  %v5350_v14 = vsel %vm564_vm0, %v14917_v24, 0.0  ;;  %v5462_v47 = vmul.f32 %v14917_v24, %v14917_v24 }
 0x732   : > { %5351 = vadd.xlane.f32.xlu0 %v5350_v14  ;;  %v5513_v43 = vsel %vm564_vm0, %v5463_v53, 0.0 }
 0x733   : > { %v5510_v16 = vsel %vm564_vm0, %v5462_v47, 0.0 }
 0x735   : > { %5514 = vadd.xlane.f32.xlu1 %v5513_v43  ;;  %v11059_v63 = vpop.f32.mrb[106].mxu1 }
 0x736   : > { %v14930_v11 = vadd.f32 %v11059_v63, %v14841_v27  ;;  %5511 = vadd.xlane.f32.xlu0 %v5510_v16  ;;  %v5217_v46 = vpop.f32.mrb[107].mxu1 }
 0x737   : > { %v14933_v20 = vadd.f32 %v14841_v27, %v5217_v46 }
 0x738   : > { %v5359_v56 = vsel %vm564_vm0, %v14930_v11, 0.0  ;;  %v5465_v28 = vmul.f32 %v14930_v11, %v14930_v11 }
 0x739   : > { %5360 = vadd.xlane.f32.xlu1 %v5359_v56  ;;  %v5356_v18 = vsel %vm564_vm0, %v14933_v20, 0.0  ;;  %v5464_v31 = vmul.f32 %v14933_v20, %v14933_v20 }
 0x73a   : > { %5357 = vadd.xlane.f32.xlu0 %v5356_v18  ;;  %v5519_v32 = vsel %vm564_vm0, %v5465_v28, 0.0 }
 0x73b   : > { %v5516_v15 = vsel %vm564_vm0, %v5464_v31, 0.0 }
 0x73d   : > { %5520 = vadd.xlane.f32.xlu1 %v5519_v32  ;;  %v11062_v50 = vpop.f32.mrb[108].mxu1 }
 0x73e   : > { %v14946_v61 = vadd.f32 %v11062_v50, %v14841_v27  ;;  %5517 = vadd.xlane.f32.xlu0 %v5516_v15  ;;  %v5227_v41 = vpop.f32.mrb[109].mxu1 }
 0x73f   : > { %v14949_v59 = vadd.f32 %v14841_v27, %v5227_v41 }
 0x740   : > { %v5365_v13 = vsel %vm564_vm0, %v14946_v61, 0.0  ;;  %v5467_v25 = vmul.f32 %v14946_v61, %v14946_v61 }
 0x741   : > { %5366 = vadd.xlane.f32.xlu1 %v5365_v13  ;;  %v5362_v6 = vsel %vm564_vm0, %v14949_v59, 0.0  ;;  %v5466_v26 = vmul.f32 %v14949_v59, %v14949_v59 }
 0x742   : > { %5363 = vadd.xlane.f32.xlu0 %v5362_v6  ;;  %v5525_v5 = vsel %vm564_vm0, %v5467_v25, 0.0 }
 0x743   : > { %v5522_v23 = vsel %vm564_vm0, %v5466_v26, 0.0 }
 0x745   : > { %5526 = vadd.xlane.f32.xlu1 %v5525_v5  ;;  %v11065_v3 = vpop.f32.mrb[110].mxu1 }
 0x746   : > { %v14962_v7 = vadd.f32 %v11065_v3, %v14841_v27  ;;  %5523 = vadd.xlane.f32.xlu0 %v5522_v23  ;;  %v5237_v40 = vpop.f32.mrb[111].mxu1 }
 0x747   : > { %v14965_v45 = vadd.f32 %v14841_v27, %v5237_v40 }
 0x748   : > { %v5371_v55 = vsel %vm564_vm0, %v14962_v7, 0.0  ;;  %v5469_v44 = vmul.f32 %v14962_v7, %v14962_v7 }
 0x749   : > { %5372 = vadd.xlane.f32.xlu1 %v5371_v55  ;;  %v5368_v60 = vsel %vm564_vm0, %v14965_v45, 0.0  ;;  %v5468_v57 = vmul.f32 %v14965_v45, %v14965_v45 }
 0x74a   : > { %5369 = vadd.xlane.f32.xlu0 %v5368_v60  ;;  %v5531_v4 = vsel %vm564_vm0, %v5469_v44, 0.0 }
 0x74b   : > { %v5528_v12 = vsel %vm564_vm0, %v5468_v57, 0.0 }
 0x74d   : > { %5532 = vadd.xlane.f32.xlu1 %v5531_v4  ;;  %v11068_v1 = vpop.f32.mrb[112].mxu1 }
 0x74e   : > { %v14978_v34 = vadd.f32 %v11068_v1, %v14841_v27  ;;  %5529 = vadd.xlane.f32.xlu0 %v5528_v12  ;;  %v5247_v30 = vpop.f32.mrb[113].mxu1 }
 0x74f   : > { %v14981_v21 = vadd.f32 %v14841_v27, %v5247_v30 }
 0x750   : > { %v5377_v48 = vsel %vm564_vm0, %v14978_v34, 0.0  ;;  %v5471_v58 = vmul.f32 %v14978_v34, %v14978_v34 }
 0x751   : > { %5378 = vadd.xlane.f32.xlu1 %v5377_v48  ;;  %v5374_v8 = vsel %vm564_vm0, %v14981_v21, 0.0  ;;  %v5470_v52 = vmul.f32 %v14981_v21, %v14981_v21 }
 0x752   : > { %5375 = vadd.xlane.f32.xlu0 %v5374_v8  ;;  %v5537_v29 = vsel %vm564_vm0, %v5471_v58, 0.0 }
 0x753   : > { %v5534_v9 = vsel %vm564_vm0, %v5470_v52, 0.0 }
 0x755   : > { %5538 = vadd.xlane.f32.xlu1 %v5537_v29  ;;  %v11071_v33 = vpop.f32.mrb[114].mxu1 }
 0x756   : > { %v14994_v36 = vadd.f32 %v11071_v33, %v14841_v27  ;;  %5535 = vadd.xlane.f32.xlu0 %v5534_v9  ;;  %v5257_v42 = vpop.f32.mrb[115].mxu1 }
 0x757   : > { %v14997_v49 = vadd.f32 %v14841_v27, %v5257_v42 }
 0x758   : > { %v5383_v2 = vsel %vm564_vm0, %v14994_v36, 0.0  ;;  %v5473_v0 = vmul.f32 %v14994_v36, %v14994_v36 }
 0x759   : > { %5384 = vadd.xlane.f32.xlu1 %v5383_v2  ;;  %v5380_v62 = vsel %vm564_vm0, %v14997_v49, 0.0  ;;  %v5472_v51 = vmul.f32 %v14997_v49, %v14997_v49 }
 0x75a   : > { %5381 = vadd.xlane.f32.xlu0 %v5380_v62  ;;  %v5543_v53 = vsel %vm564_vm0, %v5473_v0, 0.0 }
 0x75b   : > { %v5540_v47 = vsel %vm564_vm0, %v5472_v51, 0.0 }
 0x75d   : > { %5544 = vadd.xlane.f32.xlu1 %v5543_v53  ;;  %v11074_v14 = vpop.f32.mrb[116].mxu1 }
 0x75e   : > { %v15010_v43 = vadd.f32 %v11074_v14, %v14841_v27  ;;  %5541 = vadd.xlane.f32.xlu0 %v5540_v47  ;;  %v5267_v63 = vpop.f32.mrb[117].mxu1 }
 0x75f   : > { %v15013_v16 = vadd.f32 %v14841_v27, %v5267_v63 }
 0x760   : > { %v5389_v46 = vsel %vm564_vm0, %v15010_v43, 0.0  ;;  %v5475_v56 = vmul.f32 %v15010_v43, %v15010_v43 }
 0x761   : > { %5390 = vadd.xlane.f32.xlu1 %v5389_v46  ;;  %v5386_v28 = vsel %vm564_vm0, %v15013_v16, 0.0  ;;  %v5474_v18 = vmul.f32 %v15013_v16, %v15013_v16 }
 0x762   : > { %5387 = vadd.xlane.f32.xlu0 %v5386_v28  ;;  %v5549_v31 = vsel %vm564_vm0, %v5475_v56, 0.0 }
 0x763   : > { %v5546_v50 = vsel %vm564_vm0, %v5474_v18, 0.0 }
 0x765   : > { %5550 = vadd.xlane.f32.xlu1 %v5549_v31  ;;  %v11077_v32 = vpop.f32.mrb[118].mxu1 }
 0x766   : > { %v15026_v15 = vadd.f32 %v11077_v32, %v14841_v27  ;;  %5547 = vadd.xlane.f32.xlu0 %v5546_v50  ;;  %v5277_v41 = vpop.f32.mrb[119].mxu1 }
 0x767   : > { %v15029_v13 = vadd.f32 %v14841_v27, %v5277_v41 }
 0x768   : > { %v5395_v25 = vsel %vm564_vm0, %v15026_v15, 0.0  ;;  %v5477_v6 = vmul.f32 %v15026_v15, %v15026_v15 }
 0x769   : > { %5396 = vadd.xlane.f32.xlu1 %v5395_v25  ;;  %v5392_v26 = vsel %vm564_vm0, %v15029_v13, 0.0  ;;  %v5476_v5 = vmul.f32 %v15029_v13, %v15029_v13 }
 0x76a   : > { %5393 = vadd.xlane.f32.xlu0 %v5392_v26  ;;  %v5555_v3 = vsel %vm564_vm0, %v5477_v6, 0.0 }
 0x76b   : > { %v5552_v40 = vsel %vm564_vm0, %v5476_v5, 0.0 }
 0x76d   : > { %5556 = vadd.xlane.f32.xlu1 %v5555_v3  ;;  %v11080_v23 = vpop.f32.mrb[120].mxu1 }
 0x76e   : > { %v15042_v55 = vadd.f32 %v11080_v23, %v14841_v27  ;;  %5553 = vadd.xlane.f32.xlu0 %v5552_v40  ;;  %v5287_v44 = vpop.f32.mrb[121].mxu1 }
 0x76f   : > { %v15045_v60 = vadd.f32 %v14841_v27, %v5287_v44 }
 0x770   : > { %v5401_v57 = vsel %vm564_vm0, %v15042_v55, 0.0  ;;  %v5479_v4 = vmul.f32 %v15042_v55, %v15042_v55 }
 0x771   : > { %5402 = vadd.xlane.f32.xlu1 %v5401_v57  ;;  %v5398_v1 = vsel %vm564_vm0, %v15045_v60, 0.0  ;;  %v5478_v12 = vmul.f32 %v15045_v60, %v15045_v60 }
 0x772   : > { %5399 = vadd.xlane.f32.xlu0 %v5398_v1  ;;  %v5561_v30 = vsel %vm564_vm0, %v5479_v4, 0.0 }
 0x773   : > { %v5558_v58 = vsel %vm564_vm0, %v5478_v12, 0.0 }
 0x775   : > { %5562 = vadd.xlane.f32.xlu1 %v5561_v30  ;;  %v11083_v48 = vpop.f32.mrb[122].mxu1 }
 0x776   : > { %v15058_v8 = vadd.f32 %v11083_v48, %v14841_v27  ;;  %5559 = vadd.xlane.f32.xlu0 %v5558_v58  ;;  %v5297_v52 = vpop.f32.mrb[123].mxu1 }
 0x777   : > { %v15061_v29 = vadd.f32 %v14841_v27, %v5297_v52 }
 0x778   : > { %v5407_v33 = vsel %vm564_vm0, %v15058_v8, 0.0  ;;  %v5481_v9 = vmul.f32 %v15058_v8, %v15058_v8 }
 0x779   : > { %5408 = vadd.xlane.f32.xlu1 %v5407_v33  ;;  %v5404_v42 = vsel %vm564_vm0, %v15061_v29, 0.0  ;;  %v5480_v2 = vmul.f32 %v15061_v29, %v15061_v29 }
 0x77a   : > { %5405 = vadd.xlane.f32.xlu0 %v5404_v42  ;;  %v5567_v0 = vsel %vm564_vm0, %v5481_v9, 0.0 }
 0x77b   : > { %v5564_v51 = vsel %vm564_vm0, %v5480_v2, 0.0 }
 0x77d   : > { %5568 = vadd.xlane.f32.xlu1 %v5567_v0  ;;  %v11086_v62 = vpop.f32.mrb[124].mxu1 }
 0x77e   : > { %v15074_v53 = vadd.f32 %v11086_v62, %v14841_v27  ;;  %5565 = vadd.xlane.f32.xlu0 %v5564_v51  ;;  %v5307_v14 = vpop.f32.mrb[125].mxu1 }
 0x77f   : > { %v15077_v47 = vadd.f32 %v14841_v27, %v5307_v14 }
 0x780   : > { %v5413_v63 = vsel %vm564_vm0, %v15074_v53, 0.0  ;;  %v5483_v46 = vmul.f32 %v15074_v53, %v15074_v53 }
 0x781   : > { %5414 = vadd.xlane.f32.xlu1 %v5413_v63  ;;  %v5410_v56 = vsel %vm564_vm0, %v15077_v47, 0.0  ;;  %v5482_v28 = vmul.f32 %v15077_v47, %v15077_v47 }
 0x782   : > { %5411 = vadd.xlane.f32.xlu0 %v5410_v56  ;;  %v5573_v18 = vsel %vm564_vm0, %v5483_v46, 0.0 }
 0x783   : > { %v5570_v32 = vsel %vm564_vm0, %v5482_v28, 0.0 }
 0x785   : > { %5574 = vadd.xlane.f32.xlu1 %v5573_v18  ;;  %v11089_v31 = vpop.f32.mrb[126].mxu1 }
 0x786   : > { %v15090_v50 = vadd.f32 %v11089_v31, %v14841_v27  ;;  %5571 = vadd.xlane.f32.xlu0 %v5570_v32  ;;  %v5317_v41 = vpop.f32.mrb[127].mxu1 }
 0x787   : > { %v15093_v25 = vadd.f32 %v14841_v27, %v5317_v41 }
 0x788   : > { %v5419_v6 = vsel %vm564_vm0, %v15090_v50, 0.0  ;;  %v5485_v26 = vmul.f32 %v15090_v50, %v15090_v50 }
 0x789   : > { %5420 = vadd.xlane.f32.xlu1 %v5419_v6  ;;  %v5416_v5 = vsel %vm564_vm0, %v15093_v25, 0.0  ;;  %v5484_v3 = vmul.f32 %v15093_v25, %v15093_v25 }
 0x78a   : > { %5417 = vadd.xlane.f32.xlu0 %v5416_v5  ;;  %v5579_v23 = vsel %vm564_vm0, %v5485_v26, 0.0 }
 0x78b   : > { %v5576_v27 = vsel %vm564_vm0, %v5484_v3, 0.0 }
 0x78d   : > { %5580 = vadd.xlane.f32.xlu1 %v5579_v23 }
 0x78e   : > { %5577 = vadd.xlane.f32.xlu0 %v5576_v27 }
 0x79e   : > { %v5331_v40 = vpop.xlane.xlu1 %5330 }
 0x79f   : > { %v5423_v44 = vmul.f32 0.03125, %v5331_v40  ;;  %v5328_v57 = vpop.xlane.xlu0 %5327 }
 0x7a0   : > { %v5422_v4 = vmul.f32 0.03125, %v5328_v57 }
 0x7a1   : > { %v5615_v12 = vmul.f32 %v5423_v44, %v5423_v44 }
 0x7a2   : > { %v5491_v1 = vpop.xlane.xlu1 %5490  ;;  %v5614_v58 = vmul.f32 %v5422_v4, %v5422_v4 }
 0x7a3   : > { %v5583_v30 = vmul.f32 0.03125, %v5491_v1  ;;  %v5488_v48 = vpop.xlane.xlu0 %5487 }
 0x7a4   : > { %v5582_v52 = vmul.f32 0.03125, %v5488_v48 }
 0x7a5   : > { %v5647_v33 = vsub.f32 %v5583_v30, %v5615_v12 }
 0x7a6   : > { %v5646_v9 = vsub.f32 %v5582_v52, %v5614_v58  ;;  %v5337_v42 = vpop.xlane.xlu1 %5336 }
 0x7a7   : > { %v5679_v2 = vmax.f32 %v5647_v33, 0.0  ;;  %v15105_v0 = vmul.f32 0.03125, %v5337_v42  ;;  %v5334_v62 = vpop.xlane.xlu0 %5333  ;;  %v5711_v33 = vsub.f32 %v14844_v39, %v5423_v44 }
 0x7a8   : > { %v5678_v51 = vmax.f32 %v5646_v9, 0.0  ;;  %v15107_v14 = vmul.f32 0.03125, %v5334_v62  ;;  %v15123_v62 = vld [vmem:[%s12781_s19 + $0x2] ss:$0 sm:$0xff] }
 0x7a9   : > { %v5743_v63 = vadd.f32 1e-05, %v5679_v2  ;;  %v5617_v28 = vmul.f32 %v15105_v0, %v15105_v0 }
 0x7aa   : > { %v5742_v46 = vadd.f32 1e-05, %v5678_v51  ;;  %v5497_v56 = vpop.xlane.xlu1 %5496  ;;  %v5616_v32 = vmul.f32 %v15107_v14, %v15107_v14  ;;  %v5710_v51 = vsub.f32 %v14847_v54, %v5422_v4  ;;  %v5713_v4 = vsub.f32 %v14860_v35, %v15105_v0 }
 0x7ab   : > { %11970 = vrsqrt.f32 %v5743_v63  ;;  %v5585_v18 = vmul.f32 0.03125, %v5497_v56  ;;  %v5494_v31 = vpop.xlane.xlu0 %5493  ;;  %v5712_v35 = vsub.f32 %v14863_v37, %v15107_v14 }
 0x7ac   : > { %11972 = vrsqrt.f32 %v5742_v46  ;;  %v5584_v41 = vmul.f32 0.03125, %v5494_v31 }
 0x7ad   : > { %v5649_v6 = vsub.f32 %v5585_v18, %v5617_v28 }
 0x7ae   : > { %v5648_v26 = vsub.f32 %v5584_v41, %v5616_v32  ;;  %v5343_v5 = vpop.xlane.xlu1 %5342  ;;  %v15129_v41 = vld [vmem:[%s12789_s26 + $0x2] ss:$0 sm:$0xff] }
 0x7af   : > { %v5681_v3 = vmax.f32 %v5649_v6, 0.0  ;;  %v15113_v23 = vmul.f32 0.03125, %v5343_v5  ;;  %v5340_v27 = vpop.xlane.xlu0 %5339 }
 0x7b0   : > { %v5680_v40 = vmax.f32 %v5648_v26, 0.0  ;;  %v15115_v57 = vmul.f32 0.03125, %v5340_v27 }
 0x7b1   : > { %v5745_v1 = vadd.f32 1e-05, %v5681_v3  ;;  %v5619_v48 = vmul.f32 %v15113_v23, %v15113_v23  ;;  %v5715_v14 = vsub.f32 %v14876_v10, %v15113_v23 }
 0x7b2   : > { %v5744_v12 = vadd.f32 1e-05, %v5680_v40  ;;  %v5503_v30 = vpop.xlane.xlu1 %5502  ;;  %v5618_v9 = vmul.f32 %v15115_v57, %v15115_v57 }
 0x7b3   : > { %11974 = vrsqrt.f32 %v5745_v1  ;;  %v5587_v58 = vmul.f32 0.03125, %v5503_v30  ;;  %v5500_v52 = vpop.xlane.xlu0 %5499 }
 0x7b4   : > { %11976 = vrsqrt.f32 %v5744_v12  ;;  %v5586_v42 = vmul.f32 0.03125, %v5500_v52 }
 0x7b5   : > { %v11971_v2 = vpop.eup %11970  ;;  %v5651_v63 = vsub.f32 %v5587_v58, %v5619_v48 }
 0x7b6   : > { %v11973_v46 = vpop.eup %11972  ;;  %v5807_v56 = vmul.f32 %v11971_v2, %v5711_v33  ;;  %v5650_v28 = vsub.f32 %v5586_v42, %v5618_v9  ;;  %v5349_v18 = vpop.xlane.xlu1 %5348 }
 0x7b7   : > { %v5683_v31 = vmax.f32 %v5651_v63, 0.0  ;;  %v15126_v32 = vmul.f32 0.03125, %v5349_v18  ;;  %v5346_v39 = vpop.xlane.xlu0 %5345  ;;  %v5806_v44 = vmul.f32 %v11973_v46, %v5710_v51 }
 0x7b8   : > { %v5844_v6 = vmul.f32 %v15123_v62, %v5807_v56  ;;  %v5682_v26 = vmax.f32 %v5650_v28, 0.0  ;;  %v15132_v5 = vmul.f32 0.03125, %v5346_v39 }
 0x7b9   : > { %v5747_v3 = vadd.f32 1e-05, %v5683_v31  ;;  %v5843_v54 = vmul.f32 %v15123_v62, %v5806_v44  ;;  %v5621_v12 = vmul.f32 %v15126_v32, %v15126_v32 }
 0x7ba   : > { %v5746_v27 = vadd.f32 1e-05, %v5682_v26  ;;  %v5509_v40 = vpop.xlane.xlu1 %5508  ;;  %v5881_v1 = vadd.f32 %v15129_v41, %v5844_v6  ;;  %v5620_v52 = vmul.f32 %v15132_v5, %v15132_v5 }
 0x7bb   : > { %11978 = vrsqrt.f32 %v5747_v3  ;;  %v5589_v30 = vmul.f32 0.03125, %v5509_v40  ;;  %v5506_v48 = vpop.xlane.xlu0 %5505  ;;  %v5880_v58 = vadd.f32 %v15129_v41, %v5843_v54 }
 0x7bc   : > { %11980 = vrsqrt.f32 %v5746_v27  ;;  %v5588_v33 = vmul.f32 0.03125, %v5506_v48  ;;  %v5913_v9 = vmul.f32 0.2, %v5881_v1 }
 0x7bd   : > { %v11975_v42 = vpop.eup %11974  ;;  %v5653_v0 = vsub.f32 %v5589_v30, %v5621_v12  ;;  %v5912_v2 = vmul.f32 0.2, %v5880_v58 }
 0x7be   : > { %v11977_v51 = vpop.eup %11976  ;;  %v5652_v63 = vsub.f32 %v5588_v33, %v5620_v52  ;;  %v5355_v46 = vpop.xlane.xlu1 %5354  ;;  %v5809_v56 = vmul.f32 %v11975_v42, %v5713_v4  ;;  %v5945_v3 = vmax.f32 %v5881_v1, %v5913_v9  ;;  %v5714_v9 = vsub.f32 %v14879_v22, %v15115_v57 }
 0x7bf   : > { %v5685_v28 = vmax.f32 %v5653_v0, 0.0  ;;  %v15145_v18 = vmul.f32 0.03125, %v5355_v46  ;;  %v5352_v31 = vpop.xlane.xlu0 %5351  ;;  %v5944_v39 = vmax.f32 %v5880_v58, %v5912_v2  ;;  %v5808_v44 = vmul.f32 %v11977_v51, %v5712_v35 }
 0x7c0   : > { %v5684_v6 = vmax.f32 %v5652_v63, 0.0  ;;  %v15147_v26 = vmul.f32 0.03125, %v5352_v31  ;;  %v5846_v54 = vmul.f32 %v15123_v62, %v5809_v56  ;;  %v5717_v57 = vsub.f32 %v14898_v38, %v15126_v32 }
 0x7c1   : > { %v5749_v27 = vadd.f32 1e-05, %v5685_v28  ;;  %11098 = vmatprep.mubr.msk.f32.mxu1 %vm564_vm0, %v5944_v39  ;;  %v5845_v37 = vmul.f32 %v15123_v62, %v5808_v44  ;;  %v5623_v1 = vmul.f32 %v15145_v18, %v15145_v18 }
 0x7c2   : > { %v5748_v4 = vadd.f32 1e-05, %v5684_v6  ;;  %v5515_v40 = vpop.xlane.xlu1 %5514  ;;  %11099 = vmatmul.mubr.msk.f32.vlgmr.msra.gmra.mrb[128].mxu1 %vm564_vm0, %v5945_v3  ;;  %v5883_v12 = vadd.f32 %v15129_v41, %v5846_v54  ;;  %v5622_v52 = vmul.f32 %v15147_v26, %v15147_v26 }
 0x7c3   : > { %11982 = vrsqrt.f32 %v5749_v27  ;;  %v5591_v30 = vmul.f32 0.03125, %v5515_v40  ;;  %v5512_v48 = vpop.xlane.xlu0 %5511  ;;  %v5882_v58 = vadd.f32 %v15129_v41, %v5845_v37 }
 0x7c4   : > { %11984 = vrsqrt.f32 %v5748_v4  ;;  %v5590_v33 = vmul.f32 0.03125, %v5512_v48  ;;  %v5915_v10 = vmul.f32 0.2, %v5883_v12 }
 0x7c5   : > { %v11979_v23 = vpop.eup %11978  ;;  %v5655_v42 = vsub.f32 %v5591_v30, %v5623_v1  ;;  %v5914_v35 = vmul.f32 0.2, %v5882_v58 }
 0x7c6   : > { %v11981_v0 = vpop.eup %11980  ;;  %v5654_v2 = vsub.f32 %v5590_v33, %v5622_v52  ;;  %v5361_v51 = vpop.xlane.xlu1 %5360  ;;  %v5811_v63 = vmul.f32 %v11979_v23, %v5715_v14  ;;  %v5947_v3 = vmax.f32 %v5883_v12, %v5915_v10  ;;  %v5716_v52 = vsub.f32 %v14901_v17, %v15132_v5 }
 0x7c7   : > { %v5687_v46 = vmax.f32 %v5655_v42, 0.0  ;;  %v15163_v56 = vmul.f32 0.03125, %v5361_v51  ;;  %v5358_v28 = vpop.xlane.xlu0 %5357  ;;  %v5946_v31 = vmax.f32 %v5882_v58, %v5914_v35  ;;  %v5810_v39 = vmul.f32 %v11981_v0, %v5714_v9 }
 0x7c8   : > { %v5686_v44 = vmax.f32 %v5654_v2, 0.0  ;;  %v15165_v6 = vmul.f32 0.03125, %v5358_v28  ;;  %v5848_v54 = vmul.f32 %v15123_v62, %v5811_v63  ;;  %v5719_v5 = vsub.f32 %v14914_v19, %v15145_v18 }
 0x7c9   : > { %v5751_v27 = vadd.f32 1e-05, %v5687_v46  ;;  %11101 = vmatprep.mubr.msk.f32.mxu1 %vm564_vm0, %v5946_v31  ;;  %v5847_v22 = vmul.f32 %v15123_v62, %v5810_v39  ;;  %v5625_v40 = vmul.f32 %v15163_v56, %v15163_v56 }
 0x7ca   : > { %v5750_v37 = vadd.f32 1e-05, %v5686_v44  ;;  %v5521_v14 = vpop.xlane.xlu1 %5520  ;;  %11102 = vmatmul.mubr.msk.f32.gmra.mrb[130].mxu1 %vm564_vm0, %v5947_v3  ;;  %v5885_v4 = vadd.f32 %v15129_v41, %v5848_v54  ;;  %v5624_v48 = vmul.f32 %v15165_v6, %v15165_v6 }
 0x7cb   : > { %11986 = vrsqrt.f32 %v5751_v27  ;;  %v5593_v12 = vmul.f32 0.03125, %v5521_v14  ;;  %v5518_v1 = vpop.xlane.xlu0 %5517  ;;  %v5884_v30 = vadd.f32 %v15129_v41, %v5847_v22 }
 0x7cc   : > { %11988 = vrsqrt.f32 %v5750_v37  ;;  %v5592_v58 = vmul.f32 0.03125, %v5518_v1  ;;  %v5917_v38 = vmul.f32 0.2, %v5885_v4  ;;  %v5718_v1 = vsub.f32 %v14917_v24, %v15147_v26 }
 0x7cd   : > { %v11983_v32 = vpop.eup %11982  ;;  %v5657_v33 = vsub.f32 %v5593_v12, %v5625_v40  ;;  %v5916_v10 = vmul.f32 0.2, %v5884_v30  ;;  %v5721_v26 = vsub.f32 %v14930_v11, %v15163_v56 }
 0x7ce   : > { %v11985_v23 = vpop.eup %11984  ;;  %v5656_v9 = vsub.f32 %v5592_v58, %v5624_v48  ;;  %v5367_v42 = vpop.xlane.xlu1 %5366  ;;  %v5813_v35 = vmul.f32 %v11983_v32, %v5717_v57  ;;  %v5949_v39 = vmax.f32 %v5885_v4, %v5917_v38 }
 0x7cf   : > { %v5689_v0 = vmax.f32 %v5657_v33, 0.0  ;;  %v15181_v2 = vmul.f32 0.03125, %v5367_v42  ;;  %v5364_v51 = vpop.xlane.xlu0 %5363  ;;  %v5948_v63 = vmax.f32 %v5884_v30, %v5916_v10  ;;  %v5812_v46 = vmul.f32 %v11985_v23, %v5716_v52 }
 0x7d0   : > { %v5688_v28 = vmax.f32 %v5656_v9, 0.0  ;;  %v15183_v31 = vmul.f32 0.03125, %v5364_v51  ;;  %v5850_v44 = vmul.f32 %v15123_v62, %v5813_v35 }
 0x7d1   : > { %v5753_v3 = vadd.f32 1e-05, %v5689_v0  ;;  %11104 = vmatprep.mubr.msk.f32.mxu1 %vm564_vm0, %v5948_v63  ;;  %v5849_v17 = vmul.f32 %v15123_v62, %v5812_v46  ;;  %v5627_v57 = vmul.f32 %v15181_v2, %v15181_v2 }
 0x7d2   : > { %v5752_v54 = vadd.f32 1e-05, %v5688_v28  ;;  %v5527_v27 = vpop.xlane.xlu1 %5526  ;;  %11105 = vmatmul.mubr.msk.f32.gmra.mrb[132].mxu1 %vm564_vm0, %v5949_v39  ;;  %v5887_v22 = vadd.f32 %v15129_v41, %v5850_v44  ;;  %v5626_v40 = vmul.f32 %v15183_v31, %v15183_v31 }
 0x7d3   : > { %11990 = vrsqrt.f32 %v5753_v3  ;;  %v5595_v37 = vmul.f32 0.03125, %v5527_v27  ;;  %v5524_v14 = vpop.xlane.xlu0 %5523  ;;  %v5886_v4 = vadd.f32 %v15129_v41, %v5849_v17 }
 0x7d4   : > { %11992 = vrsqrt.f32 %v5752_v54  ;;  %v5594_v12 = vmul.f32 0.03125, %v5524_v14  ;;  %v5919_v19 = vmul.f32 0.2, %v5887_v22 }
 0x7d5   : > { %v11987_v18 = vpop.eup %11986  ;;  %v5659_v30 = vsub.f32 %v5595_v37, %v5627_v57  ;;  %v5918_v48 = vmul.f32 0.2, %v5886_v4  ;;  %v5720_v57 = vsub.f32 %v14933_v20, %v15165_v6  ;;  %v5723_v6 = vsub.f32 %v14946_v61, %v15181_v2 }
 0x7d6   : > { %v11989_v58 = vpop.eup %11988  ;;  %v5658_v38 = vsub.f32 %v5594_v12, %v5626_v40  ;;  %v5373_v32 = vpop.xlane.xlu1 %5372  ;;  %v5815_v52 = vmul.f32 %v11987_v18, %v5719_v5  ;;  %v5951_v51 = vmax.f32 %v5887_v22, %v5919_v19 }
 0x7d7   : > { %v5691_v33 = vmax.f32 %v5659_v30, 0.0  ;;  %v15199_v10 = vmul.f32 0.03125, %v5373_v32  ;;  %v5370_v23 = vpop.xlane.xlu0 %5369  ;;  %v5950_v9 = vmax.f32 %v5886_v4, %v5918_v48  ;;  %v5814_v42 = vmul.f32 %v11989_v58, %v5718_v1 }
 0x7d8   : > { %v5690_v35 = vmax.f32 %v5658_v38, 0.0  ;;  %v15201_v0 = vmul.f32 0.03125, %v5370_v23  ;;  %v5852_v63 = vmul.f32 %v15123_v62, %v5815_v52 }
 0x7d9   : > { %v5755_v46 = vadd.f32 1e-05, %v5691_v33  ;;  %11107 = vmatprep.mubr.msk.f32.mxu1 %vm564_vm0, %v5950_v9  ;;  %v5851_v24 = vmul.f32 %v15123_v62, %v5814_v42  ;;  %v5629_v3 = vmul.f32 %v15199_v10, %v15199_v10 }
 0x7da   : > { %v5754_v28 = vadd.f32 1e-05, %v5690_v35  ;;  %v5533_v39 = vpop.xlane.xlu1 %5532  ;;  %11108 = vmatmul.mubr.msk.f32.gmra.mrb[134].mxu1 %vm564_vm0, %v5951_v51  ;;  %v5889_v44 = vadd.f32 %v15129_v41, %v5852_v63  ;;  %v5628_v27 = vmul.f32 %v15201_v0, %v15201_v0 }
 0x7db   : > { %11994 = vrsqrt.f32 %v5755_v46  ;;  %v5597_v17 = vmul.f32 0.03125, %v5533_v39  ;;  %v5530_v5 = vpop.xlane.xlu0 %5529  ;;  %v5888_v54 = vadd.f32 %v15129_v41, %v5851_v24  ;;  %v5722_v39 = vsub.f32 %v14949_v59, %v15183_v31 }
 0x7dc   : > { %11996 = vrsqrt.f32 %v5754_v28  ;;  %v5596_v22 = vmul.f32 0.03125, %v5530_v5  ;;  %v5921_v11 = vmul.f32 0.2, %v5889_v44  ;;  %v5725_v31 = vsub.f32 %v14962_v7, %v15199_v10 }
 0x7dd   : > { %v11991_v56 = vpop.eup %11990  ;;  %v5661_v37 = vsub.f32 %v5597_v17, %v5629_v3  ;;  %v5920_v14 = vmul.f32 0.2, %v5888_v54 }
 0x7de   : > { %v11993_v4 = vpop.eup %11992  ;;  %v5660_v40 = vsub.f32 %v5596_v22, %v5628_v27  ;;  %v5379_v12 = vpop.xlane.xlu1 %5378  ;;  %v5817_v19 = vmul.f32 %v11991_v56, %v5721_v26  ;;  %v5953_v52 = vmax.f32 %v5889_v44, %v5921_v11 }
 0x7df   : > { %v5693_v18 = vmax.f32 %v5661_v37, 0.0  ;;  %v15217_v1 = vmul.f32 0.03125, %v5379_v12  ;;  %v5376_v30 = vpop.xlane.xlu0 %5375  ;;  %v5952_v48 = vmax.f32 %v5888_v54, %v5920_v14  ;;  %v5816_v58 = vmul.f32 %v11993_v4, %v5720_v57 }
 0x7e0   : > { %v5692_v38 = vmax.f32 %v5660_v40, 0.0  ;;  %v15219_v32 = vmul.f32 0.03125, %v5376_v30  ;;  %v5854_v33 = vmul.f32 %v15123_v62, %v5817_v19 }
 0x7e1   : > { %v5757_v23 = vadd.f32 1e-05, %v5693_v18  ;;  %11110 = vmatprep.mubr.msk.f32.mxu1 %vm564_vm0, %v5952_v48  ;;  %v5853_v20 = vmul.f32 %v15123_v62, %v5816_v58  ;;  %v5631_v51 = vmul.f32 %v15217_v1, %v15217_v1 }
 0x7e2   : > { %v5756_v9 = vadd.f32 1e-05, %v5692_v38  ;;  %v5539_v42 = vpop.xlane.xlu1 %5538  ;;  %11111 = vmatmul.mubr.msk.f32.gmra.mrb[136].mxu1 %vm564_vm0, %v5953_v52  ;;  %v5891_v35 = vadd.f32 %v15129_v41, %v5854_v33  ;;  %v5630_v26 = vmul.f32 %v15219_v32, %v15219_v32 }
 0x7e3   : > { %11998 = vrsqrt.f32 %v5757_v23  ;;  %v5599_v63 = vmul.f32 0.03125, %v5539_v42  ;;  %v5536_v46 = vpop.xlane.xlu0 %5535  ;;  %v5890_v24 = vadd.f32 %v15129_v41, %v5853_v20 }
 0x7e4   : > { %12000 = vrsqrt.f32 %v5756_v9  ;;  %v5598_v28 = vmul.f32 0.03125, %v5536_v46  ;;  %v5923_v61 = vmul.f32 0.2, %v5891_v35 }
 0x7e5   : > { %v11995_v2 = vpop.eup %11994  ;;  %v5663_v44 = vsub.f32 %v5599_v63, %v5631_v51  ;;  %v5922_v3 = vmul.f32 0.2, %v5890_v24 }
 0x7e6   : > { %v11997_v17 = vpop.eup %11996  ;;  %v5662_v5 = vsub.f32 %v5598_v28, %v5630_v26  ;;  %v5385_v54 = vpop.xlane.xlu1 %5384  ;;  %v5819_v27 = vmul.f32 %v11995_v2, %v5723_v6  ;;  %v5955_v40 = vmax.f32 %v5891_v35, %v5923_v61  ;;  %v5724_v6 = vsub.f32 %v14965_v45, %v15201_v0 }
 0x7e7   : > { %v5695_v22 = vmax.f32 %v5663_v44, 0.0  ;;  %v15235_v11 = vmul.f32 0.03125, %v5385_v54  ;;  %v5382_v56 = vpop.xlane.xlu0 %5381  ;;  %v5954_v57 = vmax.f32 %v5890_v24, %v5922_v3  ;;  %v5818_v37 = vmul.f32 %v11997_v17, %v5722_v39 }
 0x7e8   : > { %v5694_v14 = vmax.f32 %v5662_v5, 0.0  ;;  %v15237_v4 = vmul.f32 0.03125, %v5382_v56  ;;  %v5856_v12 = vmul.f32 %v15123_v62, %v5819_v27  ;;  %v5727_v0 = vsub.f32 %v14978_v34, %v15217_v1 }
 0x7e9   : > { %v5759_v19 = vadd.f32 1e-05, %v5695_v22  ;;  %11113 = vmatprep.mubr.msk.f32.mxu1 %vm564_vm0, %v5954_v57  ;;  %v5855_v59 = vmul.f32 %v15123_v62, %v5818_v37  ;;  %v5633_v58 = vmul.f32 %v15235_v11, %v15235_v11 }
 0x7ea   : > { %v5758_v18 = vadd.f32 1e-05, %v5694_v14  ;;  %v5545_v30 = vpop.xlane.xlu1 %5544  ;;  %11114 = vmatmul.mubr.msk.f32.gmra.mrb[138].mxu1 %vm564_vm0, %v5955_v40  ;;  %v5893_v48 = vadd.f32 %v15129_v41, %v5856_v12  ;;  %v5632_v23 = vmul.f32 %v15237_v4, %v15237_v4 }
 0x7eb   : > { %12002 = vrsqrt.f32 %v5759_v19  ;;  %v5601_v38 = vmul.f32 0.03125, %v5545_v30  ;;  %v5542_v52 = vpop.xlane.xlu0 %5541  ;;  %v5892_v33 = vadd.f32 %v15129_v41, %v5855_v59  ;;  %v5726_v19 = vsub.f32 %v14981_v21, %v15219_v32 }
 0x7ec   : > { %12004 = vrsqrt.f32 %v5758_v18  ;;  %v5600_v20 = vmul.f32 0.03125, %v5542_v52  ;;  %v5925_v7 = vmul.f32 0.2, %v5893_v48  ;;  %v5729_v32 = vsub.f32 %v14994_v36, %v15235_v11 }
 0x7ed   : > { %v11999_v10 = vpop.eup %11998  ;;  %v5665_v9 = vsub.f32 %v5601_v38, %v5633_v58  ;;  %v5924_v42 = vmul.f32 0.2, %v5892_v33 }
 0x7ee   : > { %v12001_v35 = vpop.eup %12000  ;;  %v5664_v51 = vsub.f32 %v5600_v20, %v5632_v23  ;;  %v5391_v63 = vpop.xlane.xlu1 %5390  ;;  %v5821_v46 = vmul.f32 %v11999_v10, %v5725_v31  ;;  %v5957_v3 = vmax.f32 %v5893_v48, %v5925_v7 }
 0x7ef   : > { %v5697_v24 = vmax.f32 %v5665_v9, 0.0  ;;  %v15253_v26 = vmul.f32 0.03125, %v5391_v63  ;;  %v5388_v28 = vpop.xlane.xlu0 %5387  ;;  %v5956_v61 = vmax.f32 %v5892_v33, %v5924_v42  ;;  %v5820_v2 = vmul.f32 %v12001_v35, %v5724_v6 }
 0x7f0   : > { %v5696_v39 = vmax.f32 %v5664_v51, 0.0  ;;  %v15255_v44 = vmul.f32 0.03125, %v5388_v28  ;;  %v5858_v17 = vmul.f32 %v15123_v62, %v5821_v46 }
 0x7f1   : > { %v5761_v5 = vadd.f32 1e-05, %v5697_v24  ;;  %11116 = vmatprep.mubr.msk.f32.mxu1 %vm564_vm0, %v5956_v61  ;;  %v5857_v45 = vmul.f32 %v15123_v62, %v5820_v2  ;;  %v5635_v56 = vmul.f32 %v15253_v26, %v15253_v26 }
 0x7f2   : > { %v5760_v54 = vadd.f32 1e-05, %v5696_v39  ;;  %v5551_v27 = vpop.xlane.xlu1 %5550  ;;  %11117 = vmatmul.mubr.msk.f32.gmra.mrb[140].mxu1 %vm564_vm0, %v5957_v3  ;;  %v5895_v22 = vadd.f32 %v15129_v41, %v5858_v17  ;;  %v5634_v40 = vmul.f32 %v15255_v44, %v15255_v44  ;;  %v5728_v3 = vsub.f32 %v14997_v49, %v15237_v4 }
 0x7f3   : > { %12006 = vrsqrt.f32 %v5761_v5  ;;  %v5603_v57 = vmul.f32 0.03125, %v5551_v27  ;;  %v5548_v37 = vpop.xlane.xlu0 %5547  ;;  %v5894_v14 = vadd.f32 %v15129_v41, %v5857_v45  ;;  %v5731_v4 = vsub.f32 %v15010_v43, %v15253_v26 }
 0x7f4   : > { %12008 = vrsqrt.f32 %v5760_v54  ;;  %v5602_v12 = vmul.f32 0.03125, %v5548_v37  ;;  %v5927_v34 = vmul.f32 0.2, %v5895_v22 }
 0x7f5   : > { %v12003_v1 = vpop.eup %12002  ;;  %v5667_v59 = vsub.f32 %v5603_v57, %v5635_v56  ;;  %v5926_v31 = vmul.f32 0.2, %v5894_v14 }
 0x7f6   : > { %v12005_v18 = vpop.eup %12004  ;;  %v5666_v30 = vsub.f32 %v5602_v12, %v5634_v40  ;;  %v5397_v48 = vpop.xlane.xlu1 %5396  ;;  %v5823_v58 = vmul.f32 %v12003_v1, %v5727_v0  ;;  %v5959_v6 = vmax.f32 %v5895_v22, %v5927_v34 }
 0x7f7   : > { %v5699_v38 = vmax.f32 %v5667_v59, 0.0  ;;  %v15271_v52 = vmul.f32 0.03125, %v5397_v48  ;;  %v5394_v33 = vpop.xlane.xlu0 %5393  ;;  %v5958_v23 = vmax.f32 %v5894_v14, %v5926_v31  ;;  %v5822_v20 = vmul.f32 %v12005_v18, %v5726_v19 }
 0x7f8   : > { %v5698_v7 = vmax.f32 %v5666_v30, 0.0  ;;  %v15273_v10 = vmul.f32 0.03125, %v5394_v33  ;;  %v5860_v9 = vmul.f32 %v15123_v62, %v5823_v58 }
 0x7f9   : > { %v5763_v42 = vadd.f32 1e-05, %v5699_v38  ;;  %11119 = vmatprep.mubr.msk.f32.mxu1 %vm564_vm0, %v5958_v23  ;;  %v5859_v21 = vmul.f32 %v15123_v62, %v5822_v20  ;;  %v5637_v46 = vmul.f32 %v15271_v52, %v15271_v52  ;;  %v5730_v20 = vsub.f32 %v15013_v16, %v15255_v44 }
 0x7fa   : > { %v5762_v35 = vadd.f32 1e-05, %v5698_v7  ;;  %v5557_v51 = vpop.xlane.xlu1 %5556  ;;  %11120 = vmatmul.mubr.msk.f32.gmra.mrb[142].mxu1 %vm564_vm0, %v5959_v6  ;;  %v5897_v63 = vadd.f32 %v15129_v41, %v5860_v9  ;;  %v5636_v2 = vmul.f32 %v15273_v10, %v15273_v10  ;;  %v5733_v44 = vsub.f32 %v15026_v15, %v15271_v52 }
 0x7fb   : > { %12010 = vrsqrt.f32 %v5763_v42  ;;  %v5605_v24 = vmul.f32 0.03125, %v5557_v51  ;;  %v5554_v28 = vpop.xlane.xlu0 %5553  ;;  %v5896_v61 = vadd.f32 %v15129_v41, %v5859_v21 }
 0x7fc   : > { %12012 = vrsqrt.f32 %v5762_v35  ;;  %v5604_v39 = vmul.f32 0.03125, %v5554_v28  ;;  %v5929_v36 = vmul.f32 0.2, %v5897_v63 }
 0x7fd   : > { %v12007_v11 = vpop.eup %12006  ;;  %v5669_v17 = vsub.f32 %v5605_v24, %v5637_v46  ;;  %v5928_v5 = vmul.f32 0.2, %v5896_v61 }
 0x7fe   : > { %v12009_v45 = vpop.eup %12008  ;;  %v5668_v0 = vsub.f32 %v5604_v39, %v5636_v2  ;;  %v5403_v54 = vpop.xlane.xlu1 %5402  ;;  %v5825_v27 = vmul.f32 %v12007_v11, %v5729_v32  ;;  %v5961_v34 = vmax.f32 %v5897_v63, %v5929_v36 }
 0x7ff   : > { %v5701_v22 = vmax.f32 %v5669_v17, 0.0  ;;  %v15289_v56 = vmul.f32 0.03125, %v5403_v54  ;;  %v5400_v57 = vpop.xlane.xlu0 %5399  ;;  %v5960_v37 = vmax.f32 %v5896_v61, %v5928_v5  ;;  %v5824_v14 = vmul.f32 %v12009_v45, %v5728_v3 }
 0x800   : > { %v5700_v40 = vmax.f32 %v5668_v0, 0.0  ;;  %v15291_v12 = vmul.f32 0.03125, %v5400_v57  ;;  %v5862_v1 = vmul.f32 %v15123_v62, %v5825_v27  ;;  %v5732_v57 = vsub.f32 %v15029_v13, %v15273_v10 }
 0x801   : > { %v5765_v19 = vadd.f32 1e-05, %v5701_v22  ;;  %11122 = vmatprep.mubr.msk.f32.mxu1 %vm564_vm0, %v5960_v37  ;;  %v5861_v49 = vmul.f32 %v15123_v62, %v5824_v14  ;;  %v5639_v30 = vmul.f32 %v15289_v56, %v15289_v56  ;;  %v5735_v10 = vsub.f32 %v15042_v55, %v15289_v56 }
 0x802   : > { %v5764_v59 = vadd.f32 1e-05, %v5700_v40  ;;  %v5563_v31 = vpop.xlane.xlu1 %5562  ;;  %11123 = vmatmul.mubr.msk.f32.gmra.mrb[144].mxu1 %vm564_vm0, %v5961_v34  ;;  %v5899_v18 = vadd.f32 %v15129_v41, %v5862_v1  ;;  %v5638_v33 = vmul.f32 %v15291_v12, %v15291_v12 }
 0x803   : > { %12014 = vrsqrt.f32 %v5765_v19  ;;  %v5607_v48 = vmul.f32 0.03125, %v5563_v31  ;;  %v5560_v58 = vpop.xlane.xlu0 %5559  ;;  %v5898_v38 = vadd.f32 %v15129_v41, %v5861_v49 }
 0x804   : > { %12016 = vrsqrt.f32 %v5764_v59  ;;  %v5606_v23 = vmul.f32 0.03125, %v5560_v58  ;;  %v5931_v43 = vmul.f32 0.2, %v5899_v18 }
 0x805   : > { %v12011_v26 = vpop.eup %12010  ;;  %v5671_v7 = vsub.f32 %v5607_v48, %v5639_v30  ;;  %v5930_v6 = vmul.f32 0.2, %v5898_v38 }
 0x806   : > { %v12013_v9 = vpop.eup %12012  ;;  %v5670_v42 = vsub.f32 %v5606_v23, %v5638_v33  ;;  %v5409_v21 = vpop.xlane.xlu1 %5408  ;;  %v5827_v32 = vmul.f32 %v12011_v26, %v5731_v4  ;;  %v5963_v2 = vmax.f32 %v5899_v18, %v5931_v43 }
 0x807   : > { %v5703_v35 = vmax.f32 %v5671_v7, 0.0  ;;  %v15307_v51 = vmul.f32 0.03125, %v5409_v21  ;;  %v5406_v63 = vpop.xlane.xlu0 %5405  ;;  %v5962_v46 = vmax.f32 %v5898_v38, %v5930_v6  ;;  %v5826_v24 = vmul.f32 %v12013_v9, %v5730_v20 }
 0x808   : > { %v5702_v28 = vmax.f32 %v5670_v42, 0.0  ;;  %v15309_v61 = vmul.f32 0.03125, %v5406_v63  ;;  %v5864_v39 = vmul.f32 %v15123_v62, %v5827_v32  ;;  %v5734_v32 = vsub.f32 %v15045_v60, %v15291_v12 }
 0x809   : > { %v5767_v36 = vadd.f32 1e-05, %v5703_v35  ;;  %11125 = vmatprep.mubr.msk.f32.mxu1 %vm564_vm0, %v5962_v46  ;;  %v5863_v16 = vmul.f32 %v15123_v62, %v5826_v24  ;;  %v5641_v5 = vmul.f32 %v15307_v51, %v15307_v51  ;;  %v5737_v12 = vsub.f32 %v15058_v8, %v15307_v51 }
 0x80a   : > { %v5766_v11 = vadd.f32 1e-05, %v5702_v28  ;;  %v5569_v3 = vpop.xlane.xlu1 %5568  ;;  %11126 = vmatmul.mubr.msk.f32.gmra.mrb[146].mxu1 %vm564_vm0, %v5963_v2  ;;  %v5901_v17 = vadd.f32 %v15129_v41, %v5864_v39  ;;  %v5640_v27 = vmul.f32 %v15309_v61, %v15309_v61 }
 0x80b   : > { %12018 = vrsqrt.f32 %v5767_v36  ;;  %v5609_v45 = vmul.f32 0.03125, %v5569_v3  ;;  %v5566_v0 = vpop.xlane.xlu0 %5565  ;;  %v5900_v54 = vadd.f32 %v15129_v41, %v5863_v16 }
 0x80c   : > { %12020 = vrsqrt.f32 %v5766_v11  ;;  %v5608_v22 = vmul.f32 0.03125, %v5566_v0  ;;  %v5933_v15 = vmul.f32 0.2, %v5901_v17 }
 0x80d   : > { %v12015_v52 = vpop.eup %12014  ;;  %v5673_v37 = vsub.f32 %v5609_v45, %v5641_v5  ;;  %v5932_v14 = vmul.f32 0.2, %v5900_v54 }
 0x80e   : > { %v12017_v40 = vpop.eup %12016  ;;  %v5672_v34 = vsub.f32 %v5608_v22, %v5640_v27  ;;  %v5415_v1 = vpop.xlane.xlu1 %5414  ;;  %v5829_v19 = vmul.f32 %v12015_v52, %v5733_v44  ;;  %v5965_v58 = vmax.f32 %v5901_v17, %v5933_v15 }
 0x80f   : > { %v5705_v49 = vmax.f32 %v5673_v37, 0.0  ;;  %v15325_v4 = vmul.f32 0.03125, %v5415_v1  ;;  %v5412_v59 = vpop.xlane.xlu0 %5411  ;;  %v5964_v31 = vmax.f32 %v5900_v54, %v5932_v14  ;;  %v5828_v18 = vmul.f32 %v12017_v40, %v5732_v57 }
 0x810   : > { %v5704_v30 = vmax.f32 %v5672_v34, 0.0  ;;  %v15327_v48 = vmul.f32 0.03125, %v5412_v59  ;;  %v5866_v38 = vmul.f32 %v15123_v62, %v5829_v19  ;;  %v5736_v34 = vsub.f32 %v15061_v29, %v15309_v61 }
 0x811   : > { %v5769_v33 = vadd.f32 1e-05, %v5705_v49  ;;  %11128 = vmatprep.mubr.msk.f32.mxu1 %vm564_vm0, %v5964_v31  ;;  %v5865_v13 = vmul.f32 %v15123_v62, %v5828_v18  ;;  %v5643_v20 = vmul.f32 %v15325_v4, %v15325_v4 }
 0x812   : > { %v5768_v23 = vadd.f32 1e-05, %v5704_v30  ;;  %v5575_v43 = vpop.xlane.xlu1 %5574  ;;  %11129 = vmatmul.mubr.msk.f32.gmra.mrb[148].mxu1 %vm564_vm0, %v5965_v58  ;;  %v5903_v26 = vadd.f32 %v15129_v41, %v5866_v38  ;;  %v5642_v42 = vmul.f32 %v15327_v48, %v15327_v48 }
 0x813   : > { %12022 = vrsqrt.f32 %v5769_v33  ;;  %v5611_v7 = vmul.f32 0.03125, %v5575_v43  ;;  %v5572_v6 = vpop.xlane.xlu0 %5571  ;;  %v5902_v9 = vadd.f32 %v15129_v41, %v5865_v13 }
 0x814   : > { %12024 = vrsqrt.f32 %v5768_v23  ;;  %v5610_v21 = vmul.f32 0.03125, %v5572_v6  ;;  %v5935_v55 = vmul.f32 0.2, %v5903_v26  ;;  %v5738_v6 = vsub.f32 %v15077_v47, %v15327_v48 }
 0x815   : > { %v12019_v56 = vpop.eup %12018  ;;  %v5675_v35 = vsub.f32 %v5611_v7, %v5643_v20  ;;  %v5934_v63 = vmul.f32 0.2, %v5902_v9 }
 0x816   : > { %v12021_v46 = vpop.eup %12020  ;;  %v5674_v24 = vsub.f32 %v5610_v21, %v5642_v42  ;;  %v5421_v28 = vpop.xlane.xlu1 %5420  ;;  %v5831_v2 = vmul.f32 %v12019_v56, %v5735_v10  ;;  %v5967_v5 = vmax.f32 %v5903_v26, %v5935_v55  ;;  %v5739_v26 = vsub.f32 %v15074_v53, %v15325_v4 }
 0x817   : > { %v5707_v39 = vmax.f32 %v5675_v35, 0.0  ;;  %v15343_v36 = vmul.f32 0.03125, %v5421_v28  ;;  %v5418_v16 = vpop.xlane.xlu0 %5417  ;;  %v5966_v44 = vmax.f32 %v5902_v9, %v5934_v63  ;;  %v5830_v11 = vmul.f32 %v12021_v46, %v5734_v32 }
 0x818   : > { %v5706_v3 = vmax.f32 %v5674_v24, 0.0  ;;  %v15345_v17 = vmul.f32 0.03125, %v5418_v16  ;;  %v5868_v45 = vmul.f32 %v15123_v62, %v5831_v2 }
 0x819   : > { %v5771_v0 = vadd.f32 1e-05, %v5707_v39  ;;  %11131 = vmatprep.mubr.msk.f32.mxu1 %vm564_vm0, %v5966_v44  ;;  %v5867_v60 = vmul.f32 %v15123_v62, %v5830_v11  ;;  %v5645_v15 = vmul.f32 %v15343_v36, %v15343_v36  ;;  %v5741_v47 = vsub.f32 %v15090_v50, %v15343_v36 }
 0x81a   : > { %v5770_v54 = vadd.f32 1e-05, %v5706_v3  ;;  %v5581_v27 = vpop.xlane.xlu1 %5580  ;;  %11132 = vmatmul.mubr.msk.f32.gmra.mrb[150].mxu1 %vm564_vm0, %v5967_v5  ;;  %v5905_v22 = vadd.f32 %v15129_v41, %v5868_v45  ;;  %v5644_v14 = vmul.f32 %v15345_v17, %v15345_v17  ;;  %v5740_v24 = vsub.f32 %v15093_v25, %v15345_v17 }
 0x81b   : > { %12026 = vrsqrt.f32 %v5771_v0  ;;  %v5613_v52 = vmul.f32 0.03125, %v5581_v27  ;;  %v5578_v57 = vpop.xlane.xlu0 %5577  ;;  %v5904_v37 = vadd.f32 %v15129_v41, %v5867_v60  ;;  %v10144_v60 = vld [vmem:[%s17388_s2 + $0x40] sm:$0xff] }
 0x81c   : > { %12028 = vrsqrt.f32 %v5770_v54  ;;  %v5612_v40 = vmul.f32 0.03125, %v5578_v57  ;;  %v5937_v8 = vmul.f32 0.2, %v5905_v22 }
 0x81d   : > { %v12023_v51 = vpop.eup %12022  ;;  %v5677_v1 = vsub.f32 %v5613_v52, %v5645_v15  ;;  %v5936_v19 = vmul.f32 0.2, %v5904_v37 }
 0x81e   : > { %v12025_v49 = vpop.eup %12024  ;;  %v5676_v59 = vsub.f32 %v5612_v40, %v5644_v14  ;;  %v5833_v31 = vmul.f32 %v12023_v51, %v5737_v12  ;;  %v5969_v33 = vmax.f32 %v5905_v22, %v5937_v8 }
 0x81f   : > { %v5709_v18 = vmax.f32 %v5677_v1, 0.0  ;;  %v5968_v30 = vmax.f32 %v5904_v37, %v5936_v19  ;;  %v5832_v58 = vmul.f32 %v12025_v49, %v5736_v34 }
 0x820   : > { %v5708_v38 = vmax.f32 %v5676_v59, 0.0  ;;  %v5870_v13 = vmul.f32 %v15123_v62, %v5833_v31 }
 0x821   : > { %v5773_v10 = vadd.f32 1e-05, %v5709_v18  ;;  %11134 = vmatprep.mubr.msk.f32.mxu1 %vm564_vm0, %v5968_v30  ;;  %v5869_v23 = vmul.f32 %v15123_v62, %v5832_v58 }
 0x822   : > { %v5772_v43 = vadd.f32 1e-05, %v5708_v38  ;;  %11135 = vmatmul.mubr.msk.f32.gmra.mrb[152].mxu1 %vm564_vm0, %v5969_v33  ;;  %v5907_v29 = vadd.f32 %v15129_v41, %v5870_v13 }
 0x823   : > { %12030 = vrsqrt.f32 %v5773_v10  ;;  %v5906_v61 = vadd.f32 %v15129_v41, %v5869_v23 }
 0x824   : > { %12032 = vrsqrt.f32 %v5772_v43  ;;  %v5939_v20 = vmul.f32 0.2, %v5907_v29 }
 0x825   : > { %v12027_v7 = vpop.eup %12026  ;;  %v5938_v9 = vmul.f32 0.2, %v5906_v61 }
 0x826   : > { %v12029_v42 = vpop.eup %12028  ;;  %v5835_v21 = vmul.f32 %v12027_v7, %v5739_v26  ;;  %v5971_v32 = vmax.f32 %v5907_v29, %v5939_v20  ;;  %v10146_v26 = vld [vmem:[%s17388_s2 + $0x50] sm:$0xff]  ;;  %v10147_v20 = vld [vmem:[%s17388_s2 + $0x58] sm:$0xff] }
 0x827   : > { %v5970_v55 = vmax.f32 %v5906_v61, %v5938_v9  ;;  %v5834_v56 = vmul.f32 %v12029_v42, %v5738_v6  ;;  %v11446_v7 = vpack.c.bf16 %v10147_v20, %v10146_v26 }
 0x828   : > { %v5872_v35 = vmul.f32 %v15123_v62, %v5835_v21 }
 0x829   : > { %11137 = vmatprep.mubr.msk.f32.mxu1 %vm564_vm0, %v5970_v55  ;;  %v5871_v63 = vmul.f32 %v15123_v62, %v5834_v56 }
 0x82a   : > { %11138 = vmatmul.mubr.msk.f32.gmra.mrb[154].mxu1 %vm564_vm0, %v5971_v32  ;;  %v5909_v53 = vadd.f32 %v15129_v41, %v5872_v35 }
 0x82b   : > { %v5908_v4 = vadd.f32 %v15129_v41, %v5871_v63 }
 0x82c   : > { %v5941_v48 = vmul.f32 0.2, %v5909_v53 }
 0x82d   : > { %v12031_v46 = vpop.eup %12030  ;;  %v5940_v28 = vmul.f32 0.2, %v5908_v4 }
 0x82e   : > { %v12033_v2 = vpop.eup %12032  ;;  %v5837_v39 = vmul.f32 %v12031_v46, %v5741_v47  ;;  %v5973_v11 = vmax.f32 %v5909_v53, %v5941_v48 }
 0x82f   : > { %v5972_v16 = vmax.f32 %v5908_v4, %v5940_v28  ;;  %v5836_v44 = vmul.f32 %v12033_v2, %v5740_v24 }
 0x830   : > { %v5874_v3 = vmul.f32 %v15123_v62, %v5837_v39 }
 0x831   : > { %11140 = vmatprep.mubr.msk.f32.mxu1 %vm564_vm0, %v5972_v16  ;;  %v5873_v5 = vmul.f32 %v15123_v62, %v5836_v44  ;;  %v10145_v62 = vld [vmem:[%s17388_s2 + $0x48] sm:$0xff] }
 0x832   : > { %11141 = vmatmul.mubr.msk.f32.gmra.mrb[156].mxu1 %vm564_vm0, %v5973_v11  ;;  %v5911_v50 = vadd.f32 %v15129_v41, %v5874_v3  ;;  %v11442_v12 = vpack.c.bf16 %v10145_v62, %v10144_v60  ;;  %v10107_v60 = vld [vmem:[%s17392_s6 + $0x48] sm:$0xff] }
 0x833   : > { %v5910_v36 = vadd.f32 %v15129_v41, %v5873_v5  ;;  %v15398_v41 = vld [vmem:[%s17391_s5 + $0x2] ss:$0 sm:$0xff] }
 0x834   : > { %v5943_v45 = vmul.f32 0.2, %v5911_v50  ;;  %11443 = vmatprep.subr.bf16.mxu1 %v11442_v12 }
 0x835   : > { %v5942_v25 = vmul.f32 0.2, %v5910_v36  ;;  %11445 = vmatpush3.bf16.msra.mxu1 %v11442_v12 }
 0x836   : > { %v5975_v0 = vmax.f32 %v5911_v50, %v5943_v45  ;;  %11447 = vmatprep.subr.bf16.mxu1 %v11446_v7 }
 0x837   : > { %v5974_v17 = vmax.f32 %v5910_v36, %v5942_v25 }
 0x839   : > { %11143 = vmatprep.mubr.msk.f32.mxu1 %vm564_vm0, %v5974_v17  ;;  %11449 = vmatpush3.bf16.msra.mxu1 %v11446_v7 }
 0x83a   : > { %11144 = vmatmul.mubr.msk.f32.gmra.mrb[158].mxu1 %vm564_vm0, %v5975_v0  ;;  %v10106_v0 = vld [vmem:[%s17392_s6 + $0x40] sm:$0xff] }
 0x895   : > { %v11100_v54 = vpop.f32.mrb[128].mxu1 }
 0x896   : > { %v15401_v27 = vadd.f32 %v11100_v54, %v15398_v41  ;;  %v6151_v22 = vpop.f32.mrb[129].mxu1  ;;  %v11434_v54 = vpack.c.bf16 %v10107_v60, %v10106_v0 }
 0x897   : > { %v15404_v15 = vadd.f32 %v15398_v41, %v6151_v22 }
 0x898   : > { %v6313_v52 = vsel %vm564_vm0, %v15401_v27, 0.0  ;;  %v6439_v57 = vmul.f32 %v15401_v27, %v15401_v27  ;;  %11435 = vmatprep.subr.bf16.mxu0 %v11434_v54 }
 0x899   : > { %6314 = vadd.xlane.f32.xlu1 %v6313_v52  ;;  %v6310_v37 = vsel %vm564_vm0, %v15404_v15, 0.0  ;;  %v6438_v14 = vmul.f32 %v15404_v15, %v15404_v15  ;;  %11437 = vmatpush3.bf16.msra.mxu0 %v11434_v54  ;;  %v10108_v52 = vld [vmem:[%s17392_s6 + $0x50] sm:$0xff] }
 0x89a   : > { %6311 = vadd.xlane.f32.xlu0 %v6310_v37  ;;  %v6473_v40 = vsel %vm564_vm0, %v6439_v57, 0.0  ;;  %v10109_v57 = vld [vmem:[%s17392_s6 + $0x58] sm:$0xff] }
 0x89b   : > { %v6470_v51 = vsel %vm564_vm0, %v6438_v14, 0.0 }
 0x89d   : > { %6474 = vadd.xlane.f32.xlu1 %v6473_v40  ;;  %v11103_v8 = vpop.f32.mrb[130].mxu1  ;;  %v11438_v40 = vpack.c.bf16 %v10109_v57, %v10108_v52 }
 0x89e   : > { %v15417_v34 = vadd.f32 %v11103_v8, %v15398_v41  ;;  %6471 = vadd.xlane.f32.xlu0 %v6470_v51  ;;  %v6161_v1 = vpop.f32.mrb[131].mxu1 }
 0x89f   : > { %v15420_v19 = vadd.f32 %v15398_v41, %v6161_v1  ;;  %11439 = vmatprep.subr.bf16.mxu0 %v11438_v40 }
 0x8a0   : > { %v6319_v49 = vsel %vm564_vm0, %v15417_v34, 0.0  ;;  %v6441_v59 = vmul.f32 %v15417_v34, %v15417_v34  ;;  %11441 = vmatpush3.bf16.msra.mxu0 %v11438_v40 }
 0x8a1   : > { %6320 = vadd.xlane.f32.xlu1 %v6319_v49  ;;  %v6316_v31 = vsel %vm564_vm0, %v15420_v19, 0.0  ;;  %v6440_v18 = vmul.f32 %v15420_v19, %v15420_v19 }
 0x8a2   : > { %6317 = vadd.xlane.f32.xlu0 %v6316_v31  ;;  %v6479_v30 = vsel %vm564_vm0, %v6441_v59, 0.0 }
 0x8a3   : > { %v6476_v38 = vsel %vm564_vm0, %v6440_v18, 0.0 }
 0x8a5   : > { %6480 = vadd.xlane.f32.xlu1 %v6479_v30  ;;  %v11106_v58 = vpop.f32.mrb[132].mxu1 }
 0x8a6   : > { %v15433_v33 = vadd.f32 %v11106_v58, %v15398_v41  ;;  %6477 = vadd.xlane.f32.xlu0 %v6476_v38  ;;  %v6171_v13 = vpop.f32.mrb[133].mxu1 }
 0x8a7   : > { %v15436_v10 = vadd.f32 %v15398_v41, %v6171_v13 }
 0x8a8   : > { %v6325_v23 = vsel %vm564_vm0, %v15433_v33, 0.0  ;;  %v6443_v43 = vmul.f32 %v15433_v33, %v15433_v33 }
 0x8a9   : > { %6326 = vadd.xlane.f32.xlu1 %v6325_v23  ;;  %v6322_v29 = vsel %vm564_vm0, %v15436_v10, 0.0  ;;  %v6442_v61 = vmul.f32 %v15436_v10, %v15436_v10 }
 0x8aa   : > { %6323 = vadd.xlane.f32.xlu0 %v6322_v29  ;;  %v6485_v6 = vsel %vm564_vm0, %v6443_v43, 0.0 }
 0x8ab   : > { %v6482_v42 = vsel %vm564_vm0, %v6442_v61, 0.0 }
 0x8ad   : > { %6486 = vadd.xlane.f32.xlu1 %v6485_v6  ;;  %v11109_v9 = vpop.f32.mrb[134].mxu1 }
 0x8ae   : > { %v15455_v21 = vadd.f32 %v11109_v9, %v15398_v41  ;;  %6483 = vadd.xlane.f32.xlu0 %v6482_v42  ;;  %v6181_v55 = vpop.f32.mrb[135].mxu1 }
 0x8af   : > { %v15458_v56 = vadd.f32 %v15398_v41, %v6181_v55 }
 0x8b0   : > { %v6331_v32 = vsel %vm564_vm0, %v15455_v21, 0.0  ;;  %v6445_v35 = vmul.f32 %v15455_v21, %v15455_v21 }
 0x8b1   : > { %6332 = vadd.xlane.f32.xlu1 %v6331_v32  ;;  %v6328_v63 = vsel %vm564_vm0, %v15458_v56, 0.0  ;;  %v6444_v53 = vmul.f32 %v15458_v56, %v15458_v56 }
 0x8b2   : > { %6329 = vadd.xlane.f32.xlu0 %v6328_v63  ;;  %v6491_v4 = vsel %vm564_vm0, %v6445_v35, 0.0 }
 0x8b3   : > { %v6488_v48 = vsel %vm564_vm0, %v6444_v53, 0.0 }
 0x8b5   : > { %6492 = vadd.xlane.f32.xlu1 %v6491_v4  ;;  %v11112_v47 = vpop.f32.mrb[136].mxu1 }
 0x8b6   : > { %v15471_v46 = vadd.f32 %v11112_v47, %v15398_v41  ;;  %6489 = vadd.xlane.f32.xlu0 %v6488_v48  ;;  %v6191_v24 = vpop.f32.mrb[137].mxu1 }
 0x8b7   : > { %v15474_v28 = vadd.f32 %v15398_v41, %v6191_v24 }
 0x8b8   : > { %v6337_v2 = vsel %vm564_vm0, %v15471_v46, 0.0  ;;  %v6447_v39 = vmul.f32 %v15471_v46, %v15471_v46 }
 0x8b9   : > { %6338 = vadd.xlane.f32.xlu1 %v6337_v2  ;;  %v6334_v16 = vsel %vm564_vm0, %v15474_v28, 0.0  ;;  %v6446_v44 = vmul.f32 %v15474_v28, %v15474_v28 }
 0x8ba   : > { %6335 = vadd.xlane.f32.xlu0 %v6334_v16  ;;  %v6497_v11 = vsel %vm564_vm0, %v6447_v39, 0.0 }
 0x8bb   : > { %v6494_v5 = vsel %vm564_vm0, %v6446_v44, 0.0 }
 0x8bd   : > { %6498 = vadd.xlane.f32.xlu1 %v6497_v11  ;;  %v11115_v3 = vpop.f32.mrb[138].mxu1 }
 0x8be   : > { %v15487_v50 = vadd.f32 %v11115_v3, %v15398_v41  ;;  %6495 = vadd.xlane.f32.xlu0 %v6494_v5  ;;  %v6201_v36 = vpop.f32.mrb[139].mxu1 }
 0x8bf   : > { %v15490_v45 = vadd.f32 %v15398_v41, %v6201_v36 }
 0x8c0   : > { %v6343_v25 = vsel %vm564_vm0, %v15487_v50, 0.0  ;;  %v6449_v17 = vmul.f32 %v15487_v50, %v15487_v50 }
 0x8c1   : > { %6344 = vadd.xlane.f32.xlu1 %v6343_v25  ;;  %v6340_v62 = vsel %vm564_vm0, %v15490_v45, 0.0  ;;  %v6448_v12 = vmul.f32 %v15490_v45, %v15490_v45 }
 0x8c2   : > { %6341 = vadd.xlane.f32.xlu0 %v6340_v62  ;;  %v6503_v22 = vsel %vm564_vm0, %v6449_v17, 0.0 }
 0x8c3   : > { %v6500_v14 = vsel %vm564_vm0, %v6448_v12, 0.0 }
 0x8c5   : > { %6504 = vadd.xlane.f32.xlu1 %v6503_v22  ;;  %v11118_v37 = vpop.f32.mrb[140].mxu1 }
 0x8c6   : > { %v15515_v8 = vadd.f32 %v11118_v37, %v15398_v41  ;;  %6501 = vadd.xlane.f32.xlu0 %v6500_v14  ;;  %v6211_v51 = vpop.f32.mrb[141].mxu1 }
 0x8c7   : > { %v15518_v1 = vadd.f32 %v15398_v41, %v6211_v51 }
 0x8c8   : > { %v6349_v49 = vsel %vm564_vm0, %v15515_v8, 0.0  ;;  %v6451_v59 = vmul.f32 %v15515_v8, %v15515_v8 }
 0x8c9   : > { %6350 = vadd.xlane.f32.xlu1 %v6349_v49  ;;  %v6346_v31 = vsel %vm564_vm0, %v15518_v1, 0.0  ;;  %v6450_v18 = vmul.f32 %v15518_v1, %v15518_v1 }
 0x8ca   : > { %6347 = vadd.xlane.f32.xlu0 %v6346_v31  ;;  %v6509_v30 = vsel %vm564_vm0, %v6451_v59, 0.0 }
 0x8cb   : > { %v6506_v38 = vsel %vm564_vm0, %v6450_v18, 0.0 }
 0x8cd   : > { %6510 = vadd.xlane.f32.xlu1 %v6509_v30  ;;  %v11121_v58 = vpop.f32.mrb[142].mxu1 }
 0x8ce   : > { %v15531_v13 = vadd.f32 %v11121_v58, %v15398_v41  ;;  %6507 = vadd.xlane.f32.xlu0 %v6506_v38  ;;  %v6221_v23 = vpop.f32.mrb[143].mxu1 }
 0x8cf   : > { %v15534_v43 = vadd.f32 %v15398_v41, %v6221_v23 }
 0x8d0   : > { %v6355_v29 = vsel %vm564_vm0, %v15531_v13, 0.0  ;;  %v6453_v61 = vmul.f32 %v15531_v13, %v15531_v13 }
 0x8d1   : > { %6356 = vadd.xlane.f32.xlu1 %v6355_v29  ;;  %v6352_v26 = vsel %vm564_vm0, %v15534_v43, 0.0  ;;  %v6452_v20 = vmul.f32 %v15534_v43, %v15534_v43 }
 0x8d2   : > { %6353 = vadd.xlane.f32.xlu0 %v6352_v26  ;;  %v6515_v7 = vsel %vm564_vm0, %v6453_v61, 0.0 }
 0x8d3   : > { %v6512_v9 = vsel %vm564_vm0, %v6452_v20, 0.0 }
 0x8d5   : > { %6516 = vadd.xlane.f32.xlu1 %v6515_v7  ;;  %v11124_v6 = vpop.f32.mrb[144].mxu1 }
 0x8d6   : > { %v15547_v42 = vadd.f32 %v11124_v6, %v15398_v41  ;;  %6513 = vadd.xlane.f32.xlu0 %v6512_v9  ;;  %v6231_v55 = vpop.f32.mrb[145].mxu1 }
 0x8d7   : > { %v15550_v32 = vadd.f32 %v15398_v41, %v6231_v55 }
 0x8d8   : > { %v6361_v35 = vsel %vm564_vm0, %v15547_v42, 0.0  ;;  %v6455_v63 = vmul.f32 %v15547_v42, %v15547_v42 }
 0x8d9   : > { %6362 = vadd.xlane.f32.xlu1 %v6361_v35  ;;  %v6358_v53 = vsel %vm564_vm0, %v15550_v32, 0.0  ;;  %v6454_v4 = vmul.f32 %v15550_v32, %v15550_v32 }
 0x8da   : > { %6359 = vadd.xlane.f32.xlu0 %v6358_v53  ;;  %v6521_v47 = vsel %vm564_vm0, %v6455_v63, 0.0 }
 0x8db   : > { %v6518_v24 = vsel %vm564_vm0, %v6454_v4, 0.0 }
 0x8dd   : > { %6522 = vadd.xlane.f32.xlu1 %v6521_v47  ;;  %v11127_v48 = vpop.f32.mrb[146].mxu1 }
 0x8de   : > { %v15563_v2 = vadd.f32 %v11127_v48, %v15398_v41  ;;  %6519 = vadd.xlane.f32.xlu0 %v6518_v24  ;;  %v6241_v39 = vpop.f32.mrb[147].mxu1 }
 0x8df   : > { %v15566_v16 = vadd.f32 %v15398_v41, %v6241_v39 }
 0x8e0   : > { %v6367_v44 = vsel %vm564_vm0, %v15563_v2, 0.0  ;;  %v6457_v11 = vmul.f32 %v15563_v2, %v15563_v2 }
 0x8e1   : > { %6368 = vadd.xlane.f32.xlu1 %v6367_v44  ;;  %v6364_v3 = vsel %vm564_vm0, %v15566_v16, 0.0  ;;  %v6456_v5 = vmul.f32 %v15566_v16, %v15566_v16 }
 0x8e2   : > { %6365 = vadd.xlane.f32.xlu0 %v6364_v3  ;;  %v6527_v36 = vsel %vm564_vm0, %v6457_v11, 0.0 }
 0x8e3   : > { %v6524_v17 = vsel %vm564_vm0, %v6456_v5, 0.0 }
 0x8e5   : > { %6528 = vadd.xlane.f32.xlu1 %v6527_v36  ;;  %v11130_v25 = vpop.f32.mrb[148].mxu1 }
 0x8e6   : > { %v15579_v0 = vadd.f32 %v11130_v25, %v15398_v41  ;;  %6525 = vadd.xlane.f32.xlu0 %v6524_v17  ;;  %v6251_v60 = vpop.f32.mrb[149].mxu1 }
 0x8e7   : > { %v15582_v62 = vadd.f32 %v15398_v41, %v6251_v60 }
 0x8e8   : > { %v6373_v12 = vsel %vm564_vm0, %v15579_v0, 0.0  ;;  %v6459_v54 = vmul.f32 %v15579_v0, %v15579_v0 }
 0x8e9   : > { %6374 = vadd.xlane.f32.xlu1 %v6373_v12  ;;  %v6370_v22 = vsel %vm564_vm0, %v15582_v62, 0.0  ;;  %v6458_v52 = vmul.f32 %v15582_v62, %v15582_v62 }
 0x8ea   : > { %6371 = vadd.xlane.f32.xlu0 %v6370_v22  ;;  %v6533_v57 = vsel %vm564_vm0, %v6459_v54, 0.0 }
 0x8eb   : > { %v6530_v14 = vsel %vm564_vm0, %v6458_v52, 0.0 }
 0x8ed   : > { %6534 = vadd.xlane.f32.xlu1 %v6533_v57  ;;  %v11133_v37 = vpop.f32.mrb[150].mxu1 }
 0x8ee   : > { %v15595_v40 = vadd.f32 %v11133_v37, %v15398_v41  ;;  %6531 = vadd.xlane.f32.xlu0 %v6530_v14  ;;  %v6261_v51 = vpop.f32.mrb[151].mxu1 }
 0x8ef   : > { %v15598_v49 = vadd.f32 %v15398_v41, %v6261_v51 }
 0x8f0   : > { %v6379_v59 = vsel %vm564_vm0, %v15595_v40, 0.0  ;;  %v6461_v31 = vmul.f32 %v15595_v40, %v15595_v40 }
 0x8f1   : > { %6380 = vadd.xlane.f32.xlu1 %v6379_v59  ;;  %v6376_v18 = vsel %vm564_vm0, %v15598_v49, 0.0  ;;  %v6460_v30 = vmul.f32 %v15598_v49, %v15598_v49 }
 0x8f2   : > { %6377 = vadd.xlane.f32.xlu0 %v6376_v18  ;;  %v6539_v58 = vsel %vm564_vm0, %v6461_v31, 0.0 }
 0x8f3   : > { %v6536_v23 = vsel %vm564_vm0, %v6460_v30, 0.0 }
 0x8f5   : > { %6540 = vadd.xlane.f32.xlu1 %v6539_v58  ;;  %v11136_v38 = vpop.f32.mrb[152].mxu1 }
 0x8f6   : > { %v15611_v29 = vadd.f32 %v11136_v38, %v15398_v41  ;;  %6537 = vadd.xlane.f32.xlu0 %v6536_v23  ;;  %v6271_v61 = vpop.f32.mrb[153].mxu1 }
 0x8f7   : > { %v15614_v26 = vadd.f32 %v15398_v41, %v6271_v61 }
 0x8f8   : > { %v6385_v20 = vsel %vm564_vm0, %v15611_v29, 0.0  ;;  %v6463_v7 = vmul.f32 %v15611_v29, %v15611_v29 }
 0x8f9   : > { %6386 = vadd.xlane.f32.xlu1 %v6385_v20  ;;  %v6382_v6 = vsel %vm564_vm0, %v15614_v26, 0.0  ;;  %v6462_v9 = vmul.f32 %v15614_v26, %v15614_v26 }
 0x8fa   : > { %6383 = vadd.xlane.f32.xlu0 %v6382_v6  ;;  %v6545_v55 = vsel %vm564_vm0, %v6463_v7, 0.0 }
 0x8fb   : > { %v6542_v63 = vsel %vm564_vm0, %v6462_v9, 0.0 }
 0x8fd   : > { %6546 = vadd.xlane.f32.xlu1 %v6545_v55  ;;  %v11139_v35 = vpop.f32.mrb[154].mxu1 }
 0x8fe   : > { %v15627_v53 = vadd.f32 %v11139_v35, %v15398_v41  ;;  %6543 = vadd.xlane.f32.xlu0 %v6542_v63  ;;  %v6281_v4 = vpop.f32.mrb[155].mxu1 }
 0x8ff   : > { %v15630_v47 = vadd.f32 %v15398_v41, %v6281_v4 }
 0x900   : > { %v6391_v48 = vsel %vm564_vm0, %v15627_v53, 0.0  ;;  %v6465_v24 = vmul.f32 %v15627_v53, %v15627_v53 }
 0x901   : > { %6392 = vadd.xlane.f32.xlu1 %v6391_v48  ;;  %v6388_v39 = vsel %vm564_vm0, %v15630_v47, 0.0  ;;  %v6464_v44 = vmul.f32 %v15630_v47, %v15630_v47 }
 0x902   : > { %6389 = vadd.xlane.f32.xlu0 %v6388_v39  ;;  %v6551_v11 = vsel %vm564_vm0, %v6465_v24, 0.0 }
 0x903   : > { %v6548_v5 = vsel %vm564_vm0, %v6464_v44, 0.0 }
 0x905   : > { %6552 = vadd.xlane.f32.xlu1 %v6551_v11  ;;  %v11142_v3 = vpop.f32.mrb[156].mxu1 }
 0x906   : > { %v15643_v36 = vadd.f32 %v11142_v3, %v15398_v41  ;;  %6549 = vadd.xlane.f32.xlu0 %v6548_v5  ;;  %v6291_v25 = vpop.f32.mrb[157].mxu1 }
 0x907   : > { %v15646_v17 = vadd.f32 %v15398_v41, %v6291_v25 }
 0x908   : > { %v6397_v60 = vsel %vm564_vm0, %v15643_v36, 0.0  ;;  %v6467_v12 = vmul.f32 %v15643_v36, %v15643_v36 }
 0x909   : > { %6398 = vadd.xlane.f32.xlu1 %v6397_v60  ;;  %v6394_v54 = vsel %vm564_vm0, %v15646_v17, 0.0  ;;  %v6466_v22 = vmul.f32 %v15646_v17, %v15646_v17 }
 0x90a   : > { %6395 = vadd.xlane.f32.xlu0 %v6394_v54  ;;  %v6557_v52 = vsel %vm564_vm0, %v6467_v12, 0.0 }
 0x90b   : > { %v6554_v37 = vsel %vm564_vm0, %v6466_v22, 0.0 }
 0x90d   : > { %6558 = vadd.xlane.f32.xlu1 %v6557_v52  ;;  %v11145_v57 = vpop.f32.mrb[158].mxu1 }
 0x90e   : > { %v15659_v14 = vadd.f32 %v11145_v57, %v15398_v41  ;;  %6555 = vadd.xlane.f32.xlu0 %v6554_v37  ;;  %v6301_v51 = vpop.f32.mrb[159].mxu1 }
 0x90f   : > { %v15662_v59 = vadd.f32 %v15398_v41, %v6301_v51 }
 0x910   : > { %v6403_v31 = vsel %vm564_vm0, %v15659_v14, 0.0  ;;  %v6469_v18 = vmul.f32 %v15659_v14, %v15659_v14 }
 0x911   : > { %6404 = vadd.xlane.f32.xlu1 %v6403_v31  ;;  %v6400_v30 = vsel %vm564_vm0, %v15662_v59, 0.0  ;;  %v6468_v58 = vmul.f32 %v15662_v59, %v15662_v59 }
 0x912   : > { %6401 = vadd.xlane.f32.xlu0 %v6400_v30  ;;  %v6563_v38 = vsel %vm564_vm0, %v6469_v18, 0.0 }
 0x913   : > { %v6560_v41 = vsel %vm564_vm0, %v6468_v58, 0.0 }
 0x915   : > { %6564 = vadd.xlane.f32.xlu1 %v6563_v38 }
 0x916   : > { %6561 = vadd.xlane.f32.xlu0 %v6560_v41 }
 0x926   : > { %v6315_v23 = vpop.xlane.xlu1 %6314 }
 0x927   : > { %v6407_v61 = vmul.f32 0.03125, %v6315_v23  ;;  %v6312_v20 = vpop.xlane.xlu0 %6311 }
 0x928   : > { %v6406_v7 = vmul.f32 0.03125, %v6312_v20 }
 0x929   : > { %v6599_v9 = vmul.f32 %v6407_v61, %v6407_v61 }
 0x92a   : > { %v6475_v6 = vpop.xlane.xlu1 %6474  ;;  %v6598_v63 = vmul.f32 %v6406_v7, %v6406_v7 }
 0x92b   : > { %v6567_v55 = vmul.f32 0.03125, %v6475_v6  ;;  %v6472_v35 = vpop.xlane.xlu0 %6471 }
 0x92c   : > { %v6566_v4 = vmul.f32 0.03125, %v6472_v35 }
 0x92d   : > { %v6631_v48 = vsub.f32 %v6567_v55, %v6599_v9 }
 0x92e   : > { %v6630_v24 = vsub.f32 %v6566_v4, %v6598_v63  ;;  %v6321_v39 = vpop.xlane.xlu1 %6320 }
 0x92f   : > { %v6663_v44 = vmax.f32 %v6631_v48, 0.0  ;;  %v15674_v11 = vmul.f32 0.03125, %v6321_v39  ;;  %v6318_v3 = vpop.xlane.xlu0 %6317  ;;  %v6695_v48 = vsub.f32 %v15401_v27, %v6407_v61 }
 0x930   : > { %v6662_v5 = vmax.f32 %v6630_v24, 0.0  ;;  %v15676_v25 = vmul.f32 0.03125, %v6318_v3  ;;  %v15692_v3 = vld [vmem:[%s13364_s27 + $0x2] ss:$0 sm:$0xff] }
 0x931   : > { %v6727_v60 = vadd.f32 1e-05, %v6663_v44  ;;  %v6601_v22 = vmul.f32 %v15674_v11, %v15674_v11 }
 0x932   : > { %v6726_v12 = vadd.f32 1e-05, %v6662_v5  ;;  %v6481_v54 = vpop.xlane.xlu1 %6480  ;;  %v6600_v37 = vmul.f32 %v15676_v25, %v15676_v25  ;;  %v6694_v5 = vsub.f32 %v15404_v15, %v6406_v7  ;;  %v6697_v7 = vsub.f32 %v15417_v34, %v15674_v11 }
 0x933   : > { %12034 = vrsqrt.f32 %v6727_v60  ;;  %v6569_v52 = vmul.f32 0.03125, %v6481_v54  ;;  %v6478_v57 = vpop.xlane.xlu0 %6477  ;;  %v6696_v34 = vsub.f32 %v15420_v19, %v15676_v25 }
 0x934   : > { %12036 = vrsqrt.f32 %v6726_v12  ;;  %v6568_v51 = vmul.f32 0.03125, %v6478_v57 }
 0x935   : > { %v6633_v31 = vsub.f32 %v6569_v52, %v6601_v22 }
 0x936   : > { %v6632_v18 = vsub.f32 %v6568_v51, %v6600_v37  ;;  %v6327_v30 = vpop.xlane.xlu1 %6326  ;;  %v15698_v51 = vld [vmem:[%s13375_s30 + $0x2] ss:$0 sm:$0xff] }
 0x937   : > { %v6665_v58 = vmax.f32 %v6633_v31, 0.0  ;;  %v15682_v38 = vmul.f32 0.03125, %v6327_v30  ;;  %v6324_v41 = vpop.xlane.xlu0 %6323 }
 0x938   : > { %v6664_v23 = vmax.f32 %v6632_v18, 0.0  ;;  %v15684_v20 = vmul.f32 0.03125, %v6324_v41 }
 0x939   : > { %v6729_v6 = vadd.f32 1e-05, %v6665_v58  ;;  %v6603_v35 = vmul.f32 %v15682_v38, %v15682_v38 }
 0x93a   : > { %v6728_v9 = vadd.f32 1e-05, %v6664_v23  ;;  %v6487_v55 = vpop.xlane.xlu1 %6486  ;;  %v6602_v24 = vmul.f32 %v15684_v20, %v15684_v20 }
 0x93b   : > { %12038 = vrsqrt.f32 %v6729_v6  ;;  %v6571_v63 = vmul.f32 0.03125, %v6487_v55  ;;  %v6484_v4 = vpop.xlane.xlu0 %6483 }
 0x93c   : > { %12040 = vrsqrt.f32 %v6728_v9  ;;  %v6570_v39 = vmul.f32 0.03125, %v6484_v4 }
 0x93d   : > { %v12035_v44 = vpop.eup %12034  ;;  %v6635_v60 = vsub.f32 %v6571_v63, %v6603_v35 }
 0x93e   : > { %v12037_v12 = vpop.eup %12036  ;;  %v6791_v54 = vmul.f32 %v12035_v44, %v6695_v48  ;;  %v6634_v22 = vsub.f32 %v6570_v39, %v6602_v24  ;;  %v6333_v52 = vpop.xlane.xlu1 %6332 }
 0x93f   : > { %v6667_v57 = vmax.f32 %v6635_v60, 0.0  ;;  %v15695_v37 = vmul.f32 0.03125, %v6333_v52  ;;  %v6330_v27 = vpop.xlane.xlu0 %6329  ;;  %v6790_v61 = vmul.f32 %v12037_v12, %v6694_v5 }
 0x940   : > { %v6828_v31 = vmul.f32 %v15692_v3, %v6791_v54  ;;  %v6666_v18 = vmax.f32 %v6634_v22, 0.0  ;;  %v15701_v30 = vmul.f32 0.03125, %v6330_v27 }
 0x941   : > { %v6731_v58 = vadd.f32 1e-05, %v6667_v57  ;;  %v6827_v15 = vmul.f32 %v15692_v3, %v6790_v61  ;;  %v6605_v9 = vmul.f32 %v15695_v37, %v15695_v37 }
 0x942   : > { %v6730_v41 = vadd.f32 1e-05, %v6666_v18  ;;  %v6493_v23 = vpop.xlane.xlu1 %6492  ;;  %v6865_v6 = vadd.f32 %v15698_v51, %v6828_v31  ;;  %v6604_v4 = vmul.f32 %v15701_v30, %v15701_v30 }
 0x943   : > { %12042 = vrsqrt.f32 %v6731_v58  ;;  %v6573_v55 = vmul.f32 0.03125, %v6493_v23  ;;  %v6490_v35 = vpop.xlane.xlu0 %6489  ;;  %v6864_v63 = vadd.f32 %v15698_v51, %v6827_v15 }
 0x944   : > { %12044 = vrsqrt.f32 %v6730_v41  ;;  %v6572_v48 = vmul.f32 0.03125, %v6490_v35  ;;  %v6897_v24 = vmul.f32 0.2, %v6865_v6 }
 0x945   : > { %v12039_v39 = vpop.eup %12038  ;;  %v6637_v11 = vsub.f32 %v6573_v55, %v6605_v9  ;;  %v6896_v44 = vmul.f32 0.2, %v6864_v63 }
 0x946   : > { %v12041_v5 = vpop.eup %12040  ;;  %v6636_v60 = vsub.f32 %v6572_v48, %v6604_v4  ;;  %v6339_v12 = vpop.xlane.xlu1 %6338  ;;  %v6793_v54 = vmul.f32 %v12039_v39, %v6697_v7  ;;  %v15720_v58 = vmax.f32 %v6865_v6, %v6897_v24  ;;  %v6699_v7 = vsub.f32 %v15433_v33, %v15682_v38 }
 0x947   : > { %v6669_v22 = vmax.f32 %v6637_v11, 0.0  ;;  %v15714_v52 = vmul.f32 0.03125, %v6339_v12  ;;  %v6336_v57 = vpop.xlane.xlu0 %6335  ;;  %v15716_v27 = vmax.f32 %v6864_v63, %v6896_v44  ;;  %v6792_v61 = vmul.f32 %v12041_v5, %v6696_v34 }
 0x948   : > { %v6668_v31 = vmax.f32 %v6636_v60, 0.0  ;;  %v15718_v18 = vmul.f32 0.03125, %v6336_v57  ;;  %v6830_v19 = vmul.f32 %v15692_v3, %v6793_v54  ;;  %v6698_v24 = vsub.f32 %v15436_v10, %v15684_v20 }
 0x949   : > { %v6733_v25 = vadd.f32 1e-05, %v6669_v22  ;;  %11154 = vmatprep.mubr.msk.f32.mxu0 %vm564_vm0, %v15716_v27  ;;  %11210 = vmatprep.mubr.msk.f32.mxu1 %vm564_vm0, %v15716_v27  ;;  %v6829_v15 = vmul.f32 %v15692_v3, %v6792_v61  ;;  %v6607_v9 = vmul.f32 %v15714_v52, %v15714_v52 }
 0x94a   : > { %v6732_v41 = vadd.f32 1e-05, %v6668_v31  ;;  %v6499_v23 = vpop.xlane.xlu1 %6498  ;;  %11155 = vmatmul.mubr.msk.f32.vlgmr.msra.gmra.mrb[0].mxu0 %vm564_vm0, %v15720_v58  ;;  %11211 = vmatmul.mubr.msk.f32.vlgmr.msra.gmra.mrb[160].mxu1 %vm564_vm0, %v15720_v58  ;;  %v6867_v6 = vadd.f32 %v15698_v51, %v6830_v19  ;;  %v6606_v33 = vmul.f32 %v15718_v18, %v15718_v18 }
 0x94b   : > { %12046 = vrsqrt.f32 %v6733_v25  ;;  %v6575_v55 = vmul.f32 0.03125, %v6499_v23  ;;  %v6496_v35 = vpop.xlane.xlu0 %6495  ;;  %v6866_v63 = vadd.f32 %v15698_v51, %v6829_v15 }
 0x94c   : > { %12048 = vrsqrt.f32 %v6732_v41  ;;  %v6574_v38 = vmul.f32 0.03125, %v6496_v35  ;;  %v6899_v4 = vmul.f32 0.2, %v6867_v6 }
 0x94d   : > { %v12043_v48 = vpop.eup %12042  ;;  %v6639_v39 = vsub.f32 %v6575_v55, %v6607_v9  ;;  %v6898_v34 = vmul.f32 0.2, %v6866_v63 }
 0x94e   : > { %v12045_v11 = vpop.eup %12044  ;;  %v6638_v44 = vsub.f32 %v6574_v38, %v6606_v33  ;;  %v6345_v5 = vpop.xlane.xlu1 %6344  ;;  %v6795_v60 = vmul.f32 %v12043_v48, %v6699_v7  ;;  %v15748_v25 = vmax.f32 %v6867_v6, %v6899_v4  ;;  %v6701_v7 = vsub.f32 %v15455_v21, %v15695_v37 }
 0x94f   : > { %v6671_v12 = vmax.f32 %v6639_v39, 0.0  ;;  %v15742_v54 = vmul.f32 0.03125, %v6345_v5  ;;  %v6342_v22 = vpop.xlane.xlu0 %6341  ;;  %v15744_v57 = vmax.f32 %v6866_v63, %v6898_v34  ;;  %v6794_v61 = vmul.f32 %v12045_v11, %v6698_v24 }
 0x950   : > { %v6670_v31 = vmax.f32 %v6638_v44, 0.0  ;;  %v15746_v19 = vmul.f32 0.03125, %v6342_v22  ;;  %17430 = vst [vmem:[#allocation3_spill] sm:$0xff] %v15748_v25  ;;  %v6832_v10 = vmul.f32 %v15692_v3, %v6795_v60  ;;  %v6700_v4 = vsub.f32 %v15458_v56, %v15701_v30 }
 0x951   : > { %17429 = vst [vmem:[#allocation2_spill] sm:$0xff] %v15744_v57  ;;  %v6735_v20 = vadd.f32 1e-05, %v6671_v12  ;;  %11157 = vmatprep.mubr.msk.f32.mxu0 %vm564_vm0, %v15744_v57  ;;  %11213 = vmatprep.mubr.msk.f32.mxu1 %vm564_vm0, %v15744_v57  ;;  %v6831_v15 = vmul.f32 %v15692_v3, %v6794_v61  ;;  %v6609_v9 = vmul.f32 %v15742_v54, %v15742_v54 }
 0x952   : > { %v6734_v41 = vadd.f32 1e-05, %v6670_v31  ;;  %v6505_v23 = vpop.xlane.xlu1 %6504  ;;  %11158 = vmatmul.mubr.msk.f32.gmra.mrb[2].mxu0 %vm564_vm0, %v15748_v25  ;;  %11214 = vmatmul.mubr.msk.f32.gmra.mrb[162].mxu1 %vm564_vm0, %v15748_v25  ;;  %v6869_v6 = vadd.f32 %v15698_v51, %v6832_v10  ;;  %v6608_v21 = vmul.f32 %v15746_v19, %v15746_v19 }
 0x953   : > { %12050 = vrsqrt.f32 %v6735_v20  ;;  %v6577_v55 = vmul.f32 0.03125, %v6505_v23  ;;  %v6502_v35 = vpop.xlane.xlu0 %6501  ;;  %v6868_v63 = vadd.f32 %v15698_v51, %v6831_v15 }
 0x954   : > { %12052 = vrsqrt.f32 %v6734_v41  ;;  %v6576_v37 = vmul.f32 0.03125, %v6502_v35  ;;  %v6901_v33 = vmul.f32 0.2, %v6869_v6 }
 0x955   : > { %v12047_v38 = vpop.eup %12046  ;;  %v6641_v48 = vsub.f32 %v6577_v55, %v6609_v9  ;;  %v6900_v24 = vmul.f32 0.2, %v6868_v63 }
 0x956   : > { %v12049_v39 = vpop.eup %12048  ;;  %v6640_v34 = vsub.f32 %v6576_v37, %v6608_v21  ;;  %v6351_v11 = vpop.xlane.xlu1 %6350  ;;  %v6797_v44 = vmul.f32 %v12047_v38, %v6701_v7  ;;  %v15776_v20 = vmax.f32 %v6869_v6, %v6901_v33  ;;  %v6703_v7 = vsub.f32 %v15471_v46, %v15714_v52 }
 0x957   : > { %v6673_v5 = vmax.f32 %v6641_v48, 0.0  ;;  %v15770_v60 = vmul.f32 0.03125, %v6351_v11  ;;  %v6348_v12 = vpop.xlane.xlu0 %6347  ;;  %v15772_v22 = vmax.f32 %v6868_v63, %v6900_v24  ;;  %v6796_v61 = vmul.f32 %v12049_v39, %v6700_v4 }
 0x958   : > { %v6672_v31 = vmax.f32 %v6640_v34, 0.0  ;;  %v15774_v10 = vmul.f32 0.03125, %v6348_v12  ;;  %17432 = vst [vmem:[#allocation5_spill] sm:$0xff] %v15776_v20  ;;  %v6834_v56 = vmul.f32 %v15692_v3, %v6797_v44  ;;  %v6702_v33 = vsub.f32 %v15474_v28, %v15718_v18 }
 0x959   : > { %17431 = vst [vmem:[#allocation4_spill] sm:$0xff] %v15772_v22  ;;  %v6737_v30 = vadd.f32 1e-05, %v6673_v5  ;;  %11160 = vmatprep.mubr.msk.f32.mxu0 %vm564_vm0, %v15772_v22  ;;  %11216 = vmatprep.mubr.msk.f32.mxu1 %vm564_vm0, %v15772_v22  ;;  %v6833_v15 = vmul.f32 %v15692_v3, %v6796_v61  ;;  %v6611_v9 = vmul.f32 %v15770_v60, %v15770_v60 }
 0x95a   : > { %v6736_v41 = vadd.f32 1e-05, %v6672_v31  ;;  %v6511_v23 = vpop.xlane.xlu1 %6510  ;;  %11161 = vmatmul.mubr.msk.f32.gmra.mrb[4].mxu0 %vm564_vm0, %v15776_v20  ;;  %11217 = vmatmul.mubr.msk.f32.gmra.mrb[164].mxu1 %vm564_vm0, %v15776_v20  ;;  %v6871_v6 = vadd.f32 %v15698_v51, %v6834_v56  ;;  %v6610_v46 = vmul.f32 %v15774_v10, %v15774_v10 }
 0x95b   : > { %12054 = vrsqrt.f32 %v6737_v30  ;;  %v6579_v55 = vmul.f32 0.03125, %v6511_v23  ;;  %v6508_v35 = vpop.xlane.xlu0 %6507  ;;  %v6870_v63 = vadd.f32 %v15698_v51, %v6833_v15 }
 0x95c   : > { %12056 = vrsqrt.f32 %v6736_v41  ;;  %v6578_v52 = vmul.f32 0.03125, %v6508_v35  ;;  %v6903_v21 = vmul.f32 0.2, %v6871_v6 }
 0x95d   : > { %v12051_v37 = vpop.eup %12050  ;;  %v6643_v38 = vsub.f32 %v6579_v55, %v6611_v9  ;;  %v6902_v4 = vmul.f32 0.2, %v6870_v63 }
 0x95e   : > { %v12053_v48 = vpop.eup %12052  ;;  %v6642_v24 = vsub.f32 %v6578_v52, %v6610_v46  ;;  %v6357_v39 = vpop.xlane.xlu1 %6356  ;;  %v6799_v34 = vmul.f32 %v12051_v37, %v6703_v7  ;;  %v15804_v30 = vmax.f32 %v6871_v6, %v6903_v21  ;;  %v6705_v7 = vsub.f32 %v15487_v50, %v15742_v54 }
 0x95f   : > { %v6675_v11 = vmax.f32 %v6643_v38, 0.0  ;;  %v15798_v44 = vmul.f32 0.03125, %v6357_v39  ;;  %v6354_v5 = vpop.xlane.xlu0 %6353  ;;  %v15800_v12 = vmax.f32 %v6870_v63, %v6902_v4  ;;  %v6798_v61 = vmul.f32 %v12053_v48, %v6702_v33 }
 0x960   : > { %v6674_v31 = vmax.f32 %v6642_v24, 0.0  ;;  %v15802_v56 = vmul.f32 0.03125, %v6354_v5  ;;  %17434 = vst [vmem:[#allocation7_spill] sm:$0xff] %v15804_v30  ;;  %v6836_v28 = vmul.f32 %v15692_v3, %v6799_v34  ;;  %v6704_v21 = vsub.f32 %v15490_v45, %v15746_v19 }
 0x961   : > { %17433 = vst [vmem:[#allocation6_spill] sm:$0xff] %v15800_v12  ;;  %v6739_v18 = vadd.f32 1e-05, %v6675_v11  ;;  %11163 = vmatprep.mubr.msk.f32.mxu0 %vm564_vm0, %v15800_v12  ;;  %11219 = vmatprep.mubr.msk.f32.mxu1 %vm564_vm0, %v15800_v12  ;;  %v6835_v15 = vmul.f32 %v15692_v3, %v6798_v61  ;;  %v6613_v9 = vmul.f32 %v15798_v44, %v15798_v44 }
 0x962   : > { %v6738_v41 = vadd.f32 1e-05, %v6674_v31  ;;  %v6517_v23 = vpop.xlane.xlu1 %6516  ;;  %11164 = vmatmul.mubr.msk.f32.gmra.mrb[6].mxu0 %vm564_vm0, %v15804_v30  ;;  %11220 = vmatmul.mubr.msk.f32.gmra.mrb[166].mxu1 %vm564_vm0, %v15804_v30  ;;  %v6873_v6 = vadd.f32 %v15698_v51, %v6836_v28  ;;  %v6612_v50 = vmul.f32 %v15802_v56, %v15802_v56 }
 0x963   : > { %12058 = vrsqrt.f32 %v6739_v18  ;;  %v6581_v55 = vmul.f32 0.03125, %v6517_v23  ;;  %v6514_v35 = vpop.xlane.xlu0 %6513  ;;  %v6872_v63 = vadd.f32 %v15698_v51, %v6835_v15 }
 0x964   : > { %12060 = vrsqrt.f32 %v6738_v41  ;;  %v6580_v54 = vmul.f32 0.03125, %v6514_v35  ;;  %v6905_v46 = vmul.f32 0.2, %v6873_v6 }
 0x965   : > { %v12055_v52 = vpop.eup %12054  ;;  %v6645_v37 = vsub.f32 %v6581_v55, %v6613_v9  ;;  %v6904_v33 = vmul.f32 0.2, %v6872_v63 }
 0x966   : > { %v12057_v38 = vpop.eup %12056  ;;  %v6644_v4 = vsub.f32 %v6580_v54, %v6612_v50  ;;  %v6363_v48 = vpop.xlane.xlu1 %6362  ;;  %v6801_v24 = vmul.f32 %v12055_v52, %v6705_v7  ;;  %v15832_v18 = vmax.f32 %v6873_v6, %v6905_v46  ;;  %v6707_v7 = vsub.f32 %v15515_v8, %v15770_v60 }
 0x967   : > { %v6677_v39 = vmax.f32 %v6645_v37, 0.0  ;;  %v15826_v34 = vmul.f32 0.03125, %v6363_v48  ;;  %v6360_v11 = vpop.xlane.xlu0 %6359  ;;  %v15828_v5 = vmax.f32 %v6872_v63, %v6904_v33  ;;  %v6800_v61 = vmul.f32 %v12057_v38, %v6704_v21 }
 0x968   : > { %v6676_v31 = vmax.f32 %v6644_v4, 0.0  ;;  %v15830_v28 = vmul.f32 0.03125, %v6360_v11  ;;  %17436 = vst [vmem:[#allocation9_spill] sm:$0xff] %v15832_v18  ;;  %v6838_v45 = vmul.f32 %v15692_v3, %v6801_v24  ;;  %v6706_v46 = vsub.f32 %v15518_v1, %v15774_v10 }
 0x969   : > { %17435 = vst [vmem:[#allocation8_spill] sm:$0xff] %v15828_v5  ;;  %v6741_v19 = vadd.f32 1e-05, %v6677_v39  ;;  %11166 = vmatprep.mubr.msk.f32.mxu0 %vm564_vm0, %v15828_v5  ;;  %11222 = vmatprep.mubr.msk.f32.mxu1 %vm564_vm0, %v15828_v5  ;;  %v6837_v15 = vmul.f32 %v15692_v3, %v6800_v61  ;;  %v6615_v9 = vmul.f32 %v15826_v34, %v15826_v34 }
 0x96a   : > { %v6740_v41 = vadd.f32 1e-05, %v6676_v31  ;;  %v6523_v23 = vpop.xlane.xlu1 %6522  ;;  %11167 = vmatmul.mubr.msk.f32.gmra.mrb[8].mxu0 %vm564_vm0, %v15832_v18  ;;  %11223 = vmatmul.mubr.msk.f32.gmra.mrb[168].mxu1 %vm564_vm0, %v15832_v18  ;;  %v6875_v6 = vadd.f32 %v15698_v51, %v6838_v45  ;;  %v6614_v8 = vmul.f32 %v15830_v28, %v15830_v28 }
 0x96b   : > { %12062 = vrsqrt.f32 %v6741_v19  ;;  %v6583_v55 = vmul.f32 0.03125, %v6523_v23  ;;  %v6520_v35 = vpop.xlane.xlu0 %6519  ;;  %v6874_v63 = vadd.f32 %v15698_v51, %v6837_v15 }
 0x96c   : > { %12064 = vrsqrt.f32 %v6740_v41  ;;  %v6582_v60 = vmul.f32 0.03125, %v6520_v35  ;;  %v6907_v50 = vmul.f32 0.2, %v6875_v6 }
 0x96d   : > { %v12059_v54 = vpop.eup %12058  ;;  %v6647_v52 = vsub.f32 %v6583_v55, %v6615_v9  ;;  %v6906_v21 = vmul.f32 0.2, %v6874_v63 }
 0x96e   : > { %v12061_v37 = vpop.eup %12060  ;;  %v6646_v33 = vsub.f32 %v6582_v60, %v6614_v8  ;;  %v6369_v38 = vpop.xlane.xlu1 %6368  ;;  %v6803_v4 = vmul.f32 %v12059_v54, %v6707_v7  ;;  %v15860_v19 = vmax.f32 %v6875_v6, %v6907_v50  ;;  %v6709_v7 = vsub.f32 %v15531_v13, %v15798_v44 }
 0x96f   : > { %v6679_v48 = vmax.f32 %v6647_v52, 0.0  ;;  %v15854_v24 = vmul.f32 0.03125, %v6369_v38  ;;  %v6366_v39 = vpop.xlane.xlu0 %6365  ;;  %v15856_v11 = vmax.f32 %v6874_v63, %v6906_v21  ;;  %v6802_v61 = vmul.f32 %v12061_v37, %v6706_v46 }
 0x970   : > { %v6678_v31 = vmax.f32 %v6646_v33, 0.0  ;;  %v15858_v45 = vmul.f32 0.03125, %v6366_v39  ;;  %17438 = vst [vmem:[#allocation11_spill] sm:$0xff] %v15860_v19  ;;  %v6840_v1 = vmul.f32 %v15692_v3, %v6803_v4  ;;  %v6708_v50 = vsub.f32 %v15534_v43, %v15802_v56 }
 0x971   : > { %17437 = vst [vmem:[#allocation10_spill] sm:$0xff] %v15856_v11  ;;  %v6743_v10 = vadd.f32 1e-05, %v6679_v48  ;;  %11169 = vmatprep.mubr.msk.f32.mxu0 %vm564_vm0, %v15856_v11  ;;  %11225 = vmatprep.mubr.msk.f32.mxu1 %vm564_vm0, %v15856_v11  ;;  %v6839_v15 = vmul.f32 %v15692_v3, %v6802_v61  ;;  %v6617_v9 = vmul.f32 %v15854_v24, %v15854_v24 }
 0x972   : > { %v6742_v41 = vadd.f32 1e-05, %v6678_v31  ;;  %v6529_v23 = vpop.xlane.xlu1 %6528  ;;  %11170 = vmatmul.mubr.msk.f32.gmra.mrb[10].mxu0 %vm564_vm0, %v15860_v19  ;;  %11226 = vmatmul.mubr.msk.f32.gmra.mrb[170].mxu1 %vm564_vm0, %v15860_v19  ;;  %v6877_v6 = vadd.f32 %v15698_v51, %v6840_v1  ;;  %v6616_v13 = vmul.f32 %v15858_v45, %v15858_v45 }
 0x973   : > { %12066 = vrsqrt.f32 %v6743_v10  ;;  %v6585_v55 = vmul.f32 0.03125, %v6529_v23  ;;  %v6526_v35 = vpop.xlane.xlu0 %6525  ;;  %v6876_v63 = vadd.f32 %v15698_v51, %v6839_v15 }
 0x974   : > { %12068 = vrsqrt.f32 %v6742_v41  ;;  %v6584_v44 = vmul.f32 0.03125, %v6526_v35  ;;  %v6909_v8 = vmul.f32 0.2, %v6877_v6 }
 0x975   : > { %v12063_v60 = vpop.eup %12062  ;;  %v6649_v54 = vsub.f32 %v6585_v55, %v6617_v9  ;;  %v6908_v46 = vmul.f32 0.2, %v6876_v63 }
 0x976   : > { %v12065_v52 = vpop.eup %12064  ;;  %v6648_v21 = vsub.f32 %v6584_v44, %v6616_v13  ;;  %v6375_v37 = vpop.xlane.xlu1 %6374  ;;  %v6805_v33 = vmul.f32 %v12063_v60, %v6709_v7  ;;  %v15888_v10 = vmax.f32 %v6877_v6, %v6909_v8  ;;  %v6711_v7 = vsub.f32 %v15547_v42, %v15826_v34 }
 0x977   : > { %v6681_v38 = vmax.f32 %v6649_v54, 0.0  ;;  %v15882_v4 = vmul.f32 0.03125, %v6375_v37  ;;  %v6372_v48 = vpop.xlane.xlu0 %6371  ;;  %v15884_v39 = vmax.f32 %v6876_v63, %v6908_v46  ;;  %v6804_v61 = vmul.f32 %v12065_v52, %v6708_v50 }
 0x978   : > { %v6680_v31 = vmax.f32 %v6648_v21, 0.0  ;;  %v15886_v1 = vmul.f32 0.03125, %v6372_v48  ;;  %17440 = vst [vmem:[#allocation13_spill] sm:$0xff] %v15888_v10  ;;  %v6842_v43 = vmul.f32 %v15692_v3, %v6805_v33  ;;  %v6710_v8 = vsub.f32 %v15550_v32, %v15830_v28 }
 0x979   : > { %17439 = vst [vmem:[#allocation12_spill] sm:$0xff] %v15884_v39  ;;  %v6745_v56 = vadd.f32 1e-05, %v6681_v38  ;;  %11172 = vmatprep.mubr.msk.f32.mxu0 %vm564_vm0, %v15884_v39  ;;  %11228 = vmatprep.mubr.msk.f32.mxu1 %vm564_vm0, %v15884_v39  ;;  %v6841_v15 = vmul.f32 %v15692_v3, %v6804_v61  ;;  %v6619_v9 = vmul.f32 %v15882_v4, %v15882_v4 }
 0x97a   : > { %v6744_v41 = vadd.f32 1e-05, %v6680_v31  ;;  %v6535_v23 = vpop.xlane.xlu1 %6534  ;;  %11173 = vmatmul.mubr.msk.f32.gmra.mrb[12].mxu0 %vm564_vm0, %v15888_v10  ;;  %11229 = vmatmul.mubr.msk.f32.gmra.mrb[172].mxu1 %vm564_vm0, %v15888_v10  ;;  %v6879_v6 = vadd.f32 %v15698_v51, %v6842_v43  ;;  %v6618_v42 = vmul.f32 %v15886_v1, %v15886_v1 }
 0x97b   : > { %12070 = vrsqrt.f32 %v6745_v56  ;;  %v6587_v55 = vmul.f32 0.03125, %v6535_v23  ;;  %v6532_v35 = vpop.xlane.xlu0 %6531  ;;  %v6878_v63 = vadd.f32 %v15698_v51, %v6841_v15 }
 0x97c   : > { %12072 = vrsqrt.f32 %v6744_v41  ;;  %v6586_v34 = vmul.f32 0.03125, %v6532_v35  ;;  %v6911_v13 = vmul.f32 0.2, %v6879_v6 }
 0x97d   : > { %v12067_v44 = vpop.eup %12066  ;;  %v6651_v60 = vsub.f32 %v6587_v55, %v6619_v9  ;;  %v6910_v50 = vmul.f32 0.2, %v6878_v63 }
 0x97e   : > { %v12069_v54 = vpop.eup %12068  ;;  %v6650_v46 = vsub.f32 %v6586_v34, %v6618_v42  ;;  %v6381_v52 = vpop.xlane.xlu1 %6380  ;;  %v6807_v21 = vmul.f32 %v12067_v44, %v6711_v7  ;;  %v15916_v56 = vmax.f32 %v6879_v6, %v6911_v13  ;;  %v6713_v7 = vsub.f32 %v15563_v2, %v15854_v24 }
 0x97f   : > { %v6683_v37 = vmax.f32 %v6651_v60, 0.0  ;;  %v15910_v33 = vmul.f32 0.03125, %v6381_v52  ;;  %v6378_v38 = vpop.xlane.xlu0 %6377  ;;  %v15912_v48 = vmax.f32 %v6878_v63, %v6910_v50  ;;  %v6806_v61 = vmul.f32 %v12069_v54, %v6710_v8 }
 0x980   : > { %v6682_v31 = vmax.f32 %v6650_v46, 0.0  ;;  %v15914_v43 = vmul.f32 0.03125, %v6378_v38  ;;  %17442 = vst [vmem:[#allocation15_spill] sm:$0xff] %v15916_v56  ;;  %v6844_v32 = vmul.f32 %v15692_v3, %v6807_v21  ;;  %v6712_v13 = vsub.f32 %v15566_v16, %v15858_v45 }
 0x981   : > { %17441 = vst [vmem:[#allocation14_spill] sm:$0xff] %v15912_v48  ;;  %v6747_v28 = vadd.f32 1e-05, %v6683_v37  ;;  %11175 = vmatprep.mubr.msk.f32.mxu0 %vm564_vm0, %v15912_v48  ;;  %11231 = vmatprep.mubr.msk.f32.mxu1 %vm564_vm0, %v15912_v48  ;;  %v6843_v15 = vmul.f32 %v15692_v3, %v6806_v61  ;;  %v6621_v9 = vmul.f32 %v15910_v33, %v15910_v33 }
 0x982   : > { %v6746_v41 = vadd.f32 1e-05, %v6682_v31  ;;  %v6541_v23 = vpop.xlane.xlu1 %6540  ;;  %11176 = vmatmul.mubr.msk.f32.gmra.mrb[14].mxu0 %vm564_vm0, %v15916_v56  ;;  %11232 = vmatmul.mubr.msk.f32.gmra.mrb[174].mxu1 %vm564_vm0, %v15916_v56  ;;  %v6881_v6 = vadd.f32 %v15698_v51, %v6844_v32  ;;  %v6620_v2 = vmul.f32 %v15914_v43, %v15914_v43 }
 0x983   : > { %12074 = vrsqrt.f32 %v6747_v28  ;;  %v6589_v55 = vmul.f32 0.03125, %v6541_v23  ;;  %v6538_v35 = vpop.xlane.xlu0 %6537  ;;  %v6880_v63 = vadd.f32 %v15698_v51, %v6843_v15 }
 0x984   : > { %12076 = vrsqrt.f32 %v6746_v41  ;;  %v6588_v24 = vmul.f32 0.03125, %v6538_v35  ;;  %v6913_v42 = vmul.f32 0.2, %v6881_v6 }
 0x985   : > { %v12071_v34 = vpop.eup %12070  ;;  %v6653_v44 = vsub.f32 %v6589_v55, %v6621_v9  ;;  %v6912_v8 = vmul.f32 0.2, %v6880_v63 }
 0x986   : > { %v12073_v60 = vpop.eup %12072  ;;  %v6652_v50 = vsub.f32 %v6588_v24, %v6620_v2  ;;  %v6387_v54 = vpop.xlane.xlu1 %6386  ;;  %v6809_v46 = vmul.f32 %v12071_v34, %v6713_v7  ;;  %v15944_v28 = vmax.f32 %v6881_v6, %v6913_v42  ;;  %v6715_v7 = vsub.f32 %v15579_v0, %v15882_v4 }
 0x987   : > { %v6685_v52 = vmax.f32 %v6653_v44, 0.0  ;;  %v15938_v21 = vmul.f32 0.03125, %v6387_v54  ;;  %v6384_v37 = vpop.xlane.xlu0 %6383  ;;  %v15940_v38 = vmax.f32 %v6880_v63, %v6912_v8  ;;  %v6808_v61 = vmul.f32 %v12073_v60, %v6712_v13 }
 0x988   : > { %v6684_v31 = vmax.f32 %v6652_v50, 0.0  ;;  %v15942_v32 = vmul.f32 0.03125, %v6384_v37  ;;  %17444 = vst [vmem:[#allocation17_spill] sm:$0xff] %v15944_v28  ;;  %v6846_v16 = vmul.f32 %v15692_v3, %v6809_v46  ;;  %v6714_v42 = vsub.f32 %v15582_v62, %v15886_v1 }
 0x989   : > { %17443 = vst [vmem:[#allocation16_spill] sm:$0xff] %v15940_v38  ;;  %v6749_v45 = vadd.f32 1e-05, %v6685_v52  ;;  %11178 = vmatprep.mubr.msk.f32.mxu0 %vm564_vm0, %v15940_v38  ;;  %11234 = vmatprep.mubr.msk.f32.mxu1 %vm564_vm0, %v15940_v38  ;;  %v6845_v15 = vmul.f32 %v15692_v3, %v6808_v61  ;;  %v6623_v9 = vmul.f32 %v15938_v21, %v15938_v21 }
 0x98a   : > { %v6748_v41 = vadd.f32 1e-05, %v6684_v31  ;;  %v6547_v23 = vpop.xlane.xlu1 %6546  ;;  %11179 = vmatmul.mubr.msk.f32.gmra.mrb[16].mxu0 %vm564_vm0, %v15944_v28  ;;  %11235 = vmatmul.mubr.msk.f32.gmra.mrb[176].mxu1 %vm564_vm0, %v15944_v28  ;;  %v6883_v6 = vadd.f32 %v15698_v51, %v6846_v16  ;;  %v6622_v0 = vmul.f32 %v15942_v32, %v15942_v32 }
 0x98b   : > { %12078 = vrsqrt.f32 %v6749_v45  ;;  %v6591_v55 = vmul.f32 0.03125, %v6547_v23  ;;  %v6544_v35 = vpop.xlane.xlu0 %6543  ;;  %v6882_v63 = vadd.f32 %v15698_v51, %v6845_v15 }
 0x98c   : > { %12080 = vrsqrt.f32 %v6748_v41  ;;  %v6590_v4 = vmul.f32 0.03125, %v6544_v35  ;;  %v6915_v2 = vmul.f32 0.2, %v6883_v6 }
 0x98d   : > { %v12075_v24 = vpop.eup %12074  ;;  %v6655_v34 = vsub.f32 %v6591_v55, %v6623_v9  ;;  %v6914_v13 = vmul.f32 0.2, %v6882_v63 }
 0x98e   : > { %v12077_v44 = vpop.eup %12076  ;;  %v6654_v8 = vsub.f32 %v6590_v4, %v6622_v0  ;;  %v6393_v60 = vpop.xlane.xlu1 %6392  ;;  %v6811_v50 = vmul.f32 %v12075_v24, %v6715_v7  ;;  %v15972_v45 = vmax.f32 %v6883_v6, %v6915_v2  ;;  %v6717_v7 = vsub.f32 %v15595_v40, %v15910_v33 }
 0x98f   : > { %v6687_v54 = vmax.f32 %v6655_v34, 0.0  ;;  %v15966_v46 = vmul.f32 0.03125, %v6393_v60  ;;  %v6390_v52 = vpop.xlane.xlu0 %6389  ;;  %v15968_v37 = vmax.f32 %v6882_v63, %v6914_v13  ;;  %v6810_v61 = vmul.f32 %v12077_v44, %v6714_v42 }
 0x990   : > { %v6686_v31 = vmax.f32 %v6654_v8, 0.0  ;;  %v15970_v16 = vmul.f32 0.03125, %v6390_v52  ;;  %17446 = vst [vmem:[#allocation19_spill] sm:$0xff] %v15972_v45  ;;  %v6848_v62 = vmul.f32 %v15692_v3, %v6811_v50  ;;  %v6716_v2 = vsub.f32 %v15598_v49, %v15914_v43 }
 0x991   : > { %17445 = vst [vmem:[#allocation18_spill] sm:$0xff] %v15968_v37  ;;  %v6751_v1 = vadd.f32 1e-05, %v6687_v54  ;;  %11181 = vmatprep.mubr.msk.f32.mxu0 %vm564_vm0, %v15968_v37  ;;  %11237 = vmatprep.mubr.msk.f32.mxu1 %vm564_vm0, %v15968_v37  ;;  %v6847_v15 = vmul.f32 %v15692_v3, %v6810_v61  ;;  %v6625_v9 = vmul.f32 %v15966_v46, %v15966_v46 }
 0x992   : > { %v6750_v41 = vadd.f32 1e-05, %v6686_v31  ;;  %v6553_v23 = vpop.xlane.xlu1 %6552  ;;  %11182 = vmatmul.mubr.msk.f32.gmra.mrb[18].mxu0 %vm564_vm0, %v15972_v45  ;;  %11238 = vmatmul.mubr.msk.f32.gmra.mrb[178].mxu1 %vm564_vm0, %v15972_v45  ;;  %v6885_v6 = vadd.f32 %v15698_v51, %v6848_v62  ;;  %v6624_v40 = vmul.f32 %v15970_v16, %v15970_v16 }
 0x993   : > { %12082 = vrsqrt.f32 %v6751_v1  ;;  %v6593_v55 = vmul.f32 0.03125, %v6553_v23  ;;  %v6550_v35 = vpop.xlane.xlu0 %6549  ;;  %v6884_v63 = vadd.f32 %v15698_v51, %v6847_v15 }
 0x994   : > { %12084 = vrsqrt.f32 %v6750_v41  ;;  %v6592_v33 = vmul.f32 0.03125, %v6550_v35  ;;  %v6917_v0 = vmul.f32 0.2, %v6885_v6 }
 0x995   : > { %v12079_v4 = vpop.eup %12078  ;;  %v6657_v24 = vsub.f32 %v6593_v55, %v6625_v9  ;;  %v6916_v42 = vmul.f32 0.2, %v6884_v63 }
 0x996   : > { %v12081_v34 = vpop.eup %12080  ;;  %v6656_v13 = vsub.f32 %v6592_v33, %v6624_v40  ;;  %v6399_v44 = vpop.xlane.xlu1 %6398  ;;  %v6813_v8 = vmul.f32 %v12079_v4, %v6717_v7  ;;  %v16000_v1 = vmax.f32 %v6885_v6, %v6917_v0  ;;  %v6719_v7 = vsub.f32 %v15611_v29, %v15938_v21 }
 0x997   : > { %v6689_v60 = vmax.f32 %v6657_v24, 0.0  ;;  %v15994_v50 = vmul.f32 0.03125, %v6399_v44  ;;  %v6396_v54 = vpop.xlane.xlu0 %6395  ;;  %v15996_v52 = vmax.f32 %v6884_v63, %v6916_v42  ;;  %v6812_v61 = vmul.f32 %v12081_v34, %v6716_v2 }
 0x998   : > { %v6688_v31 = vmax.f32 %v6656_v13, 0.0  ;;  %v15998_v62 = vmul.f32 0.03125, %v6396_v54  ;;  %17448 = vst [vmem:[#allocation21_spill] sm:$0xff] %v16000_v1  ;;  %v6850_v49 = vmul.f32 %v15692_v3, %v6813_v8  ;;  %v6718_v0 = vsub.f32 %v15614_v26, %v15942_v32 }
 0x999   : > { %17447 = vst [vmem:[#allocation20_spill] sm:$0xff] %v15996_v52  ;;  %v6753_v43 = vadd.f32 1e-05, %v6689_v60  ;;  %11184 = vmatprep.mubr.msk.f32.mxu0 %vm564_vm0, %v15996_v52  ;;  %11240 = vmatprep.mubr.msk.f32.mxu1 %vm564_vm0, %v15996_v52  ;;  %v6849_v15 = vmul.f32 %v15692_v3, %v6812_v61  ;;  %v6627_v9 = vmul.f32 %v15994_v50, %v15994_v50 }
 0x99a   : > { %v6752_v41 = vadd.f32 1e-05, %v6688_v31  ;;  %v6559_v23 = vpop.xlane.xlu1 %6558  ;;  %11185 = vmatmul.mubr.msk.f32.gmra.mrb[20].mxu0 %vm564_vm0, %v16000_v1  ;;  %11241 = vmatmul.mubr.msk.f32.gmra.mrb[180].mxu1 %vm564_vm0, %v16000_v1  ;;  %v6887_v6 = vadd.f32 %v15698_v51, %v6850_v49  ;;  %v6626_v29 = vmul.f32 %v15998_v62, %v15998_v62 }
 0x99b   : > { %12086 = vrsqrt.f32 %v6753_v43  ;;  %v6595_v55 = vmul.f32 0.03125, %v6559_v23  ;;  %v6556_v35 = vpop.xlane.xlu0 %6555  ;;  %v6886_v63 = vadd.f32 %v15698_v51, %v6849_v15 }
 0x99c   : > { %12088 = vrsqrt.f32 %v6752_v41  ;;  %v6594_v21 = vmul.f32 0.03125, %v6556_v35  ;;  %v6919_v40 = vmul.f32 0.2, %v6887_v6 }
 0x99d   : > { %v12083_v33 = vpop.eup %12082  ;;  %v6659_v4 = vsub.f32 %v6595_v55, %v6627_v9  ;;  %v6918_v2 = vmul.f32 0.2, %v6886_v63 }
 0x99e   : > { %v12085_v24 = vpop.eup %12084  ;;  %v6658_v42 = vsub.f32 %v6594_v21, %v6626_v29  ;;  %v6405_v34 = vpop.xlane.xlu1 %6404  ;;  %v6815_v13 = vmul.f32 %v12083_v33, %v6719_v7  ;;  %v16028_v43 = vmax.f32 %v6887_v6, %v6919_v40  ;;  %v6721_v7 = vsub.f32 %v15627_v53, %v15966_v46 }
 0x99f   : > { %v6691_v44 = vmax.f32 %v6659_v4, 0.0  ;;  %v16022_v8 = vmul.f32 0.03125, %v6405_v34  ;;  %v6402_v60 = vpop.xlane.xlu0 %6401  ;;  %v16024_v54 = vmax.f32 %v6886_v63, %v6918_v2  ;;  %v6814_v61 = vmul.f32 %v12085_v24, %v6718_v0 }
 0x9a0   : > { %v6690_v31 = vmax.f32 %v6658_v42, 0.0  ;;  %v16026_v49 = vmul.f32 0.03125, %v6402_v60  ;;  %17450 = vst [vmem:[#allocation23_spill] sm:$0xff] %v16028_v43  ;;  %v6852_v26 = vmul.f32 %v15692_v3, %v6815_v13  ;;  %v6720_v40 = vsub.f32 %v15630_v47, %v15970_v16 }
 0x9a1   : > { %17449 = vst [vmem:[#allocation22_spill] sm:$0xff] %v16024_v54  ;;  %v6755_v32 = vadd.f32 1e-05, %v6691_v44  ;;  %11187 = vmatprep.mubr.msk.f32.mxu0 %vm564_vm0, %v16024_v54  ;;  %11243 = vmatprep.mubr.msk.f32.mxu1 %vm564_vm0, %v16024_v54  ;;  %v6851_v15 = vmul.f32 %v15692_v3, %v6814_v61  ;;  %v6629_v9 = vmul.f32 %v16022_v8, %v16022_v8 }
 0x9a2   : > { %v6754_v41 = vadd.f32 1e-05, %v6690_v31  ;;  %v6565_v23 = vpop.xlane.xlu1 %6564  ;;  %11188 = vmatmul.mubr.msk.f32.gmra.mrb[22].mxu0 %vm564_vm0, %v16028_v43  ;;  %11244 = vmatmul.mubr.msk.f32.gmra.mrb[182].mxu1 %vm564_vm0, %v16028_v43  ;;  %v6889_v6 = vadd.f32 %v15698_v51, %v6852_v26  ;;  %v6628_v53 = vmul.f32 %v16026_v49, %v16026_v49 }
 0x9a3   : > { %12090 = vrsqrt.f32 %v6755_v32  ;;  %v6597_v55 = vmul.f32 0.03125, %v6565_v23  ;;  %v6562_v35 = vpop.xlane.xlu0 %6561  ;;  %v6888_v63 = vadd.f32 %v15698_v51, %v6851_v15  ;;  %v6723_v15 = vsub.f32 %v15643_v36, %v15994_v50 }
 0x9a4   : > { %12092 = vrsqrt.f32 %v6754_v41  ;;  %v6596_v46 = vmul.f32 0.03125, %v6562_v35  ;;  %v6921_v29 = vmul.f32 0.2, %v6889_v6  ;;  %v6722_v23 = vsub.f32 %v15646_v17, %v15998_v62 }
 0x9a5   : > { %v12087_v21 = vpop.eup %12086  ;;  %v6661_v33 = vsub.f32 %v6597_v55, %v6629_v9  ;;  %v6920_v0 = vmul.f32 0.2, %v6888_v63  ;;  %v6725_v62 = vsub.f32 %v15659_v14, %v16022_v8 }
 0x9a6   : > { %v12089_v4 = vpop.eup %12088  ;;  %v6660_v2 = vsub.f32 %v6596_v46, %v6628_v53  ;;  %v6817_v24 = vmul.f32 %v12087_v21, %v6721_v7  ;;  %v16052_v60 = vmax.f32 %v6889_v6, %v6921_v29 }
 0x9a7   : > { %v6693_v42 = vmax.f32 %v6661_v33, 0.0  ;;  %v16050_v34 = vmax.f32 %v6888_v63, %v6920_v0  ;;  %v6816_v13 = vmul.f32 %v12089_v4, %v6720_v40  ;;  %v6724_v40 = vsub.f32 %v15662_v59, %v16026_v49 }
 0x9a8   : > { %v6692_v44 = vmax.f32 %v6660_v2, 0.0  ;;  %17452 = vst [vmem:[#allocation25_spill] sm:$0xff] %v16052_v60  ;;  %v6854_v61 = vmul.f32 %v15692_v3, %v6817_v24 }
 0x9a9   : > { %17451 = vst [vmem:[#allocation24_spill] sm:$0xff] %v16050_v34  ;;  %v6757_v31 = vadd.f32 1e-05, %v6693_v42  ;;  %11190 = vmatprep.mubr.msk.f32.mxu0 %vm564_vm0, %v16050_v34  ;;  %11246 = vmatprep.mubr.msk.f32.mxu1 %vm564_vm0, %v16050_v34  ;;  %v6853_v47 = vmul.f32 %v15692_v3, %v6816_v13  ;;  %v12292_v42 = vld [vmem:[%s13364_s27 + $0x2] ss:$0 sm:$0xff] }
 0x9aa   : > { %v6756_v16 = vadd.f32 1e-05, %v6692_v44  ;;  %11191 = vmatmul.mubr.msk.f32.gmra.mrb[24].mxu0 %vm564_vm0, %v16052_v60  ;;  %11247 = vmatmul.mubr.msk.f32.gmra.mrb[184].mxu1 %vm564_vm0, %v16052_v60  ;;  %v6891_v26 = vadd.f32 %v15698_v51, %v6854_v61 }
 0x9ab   : > { %12094 = vrsqrt.f32 %v6757_v31  ;;  %v6890_v32 = vadd.f32 %v15698_v51, %v6853_v47  ;;  %v10185_v47 = vld [vmem:[%s17390_s4 + $0x68] sm:$0xff] }
 0x9ac   : > { %12096 = vrsqrt.f32 %v6756_v16  ;;  %v6923_v7 = vmul.f32 0.2, %v6891_v26 }
 0x9ad   : > { %v12091_v41 = vpop.eup %12090  ;;  %v6922_v6 = vmul.f32 0.2, %v6890_v32 }
 0x9ae   : > { %v12093_v9 = vpop.eup %12092  ;;  %v6819_v55 = vmul.f32 %v12091_v41, %v6723_v15  ;;  %v16072_v53 = vmax.f32 %v6891_v26, %v6923_v7  ;;  %v16126_v26 = vld [vmem:[%s17389_s3 + $0x3] ss:$0 sm:$0xff] }
 0x9af   : > { %v16070_v35 = vmax.f32 %v6890_v32, %v6922_v6  ;;  %v6818_v63 = vmul.f32 %v12093_v9, %v6722_v23 }
 0x9b0   : > { %17454 = vst [vmem:[#allocation27_spill] sm:$0xff] %v16072_v53  ;;  %v6856_v46 = vmul.f32 %v15692_v3, %v6819_v55 }
 0x9b1   : > { %17453 = vst [vmem:[#allocation26_spill] sm:$0xff] %v16070_v35  ;;  %11193 = vmatprep.mubr.msk.f32.mxu0 %vm564_vm0, %v16070_v35  ;;  %11249 = vmatprep.mubr.msk.f32.mxu1 %vm564_vm0, %v16070_v35  ;;  %v6855_v36 = vmul.f32 %v15692_v3, %v6818_v63 }
 0x9b2   : > { %11194 = vmatmul.mubr.msk.f32.gmra.mrb[26].mxu0 %vm564_vm0, %v16072_v53  ;;  %11250 = vmatmul.mubr.msk.f32.gmra.mrb[186].mxu1 %vm564_vm0, %v16072_v53  ;;  %v6893_v17 = vadd.f32 %v15698_v51, %v6856_v46 }
 0x9b3   : > { %v6892_v50 = vadd.f32 %v15698_v51, %v6855_v36 }
 0x9b4   : > { %v6925_v29 = vmul.f32 0.2, %v6893_v17 }
 0x9b5   : > { %v12095_v21 = vpop.eup %12094  ;;  %v6924_v33 = vmul.f32 0.2, %v6892_v50 }
 0x9b6   : > { %v12097_v3 = vpop.eup %12096  ;;  %v6821_v0 = vmul.f32 %v12095_v21, %v6725_v62  ;;  %v16092_v24 = vmax.f32 %v6893_v17, %v6925_v29 }
 0x9b7   : > { %v16090_v4 = vmax.f32 %v6892_v50, %v6924_v33  ;;  %v6820_v2 = vmul.f32 %v12097_v3, %v6724_v40 }
 0x9b8   : > { %17456 = vst [vmem:[#allocation29_spill] sm:$0xff] %v16092_v24  ;;  %v6858_v13 = vmul.f32 %v12292_v42, %v6821_v0 }
 0x9b9   : > { %17455 = vst [vmem:[#allocation28_spill] sm:$0xff] %v16090_v4  ;;  %11196 = vmatprep.mubr.msk.f32.mxu0 %vm564_vm0, %v16090_v4  ;;  %11252 = vmatprep.mubr.msk.f32.mxu1 %vm564_vm0, %v16090_v4  ;;  %v6857_v14 = vmul.f32 %v12292_v42, %v6820_v2 }
 0x9ba   : > { %11197 = vmatmul.mubr.msk.f32.gmra.mrb[28].mxu0 %vm564_vm0, %v16092_v24  ;;  %11253 = vmatmul.mubr.msk.f32.gmra.mrb[188].mxu1 %vm564_vm0, %v16092_v24  ;;  %v6895_v59 = vadd.f32 %v15698_v51, %v6858_v13 }
 0x9bb   : > { %v6894_v8 = vadd.f32 %v15698_v51, %v6857_v14  ;;  %v10184_v51 = vld [vmem:[%s17390_s4 + $0x60] sm:$0xff] }
 0x9bc   : > { %v6927_v49 = vmul.f32 0.2, %v6895_v59  ;;  %v11450_v16 = vpack.c.bf16 %v10185_v47, %v10184_v51  ;;  %v10186_v51 = vld [vmem:[%s17390_s4 + $0x70] sm:$0xff]  ;;  %v10187_v47 = vld [vmem:[%s17390_s4 + $0x78] sm:$0xff] }
 0x9bd   : > { %v6926_v44 = vmul.f32 0.2, %v6894_v8 }
 0x9be   : > { %v16107_v31 = vmax.f32 %v6895_v59, %v6927_v49  ;;  %11451 = vmatprep.subr.bf16.mxu0 %v11450_v16 }
 0x9bf   : > { %v16105_v61 = vmax.f32 %v6894_v8, %v6926_v44  ;;  %11453 = vmatpush3.bf16.msra.mxu0 %v11450_v16  ;;  %v11454_v16 = vpack.c.bf16 %v10187_v47, %v10186_v51 }
 0x9c0   : > { %17458 = vst [vmem:[#allocation31_spill] sm:$0xff] %v16107_v31 }
 0x9c1   : > { %17457 = vst [vmem:[#allocation30_spill] sm:$0xff] %v16105_v61  ;;  %11199 = vmatprep.mubr.msk.f32.mxu0 %vm564_vm0, %v16105_v61  ;;  %11255 = vmatprep.mubr.msk.f32.mxu1 %vm564_vm0, %v16105_v61 }
 0x9c2   : > { %11200 = vmatmul.mubr.msk.f32.gmra.mrb[30].mxu0 %vm564_vm0, %v16107_v31  ;;  %11256 = vmatmul.mubr.msk.f32.gmra.mrb[190].mxu1 %vm564_vm0, %v16107_v31 }
 0x9c3   : > { %11455 = vmatprep.subr.bf16.mxu0 %v11454_v16 }
 0x9c4   : > { %11457 = vmatpush3.bf16.msra.mxu0 %v11454_v16 }
 0xa1d   : > { %v11212_v32 = vpop.f32.mrb[160].mxu1 }
 0xa1e   : > { %v16129_v15 = vadd.f32 %v11212_v32, %v16126_v26  ;;  %v7405_v7 = vpop.f32.mrb[161].mxu1 }
 0xa1f   : > { %v16132_v41 = vadd.f32 %v16126_v26, %v7405_v7 }
 0xa20   : > { %v7567_v23 = vsel %vm564_vm0, %v16129_v15, 0.0  ;;  %v7693_v6 = vmul.f32 %v16129_v15, %v16129_v15 }
 0xa21   : > { %7568 = vadd.xlane.f32.xlu1 %v7567_v23  ;;  %v7564_v9 = vsel %vm564_vm0, %v16132_v41, 0.0  ;;  %v7692_v55 = vmul.f32 %v16132_v41, %v16132_v41 }
 0xa22   : > { %7565 = vadd.xlane.f32.xlu0 %v7564_v9  ;;  %v7727_v63 = vsel %vm564_vm0, %v7693_v6, 0.0 }
 0xa23   : > { %v7724_v36 = vsel %vm564_vm0, %v7692_v55, 0.0 }
 0xa25   : > { %7728 = vadd.xlane.f32.xlu1 %v7727_v63  ;;  %v11215_v46 = vpop.f32.mrb[162].mxu1 }
 0xa26   : > { %v16145_v17 = vadd.f32 %v11215_v46, %v16126_v26  ;;  %7725 = vadd.xlane.f32.xlu0 %v7724_v36  ;;  %v7415_v50 = vpop.f32.mrb[163].mxu1 }
 0xa27   : > { %v16148_v62 = vadd.f32 %v16126_v26, %v7415_v50 }
 0xa28   : > { %v7573_v29 = vsel %vm564_vm0, %v16145_v17, 0.0  ;;  %v7695_v21 = vmul.f32 %v16145_v17, %v16145_v17 }
 0xa29   : > { %7574 = vadd.xlane.f32.xlu1 %v7573_v29  ;;  %v7570_v40 = vsel %vm564_vm0, %v16148_v62, 0.0  ;;  %v7694_v33 = vmul.f32 %v16148_v62, %v16148_v62 }
 0xa2a   : > { %7571 = vadd.xlane.f32.xlu0 %v7570_v40  ;;  %v7733_v3 = vsel %vm564_vm0, %v7695_v21, 0.0 }
 0xa2b   : > { %v7730_v2 = vsel %vm564_vm0, %v7694_v33, 0.0 }
 0xa2d   : > { %7734 = vadd.xlane.f32.xlu1 %v7733_v3  ;;  %v11218_v0 = vpop.f32.mrb[164].mxu1 }
 0xa2e   : > { %v16161_v42 = vadd.f32 %v11218_v0, %v16126_v26  ;;  %7731 = vadd.xlane.f32.xlu0 %v7730_v2  ;;  %v7425_v13 = vpop.f32.mrb[165].mxu1 }
 0xa2f   : > { %v16164_v14 = vadd.f32 %v16126_v26, %v7425_v13 }
 0xa30   : > { %v7579_v59 = vsel %vm564_vm0, %v16161_v42, 0.0  ;;  %v7697_v8 = vmul.f32 %v16161_v42, %v16161_v42 }
 0xa31   : > { %7580 = vadd.xlane.f32.xlu1 %v7579_v59  ;;  %v7576_v49 = vsel %vm564_vm0, %v16164_v14, 0.0  ;;  %v7696_v44 = vmul.f32 %v16164_v14, %v16164_v14 }
 0xa32   : > { %7577 = vadd.xlane.f32.xlu0 %v7576_v49  ;;  %v7739_v32 = vsel %vm564_vm0, %v7697_v8, 0.0 }
 0xa33   : > { %v7736_v23 = vsel %vm564_vm0, %v7696_v44, 0.0 }
 0xa35   : > { %7740 = vadd.xlane.f32.xlu1 %v7739_v32  ;;  %v11221_v7 = vpop.f32.mrb[166].mxu1 }
 0xa36   : > { %v16183_v6 = vadd.f32 %v11221_v7, %v16126_v26  ;;  %7737 = vadd.xlane.f32.xlu0 %v7736_v23  ;;  %v7435_v9 = vpop.f32.mrb[167].mxu1 }
 0xa37   : > { %v16186_v55 = vadd.f32 %v16126_v26, %v7435_v9 }
 0xa38   : > { %v7585_v63 = vsel %vm564_vm0, %v16183_v6, 0.0  ;;  %v7699_v46 = vmul.f32 %v16183_v6, %v16183_v6 }
 0xa39   : > { %7586 = vadd.xlane.f32.xlu1 %v7585_v63  ;;  %v7582_v36 = vsel %vm564_vm0, %v16186_v55, 0.0  ;;  %v7698_v50 = vmul.f32 %v16186_v55, %v16186_v55 }
 0xa3a   : > { %7583 = vadd.xlane.f32.xlu0 %v7582_v36  ;;  %v7745_v29 = vsel %vm564_vm0, %v7699_v46, 0.0 }
 0xa3b   : > { %v7742_v40 = vsel %vm564_vm0, %v7698_v50, 0.0 }
 0xa3d   : > { %7746 = vadd.xlane.f32.xlu1 %v7745_v29  ;;  %v11224_v21 = vpop.f32.mrb[168].mxu1 }
 0xa3e   : > { %v16199_v33 = vadd.f32 %v11224_v21, %v16126_v26  ;;  %7743 = vadd.xlane.f32.xlu0 %v7742_v40  ;;  %v7445_v3 = vpop.f32.mrb[169].mxu1 }
 0xa3f   : > { %v16202_v0 = vadd.f32 %v16126_v26, %v7445_v3 }
 0xa40   : > { %v7591_v2 = vsel %vm564_vm0, %v16199_v33, 0.0  ;;  %v7701_v13 = vmul.f32 %v16199_v33, %v16199_v33 }
 0xa41   : > { %7592 = vadd.xlane.f32.xlu1 %v7591_v2  ;;  %v7588_v59 = vsel %vm564_vm0, %v16202_v0, 0.0  ;;  %v7700_v8 = vmul.f32 %v16202_v0, %v16202_v0 }
 0xa42   : > { %7589 = vadd.xlane.f32.xlu0 %v7588_v59  ;;  %v7751_v49 = vsel %vm564_vm0, %v7701_v13, 0.0 }
 0xa43   : > { %v7748_v51 = vsel %vm564_vm0, %v7700_v8, 0.0 }
 0xa45   : > { %7752 = vadd.xlane.f32.xlu1 %v7751_v49  ;;  %v11227_v44 = vpop.f32.mrb[170].mxu1 }
 0xa46   : > { %v16215_v47 = vadd.f32 %v11227_v44, %v16126_v26  ;;  %7749 = vadd.xlane.f32.xlu0 %v7748_v51  ;;  %v7455_v16 = vpop.f32.mrb[171].mxu1 }
 0xa47   : > { %v16218_v32 = vadd.f32 %v16126_v26, %v7455_v16 }
 0xa48   : > { %v7597_v7 = vsel %vm564_vm0, %v16215_v47, 0.0  ;;  %v7703_v23 = vmul.f32 %v16215_v47, %v16215_v47 }
 0xa49   : > { %7598 = vadd.xlane.f32.xlu1 %v7597_v7  ;;  %v7594_v9 = vsel %vm564_vm0, %v16218_v32, 0.0  ;;  %v7702_v63 = vmul.f32 %v16218_v32, %v16218_v32 }
 0xa4a   : > { %7595 = vadd.xlane.f32.xlu0 %v7594_v9  ;;  %v7757_v46 = vsel %vm564_vm0, %v7703_v23, 0.0 }
 0xa4b   : > { %v7754_v50 = vsel %vm564_vm0, %v7702_v63, 0.0 }
 0xa4d   : > { %7758 = vadd.xlane.f32.xlu1 %v7757_v46  ;;  %v11230_v36 = vpop.f32.mrb[172].mxu1 }
 0xa4e   : > { %v16231_v29 = vadd.f32 %v11230_v36, %v16126_v26  ;;  %7755 = vadd.xlane.f32.xlu0 %v7754_v50  ;;  %v7465_v21 = vpop.f32.mrb[173].mxu1 }
 0xa4f   : > { %v16234_v40 = vadd.f32 %v16126_v26, %v7465_v21 }
 0xa50   : > { %v7603_v3 = vsel %vm564_vm0, %v16231_v29, 0.0  ;;  %v7705_v2 = vmul.f32 %v16231_v29, %v16231_v29 }
 0xa51   : > { %7604 = vadd.xlane.f32.xlu1 %v7603_v3  ;;  %v7600_v13 = vsel %vm564_vm0, %v16234_v40, 0.0  ;;  %v7704_v59 = vmul.f32 %v16234_v40, %v16234_v40 }
 0xa52   : > { %7601 = vadd.xlane.f32.xlu0 %v7600_v13  ;;  %v7763_v8 = vsel %vm564_vm0, %v7705_v2, 0.0 }
 0xa53   : > { %v7760_v44 = vsel %vm564_vm0, %v7704_v59, 0.0 }
 0xa55   : > { %7764 = vadd.xlane.f32.xlu1 %v7763_v8  ;;  %v11233_v49 = vpop.f32.mrb[174].mxu1 }
 0xa56   : > { %v16247_v51 = vadd.f32 %v11233_v49, %v16126_v26  ;;  %7761 = vadd.xlane.f32.xlu0 %v7760_v44  ;;  %v7475_v16 = vpop.f32.mrb[175].mxu1 }
 0xa57   : > { %v16250_v7 = vadd.f32 %v16126_v26, %v7475_v16 }
 0xa58   : > { %v7609_v23 = vsel %vm564_vm0, %v16247_v51, 0.0  ;;  %v7707_v9 = vmul.f32 %v16247_v51, %v16247_v51 }
 0xa59   : > { %7610 = vadd.xlane.f32.xlu1 %v7609_v23  ;;  %v7606_v63 = vsel %vm564_vm0, %v16250_v7, 0.0  ;;  %v7706_v46 = vmul.f32 %v16250_v7, %v16250_v7 }
 0xa5a   : > { %7607 = vadd.xlane.f32.xlu0 %v7606_v63  ;;  %v7769_v36 = vsel %vm564_vm0, %v7707_v9, 0.0 }
 0xa5b   : > { %v7766_v21 = vsel %vm564_vm0, %v7706_v46, 0.0 }
 0xa5d   : > { %7770 = vadd.xlane.f32.xlu1 %v7769_v36  ;;  %v11236_v50 = vpop.f32.mrb[176].mxu1 }
 0xa5e   : > { %v16263_v3 = vadd.f32 %v11236_v50, %v16126_v26  ;;  %7767 = vadd.xlane.f32.xlu0 %v7766_v21  ;;  %v7485_v2 = vpop.f32.mrb[177].mxu1 }
 0xa5f   : > { %v16266_v13 = vadd.f32 %v16126_v26, %v7485_v2 }
 0xa60   : > { %v7615_v59 = vsel %vm564_vm0, %v16263_v3, 0.0  ;;  %v7709_v8 = vmul.f32 %v16263_v3, %v16263_v3 }
 0xa61   : > { %7616 = vadd.xlane.f32.xlu1 %v7615_v59  ;;  %v7612_v49 = vsel %vm564_vm0, %v16266_v13, 0.0  ;;  %v7708_v44 = vmul.f32 %v16266_v13, %v16266_v13 }
 0xa62   : > { %7613 = vadd.xlane.f32.xlu0 %v7612_v49  ;;  %v7775_v16 = vsel %vm564_vm0, %v7709_v8, 0.0 }
 0xa63   : > { %v7772_v9 = vsel %vm564_vm0, %v7708_v44, 0.0 }
 0xa65   : > { %7776 = vadd.xlane.f32.xlu1 %v7775_v16  ;;  %v11239_v23 = vpop.f32.mrb[178].mxu1 }
 0xa66   : > { %v16279_v63 = vadd.f32 %v11239_v23, %v16126_v26  ;;  %7773 = vadd.xlane.f32.xlu0 %v7772_v9  ;;  %v7495_v46 = vpop.f32.mrb[179].mxu1 }
 0xa67   : > { %v16282_v36 = vadd.f32 %v16126_v26, %v7495_v46 }
 0xa68   : > { %v7621_v50 = vsel %vm564_vm0, %v16279_v63, 0.0  ;;  %v7711_v21 = vmul.f32 %v16279_v63, %v16279_v63 }
 0xa69   : > { %7622 = vadd.xlane.f32.xlu1 %v7621_v50  ;;  %v7618_v2 = vsel %vm564_vm0, %v16282_v36, 0.0  ;;  %v7710_v59 = vmul.f32 %v16282_v36, %v16282_v36 }
 0xa6a   : > { %7619 = vadd.xlane.f32.xlu0 %v7618_v2  ;;  %v7781_v8 = vsel %vm564_vm0, %v7711_v21, 0.0 }
 0xa6b   : > { %v7778_v44 = vsel %vm564_vm0, %v7710_v59, 0.0 }
 0xa6d   : > { %7782 = vadd.xlane.f32.xlu1 %v7781_v8  ;;  %v11242_v49 = vpop.f32.mrb[180].mxu1 }
 0xa6e   : > { %v16295_v16 = vadd.f32 %v11242_v49, %v16126_v26  ;;  %7779 = vadd.xlane.f32.xlu0 %v7778_v44  ;;  %v7505_v23 = vpop.f32.mrb[181].mxu1 }
 0xa6f   : > { %v16298_v9 = vadd.f32 %v16126_v26, %v7505_v23 }
 0xa70   : > { %v7627_v46 = vsel %vm564_vm0, %v16295_v16, 0.0  ;;  %v7713_v50 = vmul.f32 %v16295_v16, %v16295_v16 }
 0xa71   : > { %7628 = vadd.xlane.f32.xlu1 %v7627_v46  ;;  %v7624_v21 = vsel %vm564_vm0, %v16298_v9, 0.0  ;;  %v7712_v2 = vmul.f32 %v16298_v9, %v16298_v9 }
 0xa72   : > { %7625 = vadd.xlane.f32.xlu0 %v7624_v21  ;;  %v7787_v59 = vsel %vm564_vm0, %v7713_v50, 0.0 }
 0xa73   : > { %v7784_v49 = vsel %vm564_vm0, %v7712_v2, 0.0 }
 0xa75   : > { %7788 = vadd.xlane.f32.xlu1 %v7787_v59  ;;  %v11245_v8 = vpop.f32.mrb[182].mxu1 }
 0xa76   : > { %v16311_v44 = vadd.f32 %v11245_v8, %v16126_v26  ;;  %7785 = vadd.xlane.f32.xlu0 %v7784_v49  ;;  %v7515_v23 = vpop.f32.mrb[183].mxu1 }
 0xa77   : > { %v16314_v46 = vadd.f32 %v16126_v26, %v7515_v23 }
 0xa78   : > { %v7633_v31 = vsel %vm564_vm0, %v16311_v44, 0.0  ;;  %v7715_v21 = vmul.f32 %v16311_v44, %v16311_v44 }
 0xa79   : > { %7634 = vadd.xlane.f32.xlu1 %v7633_v31  ;;  %v7630_v50 = vsel %vm564_vm0, %v16314_v46, 0.0  ;;  %v7714_v2 = vmul.f32 %v16314_v46, %v16314_v46 }
 0xa7a   : > { %7631 = vadd.xlane.f32.xlu0 %v7630_v50  ;;  %v7793_v59 = vsel %vm564_vm0, %v7715_v21, 0.0 }
 0xa7b   : > { %v7790_v49 = vsel %vm564_vm0, %v7714_v2, 0.0 }
 0xa7d   : > { %7794 = vadd.xlane.f32.xlu1 %v7793_v59  ;;  %v11248_v8 = vpop.f32.mrb[184].mxu1 }
 0xa7e   : > { %v16327_v23 = vadd.f32 %v11248_v8, %v16126_v26  ;;  %7791 = vadd.xlane.f32.xlu0 %v7790_v49  ;;  %v7525_v61 = vpop.f32.mrb[185].mxu1 }
 0xa7f   : > { %v16330_v31 = vadd.f32 %v16126_v26, %v7525_v61 }
 0xa80   : > { %v7639_v24 = vsel %vm564_vm0, %v16327_v23, 0.0  ;;  %v7717_v50 = vmul.f32 %v16327_v23, %v16327_v23 }
 0xa81   : > { %7640 = vadd.xlane.f32.xlu1 %v7639_v24  ;;  %v7636_v21 = vsel %vm564_vm0, %v16330_v31, 0.0  ;;  %v7716_v2 = vmul.f32 %v16330_v31, %v16330_v31 }
 0xa82   : > { %7637 = vadd.xlane.f32.xlu0 %v7636_v21  ;;  %v7799_v59 = vsel %vm564_vm0, %v7717_v50, 0.0 }
 0xa83   : > { %v7796_v61 = vsel %vm564_vm0, %v7716_v2, 0.0 }
 0xa85   : > { %7800 = vadd.xlane.f32.xlu1 %v7799_v59  ;;  %v11251_v8 = vpop.f32.mrb[186].mxu1 }
 0xa86   : > { %v16343_v49 = vadd.f32 %v11251_v8, %v16126_v26  ;;  %7797 = vadd.xlane.f32.xlu0 %v7796_v61  ;;  %v7535_v4 = vpop.f32.mrb[187].mxu1 }
 0xa87   : > { %v16346_v24 = vadd.f32 %v16126_v26, %v7535_v4 }
 0xa88   : > { %v7645_v53 = vsel %vm564_vm0, %v16343_v49, 0.0  ;;  %v7719_v21 = vmul.f32 %v16343_v49, %v16343_v49 }
 0xa89   : > { %7646 = vadd.xlane.f32.xlu1 %v7645_v53  ;;  %v7642_v50 = vsel %vm564_vm0, %v16346_v24, 0.0  ;;  %v7718_v2 = vmul.f32 %v16346_v24, %v16346_v24 }
 0xa8a   : > { %7643 = vadd.xlane.f32.xlu0 %v7642_v50  ;;  %v7805_v59 = vsel %vm564_vm0, %v7719_v21, 0.0 }
 0xa8b   : > { %v7802_v4 = vsel %vm564_vm0, %v7718_v2, 0.0 }
 0xa8d   : > { %7806 = vadd.xlane.f32.xlu1 %v7805_v59  ;;  %v11254_v8 = vpop.f32.mrb[188].mxu1 }
 0xa8e   : > { %v16359_v61 = vadd.f32 %v11254_v8, %v16126_v26  ;;  %7803 = vadd.xlane.f32.xlu0 %v7802_v4  ;;  %v7545_v35 = vpop.f32.mrb[189].mxu1 }
 0xa8f   : > { %v16362_v53 = vadd.f32 %v16126_v26, %v7545_v35 }
 0xa90   : > { %v7651_v60 = vsel %vm564_vm0, %v16359_v61, 0.0  ;;  %v7721_v50 = vmul.f32 %v16359_v61, %v16359_v61 }
 0xa91   : > { %7652 = vadd.xlane.f32.xlu1 %v7651_v60  ;;  %v7648_v21 = vsel %vm564_vm0, %v16362_v53, 0.0  ;;  %v7720_v2 = vmul.f32 %v16362_v53, %v16362_v53 }
 0xa92   : > { %7649 = vadd.xlane.f32.xlu0 %v7648_v21  ;;  %v7811_v59 = vsel %vm564_vm0, %v7721_v50, 0.0 }
 0xa93   : > { %v7808_v35 = vsel %vm564_vm0, %v7720_v2, 0.0 }
 0xa95   : > { %7812 = vadd.xlane.f32.xlu1 %v7811_v59  ;;  %v11257_v8 = vpop.f32.mrb[190].mxu1 }
 0xa96   : > { %v16375_v4 = vadd.f32 %v11257_v8, %v16126_v26  ;;  %7809 = vadd.xlane.f32.xlu0 %v7808_v35  ;;  %v7555_v34 = vpop.f32.mrb[191].mxu1 }
 0xa97   : > { %v16378_v60 = vadd.f32 %v16126_v26, %v7555_v34 }
 0xa98   : > { %v7657_v43 = vsel %vm564_vm0, %v16375_v4, 0.0  ;;  %v7723_v21 = vmul.f32 %v16375_v4, %v16375_v4 }
 0xa99   : > { %7658 = vadd.xlane.f32.xlu1 %v7657_v43  ;;  %v7654_v50 = vsel %vm564_vm0, %v16378_v60, 0.0  ;;  %v7722_v2 = vmul.f32 %v16378_v60, %v16378_v60 }
 0xa9a   : > { %7655 = vadd.xlane.f32.xlu0 %v7654_v50  ;;  %v7817_v59 = vsel %vm564_vm0, %v7723_v21, 0.0 }
 0xa9b   : > { %v7814_v34 = vsel %vm564_vm0, %v7722_v2, 0.0 }
 0xa9d   : > { %7818 = vadd.xlane.f32.xlu1 %v7817_v59 }
 0xa9e   : > { %7815 = vadd.xlane.f32.xlu0 %v7814_v34 }
 0xaae   : > { %v7569_v26 = vpop.xlane.xlu1 %7568 }
 0xaaf   : > { %v7661_v8 = vmul.f32 0.03125, %v7569_v26  ;;  %v7566_v35 = vpop.xlane.xlu0 %7565 }
 0xab0   : > { %v7660_v54 = vmul.f32 0.03125, %v7566_v35 }
 0xab1   : > { %v7853_v52 = vmul.f32 %v7661_v8, %v7661_v8 }
 0xab2   : > { %v7729_v1 = vpop.xlane.xlu1 %7728  ;;  %v7852_v37 = vmul.f32 %v7660_v54, %v7660_v54 }
 0xab3   : > { %v7821_v43 = vmul.f32 0.03125, %v7729_v1  ;;  %v7726_v45 = vpop.xlane.xlu0 %7725 }
 0xab4   : > { %v7820_v28 = vmul.f32 0.03125, %v7726_v45 }
 0xab5   : > { %v7885_v38 = vsub.f32 %v7821_v43, %v7853_v52 }
 0xab6   : > { %v7884_v56 = vsub.f32 %v7820_v28, %v7852_v37  ;;  %v7575_v48 = vpop.xlane.xlu1 %7574 }
 0xab7   : > { %v7917_v50 = vmax.f32 %v7885_v38, 0.0  ;;  %v16390_v10 = vmul.f32 0.03125, %v7575_v48  ;;  %v7572_v21 = vpop.xlane.xlu0 %7571 }
 0xab8   : > { %v7916_v59 = vmax.f32 %v7884_v56, 0.0  ;;  %v16392_v2 = vmul.f32 0.03125, %v7572_v21 }
 0xab9   : > { %v7981_v34 = vadd.f32 1e-05, %v7917_v50  ;;  %v7855_v1 = vmul.f32 %v16390_v10, %v16390_v10 }
 0xaba   : > { %v7980_v26 = vadd.f32 1e-05, %v7916_v59  ;;  %v7735_v39 = vpop.xlane.xlu1 %7734  ;;  %v7854_v28 = vmul.f32 %v16392_v2, %v16392_v2 }
 0xabb   : > { %12098 = vrsqrt.f32 %v7981_v34  ;;  %v7823_v35 = vmul.f32 0.03125, %v7735_v39  ;;  %v7732_v19 = vpop.xlane.xlu0 %7731 }
 0xabc   : > { %12100 = vrsqrt.f32 %v7980_v26  ;;  %v7822_v38 = vmul.f32 0.03125, %v7732_v19 }
 0xabd   : > { %v7887_v48 = vsub.f32 %v7823_v35, %v7855_v1  ;;  %v7949_v1 = vsub.f32 %v16129_v15, %v7661_v8 }
 0xabe   : > { %v7886_v37 = vsub.f32 %v7822_v38, %v7854_v28  ;;  %v7581_v45 = vpop.xlane.xlu1 %7580 }
 0xabf   : > { %v7919_v56 = vmax.f32 %v7887_v48, 0.0  ;;  %v16398_v52 = vmul.f32 0.03125, %v7581_v45  ;;  %v7578_v43 = vpop.xlane.xlu0 %7577  ;;  %v16408_v48 = vld [vmem:[%s12781_s19 + $0x3] ss:$0 sm:$0xff] }
 0xac0   : > { %v7918_v50 = vmax.f32 %v7886_v37, 0.0  ;;  %v16400_v21 = vmul.f32 0.03125, %v7578_v43  ;;  %v7948_v37 = vsub.f32 %v16132_v41, %v7660_v54 }
 0xac1   : > { %v7983_v59 = vadd.f32 1e-05, %v7919_v56  ;;  %v7857_v26 = vmul.f32 %v16398_v52, %v16398_v52 }
 0xac2   : > { %v7982_v34 = vadd.f32 1e-05, %v7918_v50  ;;  %v7741_v39 = vpop.xlane.xlu1 %7740  ;;  %v7856_v35 = vmul.f32 %v16400_v21, %v16400_v21 }
 0xac3   : > { %12102 = vrsqrt.f32 %v7983_v59  ;;  %v7825_v11 = vmul.f32 0.03125, %v7741_v39  ;;  %v7738_v19 = vpop.xlane.xlu0 %7737 }
 0xac4   : > { %12104 = vrsqrt.f32 %v7982_v34  ;;  %v7824_v28 = vmul.f32 0.03125, %v7738_v19  ;;  %v16414_v34 = vld [vmem:[%s12789_s26 + $0x3] ss:$0 sm:$0xff] }
 0xac5   : > { %v12099_v38 = vpop.eup %12098  ;;  %v7889_v45 = vsub.f32 %v7825_v11, %v7857_v26  ;;  %v7951_v11 = vsub.f32 %v16145_v17, %v16390_v10  ;;  %v7950_v10 = vsub.f32 %v16148_v62, %v16392_v2  ;;  %v7953_v2 = vsub.f32 %v16161_v42, %v16398_v52 }
 0xac6   : > { %v12101_v56 = vpop.eup %12100  ;;  %v8045_v43 = vmul.f32 %v12099_v38, %v7949_v1  ;;  %v7888_v50 = vsub.f32 %v7824_v28, %v7856_v35  ;;  %v7587_v59 = vpop.xlane.xlu1 %7586  ;;  %v7952_v52 = vsub.f32 %v16164_v14, %v16400_v21 }
 0xac7   : > { %v7921_v39 = vmax.f32 %v7889_v45, 0.0  ;;  %v16411_v18 = vmul.f32 0.03125, %v7587_v59  ;;  %v7584_v15 = vpop.xlane.xlu0 %7583  ;;  %v8044_v8 = vmul.f32 %v12101_v56, %v7948_v37 }
 0xac8   : > { %v8082_v5 = vmul.f32 %v16408_v48, %v8045_v43  ;;  %v7920_v19 = vmax.f32 %v7888_v50, 0.0  ;;  %v16417_v30 = vmul.f32 0.03125, %v7584_v15 }
 0xac9   : > { %v7985_v12 = vadd.f32 1e-05, %v7921_v39  ;;  %v8081_v54 = vmul.f32 %v16408_v48, %v8044_v8  ;;  %v7859_v35 = vmul.f32 %v16411_v18, %v16411_v18  ;;  %v7955_v21 = vsub.f32 %v16183_v6, %v16411_v18 }
 0xaca   : > { %v7984_v41 = vadd.f32 1e-05, %v7920_v19  ;;  %v7747_v26 = vpop.xlane.xlu1 %7746  ;;  %v8119_v1 = vadd.f32 %v16414_v34, %v8082_v5  ;;  %v7858_v45 = vmul.f32 %v16417_v30, %v16417_v30 }
 0xacb   : > { %12106 = vrsqrt.f32 %v7985_v12  ;;  %v7827_v28 = vmul.f32 0.03125, %v7747_v26  ;;  %v7744_v38 = vpop.xlane.xlu0 %7743  ;;  %v8118_v37 = vadd.f32 %v16414_v34, %v8081_v54 }
 0xacc   : > { %12108 = vrsqrt.f32 %v7984_v41  ;;  %v7826_v56 = vmul.f32 0.03125, %v7744_v38  ;;  %v8151_v43 = vmul.f32 0.2, %v8119_v1 }
 0xacd   : > { %v12103_v50 = vpop.eup %12102  ;;  %v7891_v17 = vsub.f32 %v7827_v28, %v7859_v35  ;;  %v8150_v5 = vmul.f32 0.2, %v8118_v37 }
 0xace   : > { %v12105_v12 = vpop.eup %12104  ;;  %v7890_v59 = vsub.f32 %v7826_v56, %v7858_v45  ;;  %v7593_v39 = vpop.xlane.xlu1 %7592  ;;  %v8047_v15 = vmul.f32 %v12103_v50, %v7951_v11  ;;  %v8183_v38 = vmax.f32 %v8119_v1, %v8151_v43 }
 0xacf   : > { %v7923_v8 = vmax.f32 %v7891_v17, 0.0  ;;  %v16430_v19 = vmul.f32 0.03125, %v7593_v39  ;;  %v7590_v54 = vpop.xlane.xlu0 %7589  ;;  %v8182_v41 = vmax.f32 %v8118_v37, %v8150_v5  ;;  %v8046_v26 = vmul.f32 %v12105_v12, %v7950_v10 }
 0xad0   : > { %v7922_v20 = vmax.f32 %v7890_v59, 0.0  ;;  %v16432_v22 = vmul.f32 0.03125, %v7590_v54  ;;  %v8084_v25 = vmul.f32 %v16408_v48, %v8047_v15 }
 0xad1   : > { %v7987_v57 = vadd.f32 1e-05, %v7923_v8  ;;  %11266 = vmatprep.mubr.msk.f32.mxu0 %vm564_vm0, %v8182_v41  ;;  %v8083_v62 = vmul.f32 %v16408_v48, %v8046_v26  ;;  %v7861_v1 = vmul.f32 %v16430_v19, %v16430_v19 }
 0xad2   : > { %v7986_v11 = vadd.f32 1e-05, %v7922_v20  ;;  %v7753_v35 = vpop.xlane.xlu1 %7752  ;;  %11267 = vmatmul.mubr.msk.f32.vlgmr.msra.gmra.mrb[64].mxu0 %vm564_vm0, %v8183_v38  ;;  %v8121_v28 = vadd.f32 %v16414_v34, %v8084_v25  ;;  %v7860_v43 = vmul.f32 %v16432_v22, %v16432_v22 }
 0xad3   : > { %12110 = vrsqrt.f32 %v7987_v57  ;;  %v7829_v37 = vmul.f32 0.03125, %v7753_v35  ;;  %v7750_v45 = vpop.xlane.xlu0 %7749  ;;  %v8120_v56 = vadd.f32 %v16414_v34, %v8083_v62 }
 0xad4   : > { %12112 = vrsqrt.f32 %v7986_v11  ;;  %v7828_v50 = vmul.f32 0.03125, %v7750_v45  ;;  %v8153_v42 = vmul.f32 0.2, %v8121_v28 }
 0xad5   : > { %v12107_v20 = vpop.eup %12106  ;;  %v7893_v10 = vsub.f32 %v7829_v37, %v7861_v1  ;;  %v8152_v25 = vmul.f32 0.2, %v8120_v56 }
 0xad6   : > { %v12109_v57 = vpop.eup %12108  ;;  %v7892_v17 = vsub.f32 %v7828_v50, %v7860_v43  ;;  %v7599_v5 = vpop.xlane.xlu1 %7598  ;;  %v8049_v12 = vmul.f32 %v12107_v20, %v7953_v2  ;;  %v8185_v38 = vmax.f32 %v8121_v28, %v8153_v42  ;;  %v7954_v42 = vsub.f32 %v16186_v55, %v16417_v30 }
 0xad7   : > { %v7925_v59 = vmax.f32 %v7893_v10, 0.0  ;;  %v16448_v39 = vmul.f32 0.03125, %v7599_v5  ;;  %v7596_v15 = vpop.xlane.xlu0 %7595  ;;  %v8184_v8 = vmax.f32 %v8120_v56, %v8152_v25  ;;  %v8048_v54 = vmul.f32 %v12109_v57, %v7952_v52 }
 0xad8   : > { %v7924_v41 = vmax.f32 %v7892_v17, 0.0  ;;  %v16450_v26 = vmul.f32 0.03125, %v7596_v15  ;;  %v8086_v62 = vmul.f32 %v16408_v48, %v8049_v12  ;;  %v7957_v55 = vsub.f32 %v16199_v33, %v16430_v19 }
 0xad9   : > { %v7989_v11 = vadd.f32 1e-05, %v7925_v59  ;;  %11269 = vmatprep.mubr.msk.f32.mxu0 %vm564_vm0, %v8184_v8  ;;  %v8085_v14 = vmul.f32 %v16408_v48, %v8048_v54  ;;  %v7863_v28 = vmul.f32 %v16448_v39, %v16448_v39 }
 0xada   : > { %v7988_v2 = vadd.f32 1e-05, %v7924_v41  ;;  %v7759_v35 = vpop.xlane.xlu1 %7758  ;;  %11270 = vmatmul.mubr.msk.f32.gmra.mrb[66].mxu0 %vm564_vm0, %v8185_v38  ;;  %v8123_v1 = vadd.f32 %v16414_v34, %v8086_v62  ;;  %v7862_v43 = vmul.f32 %v16450_v26, %v16450_v26 }
 0xadb   : > { %12114 = vrsqrt.f32 %v7989_v11  ;;  %v7831_v37 = vmul.f32 0.03125, %v7759_v35  ;;  %v7756_v45 = vpop.xlane.xlu0 %7755  ;;  %v8122_v56 = vadd.f32 %v16414_v34, %v8085_v14 }
 0xadc   : > { %12116 = vrsqrt.f32 %v7988_v2  ;;  %v7830_v50 = vmul.f32 0.03125, %v7756_v45  ;;  %v8155_v18 = vmul.f32 0.2, %v8123_v1 }
 0xadd   : > { %v12111_v6 = vpop.eup %12110  ;;  %v7895_v20 = vsub.f32 %v7831_v37, %v7863_v28  ;;  %v8154_v52 = vmul.f32 0.2, %v8122_v56 }
 0xade   : > { %v12113_v10 = vpop.eup %12112  ;;  %v7894_v25 = vsub.f32 %v7830_v50, %v7862_v43  ;;  %v7605_v57 = vpop.xlane.xlu1 %7604  ;;  %v8051_v17 = vmul.f32 %v12111_v6, %v7955_v21  ;;  %v8187_v38 = vmax.f32 %v8123_v1, %v8155_v18  ;;  %v7956_v43 = vsub.f32 %v16202_v0, %v16432_v22 }
 0xadf   : > { %v7927_v5 = vmax.f32 %v7895_v20, 0.0  ;;  %v16466_v12 = vmul.f32 0.03125, %v7605_v57  ;;  %v7602_v59 = vpop.xlane.xlu0 %7601  ;;  %v8186_v15 = vmax.f32 %v8122_v56, %v8154_v52  ;;  %v8050_v8 = vmul.f32 %v12113_v10, %v7954_v42 }
 0xae0   : > { %v7926_v54 = vmax.f32 %v7894_v25, 0.0  ;;  %v16468_v41 = vmul.f32 0.03125, %v7602_v59  ;;  %v8088_v62 = vmul.f32 %v16408_v48, %v8051_v17  ;;  %v7959_v0 = vsub.f32 %v16215_v47, %v16448_v39 }
 0xae1   : > { %v7991_v11 = vadd.f32 1e-05, %v7927_v5  ;;  %11272 = vmatprep.mubr.msk.f32.mxu0 %vm564_vm0, %v8186_v15  ;;  %v8087_v30 = vmul.f32 %v16408_v48, %v8050_v8  ;;  %v7865_v35 = vmul.f32 %v16466_v12, %v16466_v12 }
 0xae2   : > { %v7990_v14 = vadd.f32 1e-05, %v7926_v54  ;;  %v7765_v21 = vpop.xlane.xlu1 %7764  ;;  %11273 = vmatmul.mubr.msk.f32.gmra.mrb[68].mxu0 %vm564_vm0, %v8187_v38  ;;  %v8125_v2 = vadd.f32 %v16414_v34, %v8088_v62  ;;  %v7864_v45 = vmul.f32 %v16468_v41, %v16468_v41 }
 0xae3   : > { %12118 = vrsqrt.f32 %v7991_v11  ;;  %v7833_v1 = vmul.f32 0.03125, %v7765_v21  ;;  %v7762_v28 = vpop.xlane.xlu0 %7761  ;;  %v8124_v37 = vadd.f32 %v16414_v34, %v8087_v30 }
 0xae4   : > { %12120 = vrsqrt.f32 %v7990_v14  ;;  %v7832_v56 = vmul.f32 0.03125, %v7762_v28  ;;  %v8157_v33 = vmul.f32 0.2, %v8125_v2  ;;  %v7958_v28 = vsub.f32 %v16218_v32, %v16450_v26 }
 0xae5   : > { %v12115_v19 = vpop.eup %12114  ;;  %v7897_v50 = vsub.f32 %v7833_v1, %v7865_v35  ;;  %v8156_v18 = vmul.f32 0.2, %v8124_v37  ;;  %v7961_v26 = vsub.f32 %v16231_v29, %v16466_v12 }
 0xae6   : > { %v12117_v6 = vpop.eup %12116  ;;  %v7896_v42 = vsub.f32 %v7832_v56, %v7864_v45  ;;  %v7611_v20 = vpop.xlane.xlu1 %7610  ;;  %v8053_v52 = vmul.f32 %v12115_v19, %v7957_v55  ;;  %v8189_v8 = vmax.f32 %v8125_v2, %v8157_v33 }
 0xae7   : > { %v7929_v10 = vmax.f32 %v7897_v50, 0.0  ;;  %v16484_v25 = vmul.f32 0.03125, %v7611_v20  ;;  %v7608_v57 = vpop.xlane.xlu0 %7607  ;;  %v8188_v17 = vmax.f32 %v8124_v37, %v8156_v18  ;;  %v8052_v5 = vmul.f32 %v12117_v6, %v7956_v43 }
 0xae8   : > { %v7928_v59 = vmax.f32 %v7896_v42, 0.0  ;;  %v16486_v15 = vmul.f32 0.03125, %v7608_v57  ;;  %v8090_v54 = vmul.f32 %v16408_v48, %v8053_v52 }
 0xae9   : > { %v7993_v38 = vadd.f32 1e-05, %v7929_v10  ;;  %11275 = vmatprep.mubr.msk.f32.mxu0 %vm564_vm0, %v8188_v17  ;;  %v8089_v22 = vmul.f32 %v16408_v48, %v8052_v5  ;;  %v7867_v55 = vmul.f32 %v16484_v25, %v16484_v25 }
 0xaea   : > { %v7992_v62 = vadd.f32 1e-05, %v7928_v59  ;;  %v7771_v11 = vpop.xlane.xlu1 %7770  ;;  %11276 = vmatmul.mubr.msk.f32.gmra.mrb[70].mxu0 %vm564_vm0, %v8189_v8  ;;  %v8127_v30 = vadd.f32 %v16414_v34, %v8090_v54  ;;  %v7866_v35 = vmul.f32 %v16486_v15, %v16486_v15 }
 0xaeb   : > { %12122 = vrsqrt.f32 %v7993_v38  ;;  %v7835_v14 = vmul.f32 0.03125, %v7771_v11  ;;  %v7768_v21 = vpop.xlane.xlu0 %7767  ;;  %v8126_v2 = vadd.f32 %v16414_v34, %v8089_v22 }
 0xaec   : > { %12124 = vrsqrt.f32 %v7992_v62  ;;  %v7834_v1 = vmul.f32 0.03125, %v7768_v21  ;;  %v8159_v47 = vmul.f32 0.2, %v8127_v30 }
 0xaed   : > { %v12119_v39 = vpop.eup %12118  ;;  %v7899_v37 = vsub.f32 %v7835_v14, %v7867_v55  ;;  %v8158_v45 = vmul.f32 0.2, %v8126_v2  ;;  %v7960_v55 = vsub.f32 %v16234_v40, %v16468_v41  ;;  %v7963_v41 = vsub.f32 %v16247_v51, %v16484_v25 }
 0xaee   : > { %v12121_v56 = vpop.eup %12120  ;;  %v7898_v33 = vsub.f32 %v7834_v1, %v7866_v35  ;;  %v7617_v19 = vpop.xlane.xlu1 %7616  ;;  %v8055_v43 = vmul.f32 %v12119_v39, %v7959_v0  ;;  %v8191_v57 = vmax.f32 %v8127_v30, %v8159_v47 }
 0xaef   : > { %v7931_v50 = vmax.f32 %v7899_v37, 0.0  ;;  %v16502_v18 = vmul.f32 0.03125, %v7617_v19  ;;  %v7614_v6 = vpop.xlane.xlu0 %7613  ;;  %v8190_v42 = vmax.f32 %v8126_v2, %v8158_v45  ;;  %v8054_v20 = vmul.f32 %v12121_v56, %v7958_v28 }
 0xaf0   : > { %v7930_v52 = vmax.f32 %v7898_v33, 0.0  ;;  %v16504_v10 = vmul.f32 0.03125, %v7614_v6  ;;  %v8092_v17 = vmul.f32 %v16408_v48, %v8055_v43 }
 0xaf1   : > { %v7995_v5 = vadd.f32 1e-05, %v7931_v50  ;;  %11278 = vmatprep.mubr.msk.f32.mxu0 %vm564_vm0, %v8190_v42  ;;  %v8091_v32 = vmul.f32 %v16408_v48, %v8054_v20  ;;  %v7869_v38 = vmul.f32 %v16502_v18, %v16502_v18 }
 0xaf2   : > { %v7994_v59 = vadd.f32 1e-05, %v7930_v52  ;;  %v7777_v8 = vpop.xlane.xlu1 %7776  ;;  %11279 = vmatmul.mubr.msk.f32.gmra.mrb[72].mxu0 %vm564_vm0, %v8191_v57  ;;  %v8129_v54 = vadd.f32 %v16414_v34, %v8092_v17  ;;  %v7868_v11 = vmul.f32 %v16504_v10, %v16504_v10 }
 0xaf3   : > { %12126 = vrsqrt.f32 %v7995_v5  ;;  %v7837_v22 = vmul.f32 0.03125, %v7777_v8  ;;  %v7774_v0 = vpop.xlane.xlu0 %7773  ;;  %v8128_v62 = vadd.f32 %v16414_v34, %v8091_v32  ;;  %v7962_v8 = vsub.f32 %v16250_v7, %v16486_v15 }
 0xaf4   : > { %12128 = vrsqrt.f32 %v7994_v59  ;;  %v7836_v30 = vmul.f32 0.03125, %v7774_v0  ;;  %v8161_v29 = vmul.f32 0.2, %v8129_v54  ;;  %v7965_v15 = vsub.f32 %v16263_v3, %v16502_v18 }
 0xaf5   : > { %v12123_v12 = vpop.eup %12122  ;;  %v7901_v14 = vsub.f32 %v7837_v22, %v7869_v38  ;;  %v8160_v21 = vmul.f32 0.2, %v8128_v62 }
 0xaf6   : > { %v12125_v2 = vpop.eup %12124  ;;  %v7900_v35 = vsub.f32 %v7836_v30, %v7868_v11  ;;  %v7623_v1 = vpop.xlane.xlu1 %7622  ;;  %v8057_v47 = vmul.f32 %v12123_v12, %v7961_v26  ;;  %v8193_v43 = vmax.f32 %v8129_v54, %v8161_v29 }
 0xaf7   : > { %v7933_v39 = vmax.f32 %v7901_v14, 0.0  ;;  %v16520_v28 = vmul.f32 0.03125, %v7623_v1  ;;  %v7620_v37 = vpop.xlane.xlu0 %7619  ;;  %v8192_v45 = vmax.f32 %v8128_v62, %v8160_v21  ;;  %v8056_v56 = vmul.f32 %v12125_v2, %v7960_v55 }
 0xaf8   : > { %v7932_v33 = vmax.f32 %v7900_v35, 0.0  ;;  %v16522_v19 = vmul.f32 0.03125, %v7620_v37  ;;  %v8094_v50 = vmul.f32 %v16408_v48, %v8057_v47 }
 0xaf9   : > { %v7997_v6 = vadd.f32 1e-05, %v7933_v39  ;;  %11281 = vmatprep.mubr.msk.f32.mxu0 %vm564_vm0, %v8192_v45  ;;  %v8093_v40 = vmul.f32 %v16408_v48, %v8056_v56  ;;  %v7871_v57 = vmul.f32 %v16520_v28, %v16520_v28 }
 0xafa   : > { %v7996_v42 = vadd.f32 1e-05, %v7932_v33  ;;  %v7783_v20 = vpop.xlane.xlu1 %7782  ;;  %11282 = vmatmul.mubr.msk.f32.gmra.mrb[74].mxu0 %vm564_vm0, %v8193_v43  ;;  %v8131_v52 = vadd.f32 %v16414_v34, %v8094_v50  ;;  %v7870_v26 = vmul.f32 %v16522_v19, %v16522_v19 }
 0xafb   : > { %12130 = vrsqrt.f32 %v7997_v6  ;;  %v7839_v17 = vmul.f32 0.03125, %v7783_v20  ;;  %v7780_v5 = vpop.xlane.xlu0 %7779  ;;  %v8130_v32 = vadd.f32 %v16414_v34, %v8093_v40 }
 0xafc   : > { %12132 = vrsqrt.f32 %v7996_v42  ;;  %v7838_v59 = vmul.f32 0.03125, %v7780_v5  ;;  %v8163_v51 = vmul.f32 0.2, %v8131_v52 }
 0xafd   : > { %v12127_v25 = vpop.eup %12126  ;;  %v7903_v54 = vsub.f32 %v7839_v17, %v7871_v57  ;;  %v8162_v38 = vmul.f32 0.2, %v8130_v32 }
 0xafe   : > { %v12129_v22 = vpop.eup %12128  ;;  %v7902_v0 = vsub.f32 %v7838_v59, %v7870_v26  ;;  %v7629_v62 = vpop.xlane.xlu1 %7628  ;;  %v8059_v11 = vmul.f32 %v12127_v25, %v7963_v41  ;;  %v8195_v35 = vmax.f32 %v8131_v52, %v8163_v51  ;;  %v7964_v41 = vsub.f32 %v16266_v13, %v16504_v10 }
 0xaff   : > { %v7935_v30 = vmax.f32 %v7903_v54, 0.0  ;;  %v16538_v29 = vmul.f32 0.03125, %v7629_v62  ;;  %v7626_v12 = vpop.xlane.xlu0 %7625  ;;  %v8194_v55 = vmax.f32 %v8130_v32, %v8162_v38  ;;  %v8058_v14 = vmul.f32 %v12129_v22, %v7962_v8 }
 0xb00   : > { %v7934_v21 = vmax.f32 %v7902_v0, 0.0  ;;  %v16540_v2 = vmul.f32 0.03125, %v7626_v12  ;;  %v8096_v1 = vmul.f32 %v16408_v48, %v8059_v11  ;;  %v7967_v10 = vsub.f32 %v16279_v63, %v16520_v28 }
 0xb01   : > { %v7999_v47 = vadd.f32 1e-05, %v7935_v30  ;;  %11284 = vmatprep.mubr.msk.f32.mxu0 %vm564_vm0, %v8194_v55  ;;  %v8095_v7 = vmul.f32 %v16408_v48, %v8058_v14  ;;  %v7873_v56 = vmul.f32 %v16538_v29, %v16538_v29 }
 0xb02   : > { %v7998_v39 = vadd.f32 1e-05, %v7934_v21  ;;  %v7789_v37 = vpop.xlane.xlu1 %7788  ;;  %11285 = vmatmul.mubr.msk.f32.gmra.mrb[76].mxu0 %vm564_vm0, %v8195_v35  ;;  %v8133_v45 = vadd.f32 %v16414_v34, %v8096_v1  ;;  %v7872_v6 = vmul.f32 %v16540_v2, %v16540_v2 }
 0xb03   : > { %12134 = vrsqrt.f32 %v7999_v47  ;;  %v7841_v33 = vmul.f32 0.03125, %v7789_v37  ;;  %v7786_v43 = vpop.xlane.xlu0 %7785  ;;  %v8132_v50 = vadd.f32 %v16414_v34, %v8095_v7  ;;  %v7966_v47 = vsub.f32 %v16282_v36, %v16522_v19 }
 0xb04   : > { %12136 = vrsqrt.f32 %v7998_v39  ;;  %v7840_v40 = vmul.f32 0.03125, %v7786_v43  ;;  %v8165_v3 = vmul.f32 0.2, %v8133_v45  ;;  %v7969_v19 = vsub.f32 %v16295_v16, %v16538_v29 }
 0xb05   : > { %v12131_v18 = vpop.eup %12130  ;;  %v7905_v42 = vsub.f32 %v7841_v33, %v7873_v56  ;;  %v8164_v20 = vmul.f32 0.2, %v8132_v50 }
 0xb06   : > { %v12133_v52 = vpop.eup %12132  ;;  %v7904_v57 = vsub.f32 %v7840_v40, %v7872_v6  ;;  %v7635_v17 = vpop.xlane.xlu1 %7634  ;;  %v8061_v5 = vmul.f32 %v12131_v18, %v7965_v15  ;;  %v8197_v38 = vmax.f32 %v8133_v45, %v8165_v3 }
 0xb07   : > { %v7937_v32 = vmax.f32 %v7905_v42, 0.0  ;;  %v16556_v26 = vmul.f32 0.03125, %v7635_v17  ;;  %v7632_v59 = vpop.xlane.xlu0 %7631  ;;  %v8196_v51 = vmax.f32 %v8132_v50, %v8164_v20  ;;  %v8060_v25 = vmul.f32 %v12133_v52, %v7964_v41 }
 0xb08   : > { %v7936_v8 = vmax.f32 %v7904_v57, 0.0  ;;  %v16558_v54 = vmul.f32 0.03125, %v7632_v59  ;;  %v8098_v22 = vmul.f32 %v16408_v48, %v8061_v5 }
 0xb09   : > { %v8001_v0 = vadd.f32 1e-05, %v7937_v32  ;;  %11287 = vmatprep.mubr.msk.f32.mxu0 %vm564_vm0, %v8196_v51  ;;  %v8097_v13 = vmul.f32 %v16408_v48, %v8060_v25  ;;  %v7875_v12 = vmul.f32 %v16556_v26, %v16556_v26 }
 0xb0a   : > { %v8000_v62 = vadd.f32 1e-05, %v7936_v8  ;;  %v7795_v11 = vpop.xlane.xlu1 %7794  ;;  %11288 = vmatmul.mubr.msk.f32.gmra.mrb[78].mxu0 %vm564_vm0, %v8197_v38  ;;  %v8135_v30 = vadd.f32 %v16414_v34, %v8098_v22  ;;  %v7874_v35 = vmul.f32 %v16558_v54, %v16558_v54  ;;  %v7968_v38 = vsub.f32 %v16298_v9, %v16540_v2 }
 0xb0b   : > { %12138 = vrsqrt.f32 %v8001_v0  ;;  %v7843_v55 = vmul.f32 0.03125, %v7795_v11  ;;  %v7792_v14 = vpop.xlane.xlu0 %7791  ;;  %v8134_v21 = vadd.f32 %v16414_v34, %v8097_v13  ;;  %v7971_v2 = vsub.f32 %v16311_v44, %v16556_v26 }
 0xb0c   : > { %12140 = vrsqrt.f32 %v8000_v62  ;;  %v7842_v1 = vmul.f32 0.03125, %v7792_v14  ;;  %v8167_v63 = vmul.f32 0.2, %v8135_v30 }
 0xb0d   : > { %v12135_v28 = vpop.eup %12134  ;;  %v7907_v7 = vsub.f32 %v7843_v55, %v7875_v12  ;;  %v8166_v15 = vmul.f32 0.2, %v8134_v21 }
 0xb0e   : > { %v12137_v39 = vpop.eup %12136  ;;  %v7906_v37 = vsub.f32 %v7842_v1, %v7874_v35  ;;  %v7641_v45 = vpop.xlane.xlu1 %7640  ;;  %v8063_v56 = vmul.f32 %v12135_v28, %v7967_v10  ;;  %v8199_v41 = vmax.f32 %v8135_v30, %v8167_v63 }
 0xb0f   : > { %v7939_v33 = vmax.f32 %v7907_v7, 0.0  ;;  %v16574_v43 = vmul.f32 0.03125, %v7641_v45  ;;  %v7638_v50 = vpop.xlane.xlu0 %7637  ;;  %v8198_v6 = vmax.f32 %v8134_v21, %v8166_v15  ;;  %v8062_v40 = vmul.f32 %v12137_v39, %v7966_v47 }
 0xb10   : > { %v7938_v3 = vmax.f32 %v7906_v37, 0.0  ;;  %v16576_v18 = vmul.f32 0.03125, %v7638_v50  ;;  %v8100_v42 = vmul.f32 %v16408_v48, %v8063_v56 }
 0xb11   : > { %v8003_v20 = vadd.f32 1e-05, %v7939_v33  ;;  %11290 = vmatprep.mubr.msk.f32.mxu0 %vm564_vm0, %v8198_v6  ;;  %v8099_v36 = vmul.f32 %v16408_v48, %v8062_v40  ;;  %v7877_v5 = vmul.f32 %v16574_v43, %v16574_v43  ;;  %v7970_v40 = vsub.f32 %v16314_v46, %v16558_v54 }
 0xb12   : > { %v8002_v52 = vadd.f32 1e-05, %v7938_v3  ;;  %v7801_v57 = vpop.xlane.xlu1 %7800  ;;  %11291 = vmatmul.mubr.msk.f32.gmra.mrb[80].mxu0 %vm564_vm0, %v8199_v41  ;;  %v8137_v17 = vadd.f32 %v16414_v34, %v8100_v42  ;;  %v7876_v25 = vmul.f32 %v16576_v18, %v16576_v18  ;;  %v7973_v54 = vsub.f32 %v16327_v23, %v16574_v43 }
 0xb13   : > { %12142 = vrsqrt.f32 %v8003_v20  ;;  %v7845_v32 = vmul.f32 0.03125, %v7801_v57  ;;  %v7798_v59 = vpop.xlane.xlu0 %7797  ;;  %v8136_v51 = vadd.f32 %v16414_v34, %v8099_v36 }
 0xb14   : > { %12144 = vrsqrt.f32 %v8002_v52  ;;  %v7844_v8 = vmul.f32 0.03125, %v7798_v59  ;;  %v8169_v16 = vmul.f32 0.2, %v8137_v17 }
 0xb15   : > { %v12139_v29 = vpop.eup %12138  ;;  %v7909_v22 = vsub.f32 %v7845_v32, %v7877_v5  ;;  %v8168_v0 = vmul.f32 0.2, %v8136_v51 }
 0xb16   : > { %v12141_v13 = vpop.eup %12140  ;;  %v7908_v10 = vsub.f32 %v7844_v8, %v7876_v25  ;;  %v7647_v62 = vpop.xlane.xlu1 %7646  ;;  %v8065_v11 = vmul.f32 %v12139_v29, %v7969_v19  ;;  %v8201_v63 = vmax.f32 %v8137_v17, %v8169_v16 }
 0xb17   : > { %v7941_v30 = vmax.f32 %v7909_v22, 0.0  ;;  %v16592_v12 = vmul.f32 0.03125, %v7647_v62  ;;  %v7644_v55 = vpop.xlane.xlu0 %7643  ;;  %v8200_v14 = vmax.f32 %v8136_v51, %v8168_v0  ;;  %v8064_v21 = vmul.f32 %v12141_v13, %v7968_v38 }
 0xb18   : > { %v7940_v35 = vmax.f32 %v7908_v10, 0.0  ;;  %v16594_v1 = vmul.f32 0.03125, %v7644_v55  ;;  %v8102_v28 = vmul.f32 %v16408_v48, %v8065_v11  ;;  %v7972_v55 = vsub.f32 %v16330_v31, %v16576_v18 }
 0xb19   : > { %v8005_v47 = vadd.f32 1e-05, %v7941_v30  ;;  %11293 = vmatprep.mubr.msk.f32.mxu0 %vm564_vm0, %v8200_v14  ;;  %v8101_v9 = vmul.f32 %v16408_v48, %v8064_v21  ;;  %v7879_v37 = vmul.f32 %v16592_v12, %v16592_v12  ;;  %v7975_v18 = vsub.f32 %v16343_v49, %v16592_v12 }
 0xb1a   : > { %v8004_v7 = vadd.f32 1e-05, %v7940_v35  ;;  %v7807_v15 = vpop.xlane.xlu1 %7806  ;;  %11294 = vmatmul.mubr.msk.f32.gmra.mrb[82].mxu0 %vm564_vm0, %v8201_v63  ;;  %v8139_v39 = vadd.f32 %v16414_v34, %v8102_v28  ;;  %v7878_v50 = vmul.f32 %v16594_v1, %v16594_v1 }
 0xb1b   : > { %12146 = vrsqrt.f32 %v8005_v47  ;;  %v7847_v45 = vmul.f32 0.03125, %v7807_v15  ;;  %v7804_v56 = vpop.xlane.xlu0 %7803  ;;  %v8138_v33 = vadd.f32 %v16414_v34, %v8101_v9 }
 0xb1c   : > { %12148 = vrsqrt.f32 %v8004_v7  ;;  %v7846_v6 = vmul.f32 0.03125, %v7804_v56  ;;  %v8171_v44 = vmul.f32 0.2, %v8139_v39 }
 0xb1d   : > { %v12143_v26 = vpop.eup %12142  ;;  %v7911_v3 = vsub.f32 %v7847_v45, %v7879_v37  ;;  %v8170_v41 = vmul.f32 0.2, %v8138_v33 }
 0xb1e   : > { %v12145_v42 = vpop.eup %12144  ;;  %v7910_v20 = vsub.f32 %v7846_v6, %v7878_v50  ;;  %v7653_v36 = vpop.xlane.xlu1 %7652  ;;  %v8067_v19 = vmul.f32 %v12143_v26, %v7971_v2  ;;  %v8203_v25 = vmax.f32 %v8139_v39, %v8171_v44 }
 0xb1f   : > { %v7943_v52 = vmax.f32 %v7911_v3, 0.0  ;;  %v16610_v57 = vmul.f32 0.03125, %v7653_v36  ;;  %v7650_v17 = vpop.xlane.xlu0 %7649  ;;  %v8202_v5 = vmax.f32 %v8138_v33, %v8170_v41  ;;  %v8066_v32 = vmul.f32 %v12145_v42, %v7970_v40 }
 0xb20   : > { %v7942_v59 = vmax.f32 %v7910_v20, 0.0  ;;  %v16612_v51 = vmul.f32 0.03125, %v7650_v17  ;;  %v8104_v8 = vmul.f32 %v16408_v48, %v8067_v19  ;;  %v7974_v19 = vsub.f32 %v16346_v24, %v16594_v1 }
 0xb21   : > { %v8007_v16 = vadd.f32 1e-05, %v7943_v52  ;;  %11296 = vmatprep.mubr.msk.f32.mxu0 %vm564_vm0, %v8202_v5  ;;  %v8103_v46 = vmul.f32 %v16408_v48, %v8066_v32  ;;  %v7881_v0 = vmul.f32 %v16610_v57, %v16610_v57 }
 0xb22   : > { %v8006_v29 = vadd.f32 1e-05, %v7942_v59  ;;  %v7813_v38 = vpop.xlane.xlu1 %7812  ;;  %11297 = vmatmul.mubr.msk.f32.gmra.mrb[84].mxu0 %vm564_vm0, %v8203_v25  ;;  %v8141_v22 = vadd.f32 %v16414_v34, %v8104_v8  ;;  %v7880_v11 = vmul.f32 %v16612_v51, %v16612_v51 }
 0xb23   : > { %12150 = vrsqrt.f32 %v8007_v16  ;;  %v7849_v13 = vmul.f32 0.03125, %v7813_v38  ;;  %v7810_v10 = vpop.xlane.xlu0 %7809  ;;  %v8140_v62 = vadd.f32 %v16414_v34, %v8103_v46 }
 0xb24   : > { %12152 = vrsqrt.f32 %v8006_v29  ;;  %v7848_v30 = vmul.f32 0.03125, %v7810_v10  ;;  %v8173_v23 = vmul.f32 0.2, %v8141_v22 }
 0xb25   : > { %v12147_v43 = vpop.eup %12146  ;;  %v7913_v14 = vsub.f32 %v7849_v13, %v7881_v0  ;;  %v8172_v21 = vmul.f32 0.2, %v8140_v62  ;;  %v7977_v13 = vsub.f32 %v16359_v61, %v16610_v57 }
 0xb26   : > { %v12149_v35 = vpop.eup %12148  ;;  %v7912_v63 = vsub.f32 %v7848_v30, %v7880_v11  ;;  %v7659_v28 = vpop.xlane.xlu1 %7658  ;;  %v8069_v47 = vmul.f32 %v12147_v43, %v7973_v54  ;;  %v8205_v56 = vmax.f32 %v8141_v22, %v8173_v23  ;;  %v7976_v11 = vsub.f32 %v16362_v53, %v16612_v51 }
 0xb27   : > { %v7945_v9 = vmax.f32 %v7913_v14, 0.0  ;;  %v16628_v2 = vmul.f32 0.03125, %v7659_v28  ;;  %v7656_v7 = vpop.xlane.xlu0 %7655  ;;  %v8204_v15 = vmax.f32 %v8140_v62, %v8172_v21  ;;  %v8068_v39 = vmul.f32 %v12149_v35, %v7972_v55 }
 0xb28   : > { %v7944_v37 = vmax.f32 %v7912_v63, 0.0  ;;  %v16630_v45 = vmul.f32 0.03125, %v7656_v7  ;;  %v8106_v33 = vmul.f32 %v16408_v48, %v8069_v47 }
 0xb29   : > { %v8009_v50 = vadd.f32 1e-05, %v7945_v9  ;;  %11299 = vmatprep.mubr.msk.f32.mxu0 %vm564_vm0, %v8204_v15  ;;  %v8105_v31 = vmul.f32 %v16408_v48, %v8068_v39  ;;  %v7883_v40 = vmul.f32 %v16628_v2, %v16628_v2  ;;  %v7979_v53 = vsub.f32 %v16375_v4, %v16628_v2 }
 0xb2a   : > { %v8008_v6 = vadd.f32 1e-05, %v7944_v37  ;;  %v7819_v44 = vpop.xlane.xlu1 %7818  ;;  %11300 = vmatmul.mubr.msk.f32.gmra.mrb[86].mxu0 %vm564_vm0, %v8205_v56  ;;  %v8143_v26 = vadd.f32 %v16414_v34, %v8106_v33  ;;  %v7882_v20 = vmul.f32 %v16630_v45, %v16630_v45  ;;  %v7978_v47 = vsub.f32 %v16378_v60, %v16630_v45 }
 0xb2b   : > { %12154 = vrsqrt.f32 %v8009_v50  ;;  %v7851_v3 = vmul.f32 0.03125, %v7819_v44  ;;  %v7816_v41 = vpop.xlane.xlu0 %7815  ;;  %v8142_v42 = vadd.f32 %v16414_v34, %v8105_v31 }
 0xb2c   : > { %12156 = vrsqrt.f32 %v8008_v6  ;;  %v7850_v36 = vmul.f32 0.03125, %v7816_v41  ;;  %v8175_v49 = vmul.f32 0.2, %v8143_v26  ;;  %v16677_v6 = vld [vmem:[%s17391_s5 + $0x3] ss:$0 sm:$0xff] }
 0xb2d   : > { %v12151_v12 = vpop.eup %12150  ;;  %v7915_v52 = vsub.f32 %v7851_v3, %v7883_v40  ;;  %v8174_v17 = vmul.f32 0.2, %v8142_v42 }
 0xb2e   : > { %v12153_v5 = vpop.eup %12152  ;;  %v7914_v32 = vsub.f32 %v7850_v36, %v7882_v20  ;;  %v8071_v59 = vmul.f32 %v12151_v12, %v7975_v18  ;;  %v8207_v54 = vmax.f32 %v8143_v26, %v8175_v49 }
 0xb2f   : > { %v7947_v25 = vmax.f32 %v7915_v52, 0.0  ;;  %v8206_v8 = vmax.f32 %v8142_v42, %v8174_v17  ;;  %v8070_v16 = vmul.f32 %v12153_v5, %v7974_v19 }
 0xb30   : > { %v7946_v46 = vmax.f32 %v7914_v32, 0.0  ;;  %v8108_v29 = vmul.f32 %v16408_v48, %v8071_v59 }
 0xb31   : > { %v8011_v38 = vadd.f32 1e-05, %v7947_v25  ;;  %11302 = vmatprep.mubr.msk.f32.mxu0 %vm564_vm0, %v8206_v8  ;;  %v8107_v22 = vmul.f32 %v16408_v48, %v8070_v16 }
 0xb32   : > { %v8010_v0 = vadd.f32 1e-05, %v7946_v46  ;;  %11303 = vmatmul.mubr.msk.f32.gmra.mrb[88].mxu0 %vm564_vm0, %v8207_v54  ;;  %v8145_v24 = vadd.f32 %v16414_v34, %v8108_v29 }
 0xb33   : > { %12158 = vrsqrt.f32 %v8011_v38  ;;  %v8144_v1 = vadd.f32 %v16414_v34, %v8107_v22 }
 0xb34   : > { %12160 = vrsqrt.f32 %v8010_v0  ;;  %v8177_v10 = vmul.f32 0.2, %v8145_v24 }
 0xb35   : > { %v12155_v62 = vpop.eup %12154  ;;  %v8176_v30 = vmul.f32 0.2, %v8144_v1 }
 0xb36   : > { %v12157_v23 = vpop.eup %12156  ;;  %v8073_v43 = vmul.f32 %v12155_v62, %v7977_v13  ;;  %v8209_v21 = vmax.f32 %v8145_v24, %v8177_v10 }
 0xb37   : > { %v8208_v55 = vmax.f32 %v8144_v1, %v8176_v30  ;;  %v8072_v14 = vmul.f32 %v12157_v23, %v7976_v11 }
 0xb38   : > { %v8110_v35 = vmul.f32 %v16408_v48, %v8073_v43 }
 0xb39   : > { %11305 = vmatprep.mubr.msk.f32.mxu0 %vm564_vm0, %v8208_v55  ;;  %v8109_v63 = vmul.f32 %v16408_v48, %v8072_v14 }
 0xb3a   : > { %11306 = vmatmul.mubr.msk.f32.gmra.mrb[90].mxu0 %vm564_vm0, %v8209_v21  ;;  %v8147_v61 = vadd.f32 %v16414_v34, %v8110_v35 }
 0xb3b   : > { %v8146_v57 = vadd.f32 %v16414_v34, %v8109_v63 }
 0xb3c   : > { %v8179_v51 = vmul.f32 0.2, %v8147_v61 }
 0xb3d   : > { %v12159_v28 = vpop.eup %12158  ;;  %v8178_v9 = vmul.f32 0.2, %v8146_v57 }
 0xb3e   : > { %v12161_v7 = vpop.eup %12160  ;;  %v8075_v15 = vmul.f32 %v12159_v28, %v7979_v53  ;;  %v8211_v56 = vmax.f32 %v8147_v61, %v8179_v51 }
 0xb3f   : > { %v8210_v39 = vmax.f32 %v8146_v57, %v8178_v9  ;;  %v8074_v37 = vmul.f32 %v12161_v7, %v7978_v47 }
 0xb40   : > { %v8112_v33 = vmul.f32 %v16408_v48, %v8075_v15 }
 0xb41   : > { %11308 = vmatprep.mubr.msk.f32.mxu0 %vm564_vm0, %v8210_v39  ;;  %v8111_v50 = vmul.f32 %v16408_v48, %v8074_v37 }
 0xb42   : > { %11309 = vmatmul.mubr.msk.f32.gmra.mrb[92].mxu0 %vm564_vm0, %v8211_v56  ;;  %v8149_v4 = vadd.f32 %v16414_v34, %v8112_v33 }
 0xb43   : > { %v8148_v2 = vadd.f32 %v16414_v34, %v8111_v50 }
 0xb44   : > { %v8181_v31 = vmul.f32 0.2, %v8149_v4 }
 0xb45   : > { %v8180_v60 = vmul.f32 0.2, %v8148_v2 }
 0xb46   : > { %v8213_v18 = vmax.f32 %v8149_v4, %v8181_v31 }
 0xb47   : > { %v8212_v45 = vmax.f32 %v8148_v2, %v8180_v60  ;;  %v10224_v60 = vld [vmem:[%s17392_s6 + $0x60] sm:$0xff] }
 0xb49   : > { %11311 = vmatprep.mubr.msk.f32.mxu0 %vm564_vm0, %v8212_v45  ;;  %v10225_v45 = vld [vmem:[%s17392_s6 + $0x68] sm:$0xff] }
 0xb4a   : > { %11312 = vmatmul.mubr.msk.f32.gmra.mrb[94].mxu0 %vm564_vm0, %v8213_v18  ;;  %v11458_v18 = vpack.c.bf16 %v10225_v45, %v10224_v60 }
 0xb4c   : > { %11459 = vmatprep.subr.bf16.mxu0 %v11458_v18 }
 0xb4d   : > { %11461 = vmatpush3.bf16.msra.mxu0 %v11458_v18 }
 0xba5   : > { %v11268_v48 = vpop.f32.mrb[64].mxu0 }
 0xba6   : > { %v16680_v44 = vadd.f32 %v11268_v48, %v16677_v6  ;;  %v8389_v26 = vpop.f32.mrb[65].mxu0 }
 0xba7   : > { %v16683_v34 = vadd.f32 %v16677_v6, %v8389_v26 }
 0xba8   : > { %v8551_v40 = vsel %vm564_vm0, %v16680_v44, 0.0  ;;  %v8677_v3 = vmul.f32 %v16680_v44, %v16680_v44 }
 0xba9   : > { %8552 = vadd.xlane.f32.xlu1 %v8551_v40  ;;  %v8548_v41 = vsel %vm564_vm0, %v16683_v34, 0.0  ;;  %v8676_v42 = vmul.f32 %v16683_v34, %v16683_v34 }
 0xbaa   : > { %8549 = vadd.xlane.f32.xlu0 %v8548_v41  ;;  %v8711_v20 = vsel %vm564_vm0, %v8677_v3, 0.0 }
 0xbab   : > { %v8708_v49 = vsel %vm564_vm0, %v8676_v42, 0.0  ;;  %v10226_v42 = vld [vmem:[%s17392_s6 + $0x70] sm:$0xff] }
 0xbad   : > { %8712 = vadd.xlane.f32.xlu1 %v8711_v20  ;;  %v11271_v36 = vpop.f32.mrb[66].mxu0  ;;  %v10227_v20 = vld [vmem:[%s17392_s6 + $0x78] sm:$0xff] }
 0xbae   : > { %v16696_v12 = vadd.f32 %v11271_v36, %v16677_v6  ;;  %8709 = vadd.xlane.f32.xlu0 %v8708_v49  ;;  %v8399_v19 = vpop.f32.mrb[67].mxu0  ;;  %v11462_v49 = vpack.c.bf16 %v10227_v20, %v10226_v42 }
 0xbaf   : > { %v16699_v52 = vadd.f32 %v16677_v6, %v8399_v19 }
 0xbb0   : > { %v8557_v17 = vsel %vm564_vm0, %v16696_v12, 0.0  ;;  %v8679_v5 = vmul.f32 %v16696_v12, %v16696_v12  ;;  %11463 = vmatprep.subr.bf16.mxu0 %v11462_v49 }
 0xbb1   : > { %8558 = vadd.xlane.f32.xlu1 %v8557_v17  ;;  %v8554_v32 = vsel %vm564_vm0, %v16699_v52, 0.0  ;;  %v8678_v59 = vmul.f32 %v16699_v52, %v16699_v52  ;;  %11465 = vmatpush3.bf16.msra.mxu0 %v11462_v49 }
 0xbb2   : > { %8555 = vadd.xlane.f32.xlu0 %v8554_v32  ;;  %v8717_v25 = vsel %vm564_vm0, %v8679_v5, 0.0 }
 0xbb3   : > { %v8714_v16 = vsel %vm564_vm0, %v8678_v59, 0.0 }
 0xbb5   : > { %8718 = vadd.xlane.f32.xlu1 %v8717_v25  ;;  %v11274_v8 = vpop.f32.mrb[68].mxu0 }
 0xbb6   : > { %v16712_v46 = vadd.f32 %v11274_v8, %v16677_v6  ;;  %8715 = vadd.xlane.f32.xlu0 %v8714_v16  ;;  %v8409_v54 = vpop.f32.mrb[69].mxu0 }
 0xbb7   : > { %v16715_v29 = vadd.f32 %v16677_v6, %v8409_v54 }
 0xbb8   : > { %v8563_v38 = vsel %vm564_vm0, %v16712_v46, 0.0  ;;  %v8681_v22 = vmul.f32 %v16712_v46, %v16712_v46 }
 0xbb9   : > { %8564 = vadd.xlane.f32.xlu1 %v8563_v38  ;;  %v8560_v0 = vsel %vm564_vm0, %v16715_v29, 0.0  ;;  %v8680_v24 = vmul.f32 %v16715_v29, %v16715_v29 }
 0xbba   : > { %8561 = vadd.xlane.f32.xlu0 %v8560_v0  ;;  %v8723_v1 = vsel %vm564_vm0, %v8681_v22, 0.0 }
 0xbbb   : > { %v8720_v10 = vsel %vm564_vm0, %v8680_v24, 0.0 }
 0xbbd   : > { %8724 = vadd.xlane.f32.xlu1 %v8723_v1  ;;  %v11277_v13 = vpop.f32.mrb[70].mxu0 }
 0xbbe   : > { %v16728_v62 = vadd.f32 %v11277_v13, %v16677_v6  ;;  %8721 = vadd.xlane.f32.xlu0 %v8720_v10  ;;  %v8419_v11 = vpop.f32.mrb[71].mxu0 }
 0xbbf   : > { %v16731_v30 = vadd.f32 %v16677_v6, %v8419_v11 }
 0xbc0   : > { %v8569_v23 = vsel %vm564_vm0, %v16728_v62, 0.0  ;;  %v8683_v43 = vmul.f32 %v16728_v62, %v16728_v62 }
 0xbc1   : > { %8570 = vadd.xlane.f32.xlu1 %v8569_v23  ;;  %v8566_v55 = vsel %vm564_vm0, %v16731_v30, 0.0  ;;  %v8682_v14 = vmul.f32 %v16731_v30, %v16731_v30 }
 0xbc2   : > { %8567 = vadd.xlane.f32.xlu0 %v8566_v55  ;;  %v8729_v21 = vsel %vm564_vm0, %v8683_v43, 0.0 }
 0xbc3   : > { %v8726_v63 = vsel %vm564_vm0, %v8682_v14, 0.0 }
 0xbc5   : > { %8730 = vadd.xlane.f32.xlu1 %v8729_v21  ;;  %v11280_v35 = vpop.f32.mrb[72].mxu0 }
 0xbc6   : > { %v16744_v61 = vadd.f32 %v11280_v35, %v16677_v6  ;;  %8727 = vadd.xlane.f32.xlu0 %v8726_v63  ;;  %v8429_v57 = vpop.f32.mrb[73].mxu0 }
 0xbc7   : > { %v16747_v53 = vadd.f32 %v16677_v6, %v8429_v57 }
 0xbc8   : > { %v8575_v51 = vsel %vm564_vm0, %v16744_v61, 0.0  ;;  %v8685_v28 = vmul.f32 %v16744_v61, %v16744_v61 }
 0xbc9   : > { %8576 = vadd.xlane.f32.xlu1 %v8575_v51  ;;  %v8572_v47 = vsel %vm564_vm0, %v16747_v53, 0.0  ;;  %v8684_v9 = vmul.f32 %v16747_v53, %v16747_v53 }
 0xbca   : > { %8573 = vadd.xlane.f32.xlu0 %v8572_v47  ;;  %v8735_v7 = vsel %vm564_vm0, %v8685_v28, 0.0 }
 0xbcb   : > { %v8732_v39 = vsel %vm564_vm0, %v8684_v9, 0.0 }
 0xbcd   : > { %8736 = vadd.xlane.f32.xlu1 %v8735_v7  ;;  %v11283_v15 = vpop.f32.mrb[74].mxu0 }
 0xbce   : > { %v16760_v37 = vadd.f32 %v11283_v15, %v16677_v6  ;;  %8733 = vadd.xlane.f32.xlu0 %v8732_v39  ;;  %v8439_v56 = vpop.f32.mrb[75].mxu0 }
 0xbcf   : > { %v16763_v33 = vadd.f32 %v16677_v6, %v8439_v56 }
 0xbd0   : > { %v8581_v50 = vsel %vm564_vm0, %v16760_v37, 0.0  ;;  %v8687_v4 = vmul.f32 %v16760_v37, %v16760_v37 }
 0xbd1   : > { %8582 = vadd.xlane.f32.xlu1 %v8581_v50  ;;  %v8578_v2 = vsel %vm564_vm0, %v16763_v33, 0.0  ;;  %v8686_v31 = vmul.f32 %v16763_v33, %v16763_v33 }
 0xbd2   : > { %8579 = vadd.xlane.f32.xlu0 %v8578_v2  ;;  %v8741_v48 = vsel %vm564_vm0, %v8687_v4, 0.0 }
 0xbd3   : > { %v8738_v40 = vsel %vm564_vm0, %v8686_v31, 0.0 }
 0xbd5   : > { %8742 = vadd.xlane.f32.xlu1 %v8741_v48  ;;  %v11286_v26 = vpop.f32.mrb[76].mxu0 }
 0xbd6   : > { %v16782_v3 = vadd.f32 %v11286_v26, %v16677_v6  ;;  %8739 = vadd.xlane.f32.xlu0 %v8738_v40  ;;  %v8449_v41 = vpop.f32.mrb[77].mxu0 }
 0xbd7   : > { %v16791_v36 = vadd.f32 %v16677_v6, %v8449_v41 }
 0xbd8   : > { %v8587_v19 = vsel %vm564_vm0, %v16782_v3, 0.0  ;;  %v8689_v17 = vmul.f32 %v16782_v3, %v16782_v3 }
 0xbd9   : > { %8588 = vadd.xlane.f32.xlu1 %v8587_v19  ;;  %v8584_v5 = vsel %vm564_vm0, %v16791_v36, 0.0  ;;  %v8688_v32 = vmul.f32 %v16791_v36, %v16791_v36 }
 0xbda   : > { %8585 = vadd.xlane.f32.xlu0 %v8584_v5  ;;  %v8747_v59 = vsel %vm564_vm0, %v8689_v17, 0.0 }
 0xbdb   : > { %v8744_v8 = vsel %vm564_vm0, %v8688_v32, 0.0 }
 0xbdd   : > { %8748 = vadd.xlane.f32.xlu1 %v8747_v59  ;;  %v11289_v25 = vpop.f32.mrb[78].mxu0 }
 0xbde   : > { %v16804_v16 = vadd.f32 %v11289_v25, %v16677_v6  ;;  %8745 = vadd.xlane.f32.xlu0 %v8744_v8  ;;  %v8459_v54 = vpop.f32.mrb[79].mxu0 }
 0xbdf   : > { %v16807_v38 = vadd.f32 %v16677_v6, %v8459_v54 }
 0xbe0   : > { %v8593_v22 = vsel %vm564_vm0, %v16804_v16, 0.0  ;;  %v8691_v0 = vmul.f32 %v16804_v16, %v16804_v16 }
 0xbe1   : > { %8594 = vadd.xlane.f32.xlu1 %v8593_v22  ;;  %v8590_v24 = vsel %vm564_vm0, %v16807_v38, 0.0  ;;  %v8690_v1 = vmul.f32 %v16807_v38, %v16807_v38 }
 0xbe2   : > { %8591 = vadd.xlane.f32.xlu0 %v8590_v24  ;;  %v8753_v13 = vsel %vm564_vm0, %v8691_v0, 0.0 }
 0xbe3   : > { %v8750_v11 = vsel %vm564_vm0, %v8690_v1, 0.0 }
 0xbe5   : > { %8754 = vadd.xlane.f32.xlu1 %v8753_v13  ;;  %v11292_v10 = vpop.f32.mrb[80].mxu0 }
 0xbe6   : > { %v16820_v23 = vadd.f32 %v11292_v10, %v16677_v6  ;;  %8751 = vadd.xlane.f32.xlu0 %v8750_v11  ;;  %v8469_v43 = vpop.f32.mrb[81].mxu0 }
 0xbe7   : > { %v16823_v55 = vadd.f32 %v16677_v6, %v8469_v43 }
 0xbe8   : > { %v8599_v14 = vsel %vm564_vm0, %v16820_v23, 0.0  ;;  %v8693_v21 = vmul.f32 %v16820_v23, %v16820_v23 }
 0xbe9   : > { %8600 = vadd.xlane.f32.xlu1 %v8599_v14  ;;  %v8596_v35 = vsel %vm564_vm0, %v16823_v55, 0.0  ;;  %v8692_v63 = vmul.f32 %v16823_v55, %v16823_v55 }
 0xbea   : > { %8597 = vadd.xlane.f32.xlu0 %v8596_v35  ;;  %v8759_v57 = vsel %vm564_vm0, %v8693_v21, 0.0 }
 0xbeb   : > { %v8756_v28 = vsel %vm564_vm0, %v8692_v63, 0.0 }
 0xbed   : > { %8760 = vadd.xlane.f32.xlu1 %v8759_v57  ;;  %v11295_v51 = vpop.f32.mrb[82].mxu0 }
 0xbee   : > { %v16836_v47 = vadd.f32 %v11295_v51, %v16677_v6  ;;  %8757 = vadd.xlane.f32.xlu0 %v8756_v28  ;;  %v8479_v9 = vpop.f32.mrb[83].mxu0 }
 0xbef   : > { %v16839_v7 = vadd.f32 %v16677_v6, %v8479_v9 }
 0xbf0   : > { %v8605_v15 = vsel %vm564_vm0, %v16836_v47, 0.0  ;;  %v8695_v39 = vmul.f32 %v16836_v47, %v16836_v47 }
 0xbf1   : > { %8606 = vadd.xlane.f32.xlu1 %v8605_v15  ;;  %v8602_v56 = vsel %vm564_vm0, %v16839_v7, 0.0  ;;  %v8694_v50 = vmul.f32 %v16839_v7, %v16839_v7 }
 0xbf2   : > { %8603 = vadd.xlane.f32.xlu0 %v8602_v56  ;;  %v8765_v4 = vsel %vm564_vm0, %v8695_v39, 0.0 }
 0xbf3   : > { %v8762_v31 = vsel %vm564_vm0, %v8694_v50, 0.0 }
 0xbf5   : > { %8766 = vadd.xlane.f32.xlu1 %v8765_v4  ;;  %v11298_v2 = vpop.f32.mrb[84].mxu0 }
 0xbf6   : > { %v16852_v60 = vadd.f32 %v11298_v2, %v16677_v6  ;;  %8763 = vadd.xlane.f32.xlu0 %v8762_v31  ;;  %v8489_v45 = vpop.f32.mrb[85].mxu0 }
 0xbf7   : > { %v16855_v18 = vadd.f32 %v16677_v6, %v8489_v45 }
 0xbf8   : > { %v8611_v48 = vsel %vm564_vm0, %v16852_v60, 0.0  ;;  %v8697_v26 = vmul.f32 %v16852_v60, %v16852_v60 }
 0xbf9   : > { %8612 = vadd.xlane.f32.xlu1 %v8611_v48  ;;  %v8608_v40 = vsel %vm564_vm0, %v16855_v18, 0.0  ;;  %v8696_v41 = vmul.f32 %v16855_v18, %v16855_v18 }
 0xbfa   : > { %8609 = vadd.xlane.f32.xlu0 %v8608_v40  ;;  %v8771_v42 = vsel %vm564_vm0, %v8697_v26, 0.0 }
 0xbfb   : > { %v8768_v49 = vsel %vm564_vm0, %v8696_v41, 0.0 }
 0xbfd   : > { %8772 = vadd.xlane.f32.xlu1 %v8771_v42  ;;  %v11301_v20 = vpop.f32.mrb[86].mxu0 }
 0xbfe   : > { %v16868_v19 = vadd.f32 %v11301_v20, %v16677_v6  ;;  %8769 = vadd.xlane.f32.xlu0 %v8768_v49  ;;  %v8499_v17 = vpop.f32.mrb[87].mxu0 }
 0xbff   : > { %v16871_v5 = vadd.f32 %v16677_v6, %v8499_v17 }
 0xc00   : > { %v8617_v32 = vsel %vm564_vm0, %v16868_v19, 0.0  ;;  %v8699_v59 = vmul.f32 %v16868_v19, %v16868_v19 }
 0xc01   : > { %8618 = vadd.xlane.f32.xlu1 %v8617_v32  ;;  %v8614_v25 = vsel %vm564_vm0, %v16871_v5, 0.0  ;;  %v8698_v8 = vmul.f32 %v16871_v5, %v16871_v5 }
 0xc02   : > { %8615 = vadd.xlane.f32.xlu0 %v8614_v25  ;;  %v8777_v54 = vsel %vm564_vm0, %v8699_v59, 0.0 }
 0xc03   : > { %v8774_v0 = vsel %vm564_vm0, %v8698_v8, 0.0 }
 0xc05   : > { %8778 = vadd.xlane.f32.xlu1 %v8777_v54  ;;  %v11304_v22 = vpop.f32.mrb[88].mxu0 }
 0xc06   : > { %v16884_v24 = vadd.f32 %v11304_v22, %v16677_v6  ;;  %8775 = vadd.xlane.f32.xlu0 %v8774_v0  ;;  %v8509_v1 = vpop.f32.mrb[89].mxu0 }
 0xc07   : > { %v16887_v13 = vadd.f32 %v16677_v6, %v8509_v1 }
 0xc08   : > { %v8623_v10 = vsel %vm564_vm0, %v16884_v24, 0.0  ;;  %v8701_v11 = vmul.f32 %v16884_v24, %v16884_v24 }
 0xc09   : > { %8624 = vadd.xlane.f32.xlu1 %v8623_v10  ;;  %v8620_v43 = vsel %vm564_vm0, %v16887_v13, 0.0  ;;  %v8700_v14 = vmul.f32 %v16887_v13, %v16887_v13 }
 0xc0a   : > { %8621 = vadd.xlane.f32.xlu0 %v8620_v43  ;;  %v8783_v21 = vsel %vm564_vm0, %v8701_v11, 0.0 }
 0xc0b   : > { %v8780_v63 = vsel %vm564_vm0, %v8700_v14, 0.0 }
 0xc0d   : > { %8784 = vadd.xlane.f32.xlu1 %v8783_v21  ;;  %v11307_v35 = vpop.f32.mrb[90].mxu0 }
 0xc0e   : > { %v16900_v57 = vadd.f32 %v11307_v35, %v16677_v6  ;;  %8781 = vadd.xlane.f32.xlu0 %v8780_v63  ;;  %v8519_v51 = vpop.f32.mrb[91].mxu0 }
 0xc0f   : > { %v16903_v28 = vadd.f32 %v16677_v6, %v8519_v51 }
 0xc10   : > { %v8629_v9 = vsel %vm564_vm0, %v16900_v57, 0.0  ;;  %v8703_v15 = vmul.f32 %v16900_v57, %v16900_v57 }
 0xc11   : > { %8630 = vadd.xlane.f32.xlu1 %v8629_v9  ;;  %v8626_v39 = vsel %vm564_vm0, %v16903_v28, 0.0  ;;  %v8702_v56 = vmul.f32 %v16903_v28, %v16903_v28 }
 0xc12   : > { %8627 = vadd.xlane.f32.xlu0 %v8626_v39  ;;  %v8789_v50 = vsel %vm564_vm0, %v8703_v15, 0.0 }
 0xc13   : > { %v8786_v2 = vsel %vm564_vm0, %v8702_v56, 0.0 }
 0xc15   : > { %8790 = vadd.xlane.f32.xlu1 %v8789_v50  ;;  %v11310_v4 = vpop.f32.mrb[92].mxu0 }
 0xc16   : > { %v16916_v31 = vadd.f32 %v11310_v4, %v16677_v6  ;;  %8787 = vadd.xlane.f32.xlu0 %v8786_v2  ;;  %v8529_v45 = vpop.f32.mrb[93].mxu0 }
 0xc17   : > { %v16919_v48 = vadd.f32 %v16677_v6, %v8529_v45 }
 0xc18   : > { %v8635_v26 = vsel %vm564_vm0, %v16916_v31, 0.0  ;;  %v8705_v40 = vmul.f32 %v16916_v31, %v16916_v31 }
 0xc19   : > { %8636 = vadd.xlane.f32.xlu1 %v8635_v26  ;;  %v8632_v41 = vsel %vm564_vm0, %v16919_v48, 0.0  ;;  %v8704_v42 = vmul.f32 %v16919_v48, %v16919_v48 }
 0xc1a   : > { %8633 = vadd.xlane.f32.xlu0 %v8632_v41  ;;  %v8795_v20 = vsel %vm564_vm0, %v8705_v40, 0.0 }
 0xc1b   : > { %v8792_v17 = vsel %vm564_vm0, %v8704_v42, 0.0 }
 0xc1d   : > { %8796 = vadd.xlane.f32.xlu1 %v8795_v20  ;;  %v11313_v49 = vpop.f32.mrb[94].mxu0 }
 0xc1e   : > { %v16932_v32 = vadd.f32 %v11313_v49, %v16677_v6  ;;  %8793 = vadd.xlane.f32.xlu0 %v8792_v17  ;;  %v8539_v59 = vpop.f32.mrb[95].mxu0 }
 0xc1f   : > { %v16935_v25 = vadd.f32 %v16677_v6, %v8539_v59 }
 0xc20   : > { %v8641_v8 = vsel %vm564_vm0, %v16932_v32, 0.0  ;;  %v8707_v54 = vmul.f32 %v16932_v32, %v16932_v32 }
 0xc21   : > { %8642 = vadd.xlane.f32.xlu1 %v8641_v8  ;;  %v8638_v22 = vsel %vm564_vm0, %v16935_v25, 0.0  ;;  %v8706_v0 = vmul.f32 %v16935_v25, %v16935_v25 }
 0xc22   : > { %8639 = vadd.xlane.f32.xlu0 %v8638_v22  ;;  %v8801_v1 = vsel %vm564_vm0, %v8707_v54, 0.0 }
 0xc23   : > { %v8798_v6 = vsel %vm564_vm0, %v8706_v0, 0.0 }
 0xc25   : > { %8802 = vadd.xlane.f32.xlu1 %v8801_v1 }
 0xc26   : > { %8799 = vadd.xlane.f32.xlu0 %v8798_v6 }
 0xc36   : > { %v8553_v10 = vpop.xlane.xlu1 %8552 }
 0xc37   : > { %v8645_v11 = vmul.f32 0.03125, %v8553_v10  ;;  %v8550_v43 = vpop.xlane.xlu0 %8549 }
 0xc38   : > { %v8644_v14 = vmul.f32 0.03125, %v8550_v43 }
 0xc39   : > { %v8837_v35 = vmul.f32 %v8645_v11, %v8645_v11 }
 0xc3a   : > { %v8713_v21 = vpop.xlane.xlu1 %8712  ;;  %v8836_v9 = vmul.f32 %v8644_v14, %v8644_v14 }
 0xc3b   : > { %v8805_v63 = vmul.f32 0.03125, %v8713_v21  ;;  %v8710_v51 = vpop.xlane.xlu0 %8709 }
 0xc3c   : > { %v8804_v15 = vmul.f32 0.03125, %v8710_v51 }
 0xc3d   : > { %v8869_v39 = vsub.f32 %v8805_v63, %v8837_v35 }
 0xc3e   : > { %v8868_v56 = vsub.f32 %v8804_v15, %v8836_v9  ;;  %v8559_v50 = vpop.xlane.xlu1 %8558 }
 0xc3f   : > { %v8901_v4 = vmax.f32 %v8869_v39, 0.0  ;;  %v16947_v2 = vmul.f32 0.03125, %v8559_v50  ;;  %v8556_v45 = vpop.xlane.xlu0 %8555  ;;  %v8933_v50 = vsub.f32 %v16680_v44, %v8645_v11 }
 0xc40   : > { %v8900_v26 = vmax.f32 %v8868_v56, 0.0  ;;  %v16949_v40 = vmul.f32 0.03125, %v8556_v45 }
 0xc41   : > { %v8965_v41 = vadd.f32 1e-05, %v8901_v4  ;;  %v8839_v49 = vmul.f32 %v16947_v2, %v16947_v2 }
 0xc42   : > { %v8964_v42 = vadd.f32 1e-05, %v8900_v26  ;;  %v8719_v20 = vpop.xlane.xlu1 %8718  ;;  %v8838_v8 = vmul.f32 %v16949_v40, %v16949_v40 }
 0xc43   : > { %12162 = vrsqrt.f32 %v8965_v41  ;;  %v8807_v17 = vmul.f32 0.03125, %v8719_v20  ;;  %v8716_v59 = vpop.xlane.xlu0 %8715  ;;  %v16965_v41 = vld [vmem:[%s13364_s27 + $0x3] ss:$0 sm:$0xff] }
 0xc44   : > { %12164 = vrsqrt.f32 %v8964_v42  ;;  %v8806_v54 = vmul.f32 0.03125, %v8716_v59  ;;  %v8932_v42 = vsub.f32 %v16683_v34, %v8644_v14 }
 0xc45   : > { %v8871_v22 = vsub.f32 %v8807_v17, %v8839_v49 }
 0xc46   : > { %v8870_v0 = vsub.f32 %v8806_v54, %v8838_v8  ;;  %v8565_v1 = vpop.xlane.xlu1 %8564  ;;  %v16969_v54 = vld [vmem:[%s13375_s30 + $0x3] ss:$0 sm:$0xff] }
 0xc47   : > { %v8903_v6 = vmax.f32 %v8871_v22, 0.0  ;;  %v16955_v10 = vmul.f32 0.03125, %v8565_v1  ;;  %v8562_v43 = vpop.xlane.xlu0 %8561 }
 0xc48   : > { %v8902_v21 = vmax.f32 %v8870_v0, 0.0  ;;  %v16957_v35 = vmul.f32 0.03125, %v8562_v43 }
 0xc49   : > { %v8967_v63 = vadd.f32 1e-05, %v8903_v6  ;;  %v8841_v15 = vmul.f32 %v16955_v10, %v16955_v10 }
 0xc4a   : > { %v8966_v51 = vadd.f32 1e-05, %v8902_v21  ;;  %v8725_v9 = vpop.xlane.xlu1 %8724  ;;  %v8840_v4 = vmul.f32 %v16957_v35, %v16957_v35 }
 0xc4b   : > { %12166 = vrsqrt.f32 %v8967_v63  ;;  %v8809_v39 = vmul.f32 0.03125, %v8725_v9  ;;  %v8722_v56 = vpop.xlane.xlu0 %8721  ;;  %v8935_v63 = vsub.f32 %v16696_v12, %v16947_v2  ;;  %v8934_v12 = vsub.f32 %v16699_v52, %v16949_v40 }
 0xc4c   : > { %12168 = vrsqrt.f32 %v8966_v51  ;;  %v8808_v45 = vmul.f32 0.03125, %v8722_v56  ;;  %v8937_v40 = vsub.f32 %v16712_v46, %v16955_v10 }
 0xc4d   : > { %v12163_v26 = vpop.eup %12162  ;;  %v8873_v20 = vsub.f32 %v8809_v39, %v8841_v15 }
 0xc4e   : > { %v12165_v49 = vpop.eup %12164  ;;  %v9029_v17 = vmul.f32 %v12163_v26, %v8933_v50  ;;  %v8872_v59 = vsub.f32 %v8808_v45, %v8840_v4  ;;  %v8571_v8 = vpop.xlane.xlu1 %8570 }
 0xc4f   : > { %v9028_v22 = vmul.f32 %v12165_v49, %v8932_v42  ;;  %v8905_v0 = vmax.f32 %v8873_v20, 0.0  ;;  %v16971_v44 = vmul.f32 0.03125, %v8571_v8  ;;  %v8568_v11 = vpop.xlane.xlu0 %8567 }
 0xc50   : > { %v9066_v1 = vmul.f32 %v16965_v41, %v9029_v17  ;;  %v8904_v6 = vmax.f32 %v8872_v59, 0.0  ;;  %v16974_v43 = vmul.f32 0.03125, %v8568_v11 }
 0xc51   : > { %v8969_v21 = vadd.f32 1e-05, %v8905_v0  ;;  %v9065_v34 = vmul.f32 %v16965_v41, %v9028_v22  ;;  %v8843_v15 = vmul.f32 %v16971_v44, %v16971_v44 }
 0xc52   : > { %v9103_v14 = vadd.f32 %v16969_v54, %v9066_v1  ;;  %v8968_v51 = vadd.f32 1e-05, %v8904_v6  ;;  %v8731_v9 = vpop.xlane.xlu1 %8730  ;;  %v8842_v45 = vmul.f32 %v16974_v43, %v16974_v43 }
 0xc53   : > { %12170 = vrsqrt.f32 %v8969_v21  ;;  %v8811_v39 = vmul.f32 0.03125, %v8731_v9  ;;  %v8728_v56 = vpop.xlane.xlu0 %8727  ;;  %v9102_v50 = vadd.f32 %v16969_v54, %v9065_v34 }
 0xc54   : > { %v9135_v4 = vmul.f32 0.2, %v9103_v14  ;;  %12172 = vrsqrt.f32 %v8968_v51  ;;  %v8810_v26 = vmul.f32 0.03125, %v8728_v56 }
 0xc55   : > { %v12167_v42 = vpop.eup %12166  ;;  %v8875_v2 = vsub.f32 %v8811_v39, %v8843_v15  ;;  %v9134_v20 = vmul.f32 0.2, %v9102_v50 }
 0xc56   : > { %v12169_v49 = vpop.eup %12168  ;;  %v9031_v17 = vmul.f32 %v12167_v42, %v8935_v63  ;;  %v8874_v59 = vsub.f32 %v8810_v26, %v8842_v45  ;;  %v8577_v8 = vpop.xlane.xlu1 %8576  ;;  %v9167_v22 = vmax.f32 %v9103_v14, %v9135_v4  ;;  %v8936_v42 = vsub.f32 %v16715_v29, %v16957_v35 }
 0xc57   : > { %v9030_v0 = vmul.f32 %v12169_v49, %v8934_v12  ;;  %v8907_v11 = vmax.f32 %v8875_v2, 0.0  ;;  %v16987_v1 = vmul.f32 0.03125, %v8577_v8  ;;  %v8574_v6 = vpop.xlane.xlu0 %8573  ;;  %v9166_v21 = vmax.f32 %v9102_v50, %v9134_v20 }
 0xc58   : > { %v8906_v34 = vmax.f32 %v8874_v59, 0.0  ;;  %v16989_v51 = vmul.f32 0.03125, %v8574_v6  ;;  %v9068_v9 = vmul.f32 %v16965_v41, %v9031_v17  ;;  %v9199_v14 = vadd.f32 %v9167_v22, %v15720_v58 }
 0xc59   : > { %v8971_v56 = vadd.f32 1e-05, %v8907_v11  ;;  %v9198_v52 = vadd.f32 %v9166_v21, %v15716_v27  ;;  %v9067_v39 = vmul.f32 %v16965_v41, %v9030_v0  ;;  %v8845_v50 = vmul.f32 %v16987_v1, %v16987_v1 }
 0xc5a   : > { %v8970_v63 = vadd.f32 1e-05, %v8906_v34  ;;  %v8737_v15 = vpop.xlane.xlu1 %8736  ;;  %v9105_v26 = vadd.f32 %v16969_v54, %v9068_v9  ;;  %v8844_v27 = vmul.f32 %v16989_v51, %v16989_v51 }
 0xc5b   : > { %12174 = vrsqrt.f32 %v8971_v56  ;;  %v8813_v4 = vmul.f32 0.03125, %v8737_v15  ;;  %11322 = vmatprep.mubr.msk.f32.mxu0 %vm564_vm0, %v9198_v52  ;;  %v8734_v45 = vpop.xlane.xlu0 %8733  ;;  %v9104_v58 = vadd.f32 %v16969_v54, %v9067_v39  ;;  %v17459_v15 = vld [vmem:[#allocation2_spill] sm:$0xff]  ;;  %v17460_v39 = vld [vmem:[#allocation3_spill] sm:$0xff] }
 0xc5c   : > { %12176 = vrsqrt.f32 %v8970_v63  ;;  %v8812_v46 = vmul.f32 0.03125, %v8734_v45  ;;  %11323 = vmatmul.mubr.msk.f32.vlgmr.msra.gmra.mrb[0].mxu0 %vm564_vm0, %v9199_v14  ;;  %v9137_v2 = vmul.f32 0.2, %v9105_v26 }
 0xc5d   : > { %v12171_v10 = vpop.eup %12170  ;;  %v8877_v12 = vsub.f32 %v8813_v4, %v8845_v50  ;;  %v9136_v8 = vmul.f32 0.2, %v9104_v58 }
 0xc5e   : > { %v12173_v20 = vpop.eup %12172  ;;  %v9033_v49 = vmul.f32 %v12171_v10, %v8937_v40  ;;  %v8876_v17 = vsub.f32 %v8812_v46, %v8844_v27  ;;  %v8583_v59 = vpop.xlane.xlu1 %8582  ;;  %v9169_v21 = vmax.f32 %v9105_v26, %v9137_v2  ;;  %v8939_v46 = vsub.f32 %v16728_v62, %v16971_v44 }
 0xc5f   : > { %v9032_v22 = vmul.f32 %v12173_v20, %v8936_v42  ;;  %v8909_v0 = vmax.f32 %v8877_v12, 0.0  ;;  %v17007_v11 = vmul.f32 0.03125, %v8583_v59  ;;  %v8580_v6 = vpop.xlane.xlu0 %8579  ;;  %v9168_v56 = vmax.f32 %v9104_v58, %v9136_v8 }
 0xc60   : > { %v8908_v34 = vmax.f32 %v8876_v17, 0.0  ;;  %v17009_v9 = vmul.f32 0.03125, %v8580_v6  ;;  %v9070_v52 = vmul.f32 %v16965_v41, %v9033_v49  ;;  %v9201_v50 = vadd.f32 %v9169_v21, %v17460_v39 }
 0xc61   : > { %v8973_v29 = vadd.f32 1e-05, %v8909_v0  ;;  %v8847_v40 = vmul.f32 %v17007_v11, %v17007_v11  ;;  %v9200_v14 = vadd.f32 %v9168_v56, %v17459_v15  ;;  %v9069_v26 = vmul.f32 %v16965_v41, %v9032_v22 }
 0xc62   : > { %v8972_v35 = vadd.f32 1e-05, %v8908_v34  ;;  %v8743_v63 = vpop.xlane.xlu1 %8742  ;;  %v9107_v27 = vadd.f32 %v16969_v54, %v9070_v52  ;;  %v8846_v58 = vmul.f32 %v17009_v9, %v17009_v9  ;;  %v8938_v12 = vsub.f32 %v16731_v30, %v16974_v43 }
 0xc63   : > { %12178 = vrsqrt.f32 %v8973_v29  ;;  %v8815_v4 = vmul.f32 0.03125, %v8743_v63  ;;  %v8740_v45 = vpop.xlane.xlu0 %8739  ;;  %11325 = vmatprep.mubr.msk.f32.mxu0 %vm564_vm0, %v9200_v14  ;;  %v9106_v20 = vadd.f32 %v16969_v54, %v9069_v26 }
 0xc64   : > { %12180 = vrsqrt.f32 %v8972_v35  ;;  %v8814_v10 = vmul.f32 0.03125, %v8740_v45  ;;  %11326 = vmatmul.mubr.msk.f32.gmra.mrb[2].mxu0 %vm564_vm0, %v9201_v50  ;;  %v9139_v49 = vmul.f32 0.2, %v9107_v27  ;;  %v8941_v35 = vsub.f32 %v16744_v61, %v16987_v1  ;;  %v17461_v50 = vld [vmem:[#allocation4_spill] sm:$0xff] }
 0xc65   : > { %v12175_v42 = vpop.eup %12174  ;;  %v8879_v2 = vsub.f32 %v8815_v4, %v8847_v40  ;;  %v9138_v21 = vmul.f32 0.2, %v9106_v20 }
 0xc66   : > { %v12177_v17 = vpop.eup %12176  ;;  %v9035_v59 = vmul.f32 %v12175_v42, %v8939_v46  ;;  %v8878_v62 = vsub.f32 %v8814_v10, %v8846_v58  ;;  %v8589_v44 = vpop.xlane.xlu1 %8588  ;;  %v9171_v30 = vmax.f32 %v9107_v27, %v9139_v49  ;;  %v17462_v46 = vld [vmem:[#allocation5_spill] sm:$0xff]  ;;  %v8940_v10 = vsub.f32 %v16747_v53, %v16989_v51 }
 0xc67   : > { %v9034_v8 = vmul.f32 %v12177_v17, %v8938_v12  ;;  %v8911_v22 = vmax.f32 %v8879_v2, 0.0  ;;  %v17027_v0 = vmul.f32 0.03125, %v8589_v44  ;;  %v8586_v6 = vpop.xlane.xlu0 %8585  ;;  %v9170_v29 = vmax.f32 %v9106_v20, %v9138_v21 }
 0xc68   : > { %v8910_v34 = vmax.f32 %v8878_v62, 0.0  ;;  %v17029_v56 = vmul.f32 0.03125, %v8586_v6  ;;  %v9072_v43 = vmul.f32 %v16965_v41, %v9035_v59  ;;  %v9203_v58 = vadd.f32 %v9171_v30, %v17462_v46 }
 0xc69   : > { %v8975_v52 = vadd.f32 1e-05, %v8911_v22  ;;  %v8849_v63 = vmul.f32 %v17027_v0, %v17027_v0  ;;  %v9202_v4 = vadd.f32 %v9170_v29, %v17461_v50  ;;  %v9071_v26 = vmul.f32 %v16965_v41, %v9034_v8 }
 0xc6a   : > { %v8974_v40 = vadd.f32 1e-05, %v8910_v34  ;;  %v8848_v15 = vmul.f32 %v17029_v56, %v17029_v56  ;;  %v8749_v14 = vpop.xlane.xlu1 %8748  ;;  %v9109_v61 = vadd.f32 %v16969_v54, %v9072_v43  ;;  %v8942_v46 = vsub.f32 %v16763_v33, %v17009_v9 }
 0xc6b   : > { %12182 = vrsqrt.f32 %v8975_v52  ;;  %v8817_v39 = vmul.f32 0.03125, %v8749_v14  ;;  %v8746_v45 = vpop.xlane.xlu0 %8745  ;;  %11328 = vmatprep.mubr.msk.f32.mxu0 %vm564_vm0, %v9202_v4  ;;  %v9108_v12 = vadd.f32 %v16969_v54, %v9071_v26  ;;  %v8943_v52 = vsub.f32 %v16760_v37, %v17007_v11  ;;  %v17463_v14 = vld [vmem:[#allocation6_spill] sm:$0xff]  ;;  %v17464_v26 = vld [vmem:[#allocation7_spill] sm:$0xff] }
 0xc6c   : > { %12184 = vrsqrt.f32 %v8974_v40  ;;  %v8816_v27 = vmul.f32 0.03125, %v8746_v45  ;;  %11329 = vmatmul.mubr.msk.f32.gmra.mrb[4].mxu0 %vm564_vm0, %v9203_v58  ;;  %v9141_v59 = vmul.f32 0.2, %v9109_v61 }
 0xc6d   : > { %v12179_v1 = vpop.eup %12178  ;;  %v8881_v42 = vsub.f32 %v8817_v39, %v8849_v63  ;;  %v9140_v6 = vmul.f32 0.2, %v9108_v12 }
 0xc6e   : > { %v12181_v2 = vpop.eup %12180  ;;  %v9037_v20 = vmul.f32 %v12179_v1, %v8941_v35  ;;  %v8880_v49 = vsub.f32 %v8816_v27, %v8848_v15  ;;  %v8595_v17 = vpop.xlane.xlu1 %8594  ;;  %v9173_v51 = vmax.f32 %v9109_v61, %v9141_v59 }
 0xc6f   : > { %v9036_v62 = vmul.f32 %v12181_v2, %v8940_v10  ;;  %v8913_v44 = vmax.f32 %v8881_v42, 0.0  ;;  %v17047_v8 = vmul.f32 0.03125, %v8595_v17  ;;  %v8592_v22 = vpop.xlane.xlu0 %8591  ;;  %v9172_v43 = vmax.f32 %v9108_v12, %v9140_v6 }
 0xc70   : > { %v8912_v21 = vmax.f32 %v8880_v49, 0.0  ;;  %v17049_v53 = vmul.f32 0.03125, %v8592_v22  ;;  %v9074_v34 = vmul.f32 %v16965_v41, %v9037_v20  ;;  %v9205_v27 = vadd.f32 %v9173_v51, %v17464_v26 }
 0xc71   : > { %v8977_v30 = vadd.f32 1e-05, %v8913_v44  ;;  %v8851_v35 = vmul.f32 %v17047_v8, %v17047_v8  ;;  %v9204_v39 = vadd.f32 %v9172_v43, %v17463_v14  ;;  %v9073_v4 = vmul.f32 %v16965_v41, %v9036_v62 }
 0xc72   : > { %v8976_v29 = vadd.f32 1e-05, %v8912_v21  ;;  %v8850_v40 = vmul.f32 %v17049_v53, %v17049_v53  ;;  %v8755_v63 = vpop.xlane.xlu1 %8754  ;;  %v9111_v37 = vadd.f32 %v16969_v54, %v9074_v34  ;;  %v8945_v51 = vsub.f32 %v16782_v3, %v17027_v0 }
 0xc73   : > { %12186 = vrsqrt.f32 %v8977_v30  ;;  %v8819_v15 = vmul.f32 0.03125, %v8755_v63  ;;  %v8752_v50 = vpop.xlane.xlu0 %8751  ;;  %11331 = vmatprep.mubr.msk.f32.mxu0 %vm564_vm0, %v9204_v39  ;;  %v9110_v61 = vadd.f32 %v16969_v54, %v9073_v4  ;;  %v17466_v39 = vld [vmem:[#allocation9_spill] sm:$0xff]  ;;  %v8944_v4 = vsub.f32 %v16791_v36, %v17029_v56 }
 0xc74   : > { %12188 = vrsqrt.f32 %v8976_v29  ;;  %v8818_v45 = vmul.f32 0.03125, %v8752_v50  ;;  %11332 = vmatmul.mubr.msk.f32.gmra.mrb[6].mxu0 %vm564_vm0, %v9205_v27  ;;  %v9143_v2 = vmul.f32 0.2, %v9111_v37 }
 0xc75   : > { %v12183_v11 = vpop.eup %12182  ;;  %v8883_v58 = vsub.f32 %v8819_v15, %v8851_v35  ;;  %v9142_v62 = vmul.f32 0.2, %v9110_v61  ;;  %v17465_v35 = vld [vmem:[#allocation8_spill] sm:$0xff] }
 0xc76   : > { %v12185_v1 = vpop.eup %12184  ;;  %v9039_v10 = vmul.f32 %v12183_v11, %v8943_v52  ;;  %v8882_v42 = vsub.f32 %v8818_v45, %v8850_v40  ;;  %v8601_v12 = vpop.xlane.xlu1 %8600  ;;  %v9175_v9 = vmax.f32 %v9111_v37, %v9143_v2 }
 0xc77   : > { %v9038_v20 = vmul.f32 %v12185_v1, %v8942_v46  ;;  %v8915_v49 = vmax.f32 %v8883_v58, 0.0  ;;  %v17067_v17 = vmul.f32 0.03125, %v8601_v12  ;;  %v8598_v59 = vpop.xlane.xlu0 %8597  ;;  %v9174_v21 = vmax.f32 %v9110_v61, %v9142_v62 }
 0xc78   : > { %v8914_v44 = vmax.f32 %v8882_v42, 0.0  ;;  %v17069_v33 = vmul.f32 0.03125, %v8598_v59  ;;  %v9076_v22 = vmul.f32 %v16965_v41, %v9039_v10  ;;  %v9207_v50 = vadd.f32 %v9175_v9, %v17466_v39 }
 0xc79   : > { %v8979_v6 = vadd.f32 1e-05, %v8915_v49  ;;  %v8853_v30 = vmul.f32 %v17067_v17, %v17067_v17  ;;  %v9206_v40 = vadd.f32 %v9174_v21, %v17465_v35  ;;  %v9075_v15 = vmul.f32 %v16965_v41, %v9038_v20 }
 0xc7a   : > { %v8978_v34 = vadd.f32 1e-05, %v8914_v44  ;;  %v8852_v43 = vmul.f32 %v17069_v33, %v17069_v33  ;;  %v8761_v52 = vpop.xlane.xlu1 %8760  ;;  %v9113_v3 = vadd.f32 %v16969_v54, %v9076_v22  ;;  %v8947_v62 = vsub.f32 %v16804_v16, %v17047_v8 }
 0xc7b   : > { %12190 = vrsqrt.f32 %v8979_v6  ;;  %v8821_v29 = vmul.f32 0.03125, %v8761_v52  ;;  %v8758_v63 = vpop.xlane.xlu0 %8757  ;;  %11334 = vmatprep.mubr.msk.f32.mxu0 %vm564_vm0, %v9206_v40  ;;  %v9112_v26 = vadd.f32 %v16969_v54, %v9075_v15  ;;  %v8946_v40 = vsub.f32 %v16807_v38, %v17049_v53 }
 0xc7c   : > { %12192 = vrsqrt.f32 %v8978_v34  ;;  %v8820_v14 = vmul.f32 0.03125, %v8758_v63  ;;  %11335 = vmatmul.mubr.msk.f32.gmra.mrb[8].mxu0 %vm564_vm0, %v9207_v50  ;;  %v9145_v58 = vmul.f32 0.2, %v9113_v3 }
 0xc7d   : > { %v12187_v0 = vpop.eup %12186  ;;  %v8885_v45 = vsub.f32 %v8821_v29, %v8853_v30  ;;  %v9144_v12 = vmul.f32 0.2, %v9112_v26  ;;  %v17468_v29 = vld [vmem:[#allocation11_spill] sm:$0xff] }
 0xc7e   : > { %v12189_v27 = vpop.eup %12188  ;;  %v9041_v37 = vmul.f32 %v12187_v0, %v8945_v51  ;;  %v8884_v11 = vsub.f32 %v8820_v14, %v8852_v43  ;;  %v8607_v46 = vpop.xlane.xlu1 %8606  ;;  %v9177_v56 = vmax.f32 %v9113_v3, %v9145_v58  ;;  %v17467_v51 = vld [vmem:[#allocation10_spill] sm:$0xff] }
 0xc7f   : > { %v9040_v61 = vmul.f32 %v12189_v27, %v8944_v4  ;;  %v8917_v1 = vmax.f32 %v8885_v45, 0.0  ;;  %v17087_v10 = vmul.f32 0.03125, %v8607_v46  ;;  %v8604_v42 = vpop.xlane.xlu0 %8603  ;;  %v9176_v59 = vmax.f32 %v9112_v26, %v9144_v12 }
 0xc80   : > { %v8916_v2 = vmax.f32 %v8884_v11, 0.0  ;;  %v17089_v36 = vmul.f32 0.03125, %v8604_v42  ;;  %v9078_v20 = vmul.f32 %v16965_v41, %v9041_v37  ;;  %v9209_v35 = vadd.f32 %v9177_v56, %v17468_v29 }
 0xc81   : > { %v8981_v49 = vadd.f32 1e-05, %v8917_v1  ;;  %v8855_v9 = vmul.f32 %v17087_v10, %v17087_v10  ;;  %v9208_v34 = vadd.f32 %v9176_v59, %v17467_v51  ;;  %v9077_v43 = vmul.f32 %v16965_v41, %v9040_v61 }
 0xc82   : > { %v8980_v44 = vadd.f32 1e-05, %v8916_v2  ;;  %v8854_v22 = vmul.f32 %v17089_v36, %v17089_v36  ;;  %v8767_v6 = vpop.xlane.xlu1 %8766  ;;  %v9115_v16 = vadd.f32 %v16969_v54, %v9078_v20  ;;  %v8949_v1 = vsub.f32 %v16820_v23, %v17067_v17 }
 0xc83   : > { %12194 = vrsqrt.f32 %v8981_v49  ;;  %v8823_v21 = vmul.f32 0.03125, %v8767_v6  ;;  %v8764_v30 = vpop.xlane.xlu0 %8763  ;;  %11337 = vmatprep.mubr.msk.f32.mxu0 %vm564_vm0, %v9208_v34  ;;  %v9114_v15 = vadd.f32 %v16969_v54, %v9077_v43  ;;  %v17469_v49 = vld [vmem:[#allocation12_spill] sm:$0xff] }
 0xc84   : > { %12196 = vrsqrt.f32 %v8980_v44  ;;  %v8822_v52 = vmul.f32 0.03125, %v8764_v30  ;;  %11338 = vmatmul.mubr.msk.f32.gmra.mrb[10].mxu0 %vm564_vm0, %v9209_v35  ;;  %v9147_v0 = vmul.f32 0.2, %v9115_v16 }
 0xc85   : > { %v12191_v8 = vpop.eup %12190  ;;  %v8887_v63 = vsub.f32 %v8823_v21, %v8855_v9  ;;  %v9146_v37 = vmul.f32 0.2, %v9114_v15  ;;  %v8948_v21 = vsub.f32 %v16823_v55, %v17069_v33 }
 0xc86   : > { %v12193_v14 = vpop.eup %12192  ;;  %v9043_v39 = vmul.f32 %v12191_v8, %v8947_v62  ;;  %v8886_v50 = vsub.f32 %v8822_v52, %v8854_v22  ;;  %v8613_v3 = vpop.xlane.xlu1 %8612  ;;  %v9179_v53 = vmax.f32 %v9115_v16, %v9147_v0  ;;  %v17470_v22 = vld [vmem:[#allocation13_spill] sm:$0xff]  ;;  %v8951_v0 = vsub.f32 %v16836_v47, %v17087_v10 }
 0xc87   : > { %v9042_v4 = vmul.f32 %v12193_v14, %v8946_v40  ;;  %v8919_v45 = vmax.f32 %v8887_v63, 0.0  ;;  %v17107_v26 = vmul.f32 0.03125, %v8613_v3  ;;  %v8610_v27 = vpop.xlane.xlu0 %8609  ;;  %v9178_v61 = vmax.f32 %v9114_v15, %v9146_v37 }
 0xc88   : > { %v8918_v11 = vmax.f32 %v8886_v50, 0.0  ;;  %v17109_v38 = vmul.f32 0.03125, %v8610_v27  ;;  %v9080_v46 = vmul.f32 %v16965_v41, %v9043_v39  ;;  %v9211_v6 = vadd.f32 %v9179_v53, %v17470_v22  ;;  %v17471_v53 = vld [vmem:[#allocation14_spill] sm:$0xff] }
 0xc89   : > { %v8983_v58 = vadd.f32 1e-05, %v8919_v45  ;;  %v8857_v12 = vmul.f32 %v17107_v26, %v17107_v26  ;;  %v9210_v59 = vadd.f32 %v9178_v61, %v17469_v49  ;;  %v9079_v44 = vmul.f32 %v16965_v41, %v9042_v4 }
 0xc8a   : > { %v8982_v42 = vadd.f32 1e-05, %v8918_v11  ;;  %v8856_v2 = vmul.f32 %v17109_v38, %v17109_v38  ;;  %v8773_v56 = vpop.xlane.xlu1 %8772  ;;  %v9117_v23 = vadd.f32 %v16969_v54, %v9080_v46 }
 0xc8b   : > { %12198 = vrsqrt.f32 %v8983_v58  ;;  %v8825_v20 = vmul.f32 0.03125, %v8773_v56  ;;  %v8770_v62 = vpop.xlane.xlu0 %8769  ;;  %11340 = vmatprep.mubr.msk.f32.mxu0 %vm564_vm0, %v9210_v59  ;;  %v9116_v34 = vadd.f32 %v16969_v54, %v9079_v44 }
 0xc8c   : > { %12200 = vrsqrt.f32 %v8982_v42  ;;  %v8824_v9 = vmul.f32 0.03125, %v8770_v62  ;;  %11341 = vmatmul.mubr.msk.f32.gmra.mrb[12].mxu0 %vm564_vm0, %v9211_v6  ;;  %v9149_v35 = vmul.f32 0.2, %v9117_v23  ;;  %v17472_v42 = vld [vmem:[#allocation15_spill] sm:$0xff] }
 0xc8d   : > { %v12195_v17 = vpop.eup %12194  ;;  %v8889_v51 = vsub.f32 %v8825_v20, %v8857_v12  ;;  %v9148_v15 = vmul.f32 0.2, %v9116_v34 }
 0xc8e   : > { %v12197_v30 = vpop.eup %12196  ;;  %v9045_v43 = vmul.f32 %v12195_v17, %v8949_v1  ;;  %v8888_v52 = vsub.f32 %v8824_v9, %v8856_v2  ;;  %v8619_v29 = vpop.xlane.xlu1 %8618  ;;  %v9181_v33 = vmax.f32 %v9117_v23, %v9149_v35  ;;  %v8950_v2 = vsub.f32 %v16839_v7, %v17089_v36 }
 0xc8f   : > { %v9044_v16 = vmul.f32 %v12197_v30, %v8948_v21  ;;  %v8921_v8 = vmax.f32 %v8889_v51, 0.0  ;;  %v17127_v40 = vmul.f32 0.03125, %v8619_v29  ;;  %v8616_v63 = vpop.xlane.xlu0 %8615  ;;  %v9180_v3 = vmax.f32 %v9116_v34, %v9148_v15  ;;  %v17473_v15 = vld [vmem:[#allocation16_spill] sm:$0xff] }
 0xc90   : > { %v8920_v14 = vmax.f32 %v8888_v52, 0.0  ;;  %v17129_v55 = vmul.f32 0.03125, %v8616_v63  ;;  %v9082_v39 = vmul.f32 %v16965_v41, %v9045_v43  ;;  %v9213_v12 = vadd.f32 %v9181_v33, %v17472_v42 }
 0xc91   : > { %v8985_v50 = vadd.f32 1e-05, %v8921_v8  ;;  %v8859_v45 = vmul.f32 %v17127_v40, %v17127_v40  ;;  %v9212_v46 = vadd.f32 %v9180_v3, %v17471_v53  ;;  %v9081_v61 = vmul.f32 %v16965_v41, %v9044_v16  ;;  %v17474_v3 = vld [vmem:[#allocation17_spill] sm:$0xff] }
 0xc92   : > { %v8984_v4 = vadd.f32 1e-05, %v8920_v14  ;;  %v8858_v27 = vmul.f32 %v17129_v55, %v17129_v55  ;;  %v8779_v37 = vpop.xlane.xlu1 %8778  ;;  %v9119_v47 = vadd.f32 %v16969_v54, %v9082_v39  ;;  %v8953_v52 = vsub.f32 %v16852_v60, %v17107_v26 }
 0xc93   : > { %12202 = vrsqrt.f32 %v8985_v50  ;;  %v8827_v11 = vmul.f32 0.03125, %v8779_v37  ;;  %v8776_v58 = vpop.xlane.xlu0 %8775  ;;  %11343 = vmatprep.mubr.msk.f32.mxu0 %vm564_vm0, %v9212_v46  ;;  %v9118_v20 = vadd.f32 %v16969_v54, %v9081_v61 }
 0xc94   : > { %12204 = vrsqrt.f32 %v8984_v4  ;;  %v8826_v1 = vmul.f32 0.03125, %v8776_v58  ;;  %11344 = vmatmul.mubr.msk.f32.gmra.mrb[14].mxu0 %vm564_vm0, %v9213_v12  ;;  %v9151_v9 = vmul.f32 0.2, %v9119_v47  ;;  %v8952_v4 = vsub.f32 %v16855_v18, %v17109_v38 }
 0xc95   : > { %v12199_v10 = vpop.eup %12198  ;;  %v8891_v56 = vsub.f32 %v8827_v11, %v8859_v45  ;;  %v9150_v21 = vmul.f32 0.2, %v9118_v20 }
 0xc96   : > { %v12201_v49 = vpop.eup %12200  ;;  %v9047_v59 = vmul.f32 %v12199_v10, %v8951_v0  ;;  %v8890_v62 = vsub.f32 %v8826_v1, %v8858_v27  ;;  %v8625_v44 = vpop.xlane.xlu1 %8624  ;;  %v9183_v36 = vmax.f32 %v9119_v47, %v9151_v9 }
 0xc97   : > { %v9046_v22 = vmul.f32 %v12201_v49, %v8950_v2  ;;  %v8923_v6 = vmax.f32 %v8891_v56, 0.0  ;;  %v17147_v23 = vmul.f32 0.03125, %v8625_v44  ;;  %v8622_v17 = vpop.xlane.xlu0 %8621  ;;  %v9182_v43 = vmax.f32 %v9118_v20, %v9150_v21 }
 0xc98   : > { %v8922_v51 = vmax.f32 %v8890_v62, 0.0  ;;  %v17149_v7 = vmul.f32 0.03125, %v8622_v17  ;;  %v9084_v34 = vmul.f32 %v16965_v41, %v9047_v59  ;;  %v9215_v0 = vadd.f32 %v9183_v36, %v17474_v3 }
 0xc99   : > { %v8987_v30 = vadd.f32 1e-05, %v8923_v6  ;;  %v8861_v35 = vmul.f32 %v17147_v23, %v17147_v23  ;;  %v9214_v14 = vadd.f32 %v9182_v43, %v17473_v15  ;;  %v9083_v39 = vmul.f32 %v16965_v41, %v9046_v22  ;;  %v17475_v6 = vld [vmem:[#allocation18_spill] sm:$0xff] }
 0xc9a   : > { %v8986_v29 = vadd.f32 1e-05, %v8922_v51  ;;  %v8860_v16 = vmul.f32 %v17149_v7, %v17149_v7  ;;  %v8785_v8 = vpop.xlane.xlu1 %8784  ;;  %v9121_v60 = vadd.f32 %v16969_v54, %v9084_v34  ;;  %v8955_v49 = vsub.f32 %v16868_v19, %v17127_v40  ;;  %v17476_v34 = vld [vmem:[#allocation19_spill] sm:$0xff] }
 0xc9b   : > { %12206 = vrsqrt.f32 %v8987_v30  ;;  %v8829_v63 = vmul.f32 0.03125, %v8785_v8  ;;  %v8782_v33 = vpop.xlane.xlu0 %8781  ;;  %11346 = vmatprep.mubr.msk.f32.mxu0 %vm564_vm0, %v9214_v14  ;;  %v9120_v27 = vadd.f32 %v16969_v54, %v9083_v39  ;;  %v8954_v43 = vsub.f32 %v16871_v5, %v17129_v55 }
 0xc9c   : > { %12208 = vrsqrt.f32 %v8986_v29  ;;  %v8828_v50 = vmul.f32 0.03125, %v8782_v33  ;;  %11347 = vmatmul.mubr.msk.f32.gmra.mrb[16].mxu0 %vm564_vm0, %v9215_v0  ;;  %v9153_v58 = vmul.f32 0.2, %v9121_v60 }
 0xc9d   : > { %v12203_v26 = vpop.eup %12202  ;;  %v8893_v45 = vsub.f32 %v8829_v63, %v8861_v35  ;;  %v9152_v47 = vmul.f32 0.2, %v9120_v27 }
 0xc9e   : > { %v12205_v37 = vpop.eup %12204  ;;  %v9049_v11 = vmul.f32 %v12203_v26, %v8953_v52  ;;  %v8892_v53 = vsub.f32 %v8828_v50, %v8860_v16  ;;  %v8631_v46 = vpop.xlane.xlu1 %8630  ;;  %v9185_v38 = vmax.f32 %v9121_v60, %v9153_v58  ;;  %v17477_v58 = vld [vmem:[#allocation20_spill] sm:$0xff] }
 0xc9f   : > { %v9048_v61 = vmul.f32 %v12205_v37, %v8952_v4  ;;  %v8925_v1 = vmax.f32 %v8893_v45, 0.0  ;;  %v17167_v42 = vmul.f32 0.03125, %v8631_v46  ;;  %v8628_v12 = vpop.xlane.xlu0 %8627  ;;  %v9184_v20 = vmax.f32 %v9120_v27, %v9152_v47 }
 0xca0   : > { %v8924_v10 = vmax.f32 %v8892_v53, 0.0  ;;  %v17169_v18 = vmul.f32 0.03125, %v8628_v12  ;;  %v9086_v2 = vmul.f32 %v16965_v41, %v9049_v11  ;;  %v9217_v30 = vadd.f32 %v9185_v38, %v17476_v34 }
 0xca1   : > { %v8989_v56 = vadd.f32 1e-05, %v8925_v1  ;;  %v8863_v62 = vmul.f32 %v17167_v42, %v17167_v42  ;;  %v9216_v17 = vadd.f32 %v9184_v20, %v17475_v6  ;;  %v9085_v51 = vmul.f32 %v16965_v41, %v9048_v61 }
 0xca2   : > { %v8988_v59 = vadd.f32 1e-05, %v8924_v10  ;;  %v8862_v44 = vmul.f32 %v17169_v18, %v17169_v18  ;;  %v8791_v9 = vpop.xlane.xlu1 %8790  ;;  %v9123_v19 = vadd.f32 %v16969_v54, %v9086_v2  ;;  %v8957_v45 = vsub.f32 %v16884_v24, %v17147_v23  ;;  %v17478_v10 = vld [vmem:[#allocation21_spill] sm:$0xff] }
 0xca3   : > { %12210 = vrsqrt.f32 %v8989_v56  ;;  %v8831_v22 = vmul.f32 0.03125, %v8791_v9  ;;  %v8788_v21 = vpop.xlane.xlu0 %8787  ;;  %11349 = vmatprep.mubr.msk.f32.mxu0 %vm564_vm0, %v9216_v17  ;;  %v9122_v29 = vadd.f32 %v16969_v54, %v9085_v51  ;;  %v8956_v2 = vsub.f32 %v16887_v13, %v17149_v7 }
 0xca4   : > { %12212 = vrsqrt.f32 %v8988_v59  ;;  %v8830_v36 = vmul.f32 0.03125, %v8788_v21  ;;  %11350 = vmatmul.mubr.msk.f32.gmra.mrb[18].mxu0 %vm564_vm0, %v9217_v30  ;;  %v9155_v15 = vmul.f32 0.2, %v9123_v19 }
 0xca5   : > { %v12207_v40 = vpop.eup %12206  ;;  %v8895_v52 = vsub.f32 %v8831_v22, %v8863_v62  ;;  %v9154_v3 = vmul.f32 0.2, %v9122_v29 }
 0xca6   : > { %v12209_v35 = vpop.eup %12208  ;;  %v9051_v16 = vmul.f32 %v12207_v40, %v8955_v49  ;;  %v8894_v8 = vsub.f32 %v8830_v36, %v8862_v44  ;;  %v8637_v63 = vpop.xlane.xlu1 %8636  ;;  %v9187_v55 = vmax.f32 %v9123_v19, %v9155_v15  ;;  %v8959_v40 = vsub.f32 %v16900_v57, %v17167_v42 }
 0xca7   : > { %v9050_v14 = vmul.f32 %v12209_v35, %v8954_v43  ;;  %v8927_v33 = vmax.f32 %v8895_v52, 0.0  ;;  %v17187_v39 = vmul.f32 0.03125, %v8637_v63  ;;  %v8634_v50 = vpop.xlane.xlu0 %8633  ;;  %v9186_v4 = vmax.f32 %v9122_v29, %v9154_v3 }
 0xca8   : > { %v8926_v0 = vmax.f32 %v8894_v8, 0.0  ;;  %v17189_v5 = vmul.f32 0.03125, %v8634_v50  ;;  %v9088_v60 = vmul.f32 %v16965_v41, %v9051_v16  ;;  %v9219_v38 = vadd.f32 %v9187_v55, %v17478_v10  ;;  %v17479_v8 = vld [vmem:[#allocation22_spill] sm:$0xff]  ;;  %v17480_v50 = vld [vmem:[#allocation23_spill] sm:$0xff]  ;;  %v17481_v10 = vld [vmem:[#allocation24_spill] sm:$0xff] }
 0xca9   : > { %v8991_v26 = vadd.f32 1e-05, %v8927_v33  ;;  %v8865_v37 = vmul.f32 %v17187_v39, %v17187_v39  ;;  %v9218_v61 = vadd.f32 %v9186_v4, %v17477_v58  ;;  %v9087_v12 = vmul.f32 %v16965_v41, %v9050_v14 }
 0xcaa   : > { %v8990_v27 = vadd.f32 1e-05, %v8926_v0  ;;  %v8864_v11 = vmul.f32 %v17189_v5, %v17189_v5  ;;  %v8797_v53 = vpop.xlane.xlu1 %8796  ;;  %v9125_v24 = vadd.f32 %v16969_v54, %v9088_v60  ;;  %v8958_v0 = vsub.f32 %v16903_v28, %v17169_v18 }
 0xcab   : > { %12214 = vrsqrt.f32 %v8991_v26  ;;  %v8833_v46 = vmul.f32 0.03125, %v8797_v53  ;;  %v8794_v1 = vpop.xlane.xlu0 %8793  ;;  %11352 = vmatprep.mubr.msk.f32.mxu0 %vm564_vm0, %v9218_v61  ;;  %v9124_v20 = vadd.f32 %v16969_v54, %v9087_v12 }
 0xcac   : > { %12216 = vrsqrt.f32 %v8990_v27  ;;  %v8832_v47 = vmul.f32 0.03125, %v8794_v1  ;;  %11353 = vmatmul.mubr.msk.f32.gmra.mrb[20].mxu0 %vm564_vm0, %v9219_v38  ;;  %v9157_v9 = vmul.f32 0.2, %v9125_v24 }
 0xcad   : > { %v12211_v23 = vpop.eup %12210  ;;  %v8897_v56 = vsub.f32 %v8833_v46, %v8865_v37  ;;  %v9156_v51 = vmul.f32 0.2, %v9124_v20 }
 0xcae   : > { %v12213_v49 = vpop.eup %12212  ;;  %v9053_v59 = vmul.f32 %v12211_v23, %v8957_v45  ;;  %v8896_v62 = vsub.f32 %v8832_v47, %v8864_v11  ;;  %v8643_v44 = vpop.xlane.xlu1 %8642  ;;  %v9189_v7 = vmax.f32 %v9125_v24, %v9157_v9  ;;  %v8961_v23 = vsub.f32 %v16916_v31, %v17187_v39  ;;  %v17483_v39 = vld [vmem:[#allocation26_spill] sm:$0xff] }
 0xcaf   : > { %v9052_v22 = vmul.f32 %v12213_v49, %v8956_v2  ;;  %v8929_v6 = vmax.f32 %v8897_v56, 0.0  ;;  %v17207_v17 = vmul.f32 0.03125, %v8643_v44  ;;  %v8640_v21 = vpop.xlane.xlu0 %8639  ;;  %v9188_v19 = vmax.f32 %v9124_v20, %v9156_v51  ;;  %v17482_v2 = vld [vmem:[#allocation25_spill] sm:$0xff] }
 0xcb0   : > { %v8928_v36 = vmax.f32 %v8896_v62, 0.0  ;;  %v17209_v13 = vmul.f32 0.03125, %v8640_v21  ;;  %v9090_v34 = vmul.f32 %v16965_v41, %v9053_v59  ;;  %v9221_v3 = vadd.f32 %v9189_v7, %v17480_v50  ;;  %v17484_v7 = vld [vmem:[#allocation27_spill] sm:$0xff] }
 0xcb1   : > { %v8993_v30 = vadd.f32 1e-05, %v8929_v6  ;;  %v8867_v52 = vmul.f32 %v17207_v17, %v17207_v17  ;;  %v9220_v63 = vadd.f32 %v9188_v19, %v17479_v8  ;;  %v9089_v14 = vmul.f32 %v16965_v41, %v9052_v22 }
 0xcb2   : > { %v8992_v43 = vadd.f32 1e-05, %v8928_v36  ;;  %v8866_v29 = vmul.f32 %v17209_v13, %v17209_v13  ;;  %v8803_v35 = vpop.xlane.xlu1 %8802  ;;  %v9127_v57 = vadd.f32 %v16969_v54, %v9090_v34  ;;  %v8960_v59 = vsub.f32 %v16919_v48, %v17189_v5 }
 0xcb3   : > { %12218 = vrsqrt.f32 %v8993_v30  ;;  %v8835_v16 = vmul.f32 0.03125, %v8803_v35  ;;  %v8800_v15 = vpop.xlane.xlu0 %8799  ;;  %11355 = vmatprep.mubr.msk.f32.mxu0 %vm564_vm0, %v9220_v63  ;;  %v9126_v60 = vadd.f32 %v16969_v54, %v9089_v14  ;;  %v8963_v30 = vsub.f32 %v16932_v32, %v17207_v17  ;;  %v12293_v63 = vld [vmem:[%s13364_s27 + $0x3] ss:$0 sm:$0xff]  ;;  %v17485_v14 = vld [vmem:[#allocation28_spill] sm:$0xff]  ;;  %v17486_v32 = vld [vmem:[#allocation29_spill] sm:$0xff] }
 0xcb4   : > { %12220 = vrsqrt.f32 %v8992_v43  ;;  %v8834_v33 = vmul.f32 0.03125, %v8800_v15  ;;  %11356 = vmatmul.mubr.msk.f32.gmra.mrb[22].mxu0 %vm564_vm0, %v9221_v3  ;;  %v9159_v27 = vmul.f32 0.2, %v9127_v57 }
 0xcb5   : > { %v12215_v42 = vpop.eup %12214  ;;  %v8899_v55 = vsub.f32 %v8835_v16, %v8867_v52  ;;  %v9158_v53 = vmul.f32 0.2, %v9126_v60 }
 0xcb6   : > { %v12217_v26 = vpop.eup %12216  ;;  %v9055_v4 = vmul.f32 %v12215_v42, %v8959_v40  ;;  %v8898_v45 = vsub.f32 %v8834_v33, %v8866_v29  ;;  %v9191_v58 = vmax.f32 %v9127_v57, %v9159_v27  ;;  %v12294_v57 = vld [vmem:[%s13375_s30 + $0x3] ss:$0 sm:$0xff]  ;;  %v9993_v27 = vld [vmem:[%s17393_s7 + $0x1] ss:$0 sm:$0xff] }
 0xcb7   : > { %v9054_v37 = vmul.f32 %v12217_v26, %v8958_v0  ;;  %v8931_v11 = vmax.f32 %v8899_v55, 0.0  ;;  %v9190_v28 = vmax.f32 %v9126_v60, %v9158_v53  ;;  %v17487_v60 = vld [vmem:[#allocation30_spill] sm:$0xff] }
 0xcb8   : > { %v8930_v46 = vmax.f32 %v8898_v45, 0.0  ;;  %v9092_v61 = vmul.f32 %v16965_v41, %v9055_v4  ;;  %v9223_v56 = vadd.f32 %v9191_v58, %v17482_v2  ;;  %v17488_v4 = vld [vmem:[#allocation31_spill] sm:$0xff]  ;;  %v10229_v58 = vld [vmem:[%s17393_s7 + $0x3] ss:$0 sm:$0xff] }
 0xcb9   : > { %v8995_v1 = vadd.f32 1e-05, %v8931_v11  ;;  %v9091_v18 = vmul.f32 %v16965_v41, %v9054_v37  ;;  %v9222_v38 = vadd.f32 %v9190_v28, %v17481_v10  ;;  %v10111_v11 = vld [vmem:[%s17393_s7 + $0x2] ss:$0 sm:$0xff] }
 0xcba   : > { %v8994_v12 = vadd.f32 1e-05, %v8930_v46  ;;  %v9129_v47 = vadd.f32 %v16969_v54, %v9092_v61 }
 0xcbb   : > { %12222 = vrsqrt.f32 %v8995_v1  ;;  %v9128_v24 = vadd.f32 %v16969_v54, %v9091_v18  ;;  %11358 = vmatprep.mubr.msk.f32.mxu0 %vm564_vm0, %v9222_v38 }
 0xcbc   : > { %12224 = vrsqrt.f32 %v8994_v12  ;;  %v9161_v20 = vmul.f32 0.2, %v9129_v47  ;;  %11359 = vmatmul.mubr.msk.f32.gmra.mrb[24].mxu0 %vm564_vm0, %v9223_v56 }
 0xcbd   : > { %v12219_v49 = vpop.eup %12218  ;;  %v9160_v62 = vmul.f32 0.2, %v9128_v24 }
 0xcbe   : > { %v12221_v44 = vpop.eup %12220  ;;  %v9057_v9 = vmul.f32 %v12219_v49, %v8961_v23  ;;  %v9193_v22 = vmax.f32 %v9129_v47, %v9161_v20 }
 0xcbf   : > { %v9056_v6 = vmul.f32 %v12221_v44, %v8960_v59  ;;  %v9192_v21 = vmax.f32 %v9128_v24, %v9160_v62 }
 0xcc0   : > { %v9094_v31 = vmul.f32 %v16965_v41, %v9057_v9  ;;  %v9225_v34 = vadd.f32 %v9193_v22, %v17484_v7 }
 0xcc1   : > { %v9224_v51 = vadd.f32 %v9192_v21, %v17483_v39  ;;  %v9093_v36 = vmul.f32 %v16965_v41, %v9056_v6  ;;  %v8962_v41 = vsub.f32 %v16935_v25, %v17209_v13 }
 0xcc2   : > { %v9131_v48 = vadd.f32 %v16969_v54, %v9094_v31 }
 0xcc3   : > { %11361 = vmatprep.mubr.msk.f32.mxu0 %vm564_vm0, %v9224_v51  ;;  %v9130_v5 = vadd.f32 %v16969_v54, %v9093_v36 }
 0xcc4   : > { %11362 = vmatmul.mubr.msk.f32.gmra.mrb[26].mxu0 %vm564_vm0, %v9225_v34  ;;  %v9163_v19 = vmul.f32 0.2, %v9131_v48 }
 0xcc5   : > { %v12223_v40 = vpop.eup %12222  ;;  %v9162_v43 = vmul.f32 0.2, %v9130_v5 }
 0xcc6   : > { %v12225_v52 = vpop.eup %12224  ;;  %v9059_v29 = vmul.f32 %v12223_v40, %v8963_v30  ;;  %v9195_v35 = vmax.f32 %v9131_v48, %v9163_v19 }
 0xcc7   : > { %v9058_v16 = vmul.f32 %v12225_v52, %v8962_v41  ;;  %v9194_v8 = vmax.f32 %v9130_v5, %v9162_v43 }
 0xcc8   : > { %v9096_v15 = vmul.f32 %v12293_v63, %v9059_v29  ;;  %v9227_v17 = vadd.f32 %v9195_v35, %v17486_v32 }
 0xcc9   : > { %v9226_v33 = vadd.f32 %v9194_v8, %v17485_v14  ;;  %v9095_v50 = vmul.f32 %v12293_v63, %v9058_v16 }
 0xcca   : > { %v9133_v3 = vadd.f32 %v16969_v54, %v9096_v15  ;;  %v9879_v54 = vld [vmem:[%s17393_s7] ss:$0 sm:$0xff] }
 0xccb   : > { %11364 = vmatprep.mubr.msk.f32.mxu0 %vm564_vm0, %v9226_v33  ;;  %v9132_v42 = vadd.f32 %v12294_v57, %v9095_v50  ;;  %v11470_v37 = vadd.f32 %v9993_v27, %v9879_v54 }
 0xccc   : > { %11365 = vmatmul.mubr.msk.f32.gmra.mrb[28].mxu0 %vm564_vm0, %v9227_v17  ;;  %v9165_v25 = vmul.f32 0.2, %v9133_v3 }
 0xccd   : > { %v9164_v13 = vmul.f32 0.2, %v9132_v42  ;;  %v11471_v53 = vadd.f32 %v11470_v37, %v10111_v11 }
 0xcce   : > { %v9197_v0 = vmax.f32 %v9133_v3, %v9165_v25 }
 0xccf   : > { %v9196_v55 = vmax.f32 %v9132_v42, %v9164_v13  ;;  %v17274_v47 = vadd.f32 %v11471_v53, %v10229_v58 }
 0xcd0   : > { %v9229_v45 = vadd.f32 %v9197_v0, %v17488_v4 }
 0xcd1   : > { %v9228_v26 = vadd.f32 %v9196_v55, %v17487_v60 }
 0xcd3   : > { %11367 = vmatprep.mubr.msk.f32.mxu0 %vm564_vm0, %v9228_v26 }
 0xcd4   : > { %11368 = vmatmul.mubr.msk.f32.gmra.mrb[30].mxu0 %vm564_vm0, %v9229_v45 }
 0xd2f   : > { %v11324_v46 = vpop.f32.mrb[0].mxu0 }
 0xd30   : > { %v11468_v61 = vadd.f32 %v11471_v53, %v11324_v46  ;;  %v9405_v1 = vpop.f32.mrb[1].mxu0 }
 0xd31   : > { %v11472_v28 = vadd.f32 %v11471_v53, %v9405_v1 }
 0xd32   : > { %v11469_v18 = vadd.f32 %v11468_v61, %v10229_v58 }
 0xd33   : > { %v11473_v12 = vadd.f32 %v11472_v28, %v10229_v58 }
 0xd34   : > { %12226 = vtanh.f32 %v11469_v18 }
 0xd35   : > { %12228 = vtanh.f32 %v11473_v12 }
 0xd37   : > { %v11327_v10 = vpop.f32.mrb[2].mxu0 }
 0xd38   : > { %v11477_v38 = vadd.f32 %v17274_v47, %v11327_v10  ;;  %v9415_v24 = vpop.f32.mrb[3].mxu0 }
 0xd39   : > { %v11481_v23 = vadd.f32 %v17274_v47, %v9415_v24 }
 0xd3a   : > { %12230 = vtanh.f32 %v11477_v38 }
 0xd3b   : > { %12232 = vtanh.f32 %v11481_v23 }
 0xd3e   : > { %v12227_v2 = vpop.eup %12226 }
 0xd3f   : > { %v12229_v56 = vpop.eup %12228  ;;  %9630 = vst.msk [vmem:[%s17283_s29 + $0x8] sm:$0xff] %vm9628_vm1, %v12227_v2  ;;  %v11330_v20 = vpop.f32.mrb[4].mxu0 }
 0xd40   : > { %9629 = vst.msk [vmem:[%s17283_s29] sm:$0xff] %vm9628_vm1, %v12229_v56  ;;  %v11485_v49 = vadd.f32 %v17274_v47, %v11330_v20  ;;  %v9425_v59 = vpop.f32.mrb[5].mxu0 }
 0xd41   : > { %v11489_v62 = vadd.f32 %v17274_v47, %v9425_v59 }
 0xd42   : > { %12234 = vtanh.f32 %v11485_v49 }
 0xd43   : > { %12236 = vtanh.f32 %v11489_v62 }
 0xd44   : > { %v12231_v44 = vpop.eup %12230 }
 0xd45   : > { %v12233_v9 = vpop.eup %12232  ;;  %9632 = vst.msk [vmem:[%s17283_s29 + $0x18] sm:$0xff] %vm9628_vm1, %v12231_v44 }
 0xd46   : > { %9631 = vst.msk [vmem:[%s17283_s29 + $0x10] sm:$0xff] %vm9628_vm1, %v12233_v9 }
 0xd47   : > { %v11333_v22 = vpop.f32.mrb[6].mxu0 }
 0xd48   : > { %v11493_v6 = vadd.f32 %v17274_v47, %v11333_v22  ;;  %v9435_v21 = vpop.f32.mrb[7].mxu0 }
 0xd49   : > { %v11497_v31 = vadd.f32 %v17274_v47, %v9435_v21 }
 0xd4a   : > { %12238 = vtanh.f32 %v11493_v6 }
 0xd4b   : > { %12240 = vtanh.f32 %v11497_v31 }
 0xd4c   : > { %v12235_v39 = vpop.eup %12234 }
 0xd4d   : > { %v12237_v51 = vpop.eup %12236  ;;  %9634 = vst.msk [vmem:[%s17283_s29 + $0x28] sm:$0xff] %vm9628_vm1, %v12235_v39 }
 0xd4e   : > { %9633 = vst.msk [vmem:[%s17283_s29 + $0x20] sm:$0xff] %vm9628_vm1, %v12237_v51 }
 0xd4f   : > { %v11336_v36 = vpop.f32.mrb[8].mxu0 }
 0xd50   : > { %v11501_v7 = vadd.f32 %v17274_v47, %v11336_v36  ;;  %v9445_v34 = vpop.f32.mrb[9].mxu0 }
 0xd51   : > { %v11505_v48 = vadd.f32 %v17274_v47, %v9445_v34 }
 0xd52   : > { %12242 = vtanh.f32 %v11501_v7 }
 0xd53   : > { %12244 = vtanh.f32 %v11505_v48 }
 0xd54   : > { %v12239_v5 = vpop.eup %12238 }
 0xd55   : > { %v12241_v30 = vpop.eup %12240  ;;  %9636 = vst.msk [vmem:[%s17283_s29 + $0x38] sm:$0xff] %vm9628_vm1, %v12239_v5 }
 0xd56   : > { %9635 = vst.msk [vmem:[%s17283_s29 + $0x30] sm:$0xff] %vm9628_vm1, %v12241_v30 }
 0xd57   : > { %v11339_v19 = vpop.f32.mrb[10].mxu0 }
 0xd58   : > { %v11509_v40 = vadd.f32 %v17274_v47, %v11339_v19  ;;  %v9455_v41 = vpop.f32.mrb[11].mxu0 }
 0xd59   : > { %v11513_v43 = vadd.f32 %v17274_v47, %v9455_v41 }
 0xd5a   : > { %12246 = vtanh.f32 %v11509_v40 }
 0xd5b   : > { %12248 = vtanh.f32 %v11513_v43 }
 0xd5c   : > { %v12243_v52 = vpop.eup %12242 }
 0xd5d   : > { %v12245_v29 = vpop.eup %12244  ;;  %9638 = vst.msk [vmem:[%s17283_s29 + $0x48] sm:$0xff] %vm9628_vm1, %v12243_v52 }
 0xd5e   : > { %9637 = vst.msk [vmem:[%s17283_s29 + $0x40] sm:$0xff] %vm9628_vm1, %v12245_v29 }
 0xd5f   : > { %v11342_v35 = vpop.f32.mrb[12].mxu0 }
 0xd60   : > { %v11517_v16 = vadd.f32 %v17274_v47, %v11342_v35  ;;  %v9465_v8 = vpop.f32.mrb[13].mxu0 }
 0xd61   : > { %v11521_v63 = vadd.f32 %v17274_v47, %v9465_v8 }
 0xd62   : > { %12250 = vtanh.f32 %v11517_v16 }
 0xd63   : > { %12252 = vtanh.f32 %v11521_v63 }
 0xd64   : > { %v12247_v15 = vpop.eup %12246 }
 0xd65   : > { %v12249_v14 = vpop.eup %12248  ;;  %9640 = vst.msk [vmem:[%s17283_s29 + $0x58] sm:$0xff] %vm9628_vm1, %v12247_v15 }
 0xd66   : > { %9639 = vst.msk [vmem:[%s17283_s29 + $0x50] sm:$0xff] %vm9628_vm1, %v12249_v14 }
 0xd67   : > { %v11345_v33 = vpop.f32.mrb[14].mxu0 }
 0xd68   : > { %v11525_v50 = vadd.f32 %v17274_v47, %v11345_v33  ;;  %v9475_v32 = vpop.f32.mrb[15].mxu0 }
 0xd69   : > { %v11529_v17 = vadd.f32 %v17274_v47, %v9475_v32 }
 0xd6a   : > { %12254 = vtanh.f32 %v11525_v50 }
 0xd6b   : > { %12256 = vtanh.f32 %v11529_v17 }
 0xd6c   : > { %v12251_v3 = vpop.eup %12250 }
 0xd6d   : > { %v12253_v57 = vpop.eup %12252  ;;  %9642 = vst.msk [vmem:[%s17283_s29 + $0x68] sm:$0xff] %vm9628_vm1, %v12251_v3 }
 0xd6e   : > { %9641 = vst.msk [vmem:[%s17283_s29 + $0x60] sm:$0xff] %vm9628_vm1, %v12253_v57 }
 0xd6f   : > { %v11348_v42 = vpop.f32.mrb[16].mxu0 }
 0xd70   : > { %v11533_v25 = vadd.f32 %v17274_v47, %v11348_v42  ;;  %v9485_v13 = vpop.f32.mrb[17].mxu0 }
 0xd71   : > { %v11537_v0 = vadd.f32 %v17274_v47, %v9485_v13 }
 0xd72   : > { %12258 = vtanh.f32 %v11533_v25 }
 0xd73   : > { %12260 = vtanh.f32 %v11537_v0 }
 0xd74   : > { %v12255_v55 = vpop.eup %12254 }
 0xd75   : > { %v12257_v60 = vpop.eup %12256  ;;  %9644 = vst.msk [vmem:[%s17283_s29 + $0x78] sm:$0xff] %vm9628_vm1, %v12255_v55 }
 0xd76   : > { %9643 = vst.msk [vmem:[%s17283_s29 + $0x70] sm:$0xff] %vm9628_vm1, %v12257_v60 }
 0xd77   : > { %v11351_v26 = vpop.f32.mrb[18].mxu0 }
 0xd78   : > { %v11541_v4 = vadd.f32 %v17274_v47, %v11351_v26  ;;  %v9495_v45 = vpop.f32.mrb[19].mxu0 }
 0xd79   : > { %v11545_v54 = vadd.f32 %v17274_v47, %v9495_v45 }
 0xd7a   : > { %12262 = vtanh.f32 %v11541_v4 }
 0xd7b   : > { %12264 = vtanh.f32 %v11545_v54 }
 0xd7c   : > { %v12259_v27 = vpop.eup %12258 }
 0xd7d   : > { %v12261_v37 = vpop.eup %12260  ;;  %9646 = vst.msk [vmem:[%s17283_s29 + $0x88] sm:$0xff] %vm9628_vm1, %v12259_v27 }
 0xd7e   : > { %9645 = vst.msk [vmem:[%s17283_s29 + $0x80] sm:$0xff] %vm9628_vm1, %v12261_v37 }
 0xd7f   : > { %v11354_v11 = vpop.f32.mrb[20].mxu0 }
 0xd80   : > { %v11549_v53 = vadd.f32 %v17274_v47, %v11354_v11  ;;  %v9505_v46 = vpop.f32.mrb[21].mxu0 }
 0xd81   : > { %v11553_v58 = vadd.f32 %v17274_v47, %v9505_v46 }
 0xd82   : > { %12266 = vtanh.f32 %v11549_v53 }
 0xd83   : > { %12268 = vtanh.f32 %v11553_v58 }
 0xd84   : > { %v12263_v61 = vpop.eup %12262 }
 0xd85   : > { %v12265_v1 = vpop.eup %12264  ;;  %9648 = vst.msk [vmem:[%s17283_s29 + $0x98] sm:$0xff] %vm9628_vm1, %v12263_v61 }
 0xd86   : > { %9647 = vst.msk [vmem:[%s17283_s29 + $0x90] sm:$0xff] %vm9628_vm1, %v12265_v1 }
 0xd87   : > { %v11357_v28 = vpop.f32.mrb[22].mxu0 }
 0xd88   : > { %v11557_v18 = vadd.f32 %v17274_v47, %v11357_v28  ;;  %v9515_v12 = vpop.f32.mrb[23].mxu0 }
 0xd89   : > { %v11561_v10 = vadd.f32 %v17274_v47, %v9515_v12 }
 0xd8a   : > { %12270 = vtanh.f32 %v11557_v18 }
 0xd8b   : > { %12272 = vtanh.f32 %v11561_v10 }
 0xd8c   : > { %v12267_v38 = vpop.eup %12266 }
 0xd8d   : > { %v12269_v24 = vpop.eup %12268  ;;  %9650 = vst.msk [vmem:[%s17283_s29 + $0xa8] sm:$0xff] %vm9628_vm1, %v12267_v38 }
 0xd8e   : > { %9649 = vst.msk [vmem:[%s17283_s29 + $0xa0] sm:$0xff] %vm9628_vm1, %v12269_v24 }
 0xd8f   : > { %v11360_v23 = vpop.f32.mrb[24].mxu0 }
 0xd90   : > { %v11565_v2 = vadd.f32 %v17274_v47, %v11360_v23  ;;  %v9525_v56 = vpop.f32.mrb[25].mxu0 }
 0xd91   : > { %v11569_v20 = vadd.f32 %v17274_v47, %v9525_v56 }
 0xd92   : > { %12274 = vtanh.f32 %v11565_v2 }
 0xd93   : > { %12276 = vtanh.f32 %v11569_v20 }
 0xd94   : > { %v12271_v49 = vpop.eup %12270 }
 0xd95   : > { %v12273_v59 = vpop.eup %12272  ;;  %9652 = vst.msk [vmem:[%s17283_s29 + $0xb8] sm:$0xff] %vm9628_vm1, %v12271_v49 }
 0xd96   : > { %9651 = vst.msk [vmem:[%s17283_s29 + $0xb0] sm:$0xff] %vm9628_vm1, %v12273_v59 }
 0xd97   : > { %v11363_v62 = vpop.f32.mrb[26].mxu0 }
 0xd98   : > { %v11573_v44 = vadd.f32 %v17274_v47, %v11363_v62  ;;  %v9535_v9 = vpop.f32.mrb[27].mxu0 }
 0xd99   : > { %v11577_v22 = vadd.f32 %v17274_v47, %v9535_v9 }
 0xd9a   : > { %12278 = vtanh.f32 %v11573_v44 }
 0xd9b   : > { %12280 = vtanh.f32 %v11577_v22 }
 0xd9c   : > { %v12275_v6 = vpop.eup %12274 }
 0xd9d   : > { %v12277_v21 = vpop.eup %12276  ;;  %9654 = vst.msk [vmem:[%s17283_s29 + $0xc8] sm:$0xff] %vm9628_vm1, %v12275_v6 }
 0xd9e   : > { %9653 = vst.msk [vmem:[%s17283_s29 + $0xc0] sm:$0xff] %vm9628_vm1, %v12277_v21 }
 0xd9f   : > { %v11366_v31 = vpop.f32.mrb[28].mxu0 }
 0xda0   : > { %v11581_v39 = vadd.f32 %v17274_v47, %v11366_v31  ;;  %v9545_v51 = vpop.f32.mrb[29].mxu0 }
 0xda1   : > { %v11585_v36 = vadd.f32 %v17274_v47, %v9545_v51 }
 0xda2   : > { %12282 = vtanh.f32 %v11581_v39 }
 0xda3   : > { %12284 = vtanh.f32 %v11585_v36 }
 0xda4   : > { %v12279_v7 = vpop.eup %12278 }
 0xda5   : > { %v12281_v34 = vpop.eup %12280  ;;  %9656 = vst.msk [vmem:[%s17283_s29 + $0xd8] sm:$0xff] %vm9628_vm1, %v12279_v7 }
 0xda6   : > { %9655 = vst.msk [vmem:[%s17283_s29 + $0xd0] sm:$0xff] %vm9628_vm1, %v12281_v34 }
 0xda7   : > { %v11369_v48 = vpop.f32.mrb[30].mxu0 }
 0xda8   : > { %v11589_v5 = vadd.f32 %v17274_v47, %v11369_v48  ;;  %v9555_v30 = vpop.f32.mrb[31].mxu0 }
 0xda9   : > { %v11593_v19 = vadd.f32 %v17274_v47, %v9555_v30 }
 0xdaa   : > { %12286 = vtanh.f32 %v11589_v5 }
 0xdab   : > { %12288 = vtanh.f32 %v11593_v19 }
 0xdac   : > { %v12283_v40 = vpop.eup %12282 }
 0xdad   : > { %v12285_v41 = vpop.eup %12284  ;;  %9658 = vst.msk [vmem:[%s17283_s29 + $0xe8] sm:$0xff] %vm9628_vm1, %v12283_v40 }
 0xdae   : > { %9657 = vst.msk [vmem:[%s17283_s29 + $0xe0] sm:$0xff] %vm9628_vm1, %v12285_v41 }
 0xdb4   : > { %v12287_v43 = vpop.eup %12286 }
 0xdb5   : > { %v12289_v52 = vpop.eup %12288  ;;  %9660 = vst.msk [vmem:[%s17283_s29 + $0xf8] sm:$0xff] %vm9628_vm1, %v12287_v43 }
 0xdb6   : > { %9659 = vst.msk [vmem:[%s17283_s29 + $0xf0] sm:$0xff] %vm9628_vm1, %v12289_v52 }
 0xdb7 PF: > { %s22_s23 = sadd.s32 1, %s12317_s23   ;;  %s17489_s21 = smov %s12313_s22 }
 0xdb8   : > { %p19_p5 = scmp.ge.s32.totalorder %s22_s23, 4   ;;  %s17490_s22 = smov %s17492_s24 }
 0xdba   :  { %21 = sbr.rel (!%p19_p5) target bundleno = 2 (0x2), region = 127 }

</bundles_post_ra>
